<compile_context>
chip_gen: v7x
topology: tpu7x:2x2x1
jax: 0.10.0
libtpu: 0.0.40
codegen_flags: <defaults>
</compile_context>

<pallas_src>
import jax
import jax.numpy as jnp
from jax.experimental import pallas as pl
from jax.experimental.pallas import tpu as pltpu

R_RINGS = 2          # n_rings=2 in every R3PointConv
FDIM2 = 13           # dim(build_representation(2)) = 1 + 3 + 9
FDIM3 = 40           # dim(build_representation(3)) = 1 + 3 + 9 + 27
POOL_FIELDS = 8      # NormPool over 8 fields of dim 40
N_POINTS = 8
LANE = 128
F_PAD = 128          # padded gate-scalar width (all n_fields <= 12)

# (in_dim, out_dim, n_fields) for each SE3_ResNetBlock
BLOCK_SPECS = [
    (3 * FDIM2, 2 * FDIM3, 2),     # 39  -> 80
    (2 * FDIM3, 6 * FDIM3, 6),     # 80  -> 240
    (6 * FDIM3, 12 * FDIM3, 12),   # 240 -> 480
    (12 * FDIM3, 8 * FDIM3, 8),    # 480 -> 320
]
N_BLOCKS = len(BLOCK_SPECS)
C_IN0 = 3                          # irrep_1 input features (the coordinates)
C0 = 3 * FDIM2                     # 39

# weight list layout: [w0] + per block [w1_packed, sel, w2_packed, wskip] + [pool]
N_W = 2 + 4 * N_BLOCKS             # 18 weight arrays (all bf16, live in HBM)


def _pad_to(x, m=LANE):
    return ((x + m - 1) // m) * m


# ------------------------------------------------------------------ kernel

def _se3_resnet_kernel(*refs):
    """Fused SE3_ResNet forward: conv0, 4 gated residual blocks, NormPool."""
    pos_ref = refs[0]
    hbm = refs[1:1 + N_W]                 # HBM weight refs (pl.ANY)
    o_ref = refs[1 + N_W]                 # (N, 128) f32 output
    vbufs = refs[2 + N_W:2 + 2 * N_W]     # VMEM landing buffers (one per weight)
    sem = refs[2 + 2 * N_W]               # DMA semaphores, shape (N_W,)
    n = pos_ref.shape[0]

    # Fire ALL weight DMAs up front (issue order == consumption order); the
    # phi / conv0 / early-block compute below overlaps the rest of the stream.
    for i in range(N_W):
        pltpu.make_async_copy(hbm[i], vbufs[i], sem.at[i]).start()

    def wait(i):
        pltpu.make_async_copy(hbm[i], vbufs[i], sem.at[i]).wait()

    # ---- radial ring adjacencies, computed in-kernel from the points --------
    pos = pos_ref[...]                                     # (N, 128) f32, cols>=3 zero
    diff = pos[:, None, :] - pos[None, :, :]               # (N, N, 128)
    d = jnp.sqrt(jnp.sum(diff * diff, axis=-1) + 1e-12)    # (N, N)

    def make_phi(width):
        sigma = width / R_RINGS                            # linspace(0,width,2)
        return [(jnp.exp(-((d - r) ** 2) / (2.0 * sigma * sigma)) / n
                 ).astype(jnp.bfloat16) for r in (0.0, width)]

    phi1 = make_phi(1.0)     # width=1 convs inside the blocks
    phi10 = make_phi(10.0)   # width=10 skip convs

    def ring_msgs(phi, feats_f32):
        # per-ring messages phi_r @ F, bf16 for the following weight dot
        fb = feats_f32.astype(jnp.bfloat16)
        return [jnp.dot(p, fb, preferred_element_type=jnp.float32
                        ).astype(jnp.bfloat16) for p in phi]

    def conv(msgs, w_ref):
        # sum over rings of msg_r @ W_r (no lane concat, no relayout)
        return (jnp.dot(msgs[0], w_ref[0], preferred_element_type=jnp.float32)
                + jnp.dot(msgs[1], w_ref[1], preferred_element_type=jnp.float32))

    # ---- conv0: irrep_1 (3, padded 128) -> layer_types[0] (39, padded 128) ---
    wait(0)
    feats = conv(ring_msgs(phi1, pos), vbufs[0])           # (N, 128) f32

    # ---- residual blocks ------------------------------------------------------
    for b, (c_in, c_out, n_fields) in enumerate(BLOCK_SPECS):
        cop = _pad_to(c_out)
        i_w1, i_sel, i_w2, i_ws = 1 + 4 * b, 2 + 4 * b, 3 + 4 * b, 4 + 4 * b

        m_in = ring_msgs(phi1, feats)       # conv1 messages (width=1)
        m_sk = ring_msgs(phi10, feats)      # skip messages  (width=10)

        # conv1 (+gate) is ONE packed dot per ring: cols [0:cop)=main, [cop:)=gate
        wait(i_w1)
        h_all = conv(m_in, vbufs[i_w1])                    # (N, cop + F_PAD) f32
        wait(i_sel)
        sel = vbufs[i_sel][...]                            # (F_PAD, cop) bf16
        g1 = jax.nn.sigmoid(h_all[:, cop:]).astype(jnp.bfloat16)
        h = h_all[:, :cop] * jnp.dot(g1, sel, preferred_element_type=jnp.float32)

        # conv2 (+gate) + residual skip
        m_h = ring_msgs(phi1, h)
        wait(i_w2)
        h2_all = conv(m_h, vbufs[i_w2])                    # (N, cop + F_PAD) f32
        wait(i_ws)
        skip = conv(m_sk, vbufs[i_ws])                     # (N, cop) f32
        g2 = jax.nn.sigmoid(h2_all[:, cop:]).astype(jnp.bfloat16)
        feats = (h2_all[:, :cop]
                 * jnp.dot(g2, sel, preferred_element_type=jnp.float32) + skip)

    # ---- NormPool: per-point L2 norm of each 40-dim field --------------------
    wait(N_W - 1)
    sq = jnp.dot((feats * feats).astype(jnp.bfloat16), vbufs[N_W - 1][...],
                 preferred_element_type=jnp.float32)
    o_ref[...] = jnp.sqrt(sq + 1e-12)


def _cost_estimate(n, weights):
    flops = 0
    bytes_accessed = n * LANE * 4 * 2          # pos in + pooled out
    for w in weights:
        bytes_accessed += int(w.size) * w.dtype.itemsize
        if w.ndim == 3:                        # per-ring conv weight dots
            flops += 2 * n * int(w.shape[0]) * int(w.shape[1]) * int(w.shape[2])
        else:                                  # selector / pool dots
            flops += 2 * n * int(w.shape[0]) * int(w.shape[1])
    flops += 9 * R_RINGS * 2 * n * n * 512     # ring message dots (upper bound)
    transcendentals = 2 * N_BLOCKS * n * F_PAD + 4 * n * n
    return pl.CostEstimate(flops=int(flops),
                           transcendentals=int(transcendentals),
                           bytes_accessed=int(bytes_accessed))


def _fused_call(pos_pad, weights):
    n = pos_pad.shape[0]
    assert len(weights) == N_W
    return pl.pallas_call(
        _se3_resnet_kernel,
        out_shape=jax.ShapeDtypeStruct((n, LANE), jnp.float32),
        in_specs=[pl.BlockSpec(memory_space=pltpu.MemorySpace.VMEM)]
                 + [pl.BlockSpec(memory_space=pl.ANY)] * N_W,
        out_specs=pl.BlockSpec(memory_space=pltpu.MemorySpace.VMEM),
        scratch_shapes=[pltpu.VMEM(tuple(w.shape), w.dtype) for w in weights]
                       + [pltpu.SemaphoreType.DMA((N_W,))],
        compiler_params=pltpu.CompilerParams(vmem_limit_bytes=12 * 1024 * 1024),
        cost_estimate=_cost_estimate(n, weights),
    )(pos_pad, *weights)


# -------------------------------------------------------------- glue / setup

def conv_weight(key, c_in, c_out):
    """Per-ring dense weights (R, c_in_pad, c_out_pad), zero padded, bf16."""
    c_in_pad, c_out_pad = _pad_to(c_in), _pad_to(c_out)
    std = 1.0 / ((c_in * R_RINGS) ** 0.5)
    w = jax.random.normal(key, (R_RINGS, c_in, c_out), jnp.float32) * std
    out = jnp.zeros((R_RINGS, c_in_pad, c_out_pad), jnp.bfloat16)
    return out.at[:, :c_in, :c_out].set(w.astype(jnp.bfloat16))


def packed_conv_weight(key, c_in, c_out, n_fields):
    """main||gate packed per ring: (R, c_in_pad, c_out_pad + F_PAD), bf16.

    Columns [0:c_out) are the gated-field weights, columns starting at the
    128-aligned offset c_out_pad hold the n_fields trivial gate scalars.
    """
    c_in_pad, c_out_pad = _pad_to(c_in), _pad_to(c_out)
    km, kg = jax.random.split(key)
    std = 1.0 / ((c_in * R_RINGS) ** 0.5)
    wm = jax.random.normal(km, (R_RINGS, c_in, c_out), jnp.float32) * std
    wg = jax.random.normal(kg, (R_RINGS, c_in, n_fields), jnp.float32) * std
    out = jnp.zeros((R_RINGS, c_in_pad, c_out_pad + F_PAD), jnp.bfloat16)
    out = out.at[:, :c_in, :c_out].set(wm.astype(jnp.bfloat16))
    out = out.at[:, :c_in, c_out_pad:c_out_pad + n_fields].set(wg.astype(jnp.bfloat16))
    return out


def gate_selector(n_fields, field_dim, c_out_pad):
    # (F_PAD, c_out_pad) bf16: row f is 1 on the columns of field f, rest 0.
    base = jnp.repeat(jnp.eye(n_fields, dtype=jnp.float32), field_dim, axis=1)
    sel = jnp.zeros((F_PAD, c_out_pad), jnp.float32)
    sel = sel.at[:n_fields, :n_fields * field_dim].set(base)
    return sel.astype(jnp.bfloat16)


def norm_selector(n_fields, field_dim, c_in_pad, out_pad):
    # (c_in_pad, out_pad) bf16: column f sums the squared channels of field f.
    base = jnp.repeat(jnp.eye(n_fields, dtype=jnp.float32), field_dim, axis=0)
    sel = jnp.zeros((c_in_pad, out_pad), jnp.float32)
    sel = sel.at[:n_fields * field_dim, :n_fields].set(base)
    return sel.astype(jnp.bfloat16)


def init_params(key):
    keys = jax.random.split(key, 1 + 3 * N_BLOCKS)
    weights = [conv_weight(keys[0], C_IN0, C0)]                       # conv0
    k = 1
    for (c_in, c_out, n_fields) in BLOCK_SPECS:
        weights.append(packed_conv_weight(keys[k + 0], c_in, c_out, n_fields))   # w1
        weights.append(gate_selector(n_fields, FDIM3, _pad_to(c_out)))           # sel
        weights.append(packed_conv_weight(keys[k + 1], c_out, c_out, n_fields))  # w2
        weights.append(conv_weight(keys[k + 2], c_in, c_out))                    # skip
        k += 3
    weights.append(norm_selector(POOL_FIELDS, FDIM3,
                                 _pad_to(BLOCK_SPECS[-1][1]), LANE))  # NormPool
    return {"weights": weights}


@jax.jit
def se3_resnet_forward(params, x):
    # x: (N, 3) points; simultaneously coordinates and irrep-1 features, exactly
    # as GeometricTensor(input, in_type, input) in the torch code.
    pos = x.astype(jnp.float32)
    n = pos.shape[0]
    pos_pad = jnp.zeros((n, LANE), jnp.float32).at[:, :C_IN0].set(pos)
    out_pad = _fused_call(pos_pad, params["weights"])                 # (N, 128)
    return out_pad[:, :POOL_FIELDS]                                   # (N, 8)


if __name__ == "__main__":
    key = jax.random.PRNGKey(0)
    k_par, k_x = jax.random.split(key)
    params = init_params(k_par)
    x = jax.random.normal(k_x, (N_POINTS, 3), dtype=jnp.float32)  # 8 points in R^3
    out = se3_resnet_forward(params, x)
    out = jax.block_until_ready(out)
    assert out.shape == (N_POINTS, POOL_FIELDS)
    assert bool(jnp.all(jnp.isfinite(out)))
    print("KERNEL_OK")
</pallas_src>

<mosaic_0001>
module attributes {stable_mosaic.version = 11 : i64} {
  func.func @_se3_resnet_kernel(%arg0: memref<8x128xf32, #tpu.memory_space<vmem>>, %arg1: memref<2x128x128xbf16, #tpu.memory_space<any>>, %arg2: memref<2x128x256xbf16, #tpu.memory_space<any>>, %arg3: memref<128x128xbf16, #tpu.memory_space<any>>, %arg4: memref<2x128x256xbf16, #tpu.memory_space<any>>, %arg5: memref<2x128x128xbf16, #tpu.memory_space<any>>, %arg6: memref<2x128x384xbf16, #tpu.memory_space<any>>, %arg7: memref<128x256xbf16, #tpu.memory_space<any>>, %arg8: memref<2x256x384xbf16, #tpu.memory_space<any>>, %arg9: memref<2x128x256xbf16, #tpu.memory_space<any>>, %arg10: memref<2x256x640xbf16, #tpu.memory_space<any>>, %arg11: memref<128x512xbf16, #tpu.memory_space<any>>, %arg12: memref<2x512x640xbf16, #tpu.memory_space<any>>, %arg13: memref<2x256x512xbf16, #tpu.memory_space<any>>, %arg14: memref<2x512x512xbf16, #tpu.memory_space<any>>, %arg15: memref<128x384xbf16, #tpu.memory_space<any>>, %arg16: memref<2x384x512xbf16, #tpu.memory_space<any>>, %arg17: memref<2x512x384xbf16, #tpu.memory_space<any>>, %arg18: memref<384x128xbf16, #tpu.memory_space<any>>, %arg19: memref<8x128xf32, #tpu.memory_space<vmem>>, %arg20: memref<2x128x128xbf16, #tpu.memory_space<vmem>>, %arg21: memref<2x128x256xbf16, #tpu.memory_space<vmem>>, %arg22: memref<128x128xbf16, #tpu.memory_space<vmem>>, %arg23: memref<2x128x256xbf16, #tpu.memory_space<vmem>>, %arg24: memref<2x128x128xbf16, #tpu.memory_space<vmem>>, %arg25: memref<2x128x384xbf16, #tpu.memory_space<vmem>>, %arg26: memref<128x256xbf16, #tpu.memory_space<vmem>>, %arg27: memref<2x256x384xbf16, #tpu.memory_space<vmem>>, %arg28: memref<2x128x256xbf16, #tpu.memory_space<vmem>>, %arg29: memref<2x256x640xbf16, #tpu.memory_space<vmem>>, %arg30: memref<128x512xbf16, #tpu.memory_space<vmem>>, %arg31: memref<2x512x640xbf16, #tpu.memory_space<vmem>>, %arg32: memref<2x256x512xbf16, #tpu.memory_space<vmem>>, %arg33: memref<2x512x512xbf16, #tpu.memory_space<vmem>>, %arg34: memref<128x384xbf16, #tpu.memory_space<vmem>>, %arg35: memref<2x384x512xbf16, #tpu.memory_space<vmem>>, %arg36: memref<2x512x384xbf16, #tpu.memory_space<vmem>>, %arg37: memref<384x128xbf16, #tpu.memory_space<vmem>>, %arg38: memref<18x!tpu.dma_semaphore, #tpu.memory_space<semaphore_mem>>) attributes {dimension_semantics = [], scalar_prefetch = 0 : i64, scratch_operands = 19 : i64, tpu.core_type = #tpu.core_type<tc>} {
    %c0_i32 = arith.constant 0 : i32
    %0 = tpu.memref_slice %arg38[%c0_i32] : memref<18x!tpu.dma_semaphore, #tpu.memory_space<semaphore_mem>> -> memref<1x!tpu.dma_semaphore, #tpu.memory_space<semaphore_mem>>
    %1 = tpu.memref_squeeze %0 : memref<1x!tpu.dma_semaphore, #tpu.memory_space<semaphore_mem>> -> memref<!tpu.dma_semaphore, #tpu.memory_space<semaphore_mem>>
    tpu.enqueue_dma source(%arg1 : memref<2x128x128xbf16, #tpu.memory_space<any>>) target(%arg20 : memref<2x128x128xbf16, #tpu.memory_space<vmem>>) target_semaphore(%1 : memref<!tpu.dma_semaphore, #tpu.memory_space<semaphore_mem>>)
    %c1_i32 = arith.constant 1 : i32
    %2 = tpu.memref_slice %arg38[%c1_i32] : memref<18x!tpu.dma_semaphore, #tpu.memory_space<semaphore_mem>> -> memref<1x!tpu.dma_semaphore, #tpu.memory_space<semaphore_mem>>
    %3 = tpu.memref_squeeze %2 : memref<1x!tpu.dma_semaphore, #tpu.memory_space<semaphore_mem>> -> memref<!tpu.dma_semaphore, #tpu.memory_space<semaphore_mem>>
    tpu.enqueue_dma source(%arg2 : memref<2x128x256xbf16, #tpu.memory_space<any>>) target(%arg21 : memref<2x128x256xbf16, #tpu.memory_space<vmem>>) target_semaphore(%3 : memref<!tpu.dma_semaphore, #tpu.memory_space<semaphore_mem>>)
    %c2_i32 = arith.constant 2 : i32
    %4 = tpu.memref_slice %arg38[%c2_i32] : memref<18x!tpu.dma_semaphore, #tpu.memory_space<semaphore_mem>> -> memref<1x!tpu.dma_semaphore, #tpu.memory_space<semaphore_mem>>
    %5 = tpu.memref_squeeze %4 : memref<1x!tpu.dma_semaphore, #tpu.memory_space<semaphore_mem>> -> memref<!tpu.dma_semaphore, #tpu.memory_space<semaphore_mem>>
    tpu.enqueue_dma source(%arg3 : memref<128x128xbf16, #tpu.memory_space<any>>) target(%arg22 : memref<128x128xbf16, #tpu.memory_space<vmem>>) target_semaphore(%5 : memref<!tpu.dma_semaphore, #tpu.memory_space<semaphore_mem>>)
    %c3_i32 = arith.constant 3 : i32
    %6 = tpu.memref_slice %arg38[%c3_i32] : memref<18x!tpu.dma_semaphore, #tpu.memory_space<semaphore_mem>> -> memref<1x!tpu.dma_semaphore, #tpu.memory_space<semaphore_mem>>
    %7 = tpu.memref_squeeze %6 : memref<1x!tpu.dma_semaphore, #tpu.memory_space<semaphore_mem>> -> memref<!tpu.dma_semaphore, #tpu.memory_space<semaphore_mem>>
    tpu.enqueue_dma source(%arg4 : memref<2x128x256xbf16, #tpu.memory_space<any>>) target(%arg23 : memref<2x128x256xbf16, #tpu.memory_space<vmem>>) target_semaphore(%7 : memref<!tpu.dma_semaphore, #tpu.memory_space<semaphore_mem>>)
    %c4_i32 = arith.constant 4 : i32
    %8 = tpu.memref_slice %arg38[%c4_i32] : memref<18x!tpu.dma_semaphore, #tpu.memory_space<semaphore_mem>> -> memref<1x!tpu.dma_semaphore, #tpu.memory_space<semaphore_mem>>
    %9 = tpu.memref_squeeze %8 : memref<1x!tpu.dma_semaphore, #tpu.memory_space<semaphore_mem>> -> memref<!tpu.dma_semaphore, #tpu.memory_space<semaphore_mem>>
    tpu.enqueue_dma source(%arg5 : memref<2x128x128xbf16, #tpu.memory_space<any>>) target(%arg24 : memref<2x128x128xbf16, #tpu.memory_space<vmem>>) target_semaphore(%9 : memref<!tpu.dma_semaphore, #tpu.memory_space<semaphore_mem>>)
    %c5_i32 = arith.constant 5 : i32
    %10 = tpu.memref_slice %arg38[%c5_i32] : memref<18x!tpu.dma_semaphore, #tpu.memory_space<semaphore_mem>> -> memref<1x!tpu.dma_semaphore, #tpu.memory_space<semaphore_mem>>
    %11 = tpu.memref_squeeze %10 : memref<1x!tpu.dma_semaphore, #tpu.memory_space<semaphore_mem>> -> memref<!tpu.dma_semaphore, #tpu.memory_space<semaphore_mem>>
    tpu.enqueue_dma source(%arg6 : memref<2x128x384xbf16, #tpu.memory_space<any>>) target(%arg25 : memref<2x128x384xbf16, #tpu.memory_space<vmem>>) target_semaphore(%11 : memref<!tpu.dma_semaphore, #tpu.memory_space<semaphore_mem>>)
    %c6_i32 = arith.constant 6 : i32
    %12 = tpu.memref_slice %arg38[%c6_i32] : memref<18x!tpu.dma_semaphore, #tpu.memory_space<semaphore_mem>> -> memref<1x!tpu.dma_semaphore, #tpu.memory_space<semaphore_mem>>
    %13 = tpu.memref_squeeze %12 : memref<1x!tpu.dma_semaphore, #tpu.memory_space<semaphore_mem>> -> memref<!tpu.dma_semaphore, #tpu.memory_space<semaphore_mem>>
    tpu.enqueue_dma source(%arg7 : memref<128x256xbf16, #tpu.memory_space<any>>) target(%arg26 : memref<128x256xbf16, #tpu.memory_space<vmem>>) target_semaphore(%13 : memref<!tpu.dma_semaphore, #tpu.memory_space<semaphore_mem>>)
    %c7_i32 = arith.constant 7 : i32
    %14 = tpu.memref_slice %arg38[%c7_i32] : memref<18x!tpu.dma_semaphore, #tpu.memory_space<semaphore_mem>> -> memref<1x!tpu.dma_semaphore, #tpu.memory_space<semaphore_mem>>
    %15 = tpu.memref_squeeze %14 : memref<1x!tpu.dma_semaphore, #tpu.memory_space<semaphore_mem>> -> memref<!tpu.dma_semaphore, #tpu.memory_space<semaphore_mem>>
    tpu.enqueue_dma source(%arg8 : memref<2x256x384xbf16, #tpu.memory_space<any>>) target(%arg27 : memref<2x256x384xbf16, #tpu.memory_space<vmem>>) target_semaphore(%15 : memref<!tpu.dma_semaphore, #tpu.memory_space<semaphore_mem>>)
    %c8_i32 = arith.constant 8 : i32
    %16 = tpu.memref_slice %arg38[%c8_i32] : memref<18x!tpu.dma_semaphore, #tpu.memory_space<semaphore_mem>> -> memref<1x!tpu.dma_semaphore, #tpu.memory_space<semaphore_mem>>
    %17 = tpu.memref_squeeze %16 : memref<1x!tpu.dma_semaphore, #tpu.memory_space<semaphore_mem>> -> memref<!tpu.dma_semaphore, #tpu.memory_space<semaphore_mem>>
    tpu.enqueue_dma source(%arg9 : memref<2x128x256xbf16, #tpu.memory_space<any>>) target(%arg28 : memref<2x128x256xbf16, #tpu.memory_space<vmem>>) target_semaphore(%17 : memref<!tpu.dma_semaphore, #tpu.memory_space<semaphore_mem>>)
    %c9_i32 = arith.constant 9 : i32
    %18 = tpu.memref_slice %arg38[%c9_i32] : memref<18x!tpu.dma_semaphore, #tpu.memory_space<semaphore_mem>> -> memref<1x!tpu.dma_semaphore, #tpu.memory_space<semaphore_mem>>
    %19 = tpu.memref_squeeze %18 : memref<1x!tpu.dma_semaphore, #tpu.memory_space<semaphore_mem>> -> memref<!tpu.dma_semaphore, #tpu.memory_space<semaphore_mem>>
    tpu.enqueue_dma source(%arg10 : memref<2x256x640xbf16, #tpu.memory_space<any>>) target(%arg29 : memref<2x256x640xbf16, #tpu.memory_space<vmem>>) target_semaphore(%19 : memref<!tpu.dma_semaphore, #tpu.memory_space<semaphore_mem>>)
    %c10_i32 = arith.constant 10 : i32
    %20 = tpu.memref_slice %arg38[%c10_i32] : memref<18x!tpu.dma_semaphore, #tpu.memory_space<semaphore_mem>> -> memref<1x!tpu.dma_semaphore, #tpu.memory_space<semaphore_mem>>
    %21 = tpu.memref_squeeze %20 : memref<1x!tpu.dma_semaphore, #tpu.memory_space<semaphore_mem>> -> memref<!tpu.dma_semaphore, #tpu.memory_space<semaphore_mem>>
    tpu.enqueue_dma source(%arg11 : memref<128x512xbf16, #tpu.memory_space<any>>) target(%arg30 : memref<128x512xbf16, #tpu.memory_space<vmem>>) target_semaphore(%21 : memref<!tpu.dma_semaphore, #tpu.memory_space<semaphore_mem>>)
    %c11_i32 = arith.constant 11 : i32
    %22 = tpu.memref_slice %arg38[%c11_i32] : memref<18x!tpu.dma_semaphore, #tpu.memory_space<semaphore_mem>> -> memref<1x!tpu.dma_semaphore, #tpu.memory_space<semaphore_mem>>
    %23 = tpu.memref_squeeze %22 : memref<1x!tpu.dma_semaphore, #tpu.memory_space<semaphore_mem>> -> memref<!tpu.dma_semaphore, #tpu.memory_space<semaphore_mem>>
    tpu.enqueue_dma source(%arg12 : memref<2x512x640xbf16, #tpu.memory_space<any>>) target(%arg31 : memref<2x512x640xbf16, #tpu.memory_space<vmem>>) target_semaphore(%23 : memref<!tpu.dma_semaphore, #tpu.memory_space<semaphore_mem>>)
    %c12_i32 = arith.constant 12 : i32
    %24 = tpu.memref_slice %arg38[%c12_i32] : memref<18x!tpu.dma_semaphore, #tpu.memory_space<semaphore_mem>> -> memref<1x!tpu.dma_semaphore, #tpu.memory_space<semaphore_mem>>
    %25 = tpu.memref_squeeze %24 : memref<1x!tpu.dma_semaphore, #tpu.memory_space<semaphore_mem>> -> memref<!tpu.dma_semaphore, #tpu.memory_space<semaphore_mem>>
    tpu.enqueue_dma source(%arg13 : memref<2x256x512xbf16, #tpu.memory_space<any>>) target(%arg32 : memref<2x256x512xbf16, #tpu.memory_space<vmem>>) target_semaphore(%25 : memref<!tpu.dma_semaphore, #tpu.memory_space<semaphore_mem>>)
    %c13_i32 = arith.constant 13 : i32
    %26 = tpu.memref_slice %arg38[%c13_i32] : memref<18x!tpu.dma_semaphore, #tpu.memory_space<semaphore_mem>> -> memref<1x!tpu.dma_semaphore, #tpu.memory_space<semaphore_mem>>
    %27 = tpu.memref_squeeze %26 : memref<1x!tpu.dma_semaphore, #tpu.memory_space<semaphore_mem>> -> memref<!tpu.dma_semaphore, #tpu.memory_space<semaphore_mem>>
    tpu.enqueue_dma source(%arg14 : memref<2x512x512xbf16, #tpu.memory_space<any>>) target(%arg33 : memref<2x512x512xbf16, #tpu.memory_space<vmem>>) target_semaphore(%27 : memref<!tpu.dma_semaphore, #tpu.memory_space<semaphore_mem>>)
    %c14_i32 = arith.constant 14 : i32
    %28 = tpu.memref_slice %arg38[%c14_i32] : memref<18x!tpu.dma_semaphore, #tpu.memory_space<semaphore_mem>> -> memref<1x!tpu.dma_semaphore, #tpu.memory_space<semaphore_mem>>
    %29 = tpu.memref_squeeze %28 : memref<1x!tpu.dma_semaphore, #tpu.memory_space<semaphore_mem>> -> memref<!tpu.dma_semaphore, #tpu.memory_space<semaphore_mem>>
    tpu.enqueue_dma source(%arg15 : memref<128x384xbf16, #tpu.memory_space<any>>) target(%arg34 : memref<128x384xbf16, #tpu.memory_space<vmem>>) target_semaphore(%29 : memref<!tpu.dma_semaphore, #tpu.memory_space<semaphore_mem>>)
    %c15_i32 = arith.constant 15 : i32
    %30 = tpu.memref_slice %arg38[%c15_i32] : memref<18x!tpu.dma_semaphore, #tpu.memory_space<semaphore_mem>> -> memref<1x!tpu.dma_semaphore, #tpu.memory_space<semaphore_mem>>
    %31 = tpu.memref_squeeze %30 : memref<1x!tpu.dma_semaphore, #tpu.memory_space<semaphore_mem>> -> memref<!tpu.dma_semaphore, #tpu.memory_space<semaphore_mem>>
    tpu.enqueue_dma source(%arg16 : memref<2x384x512xbf16, #tpu.memory_space<any>>) target(%arg35 : memref<2x384x512xbf16, #tpu.memory_space<vmem>>) target_semaphore(%31 : memref<!tpu.dma_semaphore, #tpu.memory_space<semaphore_mem>>)
    %c16_i32 = arith.constant 16 : i32
    %32 = tpu.memref_slice %arg38[%c16_i32] : memref<18x!tpu.dma_semaphore, #tpu.memory_space<semaphore_mem>> -> memref<1x!tpu.dma_semaphore, #tpu.memory_space<semaphore_mem>>
    %33 = tpu.memref_squeeze %32 : memref<1x!tpu.dma_semaphore, #tpu.memory_space<semaphore_mem>> -> memref<!tpu.dma_semaphore, #tpu.memory_space<semaphore_mem>>
    tpu.enqueue_dma source(%arg17 : memref<2x512x384xbf16, #tpu.memory_space<any>>) target(%arg36 : memref<2x512x384xbf16, #tpu.memory_space<vmem>>) target_semaphore(%33 : memref<!tpu.dma_semaphore, #tpu.memory_space<semaphore_mem>>)
    %c17_i32 = arith.constant 17 : i32
    %34 = tpu.memref_slice %arg38[%c17_i32] : memref<18x!tpu.dma_semaphore, #tpu.memory_space<semaphore_mem>> -> memref<1x!tpu.dma_semaphore, #tpu.memory_space<semaphore_mem>>
    %35 = tpu.memref_squeeze %34 : memref<1x!tpu.dma_semaphore, #tpu.memory_space<semaphore_mem>> -> memref<!tpu.dma_semaphore, #tpu.memory_space<semaphore_mem>>
    tpu.enqueue_dma source(%arg18 : memref<384x128xbf16, #tpu.memory_space<any>>) target(%arg37 : memref<384x128xbf16, #tpu.memory_space<vmem>>) target_semaphore(%35 : memref<!tpu.dma_semaphore, #tpu.memory_space<semaphore_mem>>)
    %c0 = arith.constant 0 : index
    %c0_0 = arith.constant 0 : index
    %36 = vector.load %arg0[%c0, %c0_0] : memref<8x128xf32, #tpu.memory_space<vmem>>, vector<8x128xf32>
    %37 = vector.shape_cast %36 : vector<8x128xf32> to vector<8x1x128xf32>
    %38 = vector.shape_cast %36 : vector<8x128xf32> to vector<1x8x128xf32>
    %39 = vector.broadcast %37 : vector<8x1x128xf32> to vector<8x8x128xf32>
    %40 = vector.broadcast %38 : vector<1x8x128xf32> to vector<8x8x128xf32>
    %41 = arith.subf %39, %40 : vector<8x8x128xf32>
    %42 = arith.mulf %41, %41 : vector<8x8x128xf32>
    %cst = arith.constant dense<0.000000e+00> : vector<8x8xf32>
    %43 = vector.multi_reduction <add>, %42, %cst [2] : vector<8x8x128xf32> to vector<8x8xf32>
    %cst_1 = arith.constant 9.99999996E-13 : f32
    %44 = vector.broadcast %cst_1 : f32 to vector<8x8xf32>
    %45 = arith.addf %43, %44 : vector<8x8xf32>
    %46 = math.sqrt %45 : vector<8x8xf32>
    %cst_2 = arith.constant 0.000000e+00 : f32
    %47 = vector.broadcast %cst_2 : f32 to vector<8x8xf32>
    %48 = arith.subf %46, %47 : vector<8x8xf32>
    %49 = arith.mulf %48, %48 : vector<8x8xf32>
    %cst_3 = arith.constant 0.000000e+00 : f32
    %50 = vector.broadcast %cst_3 : f32 to vector<8x8xf32>
    %51 = arith.subf %50, %49 : vector<8x8xf32>
    %cst_4 = arith.constant 5.000000e-01 : f32
    %52 = vector.broadcast %cst_4 : f32 to vector<8x8xf32>
    %53 = arith.divf %51, %52 : vector<8x8xf32>
    %54 = math.exp %53 : vector<8x8xf32>
    %cst_5 = arith.constant 8.000000e+00 : f32
    %55 = vector.broadcast %cst_5 : f32 to vector<8x8xf32>
    %56 = arith.divf %54, %55 : vector<8x8xf32>
    %57 = arith.truncf %56 : vector<8x8xf32> to vector<8x8xbf16>
    %cst_6 = arith.constant 1.000000e+00 : f32
    %58 = vector.broadcast %cst_6 : f32 to vector<8x8xf32>
    %59 = arith.subf %46, %58 : vector<8x8xf32>
    %60 = arith.mulf %59, %59 : vector<8x8xf32>
    %cst_7 = arith.constant 0.000000e+00 : f32
    %61 = vector.broadcast %cst_7 : f32 to vector<8x8xf32>
    %62 = arith.subf %61, %60 : vector<8x8xf32>
    %cst_8 = arith.constant 5.000000e-01 : f32
    %63 = vector.broadcast %cst_8 : f32 to vector<8x8xf32>
    %64 = arith.divf %62, %63 : vector<8x8xf32>
    %65 = math.exp %64 : vector<8x8xf32>
    %cst_9 = arith.constant 8.000000e+00 : f32
    %66 = vector.broadcast %cst_9 : f32 to vector<8x8xf32>
    %67 = arith.divf %65, %66 : vector<8x8xf32>
    %68 = arith.truncf %67 : vector<8x8xf32> to vector<8x8xbf16>
    %cst_10 = arith.constant 0.000000e+00 : f32
    %69 = vector.broadcast %cst_10 : f32 to vector<8x8xf32>
    %70 = arith.subf %46, %69 : vector<8x8xf32>
    %71 = arith.mulf %70, %70 : vector<8x8xf32>
    %cst_11 = arith.constant 0.000000e+00 : f32
    %72 = vector.broadcast %cst_11 : f32 to vector<8x8xf32>
    %73 = arith.subf %72, %71 : vector<8x8xf32>
    %cst_12 = arith.constant 5.000000e+01 : f32
    %74 = vector.broadcast %cst_12 : f32 to vector<8x8xf32>
    %75 = arith.divf %73, %74 : vector<8x8xf32>
    %76 = math.exp %75 : vector<8x8xf32>
    %cst_13 = arith.constant 8.000000e+00 : f32
    %77 = vector.broadcast %cst_13 : f32 to vector<8x8xf32>
    %78 = arith.divf %76, %77 : vector<8x8xf32>
    %79 = arith.truncf %78 : vector<8x8xf32> to vector<8x8xbf16>
    %cst_14 = arith.constant 1.000000e+01 : f32
    %80 = vector.broadcast %cst_14 : f32 to vector<8x8xf32>
    %81 = arith.subf %46, %80 : vector<8x8xf32>
    %82 = arith.mulf %81, %81 : vector<8x8xf32>
    %cst_15 = arith.constant 0.000000e+00 : f32
    %83 = vector.broadcast %cst_15 : f32 to vector<8x8xf32>
    %84 = arith.subf %83, %82 : vector<8x8xf32>
    %cst_16 = arith.constant 5.000000e+01 : f32
    %85 = vector.broadcast %cst_16 : f32 to vector<8x8xf32>
    %86 = arith.divf %84, %85 : vector<8x8xf32>
    %87 = math.exp %86 : vector<8x8xf32>
    %cst_17 = arith.constant 8.000000e+00 : f32
    %88 = vector.broadcast %cst_17 : f32 to vector<8x8xf32>
    %89 = arith.divf %87, %88 : vector<8x8xf32>
    %90 = arith.truncf %89 : vector<8x8xf32> to vector<8x8xbf16>
    %c0_i32_18 = arith.constant 0 : i32
    %91 = tpu.memref_slice %arg38[%c0_i32_18] : memref<18x!tpu.dma_semaphore, #tpu.memory_space<semaphore_mem>> -> memref<1x!tpu.dma_semaphore, #tpu.memory_space<semaphore_mem>>
    %92 = tpu.memref_squeeze %91 : memref<1x!tpu.dma_semaphore, #tpu.memory_space<semaphore_mem>> -> memref<!tpu.dma_semaphore, #tpu.memory_space<semaphore_mem>>
    tpu.wait_dma2 semaphore(%92 : memref<!tpu.dma_semaphore, #tpu.memory_space<semaphore_mem>>) src(%arg1 : memref<2x128x128xbf16, #tpu.memory_space<any>>) dst(%arg20 : memref<2x128x128xbf16, #tpu.memory_space<vmem>>)
    %93 = arith.truncf %36 : vector<8x128xf32> to vector<8x128xbf16>
    %cst_19 = arith.constant dense<0.000000e+00> : vector<8x128xf32>
    %94 = tpu.matmul %57, %93, %cst_19 {dimension_numbers = #tpu.dot_dimension_numbers<[1], [0], [0], [1], [0, 0, 1, 1], [], []>} : vector<8x8xbf16>, vector<8x128xbf16>, vector<8x128xf32> -> vector<8x128xf32>
    %95 = arith.truncf %94 : vector<8x128xf32> to vector<8x128xbf16>
    %cst_20 = arith.constant dense<0.000000e+00> : vector<8x128xf32>
    %96 = tpu.matmul %68, %93, %cst_20 {dimension_numbers = #tpu.dot_dimension_numbers<[1], [0], [0], [1], [0, 0, 1, 1], [], []>} : vector<8x8xbf16>, vector<8x128xbf16>, vector<8x128xf32> -> vector<8x128xf32>
    %97 = arith.truncf %96 : vector<8x128xf32> to vector<8x128xbf16>
    %c0_21 = arith.constant 0 : index
    %c0_22 = arith.constant 0 : index
    %c0_23 = arith.constant 0 : index
    %98 = vector.load %arg20[%c0_21, %c0_22, %c0_23] : memref<2x128x128xbf16, #tpu.memory_space<vmem>>, vector<1x128x128xbf16>
    %99 = vector.shape_cast %98 : vector<1x128x128xbf16> to vector<128x128xbf16>
    %cst_24 = arith.constant dense<0.000000e+00> : vector<8x128xf32>
    %100 = tpu.matmul %95, %99, %cst_24 {dimension_numbers = #tpu.dot_dimension_numbers<[1], [0], [0], [1], [0, 0, 1, 1], [], []>} : vector<8x128xbf16>, vector<128x128xbf16>, vector<8x128xf32> -> vector<8x128xf32>
    %c1 = arith.constant 1 : index
    %c0_25 = arith.constant 0 : index
    %c0_26 = arith.constant 0 : index
    %101 = vector.load %arg20[%c1, %c0_25, %c0_26] : memref<2x128x128xbf16, #tpu.memory_space<vmem>>, vector<1x128x128xbf16>
    %102 = vector.shape_cast %101 : vector<1x128x128xbf16> to vector<128x128xbf16>
    %cst_27 = arith.constant dense<0.000000e+00> : vector<8x128xf32>
    %103 = tpu.matmul %97, %102, %cst_27 {dimension_numbers = #tpu.dot_dimension_numbers<[1], [0], [0], [1], [0, 0, 1, 1], [], []>} : vector<8x128xbf16>, vector<128x128xbf16>, vector<8x128xf32> -> vector<8x128xf32>
    %104 = arith.addf %100, %103 : vector<8x128xf32>
    %105 = arith.truncf %104 : vector<8x128xf32> to vector<8x128xbf16>
    %cst_28 = arith.constant dense<0.000000e+00> : vector<8x128xf32>
    %106 = tpu.matmul %57, %105, %cst_28 {dimension_numbers = #tpu.dot_dimension_numbers<[1], [0], [0], [1], [0, 0, 1, 1], [], []>} : vector<8x8xbf16>, vector<8x128xbf16>, vector<8x128xf32> -> vector<8x128xf32>
    %107 = arith.truncf %106 : vector<8x128xf32> to vector<8x128xbf16>
    %cst_29 = arith.constant dense<0.000000e+00> : vector<8x128xf32>
    %108 = tpu.matmul %68, %105, %cst_29 {dimension_numbers = #tpu.dot_dimension_numbers<[1], [0], [0], [1], [0, 0, 1, 1], [], []>} : vector<8x8xbf16>, vector<8x128xbf16>, vector<8x128xf32> -> vector<8x128xf32>
    %109 = arith.truncf %108 : vector<8x128xf32> to vector<8x128xbf16>
    %110 = arith.truncf %104 : vector<8x128xf32> to vector<8x128xbf16>
    %cst_30 = arith.constant dense<0.000000e+00> : vector<8x128xf32>
    %111 = tpu.matmul %79, %110, %cst_30 {dimension_numbers = #tpu.dot_dimension_numbers<[1], [0], [0], [1], [0, 0, 1, 1], [], []>} : vector<8x8xbf16>, vector<8x128xbf16>, vector<8x128xf32> -> vector<8x128xf32>
    %112 = arith.truncf %111 : vector<8x128xf32> to vector<8x128xbf16>
    %cst_31 = arith.constant dense<0.000000e+00> : vector<8x128xf32>
    %113 = tpu.matmul %90, %110, %cst_31 {dimension_numbers = #tpu.dot_dimension_numbers<[1], [0], [0], [1], [0, 0, 1, 1], [], []>} : vector<8x8xbf16>, vector<8x128xbf16>, vector<8x128xf32> -> vector<8x128xf32>
    %114 = arith.truncf %113 : vector<8x128xf32> to vector<8x128xbf16>
    %c1_i32_32 = arith.constant 1 : i32
    %115 = tpu.memref_slice %arg38[%c1_i32_32] : memref<18x!tpu.dma_semaphore, #tpu.memory_space<semaphore_mem>> -> memref<1x!tpu.dma_semaphore, #tpu.memory_space<semaphore_mem>>
    %116 = tpu.memref_squeeze %115 : memref<1x!tpu.dma_semaphore, #tpu.memory_space<semaphore_mem>> -> memref<!tpu.dma_semaphore, #tpu.memory_space<semaphore_mem>>
    tpu.wait_dma2 semaphore(%116 : memref<!tpu.dma_semaphore, #tpu.memory_space<semaphore_mem>>) src(%arg2 : memref<2x128x256xbf16, #tpu.memory_space<any>>) dst(%arg21 : memref<2x128x256xbf16, #tpu.memory_space<vmem>>)
    %c0_33 = arith.constant 0 : index
    %c0_34 = arith.constant 0 : index
    %c0_35 = arith.constant 0 : index
    %117 = vector.load %arg21[%c0_33, %c0_34, %c0_35] : memref<2x128x256xbf16, #tpu.memory_space<vmem>>, vector<1x128x256xbf16>
    %118 = vector.shape_cast %117 : vector<1x128x256xbf16> to vector<128x256xbf16>
    %cst_36 = arith.constant dense<0.000000e+00> : vector<8x256xf32>
    %119 = tpu.matmul %107, %118, %cst_36 {dimension_numbers = #tpu.dot_dimension_numbers<[1], [0], [0], [1], [0, 0, 1, 1], [], []>} : vector<8x128xbf16>, vector<128x256xbf16>, vector<8x256xf32> -> vector<8x256xf32>
    %c1_37 = arith.constant 1 : index
    %c0_38 = arith.constant 0 : index
    %c0_39 = arith.constant 0 : index
    %120 = vector.load %arg21[%c1_37, %c0_38, %c0_39] : memref<2x128x256xbf16, #tpu.memory_space<vmem>>, vector<1x128x256xbf16>
    %121 = vector.shape_cast %120 : vector<1x128x256xbf16> to vector<128x256xbf16>
    %cst_40 = arith.constant dense<0.000000e+00> : vector<8x256xf32>
    %122 = tpu.matmul %109, %121, %cst_40 {dimension_numbers = #tpu.dot_dimension_numbers<[1], [0], [0], [1], [0, 0, 1, 1], [], []>} : vector<8x128xbf16>, vector<128x256xbf16>, vector<8x256xf32> -> vector<8x256xf32>
    %123 = arith.addf %119, %122 : vector<8x256xf32>
    %c2_i32_41 = arith.constant 2 : i32
    %124 = tpu.memref_slice %arg38[%c2_i32_41] : memref<18x!tpu.dma_semaphore, #tpu.memory_space<semaphore_mem>> -> memref<1x!tpu.dma_semaphore, #tpu.memory_space<semaphore_mem>>
    %125 = tpu.memref_squeeze %124 : memref<1x!tpu.dma_semaphore, #tpu.memory_space<semaphore_mem>> -> memref<!tpu.dma_semaphore, #tpu.memory_space<semaphore_mem>>
    tpu.wait_dma2 semaphore(%125 : memref<!tpu.dma_semaphore, #tpu.memory_space<semaphore_mem>>) src(%arg3 : memref<128x128xbf16, #tpu.memory_space<any>>) dst(%arg22 : memref<128x128xbf16, #tpu.memory_space<vmem>>)
    %c0_42 = arith.constant 0 : index
    %c0_43 = arith.constant 0 : index
    %126 = vector.load %arg22[%c0_42, %c0_43] : memref<128x128xbf16, #tpu.memory_space<vmem>>, vector<128x128xbf16>
    %127 = vector.extract_strided_slice %123 {offsets = [0, 128], sizes = [8, 128], strides = [1, 1]} : vector<8x256xf32> to vector<8x128xf32>
    %128 = arith.negf %127 : vector<8x128xf32>
    %129 = math.exp %128 : vector<8x128xf32>
    %cst_44 = arith.constant 1.000000e+00 : f32
    %130 = vector.broadcast %cst_44 : f32 to vector<8x128xf32>
    %131 = arith.addf %130, %129 : vector<8x128xf32>
    %132 = arith.divf %130, %131 : vector<8x128xf32>
    %133 = arith.truncf %132 : vector<8x128xf32> to vector<8x128xbf16>
    %134 = vector.extract_strided_slice %123 {offsets = [0, 0], sizes = [8, 128], strides = [1, 1]} : vector<8x256xf32> to vector<8x128xf32>
    %cst_45 = arith.constant dense<0.000000e+00> : vector<8x128xf32>
    %135 = tpu.matmul %133, %126, %cst_45 {dimension_numbers = #tpu.dot_dimension_numbers<[1], [0], [0], [1], [0, 0, 1, 1], [], []>} : vector<8x128xbf16>, vector<128x128xbf16>, vector<8x128xf32> -> vector<8x128xf32>
    %136 = arith.mulf %134, %135 : vector<8x128xf32>
    %137 = arith.truncf %136 : vector<8x128xf32> to vector<8x128xbf16>
    %cst_46 = arith.constant dense<0.000000e+00> : vector<8x128xf32>
    %138 = tpu.matmul %57, %137, %cst_46 {dimension_numbers = #tpu.dot_dimension_numbers<[1], [0], [0], [1], [0, 0, 1, 1], [], []>} : vector<8x8xbf16>, vector<8x128xbf16>, vector<8x128xf32> -> vector<8x128xf32>
    %139 = arith.truncf %138 : vector<8x128xf32> to vector<8x128xbf16>
    %cst_47 = arith.constant dense<0.000000e+00> : vector<8x128xf32>
    %140 = tpu.matmul %68, %137, %cst_47 {dimension_numbers = #tpu.dot_dimension_numbers<[1], [0], [0], [1], [0, 0, 1, 1], [], []>} : vector<8x8xbf16>, vector<8x128xbf16>, vector<8x128xf32> -> vector<8x128xf32>
    %141 = arith.truncf %140 : vector<8x128xf32> to vector<8x128xbf16>
    %c3_i32_48 = arith.constant 3 : i32
    %142 = tpu.memref_slice %arg38[%c3_i32_48] : memref<18x!tpu.dma_semaphore, #tpu.memory_space<semaphore_mem>> -> memref<1x!tpu.dma_semaphore, #tpu.memory_space<semaphore_mem>>
    %143 = tpu.memref_squeeze %142 : memref<1x!tpu.dma_semaphore, #tpu.memory_space<semaphore_mem>> -> memref<!tpu.dma_semaphore, #tpu.memory_space<semaphore_mem>>
    tpu.wait_dma2 semaphore(%143 : memref<!tpu.dma_semaphore, #tpu.memory_space<semaphore_mem>>) src(%arg4 : memref<2x128x256xbf16, #tpu.memory_space<any>>) dst(%arg23 : memref<2x128x256xbf16, #tpu.memory_space<vmem>>)
    %c0_49 = arith.constant 0 : index
    %c0_50 = arith.constant 0 : index
    %c0_51 = arith.constant 0 : index
    %144 = vector.load %arg23[%c0_49, %c0_50, %c0_51] : memref<2x128x256xbf16, #tpu.memory_space<vmem>>, vector<1x128x256xbf16>
    %145 = vector.shape_cast %144 : vector<1x128x256xbf16> to vector<128x256xbf16>
    %cst_52 = arith.constant dense<0.000000e+00> : vector<8x256xf32>
    %146 = tpu.matmul %139, %145, %cst_52 {dimension_numbers = #tpu.dot_dimension_numbers<[1], [0], [0], [1], [0, 0, 1, 1], [], []>} : vector<8x128xbf16>, vector<128x256xbf16>, vector<8x256xf32> -> vector<8x256xf32>
    %c1_53 = arith.constant 1 : index
    %c0_54 = arith.constant 0 : index
    %c0_55 = arith.constant 0 : index
    %147 = vector.load %arg23[%c1_53, %c0_54, %c0_55] : memref<2x128x256xbf16, #tpu.memory_space<vmem>>, vector<1x128x256xbf16>
    %148 = vector.shape_cast %147 : vector<1x128x256xbf16> to vector<128x256xbf16>
    %cst_56 = arith.constant dense<0.000000e+00> : vector<8x256xf32>
    %149 = tpu.matmul %141, %148, %cst_56 {dimension_numbers = #tpu.dot_dimension_numbers<[1], [0], [0], [1], [0, 0, 1, 1], [], []>} : vector<8x128xbf16>, vector<128x256xbf16>, vector<8x256xf32> -> vector<8x256xf32>
    %150 = arith.addf %146, %149 : vector<8x256xf32>
    %c4_i32_57 = arith.constant 4 : i32
    %151 = tpu.memref_slice %arg38[%c4_i32_57] : memref<18x!tpu.dma_semaphore, #tpu.memory_space<semaphore_mem>> -> memref<1x!tpu.dma_semaphore, #tpu.memory_space<semaphore_mem>>
    %152 = tpu.memref_squeeze %151 : memref<1x!tpu.dma_semaphore, #tpu.memory_space<semaphore_mem>> -> memref<!tpu.dma_semaphore, #tpu.memory_space<semaphore_mem>>
    tpu.wait_dma2 semaphore(%152 : memref<!tpu.dma_semaphore, #tpu.memory_space<semaphore_mem>>) src(%arg5 : memref<2x128x128xbf16, #tpu.memory_space<any>>) dst(%arg24 : memref<2x128x128xbf16, #tpu.memory_space<vmem>>)
    %c0_58 = arith.constant 0 : index
    %c0_59 = arith.constant 0 : index
    %c0_60 = arith.constant 0 : index
    %153 = vector.load %arg24[%c0_58, %c0_59, %c0_60] : memref<2x128x128xbf16, #tpu.memory_space<vmem>>, vector<1x128x128xbf16>
    %154 = vector.shape_cast %153 : vector<1x128x128xbf16> to vector<128x128xbf16>
    %cst_61 = arith.constant dense<0.000000e+00> : vector<8x128xf32>
    %155 = tpu.matmul %112, %154, %cst_61 {dimension_numbers = #tpu.dot_dimension_numbers<[1], [0], [0], [1], [0, 0, 1, 1], [], []>} : vector<8x128xbf16>, vector<128x128xbf16>, vector<8x128xf32> -> vector<8x128xf32>
    %c1_62 = arith.constant 1 : index
    %c0_63 = arith.constant 0 : index
    %c0_64 = arith.constant 0 : index
    %156 = vector.load %arg24[%c1_62, %c0_63, %c0_64] : memref<2x128x128xbf16, #tpu.memory_space<vmem>>, vector<1x128x128xbf16>
    %157 = vector.shape_cast %156 : vector<1x128x128xbf16> to vector<128x128xbf16>
    %cst_65 = arith.constant dense<0.000000e+00> : vector<8x128xf32>
    %158 = tpu.matmul %114, %157, %cst_65 {dimension_numbers = #tpu.dot_dimension_numbers<[1], [0], [0], [1], [0, 0, 1, 1], [], []>} : vector<8x128xbf16>, vector<128x128xbf16>, vector<8x128xf32> -> vector<8x128xf32>
    %159 = arith.addf %155, %158 : vector<8x128xf32>
    %160 = vector.extract_strided_slice %150 {offsets = [0, 128], sizes = [8, 128], strides = [1, 1]} : vector<8x256xf32> to vector<8x128xf32>
    %161 = arith.negf %160 : vector<8x128xf32>
    %162 = math.exp %161 : vector<8x128xf32>
    %cst_66 = arith.constant 1.000000e+00 : f32
    %163 = vector.broadcast %cst_66 : f32 to vector<8x128xf32>
    %164 = arith.addf %163, %162 : vector<8x128xf32>
    %165 = arith.divf %163, %164 : vector<8x128xf32>
    %166 = arith.truncf %165 : vector<8x128xf32> to vector<8x128xbf16>
    %167 = vector.extract_strided_slice %150 {offsets = [0, 0], sizes = [8, 128], strides = [1, 1]} : vector<8x256xf32> to vector<8x128xf32>
    %cst_67 = arith.constant dense<0.000000e+00> : vector<8x128xf32>
    %168 = tpu.matmul %166, %126, %cst_67 {dimension_numbers = #tpu.dot_dimension_numbers<[1], [0], [0], [1], [0, 0, 1, 1], [], []>} : vector<8x128xbf16>, vector<128x128xbf16>, vector<8x128xf32> -> vector<8x128xf32>
    %169 = arith.mulf %167, %168 : vector<8x128xf32>
    %170 = arith.addf %169, %159 : vector<8x128xf32>
    %171 = arith.truncf %170 : vector<8x128xf32> to vector<8x128xbf16>
    %cst_68 = arith.constant dense<0.000000e+00> : vector<8x128xf32>
    %172 = tpu.matmul %57, %171, %cst_68 {dimension_numbers = #tpu.dot_dimension_numbers<[1], [0], [0], [1], [0, 0, 1, 1], [], []>} : vector<8x8xbf16>, vector<8x128xbf16>, vector<8x128xf32> -> vector<8x128xf32>
    %173 = arith.truncf %172 : vector<8x128xf32> to vector<8x128xbf16>
    %cst_69 = arith.constant dense<0.000000e+00> : vector<8x128xf32>
    %174 = tpu.matmul %68, %171, %cst_69 {dimension_numbers = #tpu.dot_dimension_numbers<[1], [0], [0], [1], [0, 0, 1, 1], [], []>} : vector<8x8xbf16>, vector<8x128xbf16>, vector<8x128xf32> -> vector<8x128xf32>
    %175 = arith.truncf %174 : vector<8x128xf32> to vector<8x128xbf16>
    %176 = arith.truncf %170 : vector<8x128xf32> to vector<8x128xbf16>
    %cst_70 = arith.constant dense<0.000000e+00> : vector<8x128xf32>
    %177 = tpu.matmul %79, %176, %cst_70 {dimension_numbers = #tpu.dot_dimension_numbers<[1], [0], [0], [1], [0, 0, 1, 1], [], []>} : vector<8x8xbf16>, vector<8x128xbf16>, vector<8x128xf32> -> vector<8x128xf32>
    %178 = arith.truncf %177 : vector<8x128xf32> to vector<8x128xbf16>
    %cst_71 = arith.constant dense<0.000000e+00> : vector<8x128xf32>
    %179 = tpu.matmul %90, %176, %cst_71 {dimension_numbers = #tpu.dot_dimension_numbers<[1], [0], [0], [1], [0, 0, 1, 1], [], []>} : vector<8x8xbf16>, vector<8x128xbf16>, vector<8x128xf32> -> vector<8x128xf32>
    %180 = arith.truncf %179 : vector<8x128xf32> to vector<8x128xbf16>
    %c5_i32_72 = arith.constant 5 : i32
    %181 = tpu.memref_slice %arg38[%c5_i32_72] : memref<18x!tpu.dma_semaphore, #tpu.memory_space<semaphore_mem>> -> memref<1x!tpu.dma_semaphore, #tpu.memory_space<semaphore_mem>>
    %182 = tpu.memref_squeeze %181 : memref<1x!tpu.dma_semaphore, #tpu.memory_space<semaphore_mem>> -> memref<!tpu.dma_semaphore, #tpu.memory_space<semaphore_mem>>
    tpu.wait_dma2 semaphore(%182 : memref<!tpu.dma_semaphore, #tpu.memory_space<semaphore_mem>>) src(%arg6 : memref<2x128x384xbf16, #tpu.memory_space<any>>) dst(%arg25 : memref<2x128x384xbf16, #tpu.memory_space<vmem>>)
    %c0_73 = arith.constant 0 : index
    %c0_74 = arith.constant 0 : index
    %c0_75 = arith.constant 0 : index
    %183 = vector.load %arg25[%c0_73, %c0_74, %c0_75] : memref<2x128x384xbf16, #tpu.memory_space<vmem>>, vector<1x128x384xbf16>
    %184 = vector.shape_cast %183 : vector<1x128x384xbf16> to vector<128x384xbf16>
    %cst_76 = arith.constant dense<0.000000e+00> : vector<8x384xf32>
    %185 = tpu.matmul %173, %184, %cst_76 {dimension_numbers = #tpu.dot_dimension_numbers<[1], [0], [0], [1], [0, 0, 1, 1], [], []>} : vector<8x128xbf16>, vector<128x384xbf16>, vector<8x384xf32> -> vector<8x384xf32>
    %c1_77 = arith.constant 1 : index
    %c0_78 = arith.constant 0 : index
    %c0_79 = arith.constant 0 : index
    %186 = vector.load %arg25[%c1_77, %c0_78, %c0_79] : memref<2x128x384xbf16, #tpu.memory_space<vmem>>, vector<1x128x384xbf16>
    %187 = vector.shape_cast %186 : vector<1x128x384xbf16> to vector<128x384xbf16>
    %cst_80 = arith.constant dense<0.000000e+00> : vector<8x384xf32>
    %188 = tpu.matmul %175, %187, %cst_80 {dimension_numbers = #tpu.dot_dimension_numbers<[1], [0], [0], [1], [0, 0, 1, 1], [], []>} : vector<8x128xbf16>, vector<128x384xbf16>, vector<8x384xf32> -> vector<8x384xf32>
    %189 = arith.addf %185, %188 : vector<8x384xf32>
    %c6_i32_81 = arith.constant 6 : i32
    %190 = tpu.memref_slice %arg38[%c6_i32_81] : memref<18x!tpu.dma_semaphore, #tpu.memory_space<semaphore_mem>> -> memref<1x!tpu.dma_semaphore, #tpu.memory_space<semaphore_mem>>
    %191 = tpu.memref_squeeze %190 : memref<1x!tpu.dma_semaphore, #tpu.memory_space<semaphore_mem>> -> memref<!tpu.dma_semaphore, #tpu.memory_space<semaphore_mem>>
    tpu.wait_dma2 semaphore(%191 : memref<!tpu.dma_semaphore, #tpu.memory_space<semaphore_mem>>) src(%arg7 : memref<128x256xbf16, #tpu.memory_space<any>>) dst(%arg26 : memref<128x256xbf16, #tpu.memory_space<vmem>>)
    %c0_82 = arith.constant 0 : index
    %c0_83 = arith.constant 0 : index
    %192 = vector.load %arg26[%c0_82, %c0_83] : memref<128x256xbf16, #tpu.memory_space<vmem>>, vector<128x256xbf16>
    %193 = vector.extract_strided_slice %189 {offsets = [0, 256], sizes = [8, 128], strides = [1, 1]} : vector<8x384xf32> to vector<8x128xf32>
    %194 = arith.negf %193 : vector<8x128xf32>
    %195 = math.exp %194 : vector<8x128xf32>
    %cst_84 = arith.constant 1.000000e+00 : f32
    %196 = vector.broadcast %cst_84 : f32 to vector<8x128xf32>
    %197 = arith.addf %196, %195 : vector<8x128xf32>
    %198 = arith.divf %196, %197 : vector<8x128xf32>
    %199 = arith.truncf %198 : vector<8x128xf32> to vector<8x128xbf16>
    %200 = vector.extract_strided_slice %189 {offsets = [0, 0], sizes = [8, 256], strides = [1, 1]} : vector<8x384xf32> to vector<8x256xf32>
    %cst_85 = arith.constant dense<0.000000e+00> : vector<8x256xf32>
    %201 = tpu.matmul %199, %192, %cst_85 {dimension_numbers = #tpu.dot_dimension_numbers<[1], [0], [0], [1], [0, 0, 1, 1], [], []>} : vector<8x128xbf16>, vector<128x256xbf16>, vector<8x256xf32> -> vector<8x256xf32>
    %202 = arith.mulf %200, %201 : vector<8x256xf32>
    %203 = arith.truncf %202 : vector<8x256xf32> to vector<8x256xbf16>
    %cst_86 = arith.constant dense<0.000000e+00> : vector<8x256xf32>
    %204 = tpu.matmul %57, %203, %cst_86 {dimension_numbers = #tpu.dot_dimension_numbers<[1], [0], [0], [1], [0, 0, 1, 1], [], []>} : vector<8x8xbf16>, vector<8x256xbf16>, vector<8x256xf32> -> vector<8x256xf32>
    %205 = arith.truncf %204 : vector<8x256xf32> to vector<8x256xbf16>
    %cst_87 = arith.constant dense<0.000000e+00> : vector<8x256xf32>
    %206 = tpu.matmul %68, %203, %cst_87 {dimension_numbers = #tpu.dot_dimension_numbers<[1], [0], [0], [1], [0, 0, 1, 1], [], []>} : vector<8x8xbf16>, vector<8x256xbf16>, vector<8x256xf32> -> vector<8x256xf32>
    %207 = arith.truncf %206 : vector<8x256xf32> to vector<8x256xbf16>
    %c7_i32_88 = arith.constant 7 : i32
    %208 = tpu.memref_slice %arg38[%c7_i32_88] : memref<18x!tpu.dma_semaphore, #tpu.memory_space<semaphore_mem>> -> memref<1x!tpu.dma_semaphore, #tpu.memory_space<semaphore_mem>>
    %209 = tpu.memref_squeeze %208 : memref<1x!tpu.dma_semaphore, #tpu.memory_space<semaphore_mem>> -> memref<!tpu.dma_semaphore, #tpu.memory_space<semaphore_mem>>
    tpu.wait_dma2 semaphore(%209 : memref<!tpu.dma_semaphore, #tpu.memory_space<semaphore_mem>>) src(%arg8 : memref<2x256x384xbf16, #tpu.memory_space<any>>) dst(%arg27 : memref<2x256x384xbf16, #tpu.memory_space<vmem>>)
    %c0_89 = arith.constant 0 : index
    %c0_90 = arith.constant 0 : index
    %c0_91 = arith.constant 0 : index
    %210 = vector.load %arg27[%c0_89, %c0_90, %c0_91] : memref<2x256x384xbf16, #tpu.memory_space<vmem>>, vector<1x256x384xbf16>
    %211 = vector.shape_cast %210 : vector<1x256x384xbf16> to vector<256x384xbf16>
    %cst_92 = arith.constant dense<0.000000e+00> : vector<8x384xf32>
    %212 = tpu.matmul %205, %211, %cst_92 {dimension_numbers = #tpu.dot_dimension_numbers<[1], [0], [0], [1], [0, 0, 1, 1], [], []>} : vector<8x256xbf16>, vector<256x384xbf16>, vector<8x384xf32> -> vector<8x384xf32>
    %c1_93 = arith.constant 1 : index
    %c0_94 = arith.constant 0 : index
    %c0_95 = arith.constant 0 : index
    %213 = vector.load %arg27[%c1_93, %c0_94, %c0_95] : memref<2x256x384xbf16, #tpu.memory_space<vmem>>, vector<1x256x384xbf16>
    %214 = vector.shape_cast %213 : vector<1x256x384xbf16> to vector<256x384xbf16>
    %cst_96 = arith.constant dense<0.000000e+00> : vector<8x384xf32>
    %215 = tpu.matmul %207, %214, %cst_96 {dimension_numbers = #tpu.dot_dimension_numbers<[1], [0], [0], [1], [0, 0, 1, 1], [], []>} : vector<8x256xbf16>, vector<256x384xbf16>, vector<8x384xf32> -> vector<8x384xf32>
    %216 = arith.addf %212, %215 : vector<8x384xf32>
    %c8_i32_97 = arith.constant 8 : i32
    %217 = tpu.memref_slice %arg38[%c8_i32_97] : memref<18x!tpu.dma_semaphore, #tpu.memory_space<semaphore_mem>> -> memref<1x!tpu.dma_semaphore, #tpu.memory_space<semaphore_mem>>
    %218 = tpu.memref_squeeze %217 : memref<1x!tpu.dma_semaphore, #tpu.memory_space<semaphore_mem>> -> memref<!tpu.dma_semaphore, #tpu.memory_space<semaphore_mem>>
    tpu.wait_dma2 semaphore(%218 : memref<!tpu.dma_semaphore, #tpu.memory_space<semaphore_mem>>) src(%arg9 : memref<2x128x256xbf16, #tpu.memory_space<any>>) dst(%arg28 : memref<2x128x256xbf16, #tpu.memory_space<vmem>>)
    %c0_98 = arith.constant 0 : index
    %c0_99 = arith.constant 0 : index
    %c0_100 = arith.constant 0 : index
    %219 = vector.load %arg28[%c0_98, %c0_99, %c0_100] : memref<2x128x256xbf16, #tpu.memory_space<vmem>>, vector<1x128x256xbf16>
    %220 = vector.shape_cast %219 : vector<1x128x256xbf16> to vector<128x256xbf16>
    %cst_101 = arith.constant dense<0.000000e+00> : vector<8x256xf32>
    %221 = tpu.matmul %178, %220, %cst_101 {dimension_numbers = #tpu.dot_dimension_numbers<[1], [0], [0], [1], [0, 0, 1, 1], [], []>} : vector<8x128xbf16>, vector<128x256xbf16>, vector<8x256xf32> -> vector<8x256xf32>
    %c1_102 = arith.constant 1 : index
    %c0_103 = arith.constant 0 : index
    %c0_104 = arith.constant 0 : index
    %222 = vector.load %arg28[%c1_102, %c0_103, %c0_104] : memref<2x128x256xbf16, #tpu.memory_space<vmem>>, vector<1x128x256xbf16>
    %223 = vector.shape_cast %222 : vector<1x128x256xbf16> to vector<128x256xbf16>
    %cst_105 = arith.constant dense<0.000000e+00> : vector<8x256xf32>
    %224 = tpu.matmul %180, %223, %cst_105 {dimension_numbers = #tpu.dot_dimension_numbers<[1], [0], [0], [1], [0, 0, 1, 1], [], []>} : vector<8x128xbf16>, vector<128x256xbf16>, vector<8x256xf32> -> vector<8x256xf32>
    %225 = arith.addf %221, %224 : vector<8x256xf32>
    %226 = vector.extract_strided_slice %216 {offsets = [0, 256], sizes = [8, 128], strides = [1, 1]} : vector<8x384xf32> to vector<8x128xf32>
    %227 = arith.negf %226 : vector<8x128xf32>
    %228 = math.exp %227 : vector<8x128xf32>
    %cst_106 = arith.constant 1.000000e+00 : f32
    %229 = vector.broadcast %cst_106 : f32 to vector<8x128xf32>
    %230 = arith.addf %229, %228 : vector<8x128xf32>
    %231 = arith.divf %229, %230 : vector<8x128xf32>
    %232 = arith.truncf %231 : vector<8x128xf32> to vector<8x128xbf16>
    %233 = vector.extract_strided_slice %216 {offsets = [0, 0], sizes = [8, 256], strides = [1, 1]} : vector<8x384xf32> to vector<8x256xf32>
    %cst_107 = arith.constant dense<0.000000e+00> : vector<8x256xf32>
    %234 = tpu.matmul %232, %192, %cst_107 {dimension_numbers = #tpu.dot_dimension_numbers<[1], [0], [0], [1], [0, 0, 1, 1], [], []>} : vector<8x128xbf16>, vector<128x256xbf16>, vector<8x256xf32> -> vector<8x256xf32>
    %235 = arith.mulf %233, %234 : vector<8x256xf32>
    %236 = arith.addf %235, %225 : vector<8x256xf32>
    %237 = arith.truncf %236 : vector<8x256xf32> to vector<8x256xbf16>
    %cst_108 = arith.constant dense<0.000000e+00> : vector<8x256xf32>
    %238 = tpu.matmul %57, %237, %cst_108 {dimension_numbers = #tpu.dot_dimension_numbers<[1], [0], [0], [1], [0, 0, 1, 1], [], []>} : vector<8x8xbf16>, vector<8x256xbf16>, vector<8x256xf32> -> vector<8x256xf32>
    %239 = arith.truncf %238 : vector<8x256xf32> to vector<8x256xbf16>
    %cst_109 = arith.constant dense<0.000000e+00> : vector<8x256xf32>
    %240 = tpu.matmul %68, %237, %cst_109 {dimension_numbers = #tpu.dot_dimension_numbers<[1], [0], [0], [1], [0, 0, 1, 1], [], []>} : vector<8x8xbf16>, vector<8x256xbf16>, vector<8x256xf32> -> vector<8x256xf32>
    %241 = arith.truncf %240 : vector<8x256xf32> to vector<8x256xbf16>
    %242 = arith.truncf %236 : vector<8x256xf32> to vector<8x256xbf16>
    %cst_110 = arith.constant dense<0.000000e+00> : vector<8x256xf32>
    %243 = tpu.matmul %79, %242, %cst_110 {dimension_numbers = #tpu.dot_dimension_numbers<[1], [0], [0], [1], [0, 0, 1, 1], [], []>} : vector<8x8xbf16>, vector<8x256xbf16>, vector<8x256xf32> -> vector<8x256xf32>
    %244 = arith.truncf %243 : vector<8x256xf32> to vector<8x256xbf16>
    %cst_111 = arith.constant dense<0.000000e+00> : vector<8x256xf32>
    %245 = tpu.matmul %90, %242, %cst_111 {dimension_numbers = #tpu.dot_dimension_numbers<[1], [0], [0], [1], [0, 0, 1, 1], [], []>} : vector<8x8xbf16>, vector<8x256xbf16>, vector<8x256xf32> -> vector<8x256xf32>
    %246 = arith.truncf %245 : vector<8x256xf32> to vector<8x256xbf16>
    %c9_i32_112 = arith.constant 9 : i32
    %247 = tpu.memref_slice %arg38[%c9_i32_112] : memref<18x!tpu.dma_semaphore, #tpu.memory_space<semaphore_mem>> -> memref<1x!tpu.dma_semaphore, #tpu.memory_space<semaphore_mem>>
    %248 = tpu.memref_squeeze %247 : memref<1x!tpu.dma_semaphore, #tpu.memory_space<semaphore_mem>> -> memref<!tpu.dma_semaphore, #tpu.memory_space<semaphore_mem>>
    tpu.wait_dma2 semaphore(%248 : memref<!tpu.dma_semaphore, #tpu.memory_space<semaphore_mem>>) src(%arg10 : memref<2x256x640xbf16, #tpu.memory_space<any>>) dst(%arg29 : memref<2x256x640xbf16, #tpu.memory_space<vmem>>)
    %c0_113 = arith.constant 0 : index
    %c0_114 = arith.constant 0 : index
    %c0_115 = arith.constant 0 : index
    %249 = vector.load %arg29[%c0_113, %c0_114, %c0_115] : memref<2x256x640xbf16, #tpu.memory_space<vmem>>, vector<1x256x640xbf16>
    %250 = vector.shape_cast %249 : vector<1x256x640xbf16> to vector<256x640xbf16>
    %cst_116 = arith.constant dense<0.000000e+00> : vector<8x640xf32>
    %251 = tpu.matmul %239, %250, %cst_116 {dimension_numbers = #tpu.dot_dimension_numbers<[1], [0], [0], [1], [0, 0, 1, 1], [], []>} : vector<8x256xbf16>, vector<256x640xbf16>, vector<8x640xf32> -> vector<8x640xf32>
    %c1_117 = arith.constant 1 : index
    %c0_118 = arith.constant 0 : index
    %c0_119 = arith.constant 0 : index
    %252 = vector.load %arg29[%c1_117, %c0_118, %c0_119] : memref<2x256x640xbf16, #tpu.memory_space<vmem>>, vector<1x256x640xbf16>
    %253 = vector.shape_cast %252 : vector<1x256x640xbf16> to vector<256x640xbf16>
    %cst_120 = arith.constant dense<0.000000e+00> : vector<8x640xf32>
    %254 = tpu.matmul %241, %253, %cst_120 {dimension_numbers = #tpu.dot_dimension_numbers<[1], [0], [0], [1], [0, 0, 1, 1], [], []>} : vector<8x256xbf16>, vector<256x640xbf16>, vector<8x640xf32> -> vector<8x640xf32>
    %255 = arith.addf %251, %254 : vector<8x640xf32>
    %c10_i32_121 = arith.constant 10 : i32
    %256 = tpu.memref_slice %arg38[%c10_i32_121] : memref<18x!tpu.dma_semaphore, #tpu.memory_space<semaphore_mem>> -> memref<1x!tpu.dma_semaphore, #tpu.memory_space<semaphore_mem>>
    %257 = tpu.memref_squeeze %256 : memref<1x!tpu.dma_semaphore, #tpu.memory_space<semaphore_mem>> -> memref<!tpu.dma_semaphore, #tpu.memory_space<semaphore_mem>>
    tpu.wait_dma2 semaphore(%257 : memref<!tpu.dma_semaphore, #tpu.memory_space<semaphore_mem>>) src(%arg11 : memref<128x512xbf16, #tpu.memory_space<any>>) dst(%arg30 : memref<128x512xbf16, #tpu.memory_space<vmem>>)
    %c0_122 = arith.constant 0 : index
    %c0_123 = arith.constant 0 : index
    %258 = vector.load %arg30[%c0_122, %c0_123] : memref<128x512xbf16, #tpu.memory_space<vmem>>, vector<128x512xbf16>
    %259 = vector.extract_strided_slice %255 {offsets = [0, 512], sizes = [8, 128], strides = [1, 1]} : vector<8x640xf32> to vector<8x128xf32>
    %260 = arith.negf %259 : vector<8x128xf32>
    %261 = math.exp %260 : vector<8x128xf32>
    %cst_124 = arith.constant 1.000000e+00 : f32
    %262 = vector.broadcast %cst_124 : f32 to vector<8x128xf32>
    %263 = arith.addf %262, %261 : vector<8x128xf32>
    %264 = arith.divf %262, %263 : vector<8x128xf32>
    %265 = arith.truncf %264 : vector<8x128xf32> to vector<8x128xbf16>
    %266 = vector.extract_strided_slice %255 {offsets = [0, 0], sizes = [8, 512], strides = [1, 1]} : vector<8x640xf32> to vector<8x512xf32>
    %cst_125 = arith.constant dense<0.000000e+00> : vector<8x512xf32>
    %267 = tpu.matmul %265, %258, %cst_125 {dimension_numbers = #tpu.dot_dimension_numbers<[1], [0], [0], [1], [0, 0, 1, 1], [], []>} : vector<8x128xbf16>, vector<128x512xbf16>, vector<8x512xf32> -> vector<8x512xf32>
    %268 = arith.mulf %266, %267 : vector<8x512xf32>
    %269 = arith.truncf %268 : vector<8x512xf32> to vector<8x512xbf16>
    %cst_126 = arith.constant dense<0.000000e+00> : vector<8x512xf32>
    %270 = tpu.matmul %57, %269, %cst_126 {dimension_numbers = #tpu.dot_dimension_numbers<[1], [0], [0], [1], [0, 0, 1, 1], [], []>} : vector<8x8xbf16>, vector<8x512xbf16>, vector<8x512xf32> -> vector<8x512xf32>
    %271 = arith.truncf %270 : vector<8x512xf32> to vector<8x512xbf16>
    %cst_127 = arith.constant dense<0.000000e+00> : vector<8x512xf32>
    %272 = tpu.matmul %68, %269, %cst_127 {dimension_numbers = #tpu.dot_dimension_numbers<[1], [0], [0], [1], [0, 0, 1, 1], [], []>} : vector<8x8xbf16>, vector<8x512xbf16>, vector<8x512xf32> -> vector<8x512xf32>
    %273 = arith.truncf %272 : vector<8x512xf32> to vector<8x512xbf16>
    %c11_i32_128 = arith.constant 11 : i32
    %274 = tpu.memref_slice %arg38[%c11_i32_128] : memref<18x!tpu.dma_semaphore, #tpu.memory_space<semaphore_mem>> -> memref<1x!tpu.dma_semaphore, #tpu.memory_space<semaphore_mem>>
    %275 = tpu.memref_squeeze %274 : memref<1x!tpu.dma_semaphore, #tpu.memory_space<semaphore_mem>> -> memref<!tpu.dma_semaphore, #tpu.memory_space<semaphore_mem>>
    tpu.wait_dma2 semaphore(%275 : memref<!tpu.dma_semaphore, #tpu.memory_space<semaphore_mem>>) src(%arg12 : memref<2x512x640xbf16, #tpu.memory_space<any>>) dst(%arg31 : memref<2x512x640xbf16, #tpu.memory_space<vmem>>)
    %c0_129 = arith.constant 0 : index
    %c0_130 = arith.constant 0 : index
    %c0_131 = arith.constant 0 : index
    %276 = vector.load %arg31[%c0_129, %c0_130, %c0_131] : memref<2x512x640xbf16, #tpu.memory_space<vmem>>, vector<1x512x640xbf16>
    %277 = vector.shape_cast %276 : vector<1x512x640xbf16> to vector<512x640xbf16>
    %cst_132 = arith.constant dense<0.000000e+00> : vector<8x640xf32>
    %278 = tpu.matmul %271, %277, %cst_132 {dimension_numbers = #tpu.dot_dimension_numbers<[1], [0], [0], [1], [0, 0, 1, 1], [], []>} : vector<8x512xbf16>, vector<512x640xbf16>, vector<8x640xf32> -> vector<8x640xf32>
    %c1_133 = arith.constant 1 : index
    %c0_134 = arith.constant 0 : index
    %c0_135 = arith.constant 0 : index
    %279 = vector.load %arg31[%c1_133, %c0_134, %c0_135] : memref<2x512x640xbf16, #tpu.memory_space<vmem>>, vector<1x512x640xbf16>
    %280 = vector.shape_cast %279 : vector<1x512x640xbf16> to vector<512x640xbf16>
    %cst_136 = arith.constant dense<0.000000e+00> : vector<8x640xf32>
    %281 = tpu.matmul %273, %280, %cst_136 {dimension_numbers = #tpu.dot_dimension_numbers<[1], [0], [0], [1], [0, 0, 1, 1], [], []>} : vector<8x512xbf16>, vector<512x640xbf16>, vector<8x640xf32> -> vector<8x640xf32>
    %282 = arith.addf %278, %281 : vector<8x640xf32>
    %c12_i32_137 = arith.constant 12 : i32
    %283 = tpu.memref_slice %arg38[%c12_i32_137] : memref<18x!tpu.dma_semaphore, #tpu.memory_space<semaphore_mem>> -> memref<1x!tpu.dma_semaphore, #tpu.memory_space<semaphore_mem>>
    %284 = tpu.memref_squeeze %283 : memref<1x!tpu.dma_semaphore, #tpu.memory_space<semaphore_mem>> -> memref<!tpu.dma_semaphore, #tpu.memory_space<semaphore_mem>>
    tpu.wait_dma2 semaphore(%284 : memref<!tpu.dma_semaphore, #tpu.memory_space<semaphore_mem>>) src(%arg13 : memref<2x256x512xbf16, #tpu.memory_space<any>>) dst(%arg32 : memref<2x256x512xbf16, #tpu.memory_space<vmem>>)
    %c0_138 = arith.constant 0 : index
    %c0_139 = arith.constant 0 : index
    %c0_140 = arith.constant 0 : index
    %285 = vector.load %arg32[%c0_138, %c0_139, %c0_140] : memref<2x256x512xbf16, #tpu.memory_space<vmem>>, vector<1x256x512xbf16>
    %286 = vector.shape_cast %285 : vector<1x256x512xbf16> to vector<256x512xbf16>
    %cst_141 = arith.constant dense<0.000000e+00> : vector<8x512xf32>
    %287 = tpu.matmul %244, %286, %cst_141 {dimension_numbers = #tpu.dot_dimension_numbers<[1], [0], [0], [1], [0, 0, 1, 1], [], []>} : vector<8x256xbf16>, vector<256x512xbf16>, vector<8x512xf32> -> vector<8x512xf32>
    %c1_142 = arith.constant 1 : index
    %c0_143 = arith.constant 0 : index
    %c0_144 = arith.constant 0 : index
    %288 = vector.load %arg32[%c1_142, %c0_143, %c0_144] : memref<2x256x512xbf16, #tpu.memory_space<vmem>>, vector<1x256x512xbf16>
    %289 = vector.shape_cast %288 : vector<1x256x512xbf16> to vector<256x512xbf16>
    %cst_145 = arith.constant dense<0.000000e+00> : vector<8x512xf32>
    %290 = tpu.matmul %246, %289, %cst_145 {dimension_numbers = #tpu.dot_dimension_numbers<[1], [0], [0], [1], [0, 0, 1, 1], [], []>} : vector<8x256xbf16>, vector<256x512xbf16>, vector<8x512xf32> -> vector<8x512xf32>
    %291 = arith.addf %287, %290 : vector<8x512xf32>
    %292 = vector.extract_strided_slice %282 {offsets = [0, 512], sizes = [8, 128], strides = [1, 1]} : vector<8x640xf32> to vector<8x128xf32>
    %293 = arith.negf %292 : vector<8x128xf32>
    %294 = math.exp %293 : vector<8x128xf32>
    %cst_146 = arith.constant 1.000000e+00 : f32
    %295 = vector.broadcast %cst_146 : f32 to vector<8x128xf32>
    %296 = arith.addf %295, %294 : vector<8x128xf32>
    %297 = arith.divf %295, %296 : vector<8x128xf32>
    %298 = arith.truncf %297 : vector<8x128xf32> to vector<8x128xbf16>
    %299 = vector.extract_strided_slice %282 {offsets = [0, 0], sizes = [8, 512], strides = [1, 1]} : vector<8x640xf32> to vector<8x512xf32>
    %cst_147 = arith.constant dense<0.000000e+00> : vector<8x512xf32>
    %300 = tpu.matmul %298, %258, %cst_147 {dimension_numbers = #tpu.dot_dimension_numbers<[1], [0], [0], [1], [0, 0, 1, 1], [], []>} : vector<8x128xbf16>, vector<128x512xbf16>, vector<8x512xf32> -> vector<8x512xf32>
    %301 = arith.mulf %299, %300 : vector<8x512xf32>
    %302 = arith.addf %301, %291 : vector<8x512xf32>
    %303 = arith.truncf %302 : vector<8x512xf32> to vector<8x512xbf16>
    %cst_148 = arith.constant dense<0.000000e+00> : vector<8x512xf32>
    %304 = tpu.matmul %57, %303, %cst_148 {dimension_numbers = #tpu.dot_dimension_numbers<[1], [0], [0], [1], [0, 0, 1, 1], [], []>} : vector<8x8xbf16>, vector<8x512xbf16>, vector<8x512xf32> -> vector<8x512xf32>
    %305 = arith.truncf %304 : vector<8x512xf32> to vector<8x512xbf16>
    %cst_149 = arith.constant dense<0.000000e+00> : vector<8x512xf32>
    %306 = tpu.matmul %68, %303, %cst_149 {dimension_numbers = #tpu.dot_dimension_numbers<[1], [0], [0], [1], [0, 0, 1, 1], [], []>} : vector<8x8xbf16>, vector<8x512xbf16>, vector<8x512xf32> -> vector<8x512xf32>
    %307 = arith.truncf %306 : vector<8x512xf32> to vector<8x512xbf16>
    %308 = arith.truncf %302 : vector<8x512xf32> to vector<8x512xbf16>
    %cst_150 = arith.constant dense<0.000000e+00> : vector<8x512xf32>
    %309 = tpu.matmul %79, %308, %cst_150 {dimension_numbers = #tpu.dot_dimension_numbers<[1], [0], [0], [1], [0, 0, 1, 1], [], []>} : vector<8x8xbf16>, vector<8x512xbf16>, vector<8x512xf32> -> vector<8x512xf32>
    %310 = arith.truncf %309 : vector<8x512xf32> to vector<8x512xbf16>
    %cst_151 = arith.constant dense<0.000000e+00> : vector<8x512xf32>
    %311 = tpu.matmul %90, %308, %cst_151 {dimension_numbers = #tpu.dot_dimension_numbers<[1], [0], [0], [1], [0, 0, 1, 1], [], []>} : vector<8x8xbf16>, vector<8x512xbf16>, vector<8x512xf32> -> vector<8x512xf32>
    %312 = arith.truncf %311 : vector<8x512xf32> to vector<8x512xbf16>
    %c13_i32_152 = arith.constant 13 : i32
    %313 = tpu.memref_slice %arg38[%c13_i32_152] : memref<18x!tpu.dma_semaphore, #tpu.memory_space<semaphore_mem>> -> memref<1x!tpu.dma_semaphore, #tpu.memory_space<semaphore_mem>>
    %314 = tpu.memref_squeeze %313 : memref<1x!tpu.dma_semaphore, #tpu.memory_space<semaphore_mem>> -> memref<!tpu.dma_semaphore, #tpu.memory_space<semaphore_mem>>
    tpu.wait_dma2 semaphore(%314 : memref<!tpu.dma_semaphore, #tpu.memory_space<semaphore_mem>>) src(%arg14 : memref<2x512x512xbf16, #tpu.memory_space<any>>) dst(%arg33 : memref<2x512x512xbf16, #tpu.memory_space<vmem>>)
    %c0_153 = arith.constant 0 : index
    %c0_154 = arith.constant 0 : index
    %c0_155 = arith.constant 0 : index
    %315 = vector.load %arg33[%c0_153, %c0_154, %c0_155] : memref<2x512x512xbf16, #tpu.memory_space<vmem>>, vector<1x512x512xbf16>
    %316 = vector.shape_cast %315 : vector<1x512x512xbf16> to vector<512x512xbf16>
    %cst_156 = arith.constant dense<0.000000e+00> : vector<8x512xf32>
    %317 = tpu.matmul %305, %316, %cst_156 {dimension_numbers = #tpu.dot_dimension_numbers<[1], [0], [0], [1], [0, 0, 1, 1], [], []>} : vector<8x512xbf16>, vector<512x512xbf16>, vector<8x512xf32> -> vector<8x512xf32>
    %c1_157 = arith.constant 1 : index
    %c0_158 = arith.constant 0 : index
    %c0_159 = arith.constant 0 : index
    %318 = vector.load %arg33[%c1_157, %c0_158, %c0_159] : memref<2x512x512xbf16, #tpu.memory_space<vmem>>, vector<1x512x512xbf16>
    %319 = vector.shape_cast %318 : vector<1x512x512xbf16> to vector<512x512xbf16>
    %cst_160 = arith.constant dense<0.000000e+00> : vector<8x512xf32>
    %320 = tpu.matmul %307, %319, %cst_160 {dimension_numbers = #tpu.dot_dimension_numbers<[1], [0], [0], [1], [0, 0, 1, 1], [], []>} : vector<8x512xbf16>, vector<512x512xbf16>, vector<8x512xf32> -> vector<8x512xf32>
    %321 = arith.addf %317, %320 : vector<8x512xf32>
    %c14_i32_161 = arith.constant 14 : i32
    %322 = tpu.memref_slice %arg38[%c14_i32_161] : memref<18x!tpu.dma_semaphore, #tpu.memory_space<semaphore_mem>> -> memref<1x!tpu.dma_semaphore, #tpu.memory_space<semaphore_mem>>
    %323 = tpu.memref_squeeze %322 : memref<1x!tpu.dma_semaphore, #tpu.memory_space<semaphore_mem>> -> memref<!tpu.dma_semaphore, #tpu.memory_space<semaphore_mem>>
    tpu.wait_dma2 semaphore(%323 : memref<!tpu.dma_semaphore, #tpu.memory_space<semaphore_mem>>) src(%arg15 : memref<128x384xbf16, #tpu.memory_space<any>>) dst(%arg34 : memref<128x384xbf16, #tpu.memory_space<vmem>>)
    %c0_162 = arith.constant 0 : index
    %c0_163 = arith.constant 0 : index
    %324 = vector.load %arg34[%c0_162, %c0_163] : memref<128x384xbf16, #tpu.memory_space<vmem>>, vector<128x384xbf16>
    %325 = vector.extract_strided_slice %321 {offsets = [0, 384], sizes = [8, 128], strides = [1, 1]} : vector<8x512xf32> to vector<8x128xf32>
    %326 = arith.negf %325 : vector<8x128xf32>
    %327 = math.exp %326 : vector<8x128xf32>
    %cst_164 = arith.constant 1.000000e+00 : f32
    %328 = vector.broadcast %cst_164 : f32 to vector<8x128xf32>
    %329 = arith.addf %328, %327 : vector<8x128xf32>
    %330 = arith.divf %328, %329 : vector<8x128xf32>
    %331 = arith.truncf %330 : vector<8x128xf32> to vector<8x128xbf16>
    %332 = vector.extract_strided_slice %321 {offsets = [0, 0], sizes = [8, 384], strides = [1, 1]} : vector<8x512xf32> to vector<8x384xf32>
    %cst_165 = arith.constant dense<0.000000e+00> : vector<8x384xf32>
    %333 = tpu.matmul %331, %324, %cst_165 {dimension_numbers = #tpu.dot_dimension_numbers<[1], [0], [0], [1], [0, 0, 1, 1], [], []>} : vector<8x128xbf16>, vector<128x384xbf16>, vector<8x384xf32> -> vector<8x384xf32>
    %334 = arith.mulf %332, %333 : vector<8x384xf32>
    %335 = arith.truncf %334 : vector<8x384xf32> to vector<8x384xbf16>
    %cst_166 = arith.constant dense<0.000000e+00> : vector<8x384xf32>
    %336 = tpu.matmul %57, %335, %cst_166 {dimension_numbers = #tpu.dot_dimension_numbers<[1], [0], [0], [1], [0, 0, 1, 1], [], []>} : vector<8x8xbf16>, vector<8x384xbf16>, vector<8x384xf32> -> vector<8x384xf32>
    %337 = arith.truncf %336 : vector<8x384xf32> to vector<8x384xbf16>
    %cst_167 = arith.constant dense<0.000000e+00> : vector<8x384xf32>
    %338 = tpu.matmul %68, %335, %cst_167 {dimension_numbers = #tpu.dot_dimension_numbers<[1], [0], [0], [1], [0, 0, 1, 1], [], []>} : vector<8x8xbf16>, vector<8x384xbf16>, vector<8x384xf32> -> vector<8x384xf32>
    %339 = arith.truncf %338 : vector<8x384xf32> to vector<8x384xbf16>
    %c15_i32_168 = arith.constant 15 : i32
    %340 = tpu.memref_slice %arg38[%c15_i32_168] : memref<18x!tpu.dma_semaphore, #tpu.memory_space<semaphore_mem>> -> memref<1x!tpu.dma_semaphore, #tpu.memory_space<semaphore_mem>>
    %341 = tpu.memref_squeeze %340 : memref<1x!tpu.dma_semaphore, #tpu.memory_space<semaphore_mem>> -> memref<!tpu.dma_semaphore, #tpu.memory_space<semaphore_mem>>
    tpu.wait_dma2 semaphore(%341 : memref<!tpu.dma_semaphore, #tpu.memory_space<semaphore_mem>>) src(%arg16 : memref<2x384x512xbf16, #tpu.memory_space<any>>) dst(%arg35 : memref<2x384x512xbf16, #tpu.memory_space<vmem>>)
    %c0_169 = arith.constant 0 : index
    %c0_170 = arith.constant 0 : index
    %c0_171 = arith.constant 0 : index
    %342 = vector.load %arg35[%c0_169, %c0_170, %c0_171] : memref<2x384x512xbf16, #tpu.memory_space<vmem>>, vector<1x384x512xbf16>
    %343 = vector.shape_cast %342 : vector<1x384x512xbf16> to vector<384x512xbf16>
    %cst_172 = arith.constant dense<0.000000e+00> : vector<8x512xf32>
    %344 = tpu.matmul %337, %343, %cst_172 {dimension_numbers = #tpu.dot_dimension_numbers<[1], [0], [0], [1], [0, 0, 1, 1], [], []>} : vector<8x384xbf16>, vector<384x512xbf16>, vector<8x512xf32> -> vector<8x512xf32>
    %c1_173 = arith.constant 1 : index
    %c0_174 = arith.constant 0 : index
    %c0_175 = arith.constant 0 : index
    %345 = vector.load %arg35[%c1_173, %c0_174, %c0_175] : memref<2x384x512xbf16, #tpu.memory_space<vmem>>, vector<1x384x512xbf16>
    %346 = vector.shape_cast %345 : vector<1x384x512xbf16> to vector<384x512xbf16>
    %cst_176 = arith.constant dense<0.000000e+00> : vector<8x512xf32>
    %347 = tpu.matmul %339, %346, %cst_176 {dimension_numbers = #tpu.dot_dimension_numbers<[1], [0], [0], [1], [0, 0, 1, 1], [], []>} : vector<8x384xbf16>, vector<384x512xbf16>, vector<8x512xf32> -> vector<8x512xf32>
    %348 = arith.addf %344, %347 : vector<8x512xf32>
    %c16_i32_177 = arith.constant 16 : i32
    %349 = tpu.memref_slice %arg38[%c16_i32_177] : memref<18x!tpu.dma_semaphore, #tpu.memory_space<semaphore_mem>> -> memref<1x!tpu.dma_semaphore, #tpu.memory_space<semaphore_mem>>
    %350 = tpu.memref_squeeze %349 : memref<1x!tpu.dma_semaphore, #tpu.memory_space<semaphore_mem>> -> memref<!tpu.dma_semaphore, #tpu.memory_space<semaphore_mem>>
    tpu.wait_dma2 semaphore(%350 : memref<!tpu.dma_semaphore, #tpu.memory_space<semaphore_mem>>) src(%arg17 : memref<2x512x384xbf16, #tpu.memory_space<any>>) dst(%arg36 : memref<2x512x384xbf16, #tpu.memory_space<vmem>>)
    %c0_178 = arith.constant 0 : index
    %c0_179 = arith.constant 0 : index
    %c0_180 = arith.constant 0 : index
    %351 = vector.load %arg36[%c0_178, %c0_179, %c0_180] : memref<2x512x384xbf16, #tpu.memory_space<vmem>>, vector<1x512x384xbf16>
    %352 = vector.shape_cast %351 : vector<1x512x384xbf16> to vector<512x384xbf16>
    %cst_181 = arith.constant dense<0.000000e+00> : vector<8x384xf32>
    %353 = tpu.matmul %310, %352, %cst_181 {dimension_numbers = #tpu.dot_dimension_numbers<[1], [0], [0], [1], [0, 0, 1, 1], [], []>} : vector<8x512xbf16>, vector<512x384xbf16>, vector<8x384xf32> -> vector<8x384xf32>
    %c1_182 = arith.constant 1 : index
    %c0_183 = arith.constant 0 : index
    %c0_184 = arith.constant 0 : index
    %354 = vector.load %arg36[%c1_182, %c0_183, %c0_184] : memref<2x512x384xbf16, #tpu.memory_space<vmem>>, vector<1x512x384xbf16>
    %355 = vector.shape_cast %354 : vector<1x512x384xbf16> to vector<512x384xbf16>
    %cst_185 = arith.constant dense<0.000000e+00> : vector<8x384xf32>
    %356 = tpu.matmul %312, %355, %cst_185 {dimension_numbers = #tpu.dot_dimension_numbers<[1], [0], [0], [1], [0, 0, 1, 1], [], []>} : vector<8x512xbf16>, vector<512x384xbf16>, vector<8x384xf32> -> vector<8x384xf32>
    %357 = arith.addf %353, %356 : vector<8x384xf32>
    %358 = vector.extract_strided_slice %348 {offsets = [0, 384], sizes = [8, 128], strides = [1, 1]} : vector<8x512xf32> to vector<8x128xf32>
    %359 = arith.negf %358 : vector<8x128xf32>
    %360 = math.exp %359 : vector<8x128xf32>
    %cst_186 = arith.constant 1.000000e+00 : f32
    %361 = vector.broadcast %cst_186 : f32 to vector<8x128xf32>
    %362 = arith.addf %361, %360 : vector<8x128xf32>
    %363 = arith.divf %361, %362 : vector<8x128xf32>
    %364 = arith.truncf %363 : vector<8x128xf32> to vector<8x128xbf16>
    %365 = vector.extract_strided_slice %348 {offsets = [0, 0], sizes = [8, 384], strides = [1, 1]} : vector<8x512xf32> to vector<8x384xf32>
    %cst_187 = arith.constant dense<0.000000e+00> : vector<8x384xf32>
    %366 = tpu.matmul %364, %324, %cst_187 {dimension_numbers = #tpu.dot_dimension_numbers<[1], [0], [0], [1], [0, 0, 1, 1], [], []>} : vector<8x128xbf16>, vector<128x384xbf16>, vector<8x384xf32> -> vector<8x384xf32>
    %367 = arith.mulf %365, %366 : vector<8x384xf32>
    %368 = arith.addf %367, %357 : vector<8x384xf32>
    %c17_i32_188 = arith.constant 17 : i32
    %369 = tpu.memref_slice %arg38[%c17_i32_188] : memref<18x!tpu.dma_semaphore, #tpu.memory_space<semaphore_mem>> -> memref<1x!tpu.dma_semaphore, #tpu.memory_space<semaphore_mem>>
    %370 = tpu.memref_squeeze %369 : memref<1x!tpu.dma_semaphore, #tpu.memory_space<semaphore_mem>> -> memref<!tpu.dma_semaphore, #tpu.memory_space<semaphore_mem>>
    tpu.wait_dma2 semaphore(%370 : memref<!tpu.dma_semaphore, #tpu.memory_space<semaphore_mem>>) src(%arg18 : memref<384x128xbf16, #tpu.memory_space<any>>) dst(%arg37 : memref<384x128xbf16, #tpu.memory_space<vmem>>)
    %371 = arith.mulf %368, %368 : vector<8x384xf32>
    %372 = arith.truncf %371 : vector<8x384xf32> to vector<8x384xbf16>
    %c0_189 = arith.constant 0 : index
    %c0_190 = arith.constant 0 : index
    %373 = vector.load %arg37[%c0_189, %c0_190] : memref<384x128xbf16, #tpu.memory_space<vmem>>, vector<384x128xbf16>
    %cst_191 = arith.constant dense<0.000000e+00> : vector<8x128xf32>
    %374 = tpu.matmul %372, %373, %cst_191 {dimension_numbers = #tpu.dot_dimension_numbers<[1], [0], [0], [1], [0, 0, 1, 1], [], []>} : vector<8x384xbf16>, vector<384x128xbf16>, vector<8x128xf32> -> vector<8x128xf32>
    %cst_192 = arith.constant 9.99999996E-13 : f32
    %375 = vector.broadcast %cst_192 : f32 to vector<8x128xf32>
    %376 = arith.addf %374, %375 : vector<8x128xf32>
    %377 = math.sqrt %376 : vector<8x128xf32>
    %c0_193 = arith.constant 0 : index
    %c0_194 = arith.constant 0 : index
    %378 = vector.load %arg19[%c0_193, %c0_194] : memref<8x128xf32, #tpu.memory_space<vmem>>, vector<8x128xf32>
    tpu.vector_store %arg19[%c0_193, %c0_194], %377 {strides = array<i32>} : memref<8x128xf32, #tpu.memory_space<vmem>>, vector<8x128xf32>,
    return
  }
}

</mosaic_0001>

<bundles_post_ra>
// kernel: se3_resnet_forward.1
= control target key start
LH: loop header
LB: loop body
LE: loop exit
PB: predicated region body
PF: predicated region fallthrough
CT: control target
= control target key end

     0   :  { %s10796_s0 = inlined_call_operand.vmem [shape: f32[8,128], index: 0, kind: input, shape index: {}]   ;;  %s10797_s1 = inlined_call_operand.hbm [shape: bf16[2,128,128], index: 1, kind: input, shape index: {}]   ;;  %s10798_s2 = inlined_call_operand.hbm [shape: bf16[2,128,256], index: 2, kind: input, shape index: {}]   ;;  %s10799_s3 = inlined_call_operand.hbm [shape: bf16[128,128], index: 3, kind: input, shape index: {}]   ;;  %s10800_s4 = inlined_call_operand.hbm [shape: bf16[2,128,256], index: 4, kind: input, shape index: {}]   ;;  %s10801_s5 = inlined_call_operand.hbm [shape: bf16[2,128,128], index: 5, kind: input, shape index: {}]   ;;  %s10802_s6 = inlined_call_operand.hbm [shape: bf16[2,128,384], index: 6, kind: input, shape index: {}]   ;;  %s10803_s7 = inlined_call_operand.hbm [shape: bf16[128,256], index: 7, kind: input, shape index: {}]   ;;  %s10804_s8 = inlined_call_operand.hbm [shape: bf16[2,256,384], index: 8, kind: input, shape index: {}]   ;;  %s10805_s9 = inlined_call_operand.hbm [shape: bf16[2,128,256], index: 9, kind: input, shape index: {}]   ;;  %s10806_s10 = inlined_call_operand.hbm [shape: bf16[2,256,640], index: 10, kind: input, shape index: {}]   ;;  %s10807_s11 = inlined_call_operand.hbm [shape: bf16[128,512], index: 11, kind: input, shape index: {}]   ;;  %s10808_s12 = inlined_call_operand.hbm [shape: bf16[2,512,640], index: 12, kind: input, shape index: {}]   ;;  %s10809_s13 = inlined_call_operand.hbm [shape: bf16[2,256,512], index: 13, kind: input, shape index: {}]   ;;  %s10810_s14 = inlined_call_operand.hbm [shape: bf16[2,512,512], index: 14, kind: input, shape index: {}]   ;;  %s10811_s15 = inlined_call_operand.hbm [shape: bf16[128,384], index: 15, kind: input, shape index: {}]   ;;  %s10812_s16 = inlined_call_operand.hbm [shape: bf16[2,384,512], index: 16, kind: input, shape index: {}]   ;;  %s10813_s17 = inlined_call_operand.hbm [shape: bf16[2,512,384], index: 17, kind: input, shape index: {}]   ;;  %s10814_s18 = inlined_call_operand.hbm [shape: bf16[384,128], index: 18, kind: input, shape index: {}]   ;;  %s10815_s19 = inlined_call_operand.hbm [shape: f32[8,128], index: 19, kind: output, shape index: {}]  }
   0x1   :  { %10830 = sst [smem:[#allocation80_spill]] %s10796_s0 }
   0x2   :  { %10831 = sst [smem:[#allocation81_spill]] %s10797_s1 }
   0x3   :  { %10832 = sst [smem:[#allocation82_spill]] %s10798_s2 }
   0x4   :  { %10833 = sst [smem:[#allocation83_spill]] %s10799_s3 }
   0x5   :  { %10834 = sst [smem:[#allocation84_spill]] %s10812_s16 }
   0x6   :  { %24 = vsyncpa [#allocation22], 0  ;;  %s44_s0 = sld [smem:[#allocation0]]   ;;  %s9116_s30 = smov [#allocation2]  }
   0x7   :  { %s35_s20 = sshll.u32 %s9116_s30, 4  ;;  %s9117_s21 = smov [#allocation3]   ;;  %s36_s20 = int_to_ptr.vmem [resolvable:$true] %s35_s20 }
   0x8   :  { %s9279_s1 = sshll.u32 %s9117_s21, 4  ;;  %s10835_s23 = sld [smem:[#allocation81_spill]]  ;;  %s53_s1 = int_to_ptr.vmem [resolvable:$true] %s9279_s1 }
   0xe   :  { %s8968_s24 = scalar_lea.hbm %s10835_s23, 2048 }
   0xf   :  { %p8969_p0 = scmp.ne.s32.totalorder %s10835_s23, %s8968_s24  ;;  %p8972_p1 = scmp.lt.u32.totalorder %s8968_s24, %s10835_s23 }
  0x11   :  { %p8974_p2 = pnand %p8972_p1, %p8969_p0 }
  0x13   :  { %8977 = shalt.err (!%p8974_p2)  }
  0x14   :  { %s8978_s27 = scalar_lea.vmem %s36_s20, 2048  ;;  %p8983_p4 = scmp.lt.s32.totalorder %s36_s20, %s36_s20 }
  0x15   :  { %p8979_p3 = scmp.ne.s32.totalorder %s36_s20, %s8978_s27  ;;  %p8984_p5 = scmp.lt.s32.totalorder %s8978_s27, %s8978_s27 }
  0x17   :  { %p8985_p6 = por %p8984_p5, %p8983_p4 }
  0x19   :  { %p8986_p7 = pnand %p8985_p6, %p8979_p3 }
  0x1b   :  { %8989 = shalt.err (!%p8986_p7)  }
  0x1c   :  { %38 = dma.hbm_to_vmem [thread:$0]  %s10835_s23, 2048, %s36_s20, [#allocation20] }
  0x1d   :  { %s10818_s16 = smov 256   ;;  %s7845_s30 = sshll.u32 %s44_s0, 26 }
  0x1e   :  { %56 = sst [smem:[#allocation28]] %s10818_s16  ;;  %s9296_s21 = sadd.s32 134217728, %s7845_s30 }
  0x1f   :  { %58 = sst [smem:[#allocation28 + $0x1]] %s10818_s16  ;;  %s10822_s22 = smov 2  }
  0x20   :  { %60 = sst [smem:[#allocation28 + $0x2]] %s10822_s22  ;;  %s9120_s2 = smov 64  }
  0x21   :  { %62 = sst [smem:[#allocation28 + $0x3]] %s9120_s2  ;;  %s9121_s24 = smov 128  }
  0x22   :  { %64 = sst [smem:[#allocation28 + $0x4]] %s9121_s24  ;;  %s10820_s0 = smov 4  }
  0x23   :  { %66 = sst [smem:[#allocation28 + $0x5]] %s10822_s22  ;;  %s9123_s20 = smov [#allocation4]  }
  0x24   :  { %68 = sst [smem:[#allocation28 + $0x6]] %s9121_s24  ;;  %s83_s23 = sshll.u32 %s9123_s20, 4  ;;  %s84_s23 = int_to_ptr.vmem [resolvable:$true] %s83_s23 }
  0x25   :  { %70 = sst [smem:[#allocation28 + $0x7]] %s9120_s2  ;;  %s9124_s25 = smov [#allocation20 + $0x1]  }
  0x26   :  { %72 = sst [smem:[#allocation28 + $0x8]] %s10820_s0  ;;  %s9125_s3 = smov [#allocation27]  }
  0x27   :  { %s10836_s28 = sld [smem:[#allocation82_spill]]  ;;  %s9126_s29 = smov [#allocation5]  }
  0x28   :  { %s9311_s30 = sshll.u32 %s9126_s29, 4  ;;  %s100_s30 = int_to_ptr.vmem [resolvable:$true] %s9311_s30 }
  0x2d   :  { %74 = dma.general %s10836_s28, 4096, %s53_s1, %s9124_s25, %s9125_s3, [#allocation28], %s9296_s21, 0  }
  0x2e   :  { %103 = sst [smem:[#allocation32]] %s10818_s16  ;;  %s10837_s25 = sld [smem:[#allocation83_spill]] }
  0x2f   :  { %105 = sst [smem:[#allocation32 + $0x1]] %s10818_s16 }
  0x30   :  { %107 = sst [smem:[#allocation32 + $0x2]] %s10822_s22 }
  0x31   :  { %109 = sst [smem:[#allocation32 + $0x3]] %s9120_s2 }
  0x32   :  { %111 = sst [smem:[#allocation32 + $0x4]] %s9121_s24 }
  0x33   :  { %113 = sst [smem:[#allocation32 + $0x5]] %s10822_s22 }
  0x34   :  { %115 = sst [smem:[#allocation32 + $0x6]] %s9121_s24  ;;  %s8990_s3 = scalar_lea.hbm %s10837_s25, 1024 }
  0x35   :  { %117 = sst [smem:[#allocation32 + $0x7]] %s9120_s2  ;;  %p8991_p8 = scmp.ne.s32.totalorder %s10837_s25, %s8990_s3 }
  0x36   :  { %119 = sst [smem:[#allocation32 + $0x8]] %s10820_s0  ;;  %p8994_p9 = scmp.lt.u32.totalorder %s8990_s3, %s10837_s25 }
  0x38   :  { %p8996_p10 = pnand %p8994_p9, %p8991_p8 }
  0x3a   :  { %8999 = shalt.err (!%p8996_p10)  }
  0x3b   :  { %s9000_s16 = scalar_lea.vmem %s84_s23, 1024  ;;  %p9005_p12 = scmp.lt.s32.totalorder %s84_s23, %s84_s23 }
  0x3c   :  { %p9001_p11 = scmp.ne.s32.totalorder %s84_s23, %s9000_s16  ;;  %p9006_p13 = scmp.lt.s32.totalorder %s9000_s16, %s9000_s16 }
  0x3e   :  { %p9007_p0 = por %p9006_p13, %p9005_p12 }
  0x40   :  { %p9008_p1 = pnand %p9007_p0, %p9001_p11 }
  0x42   :  { %9011 = shalt.err (!%p9008_p1)  }
  0x43   :  { %86 = dma.hbm_to_vmem [thread:$0]  %s10837_s25, 1024, %s84_s23, [#allocation20 + $0x2] }
  0x44   :  { %s9127_s20 = smov [#allocation20 + $0x3]   ;;  %s9128_s26 = smov [#allocation31]  }
  0x45   :  { %121 = dma.general %s10800_s4, 4096, %s100_s30, %s9127_s20, %s9128_s26, [#allocation32], %s9296_s21, 0  }
  0x46   :  { %s10828_s3 = smov 384   ;;  %s9130_s16 = smov [#allocation6]  }
  0x47   :  { %150 = sst [smem:[#allocation36]] %s10828_s3  ;;  %s130_s28 = sshll.u32 %s9130_s16, 4  ;;  %s131_s28 = int_to_ptr.vmem [resolvable:$true] %s130_s28 }
  0x48   :  { %152 = sst [smem:[#allocation36 + $0x1]] %s10828_s3  ;;  %s10824_s29 = smov 3  }
  0x49   :  { %154 = sst [smem:[#allocation36 + $0x2]] %s10824_s29  ;;  %s9132_s0 = smov [#allocation7]  }
  0x4a   :  { %156 = sst [smem:[#allocation36 + $0x3]] %s9120_s2  ;;  %s146_s23 = sshll.u32 %s9132_s0, 4  ;;  %s147_s23 = int_to_ptr.vmem [resolvable:$true] %s146_s23 }
  0x4b   :  { %158 = sst [smem:[#allocation36 + $0x4]] %s9121_s24  ;;  %s10838_s25 = smov 2  }
  0x4c   :  { %160 = sst [smem:[#allocation36 + $0x5]] %s10838_s25  ;;  %s10826_s4 = smov 192  }
  0x4d   :  { %162 = sst [smem:[#allocation36 + $0x6]] %s10826_s4  ;;  %s10839_s22 = smov 4  }
  0x4e   :  { %164 = sst [smem:[#allocation36 + $0x7]] %s9120_s2  ;;  %s9012_s20 = scalar_lea.hbm %s10801_s5, 2048 }
  0x4f   :  { %166 = sst [smem:[#allocation36 + $0x8]] %s10839_s22  ;;  %p9013_p2 = scmp.ne.s32.totalorder %s10801_s5, %s9012_s20 }
  0x50   :  { %p9016_p3 = scmp.lt.u32.totalorder %s9012_s20, %s10801_s5 }
  0x52   :  { %p9018_p4 = pnand %p9016_p3, %p9013_p2 }
  0x54   :  { %9021 = shalt.err (!%p9018_p4)  }
  0x55   :  { %s9022_s29 = scalar_lea.vmem %s131_s28, 2048  ;;  %p9027_p6 = scmp.lt.s32.totalorder %s131_s28, %s131_s28 }
  0x56   :  { %p9023_p5 = scmp.ne.s32.totalorder %s131_s28, %s9022_s29  ;;  %p9028_p7 = scmp.lt.s32.totalorder %s9022_s29, %s9022_s29 }
  0x58   :  { %p9029_p8 = por %p9028_p7, %p9027_p6 }
  0x5a   :  { %p9030_p9 = pnand %p9029_p8, %p9023_p5 }
  0x5c   :  { %9033 = shalt.err (!%p9030_p9)  }
  0x5d   :  { %133 = dma.hbm_to_vmem [thread:$0]  %s10801_s5, 2048, %s131_s28, [#allocation20 + $0x4]  ;;  %v9171_v0 = vmov 1966171168   ;;  %v572_v2 = vlaneseq }
  0x5e   :  { %s9134_s1 = smov [#allocation20 + $0x5]   ;;  %s9135_s26 = smov [#allocation35]   ;;  %v570_v1 = vunpack.c.l.s4 %v9171_v0 }
  0x5f   :  { %168 = dma.general %s10802_s6, 6144, %s147_s23, %s9134_s1, %s9135_s26, [#allocation36], %s9296_s21, 0   ;;  %v9506_v4 = vshrl.u32 %v572_v2, 7 }
  0x60   :  { %s10840_s20 = smov 256   ;;  %s9136_s29 = smov [#allocation8]   ;;  %v571_v3 = vunpack.c.0.s8 %v570_v1 }
  0x61   :  { %185 = sst [smem:[#allocation38]] %s10840_s20  ;;  %s181_s16 = sshll.u32 %s9136_s29, 4  ;;  %v619_v8 = vsub.s32 0, %v9506_v4  ;;  %s182_s16 = int_to_ptr.vmem [resolvable:$true] %s181_s16 }
  0x62   :  { %187 = sst [smem:[#allocation38 + $0x1]] %s10840_s20  ;;  %s9137_s5 = smov [#allocation20 + $0x6]   ;;  %v574_v5 = vsub.s32 %v571_v3, %v9506_v4 }
  0x63   :  { %189 = sst [smem:[#allocation38 + $0x2]] %s10838_s25  ;;  %s9138_s6 = smov [#allocation37]  }
  0x64   :  { %191 = sst [smem:[#allocation38 + $0x3]] %s9120_s2  ;;  %s10841_s23 = smov 384  }
  0x65   :  { %193 = sst [smem:[#allocation38 + $0x4]] %s9121_s24  ;;  %s9139_s4 = smov [#allocation9]  }
  0x66   :  { %195 = sst [smem:[#allocation38 + $0x5]] %s10838_s25  ;;  %s216_s0 = sshll.u32 %s9139_s4, 4  ;;  %s217_s0 = int_to_ptr.vmem [resolvable:$true] %s216_s0 }
  0x67   :  { %197 = sst [smem:[#allocation38 + $0x6]] %s9121_s24  ;;  %s10842_s30 = smov 3  }
  0x68   :  { %199 = sst [smem:[#allocation38 + $0x7]] %s9120_s2  ;;  %s10843_s1 = smov 192  }
  0x69   :  { %201 = sst [smem:[#allocation38 + $0x8]] %s10839_s22  ;;  %s9141_s26 = smov [#allocation39]  }
  0x6a   :  { %203 = dma.general %s10803_s7, 2048, %s182_s16, %s9137_s5, %s9138_s6, [#allocation38], %s9296_s21, 0  }
  0x6b   :  { %220 = sst [smem:[#allocation40]] %s10841_s23  ;;  %s9140_s7 = smov [#allocation20 + $0x7]  }
  0x6c   :  { %222 = sst [smem:[#allocation40 + $0x1]] %s10841_s23  ;;  %s9142_s16 = smov [#allocation10]  }
  0x6d   :  { %224 = sst [smem:[#allocation40 + $0x2]] %s10842_s30  ;;  %s251_s5 = sshll.u32 %s9142_s16, 4  ;;  %s252_s5 = int_to_ptr.vmem [resolvable:$true] %s251_s5 }
  0x6e   :  { %226 = sst [smem:[#allocation40 + $0x3]] %s9120_s2  ;;  %s9144_s6 = smov [#allocation41]  }
  0x6f   :  { %228 = sst [smem:[#allocation40 + $0x4]] %s9121_s24  ;;  %s9145_s4 = smov 640  }
  0x70   :  { %230 = sst [smem:[#allocation40 + $0x5]] %s10838_s25  ;;  %s9148_s27 = smov 320  }
  0x71   :  { %232 = sst [smem:[#allocation40 + $0x6]] %s10843_s1  ;;  %s9150_s29 = smov [#allocation43]  }
  0x72   :  { %234 = sst [smem:[#allocation40 + $0x7]] %s9120_s2  ;;  %s9154_s28 = smov [#allocation45]  }
  0x73   :  { %236 = sst [smem:[#allocation40 + $0x8]] %s10839_s22  ;;  %s9157_s16 = smov [#allocation47]  }
  0x74   :  { %238 = dma.general %s10804_s8, 12288, %s217_s0, %s9140_s7, %s9141_s26, [#allocation40], %s9296_s21, 0  }
  0x75   :  { %255 = sst [smem:[#allocation42]] %s10840_s20  ;;  %s9143_s8 = smov [#allocation20 + $0x8]  }
  0x76   :  { %257 = sst [smem:[#allocation42 + $0x1]] %s10840_s20  ;;  %s9146_s0 = smov [#allocation11]  }
  0x77   :  { %259 = sst [smem:[#allocation42 + $0x2]] %s10838_s25  ;;  %s286_s7 = sshll.u32 %s9146_s0, 4  ;;  %s287_s7 = int_to_ptr.vmem [resolvable:$true] %s286_s7 }
  0x78   :  { %261 = sst [smem:[#allocation42 + $0x3]] %s9120_s2  ;;  %s9147_s26 = smov 5  }
  0x79   :  { %263 = sst [smem:[#allocation42 + $0x4]] %s9121_s24 }
  0x7a   :  { %265 = sst [smem:[#allocation42 + $0x5]] %s10838_s25 }
  0x7b   :  { %267 = sst [smem:[#allocation42 + $0x6]] %s9121_s24 }
  0x7c   :  { %269 = sst [smem:[#allocation42 + $0x7]] %s9120_s2 }
  0x7d   :  { %271 = sst [smem:[#allocation42 + $0x8]] %s10839_s22 }
  0x7e   :  { %273 = dma.general %s10805_s9, 4096, %s252_s5, %s9143_s8, %s9144_s6, [#allocation42], %s9296_s21, 0  }
  0x7f   :  { %290 = sst [smem:[#allocation44]] %s9145_s4  ;;  %s9149_s9 = smov [#allocation20 + $0x9]  }
  0x80   :  { %292 = sst [smem:[#allocation44 + $0x1]] %s9145_s4  ;;  %s9151_s8 = smov 512  }
  0x81   :  { %294 = sst [smem:[#allocation44 + $0x2]] %s9147_s26  ;;  %s9152_s6 = smov [#allocation12]  }
  0x82   :  { %296 = sst [smem:[#allocation44 + $0x3]] %s9120_s2  ;;  %s321_s3 = sshll.u32 %s9152_s6, 4  ;;  %s322_s3 = int_to_ptr.vmem [resolvable:$true] %s321_s3 }
  0x83   :  { %298 = sst [smem:[#allocation44 + $0x4]] %s9121_s24 }
  0x84   :  { %300 = sst [smem:[#allocation44 + $0x5]] %s10838_s25 }
  0x85   :  { %302 = sst [smem:[#allocation44 + $0x6]] %s9148_s27 }
  0x86   :  { %304 = sst [smem:[#allocation44 + $0x7]] %s9120_s2 }
  0x87   :  { %306 = sst [smem:[#allocation44 + $0x8]] %s10839_s22 }
  0x88   :  { %308 = dma.general %s10806_s10, 20480, %s287_s7, %s9149_s9, %s9150_s29, [#allocation44], %s9296_s21, 0  }
  0x89   :  { %325 = sst [smem:[#allocation46]] %s9151_s8  ;;  %s9153_s10 = smov [#allocation20 + $0xa]  }
  0x8a   :  { %327 = sst [smem:[#allocation46 + $0x1]] %s9151_s8  ;;  %s9155_s9 = smov [#allocation13]  }
  0x8b   :  { %329 = sst [smem:[#allocation46 + $0x2]] %s10839_s22  ;;  %s356_s29 = sshll.u32 %s9155_s9, 4  ;;  %s357_s29 = int_to_ptr.vmem [resolvable:$true] %s356_s29 }
  0x8c   :  { %331 = sst [smem:[#allocation46 + $0x3]] %s9120_s2  ;;  %s9163_s7 = smov [#allocation51]  }
  0x8d   :  { %333 = sst [smem:[#allocation46 + $0x4]] %s9121_s24 }
  0x8e   :  { %335 = sst [smem:[#allocation46 + $0x5]] %s10838_s25 }
  0x8f   :  { %337 = sst [smem:[#allocation46 + $0x6]] %s10840_s20 }
  0x90   :  { %339 = sst [smem:[#allocation46 + $0x7]] %s9120_s2 }
  0x91   :  { %341 = sst [smem:[#allocation46 + $0x8]] %s10839_s22 }
  0x92   :  { %343 = dma.general %s10807_s11, 4096, %s322_s3, %s9153_s10, %s9154_s28, [#allocation46], %s9296_s21, 0  }
  0x93   :  { %360 = sst [smem:[#allocation48]] %s9145_s4  ;;  %s9156_s11 = smov [#allocation20 + $0xb]  }
  0x94   :  { %362 = sst [smem:[#allocation48 + $0x1]] %s9145_s4  ;;  %s9161_s28 = smov [#allocation15]  }
  0x95   :  { %364 = sst [smem:[#allocation48 + $0x2]] %s9147_s26  ;;  %s9158_s26 = smov [#allocation14]  }
  0x96   :  { %366 = sst [smem:[#allocation48 + $0x3]] %s9120_s2  ;;  %s391_s6 = sshll.u32 %s9158_s26, 4  ;;  %s392_s6 = int_to_ptr.vmem [resolvable:$true] %s391_s6 }
  0x97   :  { %368 = sst [smem:[#allocation48 + $0x4]] %s9121_s24  ;;  %s426_s0 = sshll.u32 %s9161_s28, 4  ;;  %s427_s0 = int_to_ptr.vmem [resolvable:$true] %s426_s0 }
  0x98   :  { %370 = sst [smem:[#allocation48 + $0x5]] %s10838_s25  ;;  %s9166_s4 = smov [#allocation53]  }
  0x99   :  { %372 = sst [smem:[#allocation48 + $0x6]] %s9148_s27  ;;  %s9160_s27 = smov [#allocation49]  }
  0x9a   :  { %374 = sst [smem:[#allocation48 + $0x7]] %s9120_s2  ;;  %s9170_s28 = smov [#allocation18]  }
  0x9b   :  { %376 = sst [smem:[#allocation48 + $0x8]] %s10839_s22 }
  0x9c   :  { %378 = dma.general %s10808_s12, 40960, %s357_s29, %s9156_s11, %s9157_s16, [#allocation48], %s9296_s21, 0  }
  0x9d   :  { %395 = sst [smem:[#allocation50]] %s9151_s8  ;;  %s9159_s12 = smov [#allocation20 + $0xc]  }
  0x9e   :  { %397 = sst [smem:[#allocation50 + $0x1]] %s9151_s8  ;;  %s9164_s11 = smov [#allocation16]  }
  0x9f   :  { %399 = sst [smem:[#allocation50 + $0x2]] %s10839_s22  ;;  %s461_s16 = sshll.u32 %s9164_s11, 4  ;;  %s462_s16 = int_to_ptr.vmem [resolvable:$true] %s461_s16 }
  0xa0   :  { %401 = sst [smem:[#allocation50 + $0x3]] %s9120_s2 }
  0xa1   :  { %403 = sst [smem:[#allocation50 + $0x4]] %s9121_s24 }
  0xa2   :  { %405 = sst [smem:[#allocation50 + $0x5]] %s10838_s25 }
  0xa3   :  { %407 = sst [smem:[#allocation50 + $0x6]] %s10840_s20 }
  0xa4   :  { %409 = sst [smem:[#allocation50 + $0x7]] %s9120_s2 }
  0xa5   :  { %411 = sst [smem:[#allocation50 + $0x8]] %s10839_s22 }
  0xa6   :  { %413 = dma.general %s10809_s13, 16384, %s392_s6, %s9159_s12, %s9160_s27, [#allocation50], %s9296_s21, 0  }
  0xa7   :  { %430 = sst [smem:[#allocation52]] %s9151_s8  ;;  %s9162_s13 = smov [#allocation20 + $0xd]  }
  0xa8   :  { %432 = sst [smem:[#allocation52 + $0x1]] %s9151_s8  ;;  %s9167_s6 = smov [#allocation17]  }
  0xa9   :  { %434 = sst [smem:[#allocation52 + $0x2]] %s10839_s22  ;;  %s496_s12 = sshll.u32 %s9167_s6, 4  ;;  %s497_s12 = int_to_ptr.vmem [resolvable:$true] %s496_s12 }
  0xaa   :  { %436 = sst [smem:[#allocation52 + $0x3]] %s9120_s2  ;;  %s9169_s27 = smov [#allocation55]  }
  0xab   :  { %438 = sst [smem:[#allocation52 + $0x4]] %s9121_s24 }
  0xac   :  { %440 = sst [smem:[#allocation52 + $0x5]] %s10838_s25 }
  0xad   :  { %442 = sst [smem:[#allocation52 + $0x6]] %s10840_s20 }
  0xae   :  { %444 = sst [smem:[#allocation52 + $0x7]] %s9120_s2 }
  0xaf   :  { %446 = sst [smem:[#allocation52 + $0x8]] %s10839_s22 }
  0xb0   :  { %448 = dma.general %s10810_s14, 32768, %s427_s0, %s9162_s13, %s9163_s7, [#allocation52], %s9296_s21, 0  }
  0xb1   :  { %465 = sst [smem:[#allocation54]] %s10841_s23  ;;  %s9165_s14 = smov [#allocation20 + $0xe]  }
  0xb2   :  { %467 = sst [smem:[#allocation54 + $0x1]] %s10841_s23  ;;  %s531_s0 = sshll.u32 %s9170_s28, 4  ;;  %s532_s0 = int_to_ptr.vmem [resolvable:$true] %s531_s0 }
  0xb3   :  { %469 = sst [smem:[#allocation54 + $0x2]] %s10842_s30 }
  0xb4   :  { %471 = sst [smem:[#allocation54 + $0x3]] %s9120_s2 }
  0xb5   :  { %473 = sst [smem:[#allocation54 + $0x4]] %s9121_s24 }
  0xb6   :  { %475 = sst [smem:[#allocation54 + $0x5]] %s10838_s25 }
  0xb7   :  { %477 = sst [smem:[#allocation54 + $0x6]] %s10843_s1 }
  0xb8   :  { %479 = sst [smem:[#allocation54 + $0x7]] %s9120_s2 }
  0xb9   :  { %481 = sst [smem:[#allocation54 + $0x8]] %s10839_s22 }
  0xba   :  { %483 = dma.general %s10811_s15, 3072, %s462_s16, %s9165_s14, %s9166_s4, [#allocation54], %s9296_s21, 0  }
  0xbb   :  { %500 = sst [smem:[#allocation56]] %s9151_s8  ;;  %s9168_s15 = smov [#allocation20 + $0xf]  }
  0xbc   :  { %502 = sst [smem:[#allocation56 + $0x1]] %s9151_s8  ;;  %s10844_s10 = sld [smem:[#allocation84_spill]] }
  0xbd   :  { %504 = sst [smem:[#allocation56 + $0x2]] %s10839_s22 }
  0xbe   :  { %506 = sst [smem:[#allocation56 + $0x3]] %s9120_s2 }
  0xbf   :  { %508 = sst [smem:[#allocation56 + $0x4]] %s9121_s24 }
  0xc0   :  { %510 = sst [smem:[#allocation56 + $0x5]] %s10838_s25 }
  0xc1   :  { %512 = sst [smem:[#allocation56 + $0x6]] %s10840_s20  ;;  %s9172_s20 = smov [#allocation20 + $0x10]  }
  0xc2   :  { %514 = sst [smem:[#allocation56 + $0x7]] %s9120_s2 }
  0xc3   :  { %516 = sst [smem:[#allocation56 + $0x8]] %s10839_s22 }
  0xc4   :  { %518 = dma.general %s10844_s10, 24576, %s497_s12, %s9168_s15, %s9169_s27, [#allocation56], %s9296_s21, 0  }
  0xc5   :  { %535 = sst [smem:[#allocation58]] %s10841_s23 }
  0xc6   :  { %537 = sst [smem:[#allocation58 + $0x1]] %s10841_s23  ;;  %s9173_s23 = smov [#allocation57]  }
  0xc7   :  { %539 = sst [smem:[#allocation58 + $0x2]] %s10842_s30 }
  0xc8   :  { %541 = sst [smem:[#allocation58 + $0x3]] %s9120_s2 }
  0xc9   :  { %543 = sst [smem:[#allocation58 + $0x4]] %s9121_s24 }
  0xca   :  { %545 = sst [smem:[#allocation58 + $0x5]] %s10838_s25 }
  0xcb   :  { %547 = sst [smem:[#allocation58 + $0x6]] %s10843_s1  ;;  %s9034_s1 = scalar_lea.hbm %s10814_s18, 3072 }
  0xcc   :  { %549 = sst [smem:[#allocation58 + $0x7]] %s9120_s2  ;;  %p9035_p10 = scmp.ne.s32.totalorder %s10814_s18, %s9034_s1 }
  0xcd   :  { %551 = sst [smem:[#allocation58 + $0x8]] %s10839_s22  ;;  %p9038_p11 = scmp.lt.u32.totalorder %s9034_s1, %s10814_s18 }
  0xce   :  { %553 = dma.general %s10813_s17, 24576, %s532_s0, %s9172_s20, %s9173_s23, [#allocation58], %s9296_s21, 0  }
  0xcf   :  { %s10845_s7 = sld [smem:[#allocation80_spill]]  ;;  %s9174_s17 = smov [#allocation19]  }
  0xd0   :  { %s562_s21 = sshll.u32 %s9174_s17, 4  ;;  %p9040_p12 = pnand %p9038_p11, %p9035_p10  ;;  %s563_s21 = int_to_ptr.vmem [resolvable:$true] %s562_s21 }
  0xd5   :  { %v9512_v6 = vld [vmem:[%s10845_s7] sm:$0xff] }
  0xd6   :  { %v575_v7 = vrot.slane %v9512_v6, %v574_v5  ;;  %v568_v9 = vcombine.high %v9512_v6, %v9512_v6 }
  0xd8   :  { %v591_v10 = vrot.slane %v575_v7, %v574_v5  ;;  %v583_v11 = vcombine.high %v575_v7, %v575_v7  ;;  %v582_v12 = vrot.slane %v568_v9, %v574_v5 }
  0xda   :  { %v620_v13 = vrot.slane %v591_v10, %v619_v8  ;;  %v613_v14 = vcombine.high %v591_v10, %v591_v10  ;;  %v605_v15 = vrot.slane %v583_v11, %v574_v5  ;;  %v598_v16 = vrot.slane %v582_v12, %v574_v5 }
  0xdb   :  { %v584_v17 = vcombine.high %v582_v12, %v582_v12 }
  0xdc   :  { %v657_v18 = vsub.f32 %v620_v13, %v9512_v6  ;;  %v628_v19 = vrot.slane %v613_v14, %v619_v8  ;;  %v624_v20 = vrot.slane %v605_v15, %v619_v8  ;;  %v615_v21 = vcombine.high %v605_v15, %v605_v15 }
  0xdd   :  { %v636_v22 = vrot.slane %v598_v16, %v619_v8  ;;  %v612_v23 = vrot.slane %v584_v17, %v574_v5  ;;  %v614_v24 = vcombine.high %v598_v16, %v598_v16 }
  0xde   :  { %v665_v25 = vmul.f32 %v657_v18, %v657_v18  ;;  %v659_v26 = vsub.f32 %v628_v19, %v9512_v6  ;;  %v658_v27 = vsub.f32 %v624_v20, %v9512_v6  ;;  %v632_v28 = vrot.slane %v615_v21, %v619_v8 }
  0xdf   :  { %v661_v29 = vsub.f32 %v636_v22, %v9512_v6  ;;  %v640_v30 = vrot.slane %v612_v23, %v619_v8  ;;  %v616_v31 = vcombine.high %v612_v23, %v612_v23  ;;  %v644_v35 = vrot.slane %v614_v24, %v619_v8 }
  0xe0   :  { %673 = vadd.xlane.f32.xlu0 %v665_v25  ;;  %v667_v32 = vmul.f32 %v659_v26, %v659_v26  ;;  %v666_v33 = vmul.f32 %v658_v27, %v658_v27  ;;  %v660_v34 = vsub.f32 %v632_v28, %v9512_v6 }
  0xe1   :  { %v662_v37 = vsub.f32 %v640_v30, %v9512_v6  ;;  %v648_v38 = vrot.slane %v616_v31, %v619_v8  ;;  %v669_v39 = vmul.f32 %v661_v29, %v661_v29  ;;  %v663_v40 = vsub.f32 %v644_v35, %v9512_v6 }
  0xe2   :  { %677 = vadd.xlane.f32.xlu1 %v667_v32  ;;  %v668_v36 = vmul.f32 %v660_v34, %v660_v34 }
  0xe3   :  { %v670_v41 = vmul.f32 %v662_v37, %v662_v37  ;;  %v664_v42 = vsub.f32 %v648_v38, %v9512_v6  ;;  %v671_v43 = vmul.f32 %v663_v40, %v663_v40 }
  0xe4   :  { %675 = vadd.xlane.f32.xlu0 %v666_v33 }
  0xe5   :  { %v672_v44 = vmul.f32 %v664_v42, %v664_v42 }
  0xe6   :  { %679 = vadd.xlane.f32.xlu1 %v668_v36 }
  0xe8   :  { %681 = vadd.xlane.f32.xlu0 %v669_v39 }
  0xea   :  { %683 = vadd.xlane.f32.xlu1 %v670_v41 }
  0xec   :  { %685 = vadd.xlane.f32.xlu0 %v671_v43 }
  0xee   :  { %687 = vadd.xlane.f32.xlu1 %v672_v44 }
  0xef   :  { %9043 = shalt.err (!%p9040_p12)  }
  0xf0   :  { %s9044_s14 = scalar_lea.vmem %s563_s21, 3072  ;;  %p9049_p0 = scmp.lt.s32.totalorder %s563_s21, %s563_s21 }
  0xf1   :  { %p9045_p13 = scmp.ne.s32.totalorder %s563_s21, %s9044_s14  ;;  %p9050_p1 = scmp.lt.s32.totalorder %s9044_s14, %s9044_s14 }
  0xf3   :  { %p9051_p2 = por %p9050_p1, %p9049_p0 }
  0xf5   :  { %p9052_p3 = pnand %p9051_p2, %p9045_p13 }
  0xf7   :  { %9055 = shalt.err (!%p9052_p3)  }
  0xf8   :  { %565 = dma.hbm_to_vmem [thread:$0]  %s10814_s18, 3072, %s563_s21, [#allocation20 + $0x11] }
 0x16d   :  { %v674_v45 = vpop.xlane.xlu0 %673 }
 0x16e   :  { %v689_v46 = vadd.f32 1e-12, %v674_v45 }
 0x16f   :  { %v678_v47 = vpop.xlane.xlu1 %677 }
 0x170   :  { %8854 = vrsqrt.f32 %v689_v46  ;;  %v691_v48 = vadd.f32 1e-12, %v678_v47  ;;  %vm699_vm0 = vcmp.eq.f32.partialorder %v689_v46, inf  ;;  %vm701_vm1 = vcmp.eq.f32.partialorder %v689_v46, 0.0 }
 0x171   :  { %v676_v49 = vpop.xlane.xlu0 %675  ;;  %v702_v59 = vand.u32 2147483648, %v689_v46 }
 0x172   :  { %v690_v50 = vadd.f32 1e-12, %v676_v49  ;;  %8856 = vrsqrt.f32 %v691_v48  ;;  %vm713_vm2 = vcmp.eq.f32.partialorder %v691_v48, inf  ;;  %vm715_vm3 = vcmp.eq.f32.partialorder %v691_v48, 0.0 }
 0x173   :  { %v680_v51 = vpop.xlane.xlu1 %679  ;;  %v716_v62 = vand.u32 2147483648, %v691_v48 }
 0x174   :  { %8858 = vrsqrt.f32 %v690_v50  ;;  %v9538_v53 = vadd.f32 1e-12, %v680_v51  ;;  %vm706_vm4 = vcmp.eq.f32.partialorder %v690_v50, inf  ;;  %vm708_vm5 = vcmp.eq.f32.partialorder %v690_v50, 0.0 }
 0x175   :  { %v682_v52 = vpop.xlane.xlu0 %681  ;;  %v709_v0 = vand.u32 2147483648, %v690_v50 }
 0x176   :  { %v9540_v55 = vadd.f32 1e-12, %v682_v52  ;;  %8860 = vrsqrt.f32 %v9538_v53  ;;  %v723_v5 = vand.u32 2147483648, %v9538_v53  ;;  %vm720_vm6 = vcmp.eq.f32.partialorder %v9538_v53, inf }
 0x177   :  { %v684_v54 = vpop.xlane.xlu1 %683  ;;  %vm722_vm7 = vcmp.eq.f32.partialorder %v9538_v53, 0.0 }
 0x178   :  { %v9542_v56 = vadd.f32 1e-12, %v684_v54  ;;  %8862 = vrsqrt.f32 %v9540_v55  ;;  %v730_v11 = vand.u32 2147483648, %v9540_v55  ;;  %vm727_vm8 = vcmp.eq.f32.partialorder %v9540_v55, inf }
 0x179   :  { %v686_v57 = vpop.xlane.xlu0 %685  ;;  %vm729_vm9 = vcmp.eq.f32.partialorder %v9540_v55, 0.0 }
 0x17a   :  { %v8855_v58 = vpop.eup %8854  ;;  %v9544_v60 = vadd.f32 1e-12, %v686_v57  ;;  %8864 = vrsqrt.f32 %v9542_v56  ;;  %v737_v17 = vand.u32 2147483648, %v9542_v56  ;;  %vm734_vm10 = vcmp.eq.f32.partialorder %v9542_v56, inf }
 0x17b   :  { %v698_v61 = vmul.f32 %v8855_v58, %v689_v46  ;;  %v688_v63 = vpop.xlane.xlu1 %687  ;;  %vm736_vm11 = vcmp.eq.f32.partialorder %v9542_v56, 0.0 }
 0x17c   :  { %v8857_v1 = vpop.eup %8856  ;;  %v9551_v7 = vadd.f32 1e-12, %v688_v63  ;;  %8866 = vrsqrt.f32 %v9544_v60  ;;  %v744_v18 = vand.u32 2147483648, %v9544_v60  ;;  %vm741_vm12 = vcmp.eq.f32.partialorder %v9544_v60, inf }
 0x17d   :  { %v700_v3 = vsel %vm699_vm0, %v689_v46, %v698_v61  ;;  %v712_v10 = vmul.f32 %v8857_v1, %v691_v48  ;;  %vm743_vm13 = vcmp.eq.f32.partialorder %v9544_v60, 0.0  ;;  %vm1055_vm0 = vcmask 1043456  }
 0x17e   :  { %v8859_v8 = vpop.eup %8858  ;;  %v703_v9 = vsel %vm701_vm1, %v702_v59, %v700_v3  ;;  %8868 = vrsqrt.f32 %v9551_v7  ;;  %vm748_vm14 = vcmp.eq.f32.partialorder %v9551_v7, inf  ;;  %vm750_vm15 = vcmp.eq.f32.partialorder %v9551_v7, 0.0 }
 0x17f   :  { %v753_v12 = vmul.f32 %v703_v9, %v703_v9  ;;  %v7873_v13 = vadd.f32 -1.0, %v703_v9  ;;  %v7881_v14 = vadd.f32 -10.0, %v703_v9  ;;  %v705_v15 = vmul.f32 %v8859_v8, %v690_v50 }
 0x180   :  { %v714_v16 = vsel %vm713_vm2, %v691_v48, %v712_v10  ;;  %v8861_v35 = vpop.eup %8860 }
 0x181   :  { %v761_v19 = vsub.f32 0.0, %v753_v12  ;;  %v819_v20 = vmul.f32 %v7873_v13, %v7873_v13  ;;  %v924_v21 = vmul.f32 %v7881_v14, %v7881_v14  ;;  %v717_v22 = vsel %vm715_vm3, %v716_v62, %v714_v16 }
 0x182   :  { %v755_v23 = vmul.f32 %v717_v22, %v717_v22  ;;  %v7875_v24 = vadd.f32 -1.0, %v717_v22  ;;  %v7883_v25 = vadd.f32 -10.0, %v717_v22  ;;  %v707_v26 = vsel %vm706_vm4, %v690_v50, %v705_v15  ;;  %v8863_v40 = vpop.eup %8862 }
 0x183   :  { %v770_v27 = vmul.f32 2.0, %v761_v19  ;;  %v827_v28 = vsub.f32 0.0, %v819_v20  ;;  %v876_v29 = vmul.f32 0.02, %v761_v19  ;;  %v932_v30 = vsub.f32 0.0, %v924_v21 }
 0x184   :  { %v763_v31 = vsub.f32 0.0, %v755_v23  ;;  %v821_v32 = vmul.f32 %v7875_v24, %v7875_v24  ;;  %v926_v33 = vmul.f32 %v7883_v25, %v7883_v25  ;;  %v710_v34 = vsel %vm708_vm5, %v709_v0, %v707_v26  ;;  %v8865_v45 = vpop.eup %8864 }
 0x185   :  { %v778_v36 = vmul.f32 1.442695, %v770_v27  ;;  %v835_v37 = vmul.f32 2.0, %v827_v28  ;;  %v884_v38 = vmul.f32 1.442695, %v876_v29  ;;  %v754_v39 = vmul.f32 %v710_v34, %v710_v34 }
 0x186   :  { %v940_v41 = vmul.f32 0.02, %v932_v30  ;;  %v772_v42 = vmul.f32 2.0, %v763_v31  ;;  %v829_v43 = vsub.f32 0.0, %v821_v32  ;;  %v878_v44 = vmul.f32 0.02, %v763_v31  ;;  %v8867_v49 = vpop.eup %8866 }
 0x187   :  { %8870 = vpow2.f32 %v778_v36  ;;  %v843_v46 = vmul.f32 1.442695, %v835_v37  ;;  %v934_v47 = vsub.f32 0.0, %v926_v33  ;;  %v762_v48 = vsub.f32 0.0, %v754_v39 }
 0x188   :  { %8872 = vpow2.f32 %v884_v38  ;;  %v948_v50 = vmul.f32 1.442695, %v940_v41  ;;  %v782_v51 = vmul.f32 1.442695, %v772_v42  ;;  %v837_v52 = vmul.f32 2.0, %v829_v43  ;;  %v9568_v59 = vpop.eup %8868 }
 0x189   :  { %8874 = vpow2.f32 %v843_v46  ;;  %v888_v54 = vmul.f32 1.442695, %v878_v44  ;;  %v942_v57 = vmul.f32 0.02, %v934_v47  ;;  %v771_v58 = vmul.f32 2.0, %v762_v48 }
 0x18a   :  { %8876 = vpow2.f32 %v948_v50  ;;  %v847_v61 = vmul.f32 1.442695, %v837_v52  ;;  %v7874_v62 = vadd.f32 -1.0, %v710_v34  ;;  %v877_v63 = vmul.f32 0.02, %v762_v48 }
 0x18b   :  { %8878 = vpow2.f32 %v782_v51  ;;  %v952_v0 = vmul.f32 1.442695, %v942_v57  ;;  %v780_v1 = vmul.f32 1.442695, %v771_v58  ;;  %v7882_v3 = vadd.f32 -10.0, %v710_v34 }
 0x18c   :  { %8880 = vpow2.f32 %v847_v61  ;;  %v820_v8 = vmul.f32 %v7874_v62, %v7874_v62  ;;  %v886_v9 = vmul.f32 1.442695, %v877_v63  ;;  %v719_v10 = vmul.f32 %v8861_v35, %v9538_v53 }
 0x18d   :  { %8882 = vpow2.f32 %v888_v54  ;;  %v925_v12 = vmul.f32 %v7882_v3, %v7882_v3  ;;  %v726_v13 = vmul.f32 %v8863_v40, %v9540_v55  ;;  %v733_v14 = vmul.f32 %v8865_v45, %v9542_v56 }
 0x18e   :  { %8884 = vpow2.f32 %v952_v0  ;;  %v828_v15 = vsub.f32 0.0, %v820_v8  ;;  %v721_v16 = vsel %vm720_vm6, %v9538_v53, %v719_v10  ;;  %v9577_v19 = vmul.f32 %v8867_v49, %v9544_v60 }
 0x18f   :  { %8886 = vpow2.f32 %v780_v1  ;;  %v933_v20 = vsub.f32 0.0, %v925_v12  ;;  %v724_v21 = vsel %vm722_vm7, %v723_v5, %v721_v16  ;;  %v728_v22 = vsel %vm727_vm8, %v9540_v55, %v726_v13 }
 0x190   :  { %v836_v23 = vmul.f32 2.0, %v828_v15  ;;  %8888 = vpow2.f32 %v886_v9  ;;  %v756_v24 = vmul.f32 %v724_v21, %v724_v21  ;;  %v7876_v25 = vadd.f32 -1.0, %v724_v21 }
 0x191   :  { %v8871_v26 = vpop.eup %8870  ;;  %v941_v27 = vmul.f32 0.02, %v933_v20  ;;  %v7884_v28 = vadd.f32 -10.0, %v724_v21  ;;  %v731_v29 = vsel %vm729_vm9, %v730_v11, %v728_v22  ;;  %v735_v53 = vsel %vm734_vm10, %v9542_v56, %v733_v14 }
 0x192   :  { %v8873_v5 = vpop.eup %8872  ;;  %v9593_v30 = vmul.f32 0.125, %v8871_v26  ;;  %v845_v31 = vmul.f32 1.442695, %v836_v23  ;;  %v764_v32 = vsub.f32 0.0, %v756_v24  ;;  %v822_v33 = vmul.f32 %v7876_v25, %v7876_v25 }
 0x193   :  { %v8875_v34 = vpop.eup %8874  ;;  %v9595_v35 = vmul.f32 0.125, %v8873_v5  ;;  %v950_v36 = vmul.f32 1.442695, %v941_v27  ;;  %v927_v37 = vmul.f32 %v7884_v28, %v7884_v28  ;;  %v757_v38 = vmul.f32 %v731_v29, %v731_v29 }
 0x194   :  { %v8877_v39 = vpop.eup %8876  ;;  %v803_v55 = vpack.c.bf16 %v9593_v30, %v9593_v30  ;;  %v9599_v11 = vmul.f32 0.125, %v8875_v34  ;;  %8890 = vpow2.f32 %v845_v31  ;;  %v773_v40 = vmul.f32 2.0, %v764_v32 }
 0x195   :  { %v8879_v41 = vpop.eup %8878  ;;  %v908_v42 = vpack.c.bf16 %v9595_v35, %v9595_v35  ;;  %v9604_v43 = vmul.f32 0.125, %v8877_v39  ;;  %8892 = vpow2.f32 %v950_v36  ;;  %v830_v44 = vsub.f32 0.0, %v822_v33 }
 0x196   :  { %v8881_v45 = vpop.eup %8880  ;;  %v867_v46 = vpack.c.bf16 %v9599_v11, %v9599_v11  ;;  %v9608_v47 = vmul.f32 0.125, %v8879_v41  ;;  %v784_v48 = vmul.f32 1.442695, %v773_v40  ;;  %v879_v49 = vmul.f32 0.02, %v764_v32 }
 0x197   :  { %v8883_v50 = vpop.eup %8882  ;;  %v972_v51 = vpack.c.bf16 %v9604_v43, %v9604_v43  ;;  %v9612_v52 = vmul.f32 0.125, %v8881_v45  ;;  %v838_v54 = vmul.f32 2.0, %v830_v44  ;;  %v935_v57 = vsub.f32 0.0, %v927_v37 }
 0x198   :  { %v8885_v58 = vpop.eup %8884  ;;  %v805_v61 = vpack.c.bf16 %v9608_v47, %v9608_v47  ;;  %v9616_v62 = vmul.f32 0.125, %v8883_v50  ;;  %8894 = vpow2.f32 %v784_v48  ;;  %v890_v63 = vmul.f32 1.442695, %v879_v49 }
 0x199   :  { %v8887_v0 = vpop.eup %8886  ;;  %v869_v1 = vpack.c.bf16 %v9612_v52, %v9612_v52  ;;  %v9620_v3 = vmul.f32 0.125, %v8885_v58  ;;  %v849_v8 = vmul.f32 1.442695, %v838_v54  ;;  %v943_v9 = vmul.f32 0.02, %v935_v57 }
 0x19a   :  { %v8889_v10 = vpop.eup %8888  ;;  %v910_v12 = vpack.c.bf16 %v9616_v62, %v9616_v62  ;;  %v9624_v13 = vmul.f32 0.125, %v8887_v0  ;;  %8896 = vpow2.f32 %v890_v63  ;;  %v765_v14 = vsub.f32 0.0, %v757_v38 }
 0x19b   :  { %v974_v15 = vpack.c.bf16 %v9620_v3, %v9620_v3  ;;  %v9628_v16 = vmul.f32 0.125, %v8889_v10  ;;  %8898 = vpow2.f32 %v849_v8  ;;  %v954_v20 = vmul.f32 1.442695, %v943_v9 }
 0x19c   :  { %v804_v21 = vpack.c.bf16 %v9624_v13, %v9624_v13  ;;  %v774_v22 = vmul.f32 2.0, %v765_v14  ;;  %v7877_v23 = vadd.f32 -1.0, %v731_v29  ;;  %v880_v24 = vmul.f32 0.02, %v765_v14 }
 0x19d   :  { %v909_v25 = vpack.c.bf16 %v9628_v16, %v9628_v16  ;;  %8900 = vpow2.f32 %v954_v20  ;;  %v7885_v26 = vadd.f32 -10.0, %v731_v29  ;;  %v738_v27 = vsel %vm736_vm11, %v737_v17, %v735_v53 }
 0x19e   :  { %v8891_v28 = vpop.eup %8890  ;;  %v786_v5 = vmul.f32 1.442695, %v774_v22  ;;  %v823_v31 = vmul.f32 %v7877_v23, %v7877_v23  ;;  %v892_v32 = vmul.f32 1.442695, %v880_v24  ;;  %v758_v33 = vmul.f32 %v738_v27, %v738_v27 }
 0x19f   :  { %v8893_v34 = vpop.eup %8892  ;;  %v9640_v36 = vmul.f32 0.125, %v8891_v28  ;;  %v928_v37 = vmul.f32 %v7885_v26, %v7885_v26  ;;  %v7878_v38 = vadd.f32 -1.0, %v738_v27  ;;  %v7886_v39 = vadd.f32 -10.0, %v738_v27 }
 0x1a0   :  { %v9642_v40 = vmul.f32 0.125, %v8893_v34  ;;  %8902 = vpow2.f32 %v786_v5  ;;  %v831_v29 = vsub.f32 0.0, %v823_v31  ;;  %v766_v41 = vsub.f32 0.0, %v758_v33 }
 0x1a1   :  { %v868_v56 = vpack.c.bf16 %v9640_v36, %v9640_v36  ;;  %8904 = vpow2.f32 %v892_v32  ;;  %v936_v17 = vsub.f32 0.0, %v928_v37  ;;  %v824_v53 = vmul.f32 %v7878_v38, %v7878_v38 }
 0x1a2   :  { %v8895_v44 = vpop.eup %8894  ;;  %v973_v45 = vpack.c.bf16 %v9642_v40, %v9642_v40  ;;  %v839_v48 = vmul.f32 2.0, %v831_v29  ;;  %v775_v49 = vmul.f32 2.0, %v766_v41  ;;  %v881_v50 = vmul.f32 0.02, %v766_v41 }
 0x1a3   :  { %v9648_v54 = vmul.f32 0.125, %v8895_v44  ;;  %v944_v57 = vmul.f32 0.02, %v936_v17  ;;  %v832_v58 = vsub.f32 0.0, %v824_v53  ;;  %v929_v63 = vmul.f32 %v7886_v39, %v7886_v39 }
 0x1a4   :  { %v8897_v0 = vpop.eup %8896  ;;  %v851_v8 = vmul.f32 1.442695, %v839_v48  ;;  %v788_v9 = vmul.f32 1.442695, %v775_v49  ;;  %v894_v10 = vmul.f32 1.442695, %v881_v50  ;;  %v742_v14 = vsel %vm741_vm12, %v9544_v60, %v9577_v19 }
 0x1a5   :  { %v8899_v20 = vpop.eup %8898  ;;  %v806_v22 = vpack.c.bf16 %v9648_v54, %v9648_v54  ;;  %v9657_v23 = vmul.f32 0.125, %v8897_v0  ;;  %v956_v24 = vmul.f32 1.442695, %v944_v57  ;;  %v840_v26 = vmul.f32 2.0, %v832_v58 }
 0x1a6   :  { %v9659_v27 = vmul.f32 0.125, %v8899_v20  ;;  %8906 = vpow2.f32 %v851_v8  ;;  %v937_v28 = vsub.f32 0.0, %v929_v63  ;;  %v745_v5 = vsel %vm743_vm13, %v744_v18, %v742_v14 }
 0x1a7   :  { %v8901_v31 = vpop.eup %8900  ;;  %v911_v19 = vpack.c.bf16 %v9657_v23, %v9657_v23  ;;  %8908 = vpow2.f32 %v956_v24  ;;  %v853_v32 = vmul.f32 1.442695, %v840_v26  ;;  %v759_v33 = vmul.f32 %v745_v5, %v745_v5 }
 0x1a8   :  { %v870_v34 = vpack.c.bf16 %v9659_v27, %v9659_v27  ;;  %v9669_v37 = vmul.f32 0.125, %v8901_v31  ;;  %8910 = vpow2.f32 %v788_v9  ;;  %v945_v38 = vmul.f32 0.02, %v937_v28 }
 0x1a9   :  { %8912 = vpow2.f32 %v853_v32  ;;  %v767_v39 = vsub.f32 0.0, %v759_v33  ;;  %v7879_v29 = vadd.f32 -1.0, %v745_v5  ;;  %v7887_v41 = vadd.f32 -10.0, %v745_v5 }
 0x1aa   :  { %v8903_v60 = vpop.eup %8902  ;;  %8914 = vpow2.f32 %v894_v10  ;;  %v958_v17 = vmul.f32 1.442695, %v945_v38  ;;  %v747_v53 = vmul.f32 %v9568_v59, %v9551_v7  ;;  %v751_v24 = vand.u32 2147483648, %v9551_v7 }
 0x1ab   :  { %v8905_v44 = vpop.eup %8904  ;;  %v9675_v48 = vmul.f32 0.125, %v8903_v60  ;;  %v776_v49 = vmul.f32 2.0, %v767_v39  ;;  %v825_v50 = vmul.f32 %v7879_v29, %v7879_v29  ;;  %v882_v57 = vmul.f32 0.02, %v767_v39 }
 0x1ac   :  { %v9677_v58 = vmul.f32 0.125, %v8905_v44  ;;  %8916 = vpow2.f32 %v958_v17  ;;  %v930_v63 = vmul.f32 %v7887_v41, %v7887_v41  ;;  %v749_v0 = vsel %vm748_vm14, %v9551_v7, %v747_v53 }
 0x1ad   :  { %v807_v8 = vpack.c.bf16 %v9675_v48, %v9675_v48  ;;  %v790_v9 = vmul.f32 1.442695, %v776_v49  ;;  %v833_v10 = vsub.f32 0.0, %v825_v50  ;;  %v896_v59 = vmul.f32 1.442695, %v882_v57 }
 0x1ae   :  { %v912_v14 = vpack.c.bf16 %v9677_v58, %v9677_v58  ;;  %v938_v20 = vsub.f32 0.0, %v930_v63  ;;  %v752_v31 = vsel %vm750_vm15, %v751_v24, %v749_v0 }
 0x1af   :  { %8918 = vpow2.f32 %v790_v9  ;;  %v841_v26 = vmul.f32 2.0, %v833_v10  ;;  %v760_v39 = vmul.f32 %v752_v31, %v752_v31  ;;  %v7880_v29 = vadd.f32 -1.0, %v752_v31 }
 0x1b0   :  { %v8907_v28 = vpop.eup %8906  ;;  %8920 = vpow2.f32 %v896_v59  ;;  %v946_v5 = vmul.f32 0.02, %v938_v20  ;;  %v7888_v53 = vadd.f32 -10.0, %v752_v31 }
 0x1b1   :  { %v8909_v32 = vpop.eup %8908  ;;  %v9688_v33 = vmul.f32 0.125, %v8907_v28  ;;  %v855_v38 = vmul.f32 1.442695, %v841_v26  ;;  %v768_v50 = vsub.f32 0.0, %v760_v39  ;;  %v826_v9 = vmul.f32 %v7880_v29, %v7880_v29 }
 0x1b2   :  { %v8911_v41 = vpop.eup %8910  ;;  %v9690_v60 = vmul.f32 0.125, %v8909_v32  ;;  %v960_v17 = vmul.f32 1.442695, %v946_v5  ;;  %v931_v31 = vmul.f32 %v7888_v53, %v7888_v53 }
 0x1b3   :  { %v8913_v44 = vpop.eup %8912  ;;  %v871_v49 = vpack.c.bf16 %v9688_v33, %v9688_v33  ;;  %v9694_v7 = vmul.f32 0.125, %v8911_v41  ;;  %8922 = vpow2.f32 %v855_v38  ;;  %v777_v20 = vmul.f32 2.0, %v768_v50 }
 0x1b4   :  { %v8915_v57 = vpop.eup %8914  ;;  %v9698_v0 = vmul.f32 0.125, %v8913_v44  ;;  %8924 = vpow2.f32 %v960_v17  ;;  %v883_v24 = vmul.f32 0.02, %v768_v50  ;;  %v834_v5 = vsub.f32 0.0, %v826_v9 }
 0x1b5   :  { %v808_v10 = vpack.c.bf16 %v9694_v7, %v9694_v7  ;;  %v9702_v59 = vmul.f32 0.125, %v8915_v57  ;;  %v792_v39 = vmul.f32 1.442695, %v777_v20  ;;  %v939_v17 = vsub.f32 0.0, %v931_v31 }
 0x1b6   :  { %v8917_v26 = vpop.eup %8916  ;;  %v872_v28 = vpack.c.bf16 %v9698_v0, %v9698_v0  ;;  %v898_v29 = vmul.f32 1.442695, %v883_v24  ;;  %v842_v41 = vmul.f32 2.0, %v834_v5 }
 0x1b7   :  { %v9708_v38 = vmul.f32 0.125, %v8917_v26  ;;  %8926 = vpow2.f32 %v792_v39  ;;  %v947_v53 = vmul.f32 0.02, %v939_v17 }
 0x1b8   :  { %v857_v18 = vmul.f32 1.442695, %v842_v41  ;;  %8928 = vpow2.f32 %v898_v29 }
 0x1b9   :  { %v8919_v44 = vpop.eup %8918  ;;  %v962_v20 = vmul.f32 1.442695, %v947_v53 }
 0x1ba   :  { %v8921_v50 = vpop.eup %8920  ;;  %v9712_v63 = vmul.f32 0.125, %v8919_v44  ;;  %8930 = vpow2.f32 %v857_v18 }
 0x1bb   :  { %v9714_v9 = vmul.f32 0.125, %v8921_v50  ;;  %8932 = vpow2.f32 %v962_v20 }
 0x1bc   :  { %v809_v26 = vpack.c.bf16 %v9712_v63, %v9712_v63 }
 0x1bd   :  { %v8923_v24 = vpop.eup %8922 }
 0x1be   :  { %v8925_v31 = vpop.eup %8924  ;;  %v865_v57 = vmul.f32 0.125, %v8923_v24 }
 0x1bf   :  { %v9720_v39 = vmul.f32 0.125, %v8925_v31 }
 0x1c0   :  { %v873_v44 = vpack.c.bf16 %v865_v57, %v865_v57 }
 0x1c1   :  { %v8927_v41 = vpop.eup %8926 }
 0x1c2   :  { %v8929_v17 = vpop.eup %8928  ;;  %v9724_v50 = vmul.f32 0.125, %v8927_v41  ;;  %v985_v41 = vpack.c.bf16 %v9512_v6, %v9512_v6 }
 0x1c3   :  { %v9726_v32 = vmul.f32 0.125, %v8929_v17 }
 0x1c4   :  { %v8931_v18 = vpop.eup %8930  ;;  %v810_v53 = vpack.c.bf16 %v9724_v50, %v9724_v50 }
 0x1c5   :  { %v866_v5 = vmul.f32 0.125, %v8931_v18  ;;  %v915_v20 = vpack.c.bf16 %v9726_v32, %v9726_v32  ;;  %v8933_v24 = vpop.eup %8932 }
 0x1c6   :  { %v9732_v57 = vmul.f32 0.125, %v8933_v24 }
 0x1c7   :  { %v874_v31 = vpack.c.bf16 %v866_v5, %v866_v5 }
 0x1c8   :  { %v979_v29 = vpack.c.bf16 %v9732_v57, %v9732_v57 }
 0x1c9   :  { %9078 = dma.done.wait [#allocation20], 2048 }
 0x1ca   :  { %9079 = vsyncadd [#allocation20], 4294965248  ;;  %v9175_v17 = vmov 0.0   ;;  %vm9176_vm1 = vmmov 0   ;;  %v1003_v5 = vand.u32 127, %v572_v2  ;;  %vm1036_vm2 = vcmask 1041409  }
 0x1cb   :  { %8388 = vmatprep.subr.bf16.mxu1 %v9175_v17  ;;  %8390 = vmatprep.mubr.msk.bf16.mxu1 %vm9176_vm1, %v9175_v17  ;;  %v1057_v50 = vsel %vm1055_vm0, %v985_v41, 0  ;;  %vm1038_vm3 = vcmask 1042434   ;;  %vm1040_vm4 = vcmask 1043459   ;;  %vm1042_vm5 = vcmask 1044484  }
 0x1cc   :  { %8382 = vmatprep.subr.bf16.mxu0 %v9175_v17  ;;  %8384 = vmatprep.mubr.msk.bf16.mxu0 %vm9176_vm1, %v9175_v17  ;;  %v9747_v6 = vsub.s32 %v1003_v5, %v9506_v4  ;;  %vm1044_vm6 = vcmask 1045509   ;;  %vm1046_vm7 = vcmask 1046534   ;;  %v1108_v2 = vunpack.c.l.b16 %v867_v46 }
 0x1cd   :  { %8389 = vmatpush3.bf16.msra.mxu1 %v1057_v50  ;;  %8383 = vmatpush3.bf16.msra.mxu0 %v1057_v50  ;;  %v1109_v18 = vunpack.c.l.b16 %v868_v56  ;;  %v1110_v24 = vunpack.c.l.b16 %v869_v1  ;;  %v1111_v4 = vunpack.c.l.b16 %v870_v34  ;;  %v1112_v41 = vunpack.c.l.b16 %v871_v49 }
 0x1ce   :  { %8394 = vmatprep.subr.bf16.mxu0 %v9175_v17  ;;  %8434 = vmatprep.subr.bf16.mxu1 %v9175_v17  ;;  %v1113_v11 = vunpack.c.l.b16 %v872_v28  ;;  %v1114_v46 = vunpack.c.l.b16 %v873_v44  ;;  %v1115_v36 = vunpack.c.l.b16 %v874_v31  ;;  %v1119_v52 = vrot.slane %v1108_v2, %v9747_v6 }
 0x1cf   :  { %vm1048_vm8 = vcmask 1047559   ;;  %v1123_v1 = vrot.slane %v1109_v18, %v9747_v6  ;;  %v1127_v56 = vrot.slane %v1110_v24, %v9747_v6  ;;  %v1131_v27 = vrot.slane %v1111_v4, %v9747_v6 }
 0x1d0   :  { %v1135_v34 = vrot.slane %v1112_v41, %v9747_v6  ;;  %v1139_v33 = vrot.slane %v1113_v11, %v9747_v6  ;;  %v1143_v49 = vrot.slane %v1114_v46, %v9747_v6  ;;  %v994_v0 = vunpack.c.l.b16 %v803_v55 }
 0x1d1   :  { %v1148_v28 = vsel %vm1036_vm2, %v1123_v1, %v1119_v52  ;;  %v995_v44 = vunpack.c.l.b16 %v804_v21  ;;  %v996_v31 = vunpack.c.l.b16 %v805_v61  ;;  %v997_v5 = vunpack.c.l.b16 %v806_v22 }
 0x1d2   :  { %v1147_v50 = vrot.slane %v1115_v36, %v9747_v6  ;;  %v1149_v2 = vsel %vm1038_vm3, %v1127_v56, %v1148_v28  ;;  %v998_v30 = vunpack.c.l.b16 %v807_v8  ;;  %v999_v55 = vunpack.c.l.b16 %v808_v10  ;;  %v1213_v28 = vld [vmem:[#allocation2 + $0x60] sm:$0xff] }
 0x1d3   :  { %v1150_v13 = vsel %vm1040_vm4, %v1131_v27, %v1149_v2  ;;  %v1000_v47 = vunpack.c.l.b16 %v809_v26  ;;  %v1007_v61 = vrot.slane %v994_v0, %v9747_v6  ;;  %v1011_v21 = vrot.slane %v995_v44, %v9747_v6  ;;  %v1212_v0 = vld [vmem:[#allocation2 + $0x58] sm:$0xff]  ;;  %v1214_v44 = vld [vmem:[#allocation2 + $0x68] sm:$0xff] }
 0x1d4   :  { %v1151_v54 = vsel %vm1042_vm5, %v1135_v34, %v1150_v13  ;;  %v1001_v22 = vunpack.c.l.b16 %v810_v53  ;;  %v1015_v48 = vrot.slane %v996_v31, %v9747_v6  ;;  %v1019_v8 = vrot.slane %v997_v5, %v9747_v6  ;;  %v1209_v34 = vld [vmem:[#allocation2 + $0x40] sm:$0xff]  ;;  %v1215_v31 = vld [vmem:[#allocation2 + $0x70] sm:$0xff]  ;;  %v1216_v5 = vld [vmem:[#allocation2 + $0x78] sm:$0xff] }
 0x1d5   :  { %v1152_v7 = vsel %vm1044_vm6, %v1139_v33, %v1151_v54  ;;  %v1023_v10 = vrot.slane %v998_v30, %v9747_v6  ;;  %v1027_v63 = vrot.slane %v999_v55, %v9747_v6  ;;  %v1037_v26 = vsel %vm1036_vm2, %v1011_v21, %v1007_v61  ;;  %v1210_v33 = vld [vmem:[#allocation2 + $0x48] sm:$0xff]  ;;  %v1200_v55 = vld [vmem:[#allocation2] sm:$0xff] }
 0x1d6   :  { %v1153_v18 = vsel %vm1046_vm7, %v1143_v49, %v1152_v7  ;;  %vm1051_vm9 = vcmask 64512   ;;  %v1031_v4 = vrot.slane %v1000_v47, %v9747_v6  ;;  %v1039_v53 = vsel %vm1038_vm3, %v1015_v48, %v1037_v26  ;;  %v1211_v49 = vld [vmem:[#allocation2 + $0x50] sm:$0xff]  ;;  %v1201_v61 = vld [vmem:[#allocation2 + $0x8] sm:$0xff]  ;;  %v1203_v7 = vld [vmem:[#allocation2 + $0x18] sm:$0xff] }
 0x1d7   :  { %v1154_v24 = vsel %vm1048_vm8, %v1147_v50, %v1153_v18  ;;  %v1035_v11 = vrot.slane %v1001_v22, %v9747_v6  ;;  %v1041_v46 = vsel %vm1040_vm4, %v1019_v8, %v1039_v53  ;;  %v1202_v8 = vld [vmem:[#allocation2 + $0x10] sm:$0xff]  ;;  %v1205_v18 = vld [vmem:[#allocation2 + $0x28] sm:$0xff]  ;;  %v1207_v26 = vld [vmem:[#allocation2 + $0x38] sm:$0xff]  ;;  %v1392_v53 = vunpack.c.l.b16 %v909_v25 }
 0x1d8   :  { %v9814_v41 = vpack.c.b16 %v1154_v24, %v1154_v24  ;;  %v1043_v36 = vsel %vm1042_vm5, %v1023_v10, %v1041_v46  ;;  %v1204_v10 = vld [vmem:[#allocation2 + $0x20] sm:$0xff]  ;;  %v1492_v62 = vunpack.c.l.b16 %v973_v45  ;;  %v1493_v43 = vunpack.c.l.b16 %v974_v15 }
 0x1d9   :  { %v1045_v52 = vsel %vm1044_vm6, %v1027_v63, %v1043_v36  ;;  %v1206_v63 = vld [vmem:[#allocation2 + $0x30] sm:$0xff]  ;;  %v1406_v36 = vrot.slane %v1392_v53, %v9747_v6  ;;  %v10846_v40 = vpack.c.bf16 %v9702_v59, %v9702_v59  ;;  %v10847_v3 = vpack.c.bf16 %v9669_v37, %v9669_v37 }
 0x1da   :  { %8391 = vmatmul.mubr.msk.bf16.vlgmr.msra.gmra.mrb[0].mxu1 %vm1051_vm9, %v9814_v41  ;;  %v1047_v1 = vsel %vm1046_vm7, %v1031_v4, %v1045_v52  ;;  %v1391_v4 = vunpack.c.l.b16 %v908_v42  ;;  %v1394_v52 = vunpack.c.l.b16 %v911_v19  ;;  %v1491_v42 = vunpack.c.l.b16 %v972_v51 }
 0x1db   :  { %8436 = vmatprep.mubr.msk.bf16.mxu1 %vm9176_vm1, %v9175_v17  ;;  %v1049_v56 = vsel %vm1048_vm8, %v1035_v11, %v1047_v1  ;;  %v1393_v11 = vunpack.c.l.b16 %v910_v12  ;;  %v1395_v12 = vunpack.c.l.b16 %v912_v14  ;;  %v1396_v45 = vunpack.c.l.b16 %v10846_v40 }
 0x1dc   :  { %v9826_v27 = vpack.c.b16 %v1049_v56, %v1049_v56  ;;  %v1402_v46 = vrot.slane %v1391_v4, %v9747_v6  ;;  %v1414_v25 = vrot.slane %v1394_v52, %v9747_v6  ;;  %v1506_v58 = vrot.slane %v1492_v62, %v9747_v6 }
 0x1dd   :  { %v1410_v1 = vrot.slane %v1393_v11, %v9747_v6  ;;  %v1494_v15 = vunpack.c.l.b16 %v10847_v3  ;;  %v10848_v59 = vpack.c.bf16 %v9714_v9, %v9714_v9  ;;  %v10849_v37 = vpack.c.bf16 %v9690_v60, %v9690_v60 }
 0x1de   :  { %8385 = vmatmul.mubr.msk.bf16.vlgmr.msra.gmra.mrb[0].mxu0 %vm1051_vm9, %v9826_v27  ;;  %v1431_v35 = vsel %vm1036_vm2, %v1406_v36, %v1402_v46  ;;  %v1398_v9 = vunpack.c.l.b16 %v915_v20  ;;  %v10850_v60 = vpack.c.bf16 %v9708_v38, %v9708_v38 }
 0x1df   :  { %8395 = vmatpush3.bf16.msra.mxu0 %v1209_v34  ;;  %8410 = vmatprep.mubr.msk.bf16.mxu0 %vm9176_vm1, %v9175_v17  ;;  %v1432_v56 = vsel %vm1038_vm3, %v1410_v1, %v1431_v35  ;;  %v1502_v34 = vrot.slane %v1491_v42, %v9747_v6 }
 0x1e0   :  { %8396 = vmatprep.subr.bf16.mxu0 %v9175_v17 }
 0x1e3   :  { %8397 = vmatpush3.bf16.msra.mxu0 %v1210_v33 }
 0x1e4   :  { %8398 = vmatprep.subr.bf16.mxu0 %v9175_v17 }
 0x1e7   :  { %8399 = vmatpush3.bf16.msra.mxu0 %v1211_v49  ;;  %v1418_v49 = vrot.slane %v1395_v12, %v9747_v6 }
 0x1e8   :  { %8400 = vmatprep.subr.bf16.mxu0 %v9175_v17 }
 0x1eb   :  { %8401 = vmatpush3.bf16.msra.mxu0 %v1212_v0  ;;  %v1433_v0 = vsel %vm1040_vm4, %v1414_v25, %v1432_v56 }
 0x1ec   :  { %8402 = vmatprep.subr.bf16.mxu0 %v9175_v17 }
 0x1ef   :  { %8403 = vmatpush3.bf16.msra.mxu0 %v1213_v28  ;;  %v1397_v28 = vunpack.c.l.b16 %v10848_v59 }
 0x1f0   :  { %8404 = vmatprep.subr.bf16.mxu0 %v9175_v17 }
 0x1f3   :  { %8405 = vmatpush3.bf16.msra.mxu0 %v1214_v44  ;;  %v1510_v44 = vrot.slane %v1493_v43, %v9747_v6 }
 0x1f4   :  { %8406 = vmatprep.subr.bf16.mxu0 %v9175_v17 }
 0x1f7   :  { %8407 = vmatpush3.bf16.msra.mxu0 %v1215_v31  ;;  %v1422_v31 = vrot.slane %v1396_v45, %v9747_v6 }
 0x1f8   :  { %8408 = vmatprep.subr.bf16.mxu0 %v9175_v17 }
 0x1fb   :  { %8409 = vmatpush3.bf16.msra.mxu0 %v1216_v5  ;;  %v1531_v5 = vsel %vm1036_vm2, %v1506_v58, %v1502_v34 }
 0x1fc   :  { %8414 = vmatprep.subr.bf16.mxu0 %v9175_v17 }
 0x2ad   :  { %v1193_v50 = vpop.f32.mrb[0].mxu1 }
 0x2ae   :  { %v1199_v2 = vpack.c.bf16 %v1193_v50, %v1193_v50  ;;  %v8392_v30 = vpop.f32.mrb[1].mxu1  ;;  %v1434_v50 = vsel %vm1042_vm5, %v1418_v49, %v1433_v0 }
 0x2af   :  { %v1196_v13 = vpop.f32.mrb[2].mxu1  ;;  %v1514_v30 = vrot.slane %v1494_v15, %v9747_v6 }
 0x2b0   :  { %v8393_v47 = vpop.f32.mrb[3].mxu1  ;;  %8411 = vmatmul.mubr.bf16.vlgmr.msra.gmra.mrb[4].mxu0 %v1199_v2  ;;  %v1495_v2 = vunpack.c.l.b16 %v10849_v37  ;;  %v1532_v13 = vsel %vm1038_vm3, %v1510_v44, %v1531_v5 }
 0x2b1   :  { %8415 = vmatpush3.bf16.msra.mxu0 %v1200_v55  ;;  %8430 = vmatprep.mubr.msk.bf16.mxu0 %vm9176_vm1, %v9175_v17  ;;  %v1093_v21 = vpop.f32.mrb[0].mxu0  ;;  %v1426_v55 = vrot.slane %v1397_v28, %v9747_v6  ;;  %v1435_v47 = vsel %vm1044_vm6, %v1422_v31, %v1434_v50  ;;  %v1533_v32 = vsel %vm1040_vm4, %v1514_v30, %v1532_v13 }
 0x2b2   :  { %8416 = vmatprep.subr.bf16.mxu0 %v9175_v17  ;;  %v8386_v54 = vpop.f32.mrb[1].mxu0  ;;  %v1099_v24 = vpack.c.bf16 %v1093_v21, %v1093_v21  ;;  %v1518_v21 = vrot.slane %v1495_v2, %v9747_v6 }
 0x2b3   :  { %v1096_v22 = vpop.f32.mrb[2].mxu0  ;;  %v1430_v54 = vrot.slane %v1398_v9, %v9747_v6  ;;  %v1436_v20 = vsel %vm1046_vm7, %v1426_v55, %v1435_v47 }
 0x2b4   :  { %v8387_v48 = vpop.f32.mrb[3].mxu0  ;;  %v10851_v22 = vpack.c.bf16 %v9720_v39, %v9720_v39  ;;  %v1534_v38 = vsel %vm1042_vm5, %v1518_v21, %v1533_v32 }
 0x2b5   :  { %8417 = vmatpush3.bf16.msra.mxu0 %v1201_v61  ;;  %v1496_v61 = vunpack.c.l.b16 %v10850_v60 }
 0x2b6   :  { %8418 = vmatprep.subr.bf16.mxu0 %v9175_v17  ;;  %v1497_v48 = vunpack.c.l.b16 %v10851_v22 }
 0x2b8   :  { %v1526_v39 = vrot.slane %v1497_v48, %v9747_v6 }
 0x2b9   :  { %8419 = vmatpush3.bf16.msra.mxu0 %v1202_v8  ;;  %v1522_v8 = vrot.slane %v1496_v61, %v9747_v6 }
 0x2ba   :  { %8420 = vmatprep.subr.bf16.mxu0 %v9175_v17 }
 0x2bd   :  { %8421 = vmatpush3.bf16.msra.mxu0 %v1203_v7  ;;  %v1437_v7 = vsel %vm1048_vm8, %v1430_v54, %v1436_v20 }
 0x2be   :  { %8422 = vmatprep.subr.bf16.mxu0 %v9175_v17 }
 0x2c1   :  { %8423 = vmatpush3.bf16.msra.mxu0 %v1204_v10  ;;  %v1498_v10 = vunpack.c.l.b16 %v979_v29 }
 0x2c2   :  { %8424 = vmatprep.subr.bf16.mxu0 %v9175_v17 }
 0x2c5   :  { %8425 = vmatpush3.bf16.msra.mxu0 %v1205_v18  ;;  %v1535_v18 = vsel %vm1044_vm6, %v1522_v8, %v1534_v38 }
 0x2c6   :  { %8426 = vmatprep.subr.bf16.mxu0 %v9175_v17 }
 0x2c9   :  { %8427 = vmatpush3.bf16.msra.mxu0 %v1206_v63  ;;  %v9936_v63 = vpack.c.b16 %v1437_v7, %v1437_v7 }
 0x2ca   :  { %8428 = vmatprep.subr.bf16.mxu0 %v9175_v17 }
 0x2cd   :  { %8429 = vmatpush3.bf16.msra.mxu0 %v1207_v26  ;;  %v1530_v26 = vrot.slane %v1498_v10, %v9747_v6 }
 0x2d0   :  { %8431 = vmatmul.mubr.bf16.vlgmr.msra.gmra.mrb[4].mxu0 %v1099_v24  ;;  %v1536_v24 = vsel %vm1046_vm7, %v1526_v39, %v1535_v18 }
 0x2d1   :  { %v1537_v29 = vsel %vm1048_vm8, %v1530_v26, %v1536_v24 }
 0x2d2   :  { %v9945_v57 = vpack.c.b16 %v1537_v29, %v1537_v29 }
 0x3a3   :  { %v1291_v16 = vpop.f32.mrb[4].mxu0 }
 0x3a4   :  { %v1297_v23 = vpack.c.bf16 %v1291_v16, %v1291_v16  ;;  %v8432_v19 = vpop.f32.mrb[5].mxu0 }
 0x3a5   :  { %v1294_v51 = vpop.f32.mrb[6].mxu0 }
 0x3a6   :  { %v1299_v14 = vsel %vm1055_vm0, %v1297_v23, 0  ;;  %v8433_v33 = vpop.f32.mrb[7].mxu0 }
 0x3a7   :  { %8435 = vmatpush3.bf16.msra.mxu1 %v1299_v14 }
 0x3a8   :  { %8440 = vmatprep.subr.bf16.mxu1 %v9175_v17 }
 0x3aa   :  { %8437 = vmatmul.mubr.msk.bf16.vlgmr.msra.gmra.mrb[4].mxu1 %vm1051_vm9, %v9826_v27 }
 0x3ab   :  { %8441 = vmatpush3.bf16.msra.mxu1 %v1299_v14  ;;  %8442 = vmatprep.mubr.msk.bf16.mxu1 %vm9176_vm1, %v9175_v17 }
 0x3ac   :  { %8446 = vmatprep.subr.bf16.mxu1 %v9175_v17 }
 0x3b2   :  { %8443 = vmatmul.mubr.msk.bf16.vlgmr.msra.gmra.mrb[8].mxu1 %vm1051_vm9, %v9814_v41 }
 0x3b3   :  { %8447 = vmatpush3.bf16.msra.mxu1 %v1299_v14  ;;  %8448 = vmatprep.mubr.msk.bf16.mxu1 %vm9176_vm1, %v9175_v17 }
 0x3b4   :  { %8452 = vmatprep.subr.bf16.mxu1 %v9175_v17 }
 0x3ba   :  { %8449 = vmatmul.mubr.msk.bf16.vlgmr.msra.gmra.mrb[12].mxu1 %vm1051_vm9, %v9936_v63 }
 0x3bb   :  { %8453 = vmatpush3.bf16.msra.mxu1 %v1299_v14  ;;  %8454 = vmatprep.mubr.msk.bf16.mxu1 %vm9176_vm1, %v9175_v17 }
 0x3c2   :  { %8455 = vmatmul.mubr.msk.bf16.vlgmr.msra.gmra.mrb[16].mxu1 %vm1051_vm9, %v9945_v57 }
 0x47d   :  { %v9949_v4 = vpop.f32.mrb[4].mxu1 }
 0x47e   :  { %v1341_v6 = vpack.c.bf16 %v9949_v4, %v9949_v4  ;;  %v8438_v53 = vpop.f32.mrb[5].mxu1 }
 0x47f   :  { %v1338_v11 = vpop.f32.mrb[6].mxu1 }
 0x480   :  { %v8439_v46 = vpop.f32.mrb[7].mxu1 }
 0x485   :  { %v1376_v36 = vpop.f32.mrb[8].mxu1 }
 0x486   :  { %v1382_v52 = vpack.c.bf16 %v1376_v36, %v1376_v36  ;;  %v8444_v1 = vpop.f32.mrb[9].mxu1 }
 0x487   :  { %v1379_v35 = vpop.f32.mrb[10].mxu1 }
 0x488   :  { %v8445_v42 = vpop.f32.mrb[11].mxu1 }
 0x48d   :  { %v9953_v62 = vpop.f32.mrb[12].mxu1 }
 0x48e   :  { %v1482_v12 = vpack.c.bf16 %v9953_v62, %v9953_v62  ;;  %v8450_v16 = vpop.f32.mrb[13].mxu1 }
 0x48f   :  { %v1479_v25 = vpop.f32.mrb[14].mxu1 }
 0x490   :  { %v8451_v23 = vpop.f32.mrb[15].mxu1 }
 0x495   :  { %v9957_v19 = vpop.f32.mrb[16].mxu1 }
 0x496   :  { %v1582_v56 = vpack.c.bf16 %v9957_v19, %v9957_v19  ;;  %v8456_v43 = vpop.f32.mrb[17].mxu1 }
 0x497   :  { %v1579_v51 = vpop.f32.mrb[18].mxu1 }
 0x498   :  { %v8457_v40 = vpop.f32.mrb[19].mxu1 }
 0x499   :  { %9080 = dma.done.wait [#allocation20 + $0x1], 4096 }
 0x49a   :  { %9081 = vsyncadd [#allocation20 + $0x1], 4294963200  ;;  %v9177_v45 = vmov 0   ;;  %v1604_v34 = vld [vmem:[#allocation3 + $0x88] sm:$0xff]  ;;  %v1603_v58 = vld [vmem:[#allocation3 + $0x80] sm:$0xff] }
 0x49b   :  { %1651 = vmatprep.mubr.bf16.mxu1 %v9177_v45  ;;  %v1606_v14 = vld [vmem:[#allocation3 + $0x98] sm:$0xff]  ;;  %1619 = vmatprep.subr.bf16.mxu1 %v1604_v34  ;;  %v1605_v33 = vld [vmem:[#allocation3 + $0x90] sm:$0xff]  ;;  %v1608_v49 = vld [vmem:[#allocation3 + $0xa8] sm:$0xff] }
 0x49c   :  { %1620 = vmatpush1.bf16.msra.mxu1 %v1603_v58  ;;  %v1607_v0 = vld [vmem:[#allocation3 + $0xa0] sm:$0xff]  ;;  %v1610_v3 = vld [vmem:[#allocation3 + $0xb8] sm:$0xff]  ;;  %v1609_v15 = vld [vmem:[#allocation3 + $0xb0] sm:$0xff] }
 0x49d   :  { %1621 = vmatprep.subr.bf16.mxu1 %v1606_v14  ;;  %v1612_v59 = vld [vmem:[#allocation3 + $0xc8] sm:$0xff]  ;;  %v1611_v28 = vld [vmem:[#allocation3 + $0xc0] sm:$0xff]  ;;  %v1614_v44 = vld [vmem:[#allocation3 + $0xd8] sm:$0xff] }
 0x49e   :  { %v1613_v31 = vld [vmem:[#allocation3 + $0xd0] sm:$0xff]  ;;  %v1616_v5 = vld [vmem:[#allocation3 + $0xe8] sm:$0xff]  ;;  %v1615_v50 = vld [vmem:[#allocation3 + $0xe0] sm:$0xff] }
 0x49f   :  { %v1618_v37 = vld [vmem:[#allocation3 + $0xf8] sm:$0xff]  ;;  %v1617_v2 = vld [vmem:[#allocation3 + $0xf0] sm:$0xff]  ;;  %v1587_v9 = vld [vmem:[#allocation3 + $0x8] sm:$0xff] }
 0x4a0   :  { %1622 = vmatpush1.bf16.msra.mxu1 %v1605_v33  ;;  %v1586_v30 = vld [vmem:[#allocation3] sm:$0xff]  ;;  %v1589_v55 = vld [vmem:[#allocation3 + $0x18] sm:$0xff]  ;;  %v1588_v13 = vld [vmem:[#allocation3 + $0x10] sm:$0xff] }
 0x4a1   :  { %1623 = vmatprep.subr.bf16.mxu1 %v1608_v49  ;;  %v1591_v47 = vld [vmem:[#allocation3 + $0x28] sm:$0xff]  ;;  %v1590_v60 = vld [vmem:[#allocation3 + $0x20] sm:$0xff]  ;;  %v1593_v61 = vld [vmem:[#allocation3 + $0x38] sm:$0xff] }
 0x4a2   :  { %v1592_v21 = vld [vmem:[#allocation3 + $0x30] sm:$0xff]  ;;  %v1595_v54 = vld [vmem:[#allocation3 + $0x48] sm:$0xff]  ;;  %v1594_v32 = vld [vmem:[#allocation3 + $0x40] sm:$0xff] }
 0x4a3   :  { %v1597_v20 = vld [vmem:[#allocation3 + $0x58] sm:$0xff]  ;;  %v1596_v22 = vld [vmem:[#allocation3 + $0x50] sm:$0xff]  ;;  %v1599_v48 = vld [vmem:[#allocation3 + $0x68] sm:$0xff] }
 0x4a4   :  { %1624 = vmatpush1.bf16.msra.mxu1 %v1607_v0  ;;  %v1598_v8 = vld [vmem:[#allocation3 + $0x60] sm:$0xff]  ;;  %v1601_v38 = vld [vmem:[#allocation3 + $0x78] sm:$0xff]  ;;  %v1600_v7 = vld [vmem:[#allocation3 + $0x70] sm:$0xff] }
 0x4a5   :  { %1625 = vmatprep.subr.bf16.mxu1 %v1610_v3 }
 0x4a8   :  { %1626 = vmatpush1.bf16.msra.mxu1 %v1609_v15 }
 0x4a9   :  { %1627 = vmatprep.subr.bf16.mxu1 %v1612_v59 }
 0x4ac   :  { %1628 = vmatpush1.bf16.msra.mxu1 %v1611_v28 }
 0x4ad   :  { %1629 = vmatprep.subr.bf16.mxu1 %v1614_v44 }
 0x4b0   :  { %1630 = vmatpush1.bf16.msra.mxu1 %v1613_v31 }
 0x4b1   :  { %1631 = vmatprep.subr.bf16.mxu1 %v1616_v5 }
 0x4b4   :  { %1632 = vmatpush1.bf16.msra.mxu1 %v1615_v50 }
 0x4b5   :  { %1633 = vmatprep.subr.bf16.mxu1 %v1618_v37 }
 0x4b8   :  { %1634 = vmatpush1.bf16.msra.mxu1 %v1617_v2 }
 0x4b9   :  { %1660 = vmatprep.subr.bf16.mxu1 %v1587_v9 }
 0x4bb   :  { %1652 = vmatmul.mubr.bf16.vlgmr.msra.gmra.mrb[20].mxu1 %v1382_v52 }
 0x4bc   :  { %1661 = vmatpush1.bf16.msra.mxu1 %v1586_v30  ;;  %1692 = vmatprep.mubr.bf16.mxu1 %v9177_v45 }
 0x4bd   :  { %1662 = vmatprep.subr.bf16.mxu1 %v1589_v55 }
 0x4c0   :  { %1663 = vmatpush1.bf16.msra.mxu1 %v1588_v13 }
 0x4c1   :  { %1664 = vmatprep.subr.bf16.mxu1 %v1591_v47 }
 0x4c4   :  { %1665 = vmatpush1.bf16.msra.mxu1 %v1590_v60 }
 0x4c5   :  { %1666 = vmatprep.subr.bf16.mxu1 %v1593_v61 }
 0x4c8   :  { %1667 = vmatpush1.bf16.msra.mxu1 %v1592_v21 }
 0x4c9   :  { %1668 = vmatprep.subr.bf16.mxu1 %v1595_v54 }
 0x4cc   :  { %1669 = vmatpush1.bf16.msra.mxu1 %v1594_v32 }
 0x4cd   :  { %1670 = vmatprep.subr.bf16.mxu1 %v1597_v20 }
 0x4d0   :  { %1671 = vmatpush1.bf16.msra.mxu1 %v1596_v22 }
 0x4d1   :  { %1672 = vmatprep.subr.bf16.mxu1 %v1599_v48 }
 0x4d4   :  { %1673 = vmatpush1.bf16.msra.mxu1 %v1598_v8 }
 0x4d5   :  { %1674 = vmatprep.subr.bf16.mxu1 %v1601_v38 }
 0x4d8   :  { %1675 = vmatpush1.bf16.msra.mxu1 %v1600_v7 }
 0x4db   :  { %1693 = vmatmul.mubr.bf16.vlgmr.msra.gmra.mrb[20].mxu1 %v1341_v6 }
 0x5ae   :  { %v1694_v10 = vpop.f32.mrb[20].mxu1 }
 0x5af   :  { %v1696_v39 = vpop.f32.mrb[21].mxu1 }
 0x5b0   :  { %v1698_v18 = vpop.f32.mrb[22].mxu1 }
 0x5b1   :  { %v1699_v26 = vpop.f32.mrb[23].mxu1 }
 0x5b2   :  { %9082 = dma.done.wait [#allocation20 + $0x2], 1024 }
 0x5b3   :  { %9083 = vsyncadd [#allocation20 + $0x2], 4294966272  ;;  %8458 = vmatprep.subr.bf16.mxu0 %v9175_v17  ;;  %8474 = vmatprep.mubr.msk.bf16.mxu0 %vm9176_vm1, %v9175_v17  ;;  %v7895_v24 = vmul.f32 -1.442695, %v1696_v39  ;;  %v9972_v29 = vld [vmem:[#allocation4] sm:$0xff]  ;;  %v9976_v4 = vld [vmem:[#allocation4 + $0x8] sm:$0xff] }
 0x5b4   :  { %8484 = vmatprep.subr.bf16.mxu1 %v9175_v17  ;;  %8486 = vmatprep.mubr.msk.bf16.mxu1 %vm9176_vm1, %v9175_v17  ;;  %v9980_v6 = vld [vmem:[#allocation4 + $0x10] sm:$0xff]  ;;  %v9984_v11 = vld [vmem:[#allocation4 + $0x18] sm:$0xff]  ;;  %v9988_v36 = vld [vmem:[#allocation4 + $0x20] sm:$0xff] }
 0x5b5   :  { %8934 = vpow2.f32 %v7895_v24  ;;  %8459 = vmatpush3.bf16.msra.mxu0 %v9972_v29  ;;  %v9992_v52 = vld [vmem:[#allocation4 + $0x28] sm:$0xff]  ;;  %v9996_v1 = vld [vmem:[#allocation4 + $0x30] sm:$0xff]  ;;  %v10000_v42 = vld [vmem:[#allocation4 + $0x38] sm:$0xff] }
 0x5b6   :  { %8460 = vmatprep.subr.bf16.mxu0 %v9175_v17 }
 0x5b9   :  { %8461 = vmatpush3.bf16.msra.mxu0 %v9976_v4 }
 0x5ba   :  { %8462 = vmatprep.subr.bf16.mxu0 %v9175_v17 }
 0x5bd   :  { %8463 = vmatpush3.bf16.msra.mxu0 %v9980_v6 }
 0x5be   :  { %8464 = vmatprep.subr.bf16.mxu0 %v9175_v17 }
 0x5bf   :  { %v8935_v53 = vpop.eup %8934 }
 0x5c0   :  { %v1716_v46 = vadd.f32 1.0, %v8935_v53 }
 0x5c1   :  { %8465 = vmatpush3.bf16.msra.mxu0 %v9984_v11 }
 0x5c2   :  { %8466 = vmatprep.subr.bf16.mxu0 %v9175_v17  ;;  %8936 = vrcp.f32 %v1716_v46 }
 0x5c5   :  { %8467 = vmatpush3.bf16.msra.mxu0 %v9988_v36 }
 0x5c6   :  { %8468 = vmatprep.subr.bf16.mxu0 %v9175_v17 }
 0x5c9   :  { %8469 = vmatpush3.bf16.msra.mxu0 %v9992_v52 }
 0x5ca   :  { %8470 = vmatprep.subr.bf16.mxu0 %v9175_v17 }
 0x5cc   :  { %v8937_v35 = vpop.eup %8936 }
 0x5cd   :  { %8471 = vmatpush3.bf16.msra.mxu0 %v9996_v1  ;;  %v1719_v16 = vpack.c.bf16 %v8937_v35, %v8937_v35 }
 0x5ce   :  { %8472 = vmatprep.subr.bf16.mxu0 %v9175_v17 }
 0x5d1   :  { %8473 = vmatpush3.bf16.msra.mxu0 %v10000_v42 }
 0x5d2   :  { %8478 = vmatprep.subr.bf16.mxu0 %v9175_v17 }
 0x5d4   :  { %8475 = vmatmul.mubr.bf16.vlgmr.msra.gmra.mrb[8].mxu0 %v1719_v16 }
 0x5d5   :  { %8480 = vmatprep.mubr.msk.bf16.mxu0 %vm9176_vm1, %v9175_v17 }
 0x6a7   :  { %v1754_v25 = vpop.f32.mrb[8].mxu0 }
 0x6a8   :  { %v1760_v23 = vmul.f32 %v1754_v25, %v1694_v10  ;;  %v8476_v43 = vpop.f32.mrb[9].mxu0 }
 0x6a9   :  { %v1757_v51 = vpop.f32.mrb[10].mxu0 }
 0x6aa   :  { %v1761_v40 = vpack.c.bf16 %v1760_v23, %v1760_v23  ;;  %v8477_v34 = vpop.f32.mrb[11].mxu0 }
 0x6ac   :  { %v1763_v58 = vsel %vm1055_vm0, %v1761_v40, 0 }
 0x6ad   :  { %8479 = vmatpush3.bf16.msra.mxu0 %v1763_v58  ;;  %8485 = vmatpush3.bf16.msra.mxu1 %v1763_v58 }
 0x6b0   :  { %8481 = vmatmul.mubr.msk.bf16.vlgmr.msra.gmra.mrb[12].mxu0 %vm1051_vm9, %v9826_v27  ;;  %8487 = vmatmul.mubr.msk.bf16.vlgmr.msra.gmra.mrb[24].mxu1 %vm1051_vm9, %v9814_v41 }
 0x783   :  { %v10011_v14 = vpop.f32.mrb[12].mxu0  ;;  %v1840_v33 = vpop.f32.mrb[24].mxu1 }
 0x784   :  { %v1805_v49 = vpack.c.bf16 %v10011_v14, %v10011_v14  ;;  %v1846_v0 = vpack.c.bf16 %v1840_v33, %v1840_v33  ;;  %v8482_v3 = vpop.f32.mrb[13].mxu0  ;;  %v8488_v15 = vpop.f32.mrb[25].mxu1 }
 0x785   :  { %v1802_v59 = vpop.f32.mrb[14].mxu0  ;;  %v1843_v28 = vpop.f32.mrb[26].mxu1 }
 0x786   :  { %v8483_v44 = vpop.f32.mrb[15].mxu0  ;;  %v8489_v31 = vpop.f32.mrb[27].mxu1 }
 0x787   :  { %9084 = dma.done.wait [#allocation20 + $0x3], 4096 }
 0x788   :  { %9085 = vsyncadd [#allocation20 + $0x3], 4294963200  ;;  %1914 = vmatprep.mubr.bf16.mxu0 %v9177_v45  ;;  %v1867_v5 = vld [vmem:[#allocation5 + $0x88] sm:$0xff]  ;;  %v1866_v50 = vld [vmem:[#allocation5 + $0x80] sm:$0xff] }
 0x789   :  { %v1869_v37 = vld [vmem:[#allocation5 + $0x98] sm:$0xff]  ;;  %1882 = vmatprep.subr.bf16.mxu0 %v1867_v5  ;;  %v1868_v2 = vld [vmem:[#allocation5 + $0x90] sm:$0xff]  ;;  %v1871_v9 = vld [vmem:[#allocation5 + $0xa8] sm:$0xff] }
 0x78a   :  { %1883 = vmatpush1.bf16.msra.mxu0 %v1866_v50  ;;  %v1870_v30 = vld [vmem:[#allocation5 + $0xa0] sm:$0xff]  ;;  %v1873_v55 = vld [vmem:[#allocation5 + $0xb8] sm:$0xff]  ;;  %v1872_v13 = vld [vmem:[#allocation5 + $0xb0] sm:$0xff] }
 0x78b   :  { %1884 = vmatprep.subr.bf16.mxu0 %v1869_v37  ;;  %v1875_v47 = vld [vmem:[#allocation5 + $0xc8] sm:$0xff]  ;;  %v1874_v60 = vld [vmem:[#allocation5 + $0xc0] sm:$0xff]  ;;  %v1877_v61 = vld [vmem:[#allocation5 + $0xd8] sm:$0xff] }
 0x78c   :  { %v1876_v21 = vld [vmem:[#allocation5 + $0xd0] sm:$0xff]  ;;  %v1879_v54 = vld [vmem:[#allocation5 + $0xe8] sm:$0xff]  ;;  %v1878_v32 = vld [vmem:[#allocation5 + $0xe0] sm:$0xff] }
 0x78d   :  { %v1881_v20 = vld [vmem:[#allocation5 + $0xf8] sm:$0xff]  ;;  %v1880_v22 = vld [vmem:[#allocation5 + $0xf0] sm:$0xff]  ;;  %v1850_v48 = vld [vmem:[#allocation5 + $0x8] sm:$0xff] }
 0x78e   :  { %1885 = vmatpush1.bf16.msra.mxu0 %v1868_v2  ;;  %v1849_v8 = vld [vmem:[#allocation5] sm:$0xff]  ;;  %v1852_v38 = vld [vmem:[#allocation5 + $0x18] sm:$0xff]  ;;  %v1851_v7 = vld [vmem:[#allocation5 + $0x10] sm:$0xff] }
 0x78f   :  { %1886 = vmatprep.subr.bf16.mxu0 %v1871_v9  ;;  %v1854_v10 = vld [vmem:[#allocation5 + $0x28] sm:$0xff]  ;;  %v1853_v39 = vld [vmem:[#allocation5 + $0x20] sm:$0xff]  ;;  %v1856_v18 = vld [vmem:[#allocation5 + $0x38] sm:$0xff] }
 0x790   :  { %v1855_v26 = vld [vmem:[#allocation5 + $0x30] sm:$0xff]  ;;  %v1858_v24 = vld [vmem:[#allocation5 + $0x48] sm:$0xff]  ;;  %v1857_v53 = vld [vmem:[#allocation5 + $0x40] sm:$0xff] }
 0x791   :  { %v1860_v46 = vld [vmem:[#allocation5 + $0x58] sm:$0xff]  ;;  %v1859_v35 = vld [vmem:[#allocation5 + $0x50] sm:$0xff]  ;;  %v1862_v16 = vld [vmem:[#allocation5 + $0x68] sm:$0xff] }
 0x792   :  { %1887 = vmatpush1.bf16.msra.mxu0 %v1870_v30  ;;  %v1861_v25 = vld [vmem:[#allocation5 + $0x60] sm:$0xff]  ;;  %v1864_v23 = vld [vmem:[#allocation5 + $0x78] sm:$0xff]  ;;  %v1863_v43 = vld [vmem:[#allocation5 + $0x70] sm:$0xff] }
 0x793   :  { %1888 = vmatprep.subr.bf16.mxu0 %v1873_v55 }
 0x796   :  { %1889 = vmatpush1.bf16.msra.mxu0 %v1872_v13 }
 0x797   :  { %1890 = vmatprep.subr.bf16.mxu0 %v1875_v47 }
 0x79a   :  { %1891 = vmatpush1.bf16.msra.mxu0 %v1874_v60 }
 0x79b   :  { %1892 = vmatprep.subr.bf16.mxu0 %v1877_v61 }
 0x79e   :  { %1893 = vmatpush1.bf16.msra.mxu0 %v1876_v21 }
 0x79f   :  { %1894 = vmatprep.subr.bf16.mxu0 %v1879_v54 }
 0x7a2   :  { %1895 = vmatpush1.bf16.msra.mxu0 %v1878_v32 }
 0x7a3   :  { %1896 = vmatprep.subr.bf16.mxu0 %v1881_v20 }
 0x7a6   :  { %1897 = vmatpush1.bf16.msra.mxu0 %v1880_v22 }
 0x7a7   :  { %1923 = vmatprep.subr.bf16.mxu0 %v1850_v48 }
 0x7a9   :  { %1915 = vmatmul.mubr.bf16.vlgmr.msra.gmra.mrb[16].mxu0 %v1846_v0 }
 0x7aa   :  { %1924 = vmatpush1.bf16.msra.mxu0 %v1849_v8  ;;  %1955 = vmatprep.mubr.bf16.mxu0 %v9177_v45 }
 0x7ab   :  { %1925 = vmatprep.subr.bf16.mxu0 %v1852_v38 }
 0x7ae   :  { %1926 = vmatpush1.bf16.msra.mxu0 %v1851_v7 }
 0x7af   :  { %1927 = vmatprep.subr.bf16.mxu0 %v1854_v10 }
 0x7b2   :  { %1928 = vmatpush1.bf16.msra.mxu0 %v1853_v39 }
 0x7b3   :  { %1929 = vmatprep.subr.bf16.mxu0 %v1856_v18 }
 0x7b6   :  { %1930 = vmatpush1.bf16.msra.mxu0 %v1855_v26 }
 0x7b7   :  { %1931 = vmatprep.subr.bf16.mxu0 %v1858_v24 }
 0x7ba   :  { %1932 = vmatpush1.bf16.msra.mxu0 %v1857_v53 }
 0x7bb   :  { %1933 = vmatprep.subr.bf16.mxu0 %v1860_v46 }
 0x7be   :  { %1934 = vmatpush1.bf16.msra.mxu0 %v1859_v35 }
 0x7bf   :  { %1935 = vmatprep.subr.bf16.mxu0 %v1862_v16 }
 0x7c2   :  { %1936 = vmatpush1.bf16.msra.mxu0 %v1861_v25 }
 0x7c3   :  { %1937 = vmatprep.subr.bf16.mxu0 %v1864_v23 }
 0x7c6   :  { %1938 = vmatpush1.bf16.msra.mxu0 %v1863_v43 }
 0x7c9   :  { %1956 = vmatmul.mubr.bf16.vlgmr.msra.gmra.mrb[16].mxu0 %v1805_v49 }
 0x89c   :  { %v10020_v51 = vpop.f32.mrb[16].mxu0 }
 0x89d   :  { %v1959_v40 = vpop.f32.mrb[17].mxu0 }
 0x89e   :  { %v1961_v34 = vpop.f32.mrb[18].mxu0 }
 0x89f   :  { %v1962_v58 = vpop.f32.mrb[19].mxu0 }
 0x8a0   :  { %9086 = dma.done.wait [#allocation20 + $0x4], 2048 }
 0x8a1   :  { %9087 = vsyncadd [#allocation20 + $0x4], 4294965248  ;;  %8490 = vmatprep.subr.bf16.mxu1 %v9175_v17  ;;  %8530 = vmatprep.subr.bf16.mxu0 %v9175_v17  ;;  %v7898_v33 = vmul.f32 -1.442695, %v1959_v40  ;;  %v1975_v14 = vld [vmem:[#allocation6 + $0x40] sm:$0xff]  ;;  %v1976_v49 = vld [vmem:[#allocation6 + $0x48] sm:$0xff] }
 0x8a2   :  { %8531 = vmatpush3.bf16.msra.mxu0 %v9972_v29  ;;  %8506 = vmatprep.mubr.msk.bf16.mxu1 %vm9176_vm1, %v9175_v17  ;;  %v1977_v0 = vld [vmem:[#allocation6 + $0x50] sm:$0xff]  ;;  %v1980_v15 = vld [vmem:[#allocation6 + $0x68] sm:$0xff]  ;;  %v1966_v28 = vld [vmem:[#allocation6] sm:$0xff] }
 0x8a3   :  { %8532 = vmatprep.subr.bf16.mxu0 %v9175_v17  ;;  %8546 = vmatprep.mubr.msk.bf16.mxu0 %vm9176_vm1, %v9175_v17  ;;  %8938 = vpow2.f32 %v7898_v33  ;;  %v1981_v59 = vld [vmem:[#allocation6 + $0x70] sm:$0xff]  ;;  %v1969_v44 = vld [vmem:[#allocation6 + $0x18] sm:$0xff]  ;;  %v1970_v19 = vld [vmem:[#allocation6 + $0x20] sm:$0xff] }
 0x8a4   :  { %8491 = vmatpush3.bf16.msra.mxu1 %v1975_v14  ;;  %v1972_v31 = vld [vmem:[#allocation6 + $0x30] sm:$0xff]  ;;  %v1973_v5 = vld [vmem:[#allocation6 + $0x38] sm:$0xff] }
 0x8a5   :  { %8492 = vmatprep.subr.bf16.mxu1 %v9175_v17 }
 0x8a6   :  { %8533 = vmatpush3.bf16.msra.mxu0 %v9976_v4  ;;  %v1978_v4 = vld [vmem:[#allocation6 + $0x58] sm:$0xff] }
 0x8a7   :  { %8534 = vmatprep.subr.bf16.mxu0 %v9175_v17 }
 0x8a8   :  { %8493 = vmatpush3.bf16.msra.mxu1 %v1976_v49 }
 0x8a9   :  { %8494 = vmatprep.subr.bf16.mxu1 %v9175_v17 }
 0x8aa   :  { %8535 = vmatpush3.bf16.msra.mxu0 %v9980_v6  ;;  %v1979_v6 = vld [vmem:[#allocation6 + $0x60] sm:$0xff] }
 0x8ab   :  { %8536 = vmatprep.subr.bf16.mxu0 %v9175_v17 }
 0x8ac   :  { %8495 = vmatpush3.bf16.msra.mxu1 %v1977_v0 }
 0x8ad   :  { %v8939_v29 = vpop.eup %8938  ;;  %8496 = vmatprep.subr.bf16.mxu1 %v9175_v17 }
 0x8ae   :  { %8537 = vmatpush3.bf16.msra.mxu0 %v9984_v11  ;;  %v2066_v3 = vadd.f32 1.0, %v8939_v29 }
 0x8af   :  { %8538 = vmatprep.subr.bf16.mxu0 %v9175_v17 }
 0x8b0   :  { %8940 = vrcp.f32 %v2066_v3  ;;  %8497 = vmatpush3.bf16.msra.mxu1 %v1978_v4 }
 0x8b1   :  { %8498 = vmatprep.subr.bf16.mxu1 %v9175_v17 }
 0x8b2   :  { %8539 = vmatpush3.bf16.msra.mxu0 %v9988_v36 }
 0x8b3   :  { %8540 = vmatprep.subr.bf16.mxu0 %v9175_v17 }
 0x8b4   :  { %8499 = vmatpush3.bf16.msra.mxu1 %v1979_v6 }
 0x8b5   :  { %8500 = vmatprep.subr.bf16.mxu1 %v9175_v17 }
 0x8b6   :  { %8541 = vmatpush3.bf16.msra.mxu0 %v9992_v52  ;;  %v1982_v52 = vld [vmem:[#allocation6 + $0x78] sm:$0xff] }
 0x8b7   :  { %8542 = vmatprep.subr.bf16.mxu0 %v9175_v17 }
 0x8b8   :  { %8501 = vmatpush3.bf16.msra.mxu1 %v1980_v15 }
 0x8b9   :  { %8502 = vmatprep.subr.bf16.mxu1 %v9175_v17 }
 0x8ba   :  { %v8941_v11 = vpop.eup %8940  ;;  %8543 = vmatpush3.bf16.msra.mxu0 %v9996_v1  ;;  %v1967_v1 = vld [vmem:[#allocation6 + $0x8] sm:$0xff] }
 0x8bb   :  { %8544 = vmatprep.subr.bf16.mxu0 %v9175_v17  ;;  %v2069_v36 = vpack.c.bf16 %v8941_v11, %v8941_v11 }
 0x8bc   :  { %8503 = vmatpush3.bf16.msra.mxu1 %v1981_v59 }
 0x8bd   :  { %8504 = vmatprep.subr.bf16.mxu1 %v9175_v17 }
 0x8be   :  { %8545 = vmatpush3.bf16.msra.mxu0 %v10000_v42  ;;  %v1968_v42 = vld [vmem:[#allocation6 + $0x10] sm:$0xff] }
 0x8c0   :  { %8505 = vmatpush3.bf16.msra.mxu1 %v1982_v52 }
 0x8c1   :  { %8547 = vmatmul.mubr.bf16.vlgmr.msra.gmra.mrb[20].mxu0 %v2069_v36  ;;  %8510 = vmatprep.subr.bf16.mxu1 %v9175_v17 }
 0x8c3   :  { %8507 = vmatmul.mubr.bf16.vlgmr.msra.gmra.mrb[28].mxu1 %v1582_v56  ;;  %v1971_v56 = vld [vmem:[#allocation6 + $0x28] sm:$0xff] }
 0x8c4   :  { %8511 = vmatpush3.bf16.msra.mxu1 %v1966_v28  ;;  %8526 = vmatprep.mubr.msk.bf16.mxu1 %vm9176_vm1, %v9175_v17 }
 0x8c5   :  { %8512 = vmatprep.subr.bf16.mxu1 %v9175_v17 }
 0x8c8   :  { %8513 = vmatpush3.bf16.msra.mxu1 %v1967_v1 }
 0x8c9   :  { %8514 = vmatprep.subr.bf16.mxu1 %v9175_v17 }
 0x8cc   :  { %8515 = vmatpush3.bf16.msra.mxu1 %v1968_v42 }
 0x8cd   :  { %8516 = vmatprep.subr.bf16.mxu1 %v9175_v17 }
 0x8d0   :  { %8517 = vmatpush3.bf16.msra.mxu1 %v1969_v44 }
 0x8d1   :  { %8518 = vmatprep.subr.bf16.mxu1 %v9175_v17 }
 0x8d4   :  { %8519 = vmatpush3.bf16.msra.mxu1 %v1970_v19 }
 0x8d5   :  { %8520 = vmatprep.subr.bf16.mxu1 %v9175_v17 }
 0x8d8   :  { %8521 = vmatpush3.bf16.msra.mxu1 %v1971_v56 }
 0x8d9   :  { %8522 = vmatprep.subr.bf16.mxu1 %v9175_v17 }
 0x8dc   :  { %8523 = vmatpush3.bf16.msra.mxu1 %v1972_v31 }
 0x8dd   :  { %8524 = vmatprep.subr.bf16.mxu1 %v9175_v17 }
 0x8e0   :  { %8525 = vmatpush3.bf16.msra.mxu1 %v1973_v5 }
 0x8e1   :  { %8550 = vmatprep.subr.bf16.mxu1 %v9175_v17 }
 0x8e3   :  { %8527 = vmatmul.mubr.bf16.vlgmr.msra.gmra.mrb[32].mxu1 %v1482_v12 }
 0x8e4   :  { %8552 = vmatprep.mubr.msk.bf16.mxu1 %vm9176_vm1, %v9175_v17 }
 0x994   :  { %v2104_v50 = vpop.f32.mrb[20].mxu0 }
 0x995   :  { %v8548_v37 = vpop.f32.mrb[21].mxu0  ;;  %v2110_v60 = vmul.f32 %v2104_v50, %v10020_v51 }
 0x996   :  { %v2107_v2 = vpop.f32.mrb[22].mxu0  ;;  %v2017_v30 = vpop.f32.mrb[28].mxu1 }
 0x997   :  { %v8549_v9 = vpop.f32.mrb[23].mxu0  ;;  %v8508_v55 = vpop.f32.mrb[29].mxu1 }
 0x998   :  { %v2020_v13 = vpop.f32.mrb[30].mxu1 }
 0x999   :  { %v8509_v47 = vpop.f32.mrb[31].mxu1 }
 0x9b6   :  { %v2057_v61 = vpop.f32.mrb[32].mxu1 }
 0x9b7   :  { %v2058_v21 = vadd.f32 %v2057_v61, %v2017_v30  ;;  %v8528_v54 = vpop.f32.mrb[33].mxu1 }
 0x9b8   :  { %v2060_v32 = vpop.f32.mrb[34].mxu1 }
 0x9b9   :  { %v2111_v20 = vadd.f32 %v2110_v60, %v2058_v21  ;;  %v8529_v62 = vpop.f32.mrb[35].mxu1 }
 0x9bb   :  { %v2112_v12 = vpack.c.bf16 %v2111_v20, %v2111_v20 }
 0x9bd   :  { %v2114_v22 = vsel %vm1055_vm0, %v2112_v12, 0 }
 0x9be   :  { %8551 = vmatpush3.bf16.msra.mxu1 %v2114_v22 }
 0x9bf   :  { %8556 = vmatprep.subr.bf16.mxu1 %v9175_v17 }
 0x9c1   :  { %8553 = vmatmul.mubr.msk.bf16.vlgmr.msra.gmra.mrb[36].mxu1 %vm1051_vm9, %v9826_v27 }
 0x9c2   :  { %8557 = vmatpush3.bf16.msra.mxu1 %v2114_v22  ;;  %8558 = vmatprep.mubr.msk.bf16.mxu1 %vm9176_vm1, %v9175_v17 }
 0x9c3   :  { %8562 = vmatprep.subr.bf16.mxu1 %v9175_v17 }
 0x9c9   :  { %8559 = vmatmul.mubr.msk.bf16.vlgmr.msra.gmra.mrb[40].mxu1 %vm1051_vm9, %v9814_v41 }
 0x9ca   :  { %8563 = vmatpush3.bf16.msra.mxu1 %v2114_v22  ;;  %8564 = vmatprep.mubr.msk.bf16.mxu1 %vm9176_vm1, %v9175_v17 }
 0x9cb   :  { %8568 = vmatprep.subr.bf16.mxu1 %v9175_v17 }
 0x9d1   :  { %8565 = vmatmul.mubr.msk.bf16.vlgmr.msra.gmra.mrb[44].mxu1 %vm1051_vm9, %v9936_v63 }
 0x9d2   :  { %8569 = vmatpush3.bf16.msra.mxu1 %v2114_v22  ;;  %8570 = vmatprep.mubr.msk.bf16.mxu1 %vm9176_vm1, %v9175_v17 }
 0x9d9   :  { %8571 = vmatmul.mubr.msk.bf16.vlgmr.msra.gmra.mrb[48].mxu1 %vm1051_vm9, %v9945_v57 }
 0xa94   :  { %v2150_v48 = vpop.f32.mrb[36].mxu1 }
 0xa95   :  { %v10088_v8 = vpack.c.bf16 %v2150_v48, %v2150_v48  ;;  %v8554_v38 = vpop.f32.mrb[37].mxu1 }
 0xa96   :  { %v2153_v7 = vpop.f32.mrb[38].mxu1 }
 0xa97   :  { %v8555_v10 = vpop.f32.mrb[39].mxu1 }
 0xa9c   :  { %v2191_v39 = vpop.f32.mrb[40].mxu1 }
 0xa9d   :  { %v10090_v18 = vpack.c.bf16 %v2191_v39, %v2191_v39  ;;  %v8560_v26 = vpop.f32.mrb[41].mxu1 }
 0xa9e   :  { %v2194_v24 = vpop.f32.mrb[42].mxu1 }
 0xa9f   :  { %v8561_v53 = vpop.f32.mrb[43].mxu1 }
 0xaa4   :  { %v10092_v46 = vpop.f32.mrb[44].mxu1 }
 0xaa5   :  { %v2238_v35 = vpack.c.bf16 %v10092_v46, %v10092_v46  ;;  %v8566_v16 = vpop.f32.mrb[45].mxu1 }
 0xaa6   :  { %v2235_v25 = vpop.f32.mrb[46].mxu1 }
 0xaa7   :  { %v8567_v23 = vpop.f32.mrb[47].mxu1 }
 0xaac   :  { %v10096_v43 = vpop.f32.mrb[48].mxu1 }
 0xaad   :  { %v2279_v51 = vpack.c.bf16 %v10096_v43, %v10096_v43  ;;  %v8572_v40 = vpop.f32.mrb[49].mxu1 }
 0xaae   :  { %v2276_v34 = vpop.f32.mrb[50].mxu1 }
 0xaaf   :  { %v8573_v58 = vpop.f32.mrb[51].mxu1 }
 0xab0   :  { %9088 = dma.done.wait [#allocation20 + $0x5], 6144 }
 0xab1   :  { %9089 = vsyncadd [#allocation20 + $0x5], 4294961152  ;;  %8574 = vmatprep.subr.bf16.mxu1 %v9175_v17  ;;  %8590 = vmatprep.mubr.msk.bf16.mxu1 %vm9176_vm1, %v9175_v17  ;;  %v2309_v33 = vld [vmem:[#allocation7 + $0xc8] sm:$0xff]  ;;  %v2310_v14 = vld [vmem:[#allocation7 + $0xd0] sm:$0xff] }
 0xab2   :  { %2364 = vmatprep.mubr.bf16.mxu0 %v9177_v45  ;;  %v2308_v49 = vld [vmem:[#allocation7 + $0xc0] sm:$0xff]  ;;  %2332 = vmatprep.subr.bf16.mxu0 %v2309_v33  ;;  %v2313_v0 = vld [vmem:[#allocation7 + $0xe8] sm:$0xff]  ;;  %v2311_v3 = vld [vmem:[#allocation7 + $0xd8] sm:$0xff] }
 0xab3   :  { %8575 = vmatpush3.bf16.msra.mxu1 %v2310_v14  ;;  %v2312_v29 = vld [vmem:[#allocation7 + $0xe0] sm:$0xff]  ;;  %2333 = vmatpush1.bf16.msra.mxu0 %v2308_v49  ;;  %v2315_v4 = vld [vmem:[#allocation7 + $0xf8] sm:$0xff]  ;;  %v2314_v11 = vld [vmem:[#allocation7 + $0xf0] sm:$0xff] }
 0xab4   :  { %8576 = vmatprep.subr.bf16.mxu1 %v9175_v17  ;;  %2334 = vmatprep.subr.bf16.mxu0 %v2312_v29  ;;  %v2316_v6 = vld [vmem:[#allocation7 + $0x100] sm:$0xff]  ;;  %v2318_v15 = vld [vmem:[#allocation7 + $0x110] sm:$0xff]  ;;  %v2319_v36 = vld [vmem:[#allocation7 + $0x118] sm:$0xff] }
 0xab5   :  { %v2317_v59 = vld [vmem:[#allocation7 + $0x108] sm:$0xff]  ;;  %v2322_v28 = vld [vmem:[#allocation7 + $0x130] sm:$0xff]  ;;  %v2320_v1 = vld [vmem:[#allocation7 + $0x120] sm:$0xff] }
 0xab6   :  { %v2321_v52 = vld [vmem:[#allocation7 + $0x128] sm:$0xff]  ;;  %v2324_v42 = vld [vmem:[#allocation7 + $0x140] sm:$0xff]  ;;  %v2323_v19 = vld [vmem:[#allocation7 + $0x138] sm:$0xff] }
 0xab7   :  { %8577 = vmatpush3.bf16.msra.mxu1 %v2313_v0  ;;  %2335 = vmatpush1.bf16.msra.mxu0 %v2311_v3  ;;  %v2325_v44 = vld [vmem:[#allocation7 + $0x148] sm:$0xff]  ;;  %v2327_v56 = vld [vmem:[#allocation7 + $0x158] sm:$0xff]  ;;  %v2328_v31 = vld [vmem:[#allocation7 + $0x160] sm:$0xff] }
 0xab8   :  { %8578 = vmatprep.subr.bf16.mxu1 %v9175_v17  ;;  %2336 = vmatprep.subr.bf16.mxu0 %v2315_v4  ;;  %v2326_v5 = vld [vmem:[#allocation7 + $0x150] sm:$0xff]  ;;  %v2331_v37 = vld [vmem:[#allocation7 + $0x178] sm:$0xff]  ;;  %v2329_v2 = vld [vmem:[#allocation7 + $0x168] sm:$0xff] }
 0xab9   :  { %v2330_v50 = vld [vmem:[#allocation7 + $0x170] sm:$0xff]  ;;  %v2284_v9 = vld [vmem:[#allocation7 + $0x8] sm:$0xff]  ;;  %v2283_v55 = vld [vmem:[#allocation7] sm:$0xff] }
 0xaba   :  { %v2285_v30 = vld [vmem:[#allocation7 + $0x10] sm:$0xff]  ;;  %v2287_v13 = vld [vmem:[#allocation7 + $0x20] sm:$0xff]  ;;  %v2288_v47 = vld [vmem:[#allocation7 + $0x28] sm:$0xff] }
 0xabb   :  { %8579 = vmatpush3.bf16.msra.mxu1 %v2316_v6  ;;  %2337 = vmatpush1.bf16.msra.mxu0 %v2314_v11  ;;  %v2286_v60 = vld [vmem:[#allocation7 + $0x18] sm:$0xff]  ;;  %v2291_v21 = vld [vmem:[#allocation7 + $0x40] sm:$0xff]  ;;  %v2289_v54 = vld [vmem:[#allocation7 + $0x30] sm:$0xff] }
 0xabc   :  { %8580 = vmatprep.subr.bf16.mxu1 %v9175_v17  ;;  %2338 = vmatprep.subr.bf16.mxu0 %v2318_v15  ;;  %v2290_v61 = vld [vmem:[#allocation7 + $0x38] sm:$0xff]  ;;  %v2293_v32 = vld [vmem:[#allocation7 + $0x50] sm:$0xff]  ;;  %v2292_v62 = vld [vmem:[#allocation7 + $0x48] sm:$0xff] }
 0xabd   :  { %v2294_v20 = vld [vmem:[#allocation7 + $0x58] sm:$0xff]  ;;  %v2296_v12 = vld [vmem:[#allocation7 + $0x68] sm:$0xff]  ;;  %v2297_v22 = vld [vmem:[#allocation7 + $0x70] sm:$0xff] }
 0xabe   :  { %v2295_v48 = vld [vmem:[#allocation7 + $0x60] sm:$0xff]  ;;  %v2300_v7 = vld [vmem:[#allocation7 + $0x88] sm:$0xff]  ;;  %v2298_v10 = vld [vmem:[#allocation7 + $0x78] sm:$0xff] }
 0xabf   :  { %8581 = vmatpush3.bf16.msra.mxu1 %v2319_v36  ;;  %2339 = vmatpush1.bf16.msra.mxu0 %v2317_v59  ;;  %v2299_v38 = vld [vmem:[#allocation7 + $0x80] sm:$0xff]  ;;  %v2302_v39 = vld [vmem:[#allocation7 + $0x98] sm:$0xff]  ;;  %v2301_v26 = vld [vmem:[#allocation7 + $0x90] sm:$0xff] }
 0xac0   :  { %8582 = vmatprep.subr.bf16.mxu1 %v9175_v17  ;;  %2340 = vmatprep.subr.bf16.mxu0 %v2321_v52  ;;  %v2305_v24 = vld [vmem:[#allocation7 + $0xb0] sm:$0xff]  ;;  %v2306_v53 = vld [vmem:[#allocation7 + $0xb8] sm:$0xff]  ;;  %v2304_v16 = vld [vmem:[#allocation7 + $0xa8] sm:$0xff] }
 0xac3   :  { %8583 = vmatpush3.bf16.msra.mxu1 %v2322_v28  ;;  %2341 = vmatpush1.bf16.msra.mxu0 %v2320_v1 }
 0xac4   :  { %8584 = vmatprep.subr.bf16.mxu1 %v9175_v17  ;;  %2342 = vmatprep.subr.bf16.mxu0 %v2324_v42 }
 0xac7   :  { %8585 = vmatpush3.bf16.msra.mxu1 %v2325_v44  ;;  %2343 = vmatpush1.bf16.msra.mxu0 %v2323_v19 }
 0xac8   :  { %8586 = vmatprep.subr.bf16.mxu1 %v9175_v17  ;;  %2344 = vmatprep.subr.bf16.mxu0 %v2327_v56 }
 0xacb   :  { %8587 = vmatpush3.bf16.msra.mxu1 %v2328_v31  ;;  %2345 = vmatpush1.bf16.msra.mxu0 %v2326_v5 }
 0xacc   :  { %8588 = vmatprep.subr.bf16.mxu1 %v9175_v17  ;;  %2346 = vmatprep.subr.bf16.mxu0 %v2330_v50 }
 0xacf   :  { %8589 = vmatpush3.bf16.msra.mxu1 %v2331_v37  ;;  %2347 = vmatpush1.bf16.msra.mxu0 %v2329_v2 }
 0xad0   :  { %8594 = vmatprep.subr.bf16.mxu1 %v9175_v17  ;;  %2413 = vmatprep.subr.bf16.mxu0 %v2284_v9 }
 0xad2   :  { %8591 = vmatmul.mubr.bf16.vlgmr.msra.gmra.mrb[52].mxu1 %v10090_v18  ;;  %2365 = vmatmul.mubr.bf16.vlgmr.msra.gmra.mrb[24].mxu0 %v10090_v18  ;;  %v2303_v18 = vld [vmem:[#allocation7 + $0xa0] sm:$0xff] }
 0xad3   :  { %8595 = vmatpush3.bf16.msra.mxu1 %v2285_v30  ;;  %2414 = vmatpush1.bf16.msra.mxu0 %v2283_v55 }
 0xad4   :  { %8596 = vmatprep.subr.bf16.mxu1 %v9175_v17  ;;  %2415 = vmatprep.subr.bf16.mxu0 %v2287_v13 }
 0xad5   :  { %8610 = vmatprep.mubr.msk.bf16.mxu1 %vm9176_vm1, %v9175_v17  ;;  %2445 = vmatprep.mubr.bf16.mxu0 %v9177_v45 }
 0xad7   :  { %8597 = vmatpush3.bf16.msra.mxu1 %v2288_v47  ;;  %2416 = vmatpush1.bf16.msra.mxu0 %v2286_v60 }
 0xad8   :  { %8598 = vmatprep.subr.bf16.mxu1 %v9175_v17  ;;  %2417 = vmatprep.subr.bf16.mxu0 %v2290_v61 }
 0xadb   :  { %8599 = vmatpush3.bf16.msra.mxu1 %v2291_v21  ;;  %2418 = vmatpush1.bf16.msra.mxu0 %v2289_v54 }
 0xadc   :  { %8600 = vmatprep.subr.bf16.mxu1 %v9175_v17  ;;  %2419 = vmatprep.subr.bf16.mxu0 %v2293_v32 }
 0xadf   :  { %8601 = vmatpush3.bf16.msra.mxu1 %v2294_v20  ;;  %2420 = vmatpush1.bf16.msra.mxu0 %v2292_v62 }
 0xae0   :  { %8602 = vmatprep.subr.bf16.mxu1 %v9175_v17  ;;  %2421 = vmatprep.subr.bf16.mxu0 %v2296_v12 }
 0xae3   :  { %8603 = vmatpush3.bf16.msra.mxu1 %v2297_v22  ;;  %2422 = vmatpush1.bf16.msra.mxu0 %v2295_v48 }
 0xae4   :  { %8604 = vmatprep.subr.bf16.mxu1 %v9175_v17  ;;  %2423 = vmatprep.subr.bf16.mxu0 %v2299_v38 }
 0xae7   :  { %8605 = vmatpush3.bf16.msra.mxu1 %v2300_v7  ;;  %2424 = vmatpush1.bf16.msra.mxu0 %v2298_v10 }
 0xae8   :  { %8606 = vmatprep.subr.bf16.mxu1 %v9175_v17  ;;  %2425 = vmatprep.subr.bf16.mxu0 %v2302_v39 }
 0xaeb   :  { %8607 = vmatpush3.bf16.msra.mxu1 %v2303_v18  ;;  %2426 = vmatpush1.bf16.msra.mxu0 %v2301_v26 }
 0xaec   :  { %8608 = vmatprep.subr.bf16.mxu1 %v9175_v17  ;;  %2427 = vmatprep.subr.bf16.mxu0 %v2305_v24 }
 0xaef   :  { %8609 = vmatpush3.bf16.msra.mxu1 %v2306_v53  ;;  %2428 = vmatpush1.bf16.msra.mxu0 %v2304_v16 }
 0xaf2   :  { %8611 = vmatmul.mubr.bf16.vlgmr.msra.gmra.mrb[52].mxu1 %v10088_v8  ;;  %2446 = vmatmul.mubr.bf16.vlgmr.msra.gmra.mrb[24].mxu0 %v10088_v8 }
 0xbc5   :  { %v2488_v25 = vpop.f32.mrb[52].mxu1  ;;  %v2447_v23 = vpop.f32.mrb[24].mxu0 }
 0xbc6   :  { %v8612_v40 = vpop.f32.mrb[53].mxu1  ;;  %v2449_v34 = vpop.f32.mrb[25].mxu0 }
 0xbc7   :  { %v2491_v58 = vpop.f32.mrb[54].mxu1  ;;  %v2451_v33 = vpop.f32.mrb[26].mxu0 }
 0xbc8   :  { %v8613_v14 = vpop.f32.mrb[55].mxu1  ;;  %v2452_v49 = vpop.f32.mrb[27].mxu0 }
 0xbc9   :  { %9090 = dma.done.wait [#allocation20 + $0x6], 2048 }
 0xbca   :  { %9091 = vsyncadd [#allocation20 + $0x6], 4294965248  ;;  %2552 = vmatprep.mubr.bf16.mxu0 %v9177_v45  ;;  %2603 = vmatprep.mubr.bf16.mxu1 %v9177_v45  ;;  %v7903_v29 = vmul.f32 -1.442695, %v2488_v25  ;;  %v10128_v0 = vld [vmem:[#allocation8 + $0x8] sm:$0xff]  ;;  %v10130_v3 = vld [vmem:[#allocation8] sm:$0xff] }
 0xbcb   :  { %v10132_v8 = vld [vmem:[#allocation8 + $0x18] sm:$0xff]  ;;  %2520 = vmatprep.subr.bf16.mxu0 %v10128_v0  ;;  %v10137_v4 = vld [vmem:[#allocation8 + $0x10] sm:$0xff]  ;;  %v10139_v6 = vld [vmem:[#allocation8 + $0x28] sm:$0xff] }
 0xbcc   :  { %8942 = vpow2.f32 %v7903_v29  ;;  %2521 = vmatpush1.bf16.msra.mxu0 %v10130_v3  ;;  %v10143_v11 = vld [vmem:[#allocation8 + $0x20] sm:$0xff]  ;;  %v10145_v15 = vld [vmem:[#allocation8 + $0x38] sm:$0xff]  ;;  %v10149_v59 = vld [vmem:[#allocation8 + $0x30] sm:$0xff] }
 0xbcd   :  { %2522 = vmatprep.subr.bf16.mxu0 %v10132_v8  ;;  %v10151_v52 = vld [vmem:[#allocation8 + $0x48] sm:$0xff]  ;;  %v10155_v1 = vld [vmem:[#allocation8 + $0x40] sm:$0xff]  ;;  %v10157_v42 = vld [vmem:[#allocation8 + $0x58] sm:$0xff] }
 0xbce   :  { %v10161_v44 = vld [vmem:[#allocation8 + $0x50] sm:$0xff]  ;;  %v10163_v19 = vld [vmem:[#allocation8 + $0x68] sm:$0xff]  ;;  %v10167_v56 = vld [vmem:[#allocation8 + $0x60] sm:$0xff] }
 0xbcf   :  { %v10169_v31 = vld [vmem:[#allocation8 + $0x78] sm:$0xff]  ;;  %v10173_v50 = vld [vmem:[#allocation8 + $0x70] sm:$0xff] }
 0xbd0   :  { %2523 = vmatpush1.bf16.msra.mxu0 %v10137_v4 }
 0xbd1   :  { %2524 = vmatprep.subr.bf16.mxu0 %v10139_v6 }
 0xbd4   :  { %2525 = vmatpush1.bf16.msra.mxu0 %v10143_v11 }
 0xbd5   :  { %2526 = vmatprep.subr.bf16.mxu0 %v10145_v15 }
 0xbd6   :  { %v8943_v36 = vpop.eup %8942 }
 0xbd7   :  { %v2516_v28 = vadd.f32 1.0, %v8943_v36 }
 0xbd8   :  { %2527 = vmatpush1.bf16.msra.mxu0 %v10149_v59 }
 0xbd9   :  { %2528 = vmatprep.subr.bf16.mxu0 %v10151_v52  ;;  %8944 = vrcp.f32 %v2516_v28 }
 0xbdc   :  { %2529 = vmatpush1.bf16.msra.mxu0 %v10155_v1 }
 0xbdd   :  { %2530 = vmatprep.subr.bf16.mxu0 %v10157_v42 }
 0xbe0   :  { %2531 = vmatpush1.bf16.msra.mxu0 %v10161_v44 }
 0xbe1   :  { %2532 = vmatprep.subr.bf16.mxu0 %v10163_v19 }
 0xbe3   :  { %v8945_v5 = vpop.eup %8944 }
 0xbe4   :  { %2533 = vmatpush1.bf16.msra.mxu0 %v10167_v56  ;;  %v2519_v37 = vpack.c.bf16 %v8945_v5, %v8945_v5 }
 0xbe5   :  { %2534 = vmatprep.subr.bf16.mxu0 %v10169_v31 }
 0xbe8   :  { %2535 = vmatpush1.bf16.msra.mxu0 %v10173_v50 }
 0xbeb   :  { %2553 = vmatmul.mubr.bf16.vlgmr.msra.gmra.mrb[28].mxu0 %v2519_v37 }
 0xcbe   :  { %v2554_v2 = vpop.f32.mrb[28].mxu0 }
 0xcbf   :  { %v2561_v9 = vmul.f32 %v2554_v2, %v2447_v23  ;;  %v2556_v30 = vpop.f32.mrb[29].mxu0 }
 0xcc0   :  { %v2562_v55 = vmul.f32 %v2556_v30, %v2449_v34  ;;  %v2558_v13 = vpop.f32.mrb[30].mxu0 }
 0xcc1   :  { %v2559_v47 = vpop.f32.mrb[31].mxu0  ;;  %v2563_v60 = vpack.c.bf16 %v2561_v9, %v2561_v9 }
 0xcc2   :  { %v2564_v61 = vpack.c.bf16 %v2562_v55, %v2562_v55 }
 0xcc3   :  { %v2566_v21 = vsel %vm1055_vm0, %v2563_v60, 0 }
 0xcc4   :  { %7904 = vmatprep.subr.msk.bf16.mxu1 %vm1055_vm0, %v2564_v61 }
 0xcc5   :  { %2572 = vmatpush1.bf16.msra.mxu1 %v2566_v21 }
 0xcc6   :  { %7906 = vmatprep.subr.msk.bf16.mxu1 %vm1055_vm0, %v2564_v61 }
 0xcc8   :  { %7905 = vmatmul.mubr.msk.bf16.vlgmr.msra.gmra.mrb[56].mxu1 %vm1051_vm9, %v9826_v27 }
 0xcc9   :  { %2615 = vmatpush1.bf16.msra.mxu1 %v2566_v21  ;;  %2646 = vmatprep.mubr.bf16.mxu1 %v9177_v45 }
 0xcd0   :  { %7907 = vmatmul.mubr.msk.bf16.vlgmr.msra.gmra.mrb[60].mxu1 %vm1051_vm9, %v9814_v41 }
 0xd9b   :  { %v2605_v54 = vpop.f32.mrb[56].mxu1 }
 0xd9c   :  { %v10184_v32 = vpack.c.bf16 %v2605_v54, %v2605_v54  ;;  %v2607_v20 = vpop.f32.mrb[57].mxu1 }
 0xd9d   :  { %v10186_v62 = vpack.c.bf16 %v2607_v20, %v2607_v20  ;;  %v2609_v12 = vpop.f32.mrb[58].mxu1 }
 0xd9e   :  { %v2610_v22 = vpop.f32.mrb[59].mxu1 }
 0xda3   :  { %v2648_v48 = vpop.f32.mrb[60].mxu1 }
 0xda4   :  { %v10188_v38 = vpack.c.bf16 %v2648_v48, %v2648_v48  ;;  %v2650_v7 = vpop.f32.mrb[61].mxu1 }
 0xda5   :  { %v2656_v10 = vpack.c.bf16 %v2650_v7, %v2650_v7  ;;  %v2652_v39 = vpop.f32.mrb[62].mxu1 }
 0xda6   :  { %v2653_v18 = vpop.f32.mrb[63].mxu1 }
 0xda7   :  { %9092 = dma.done.wait [#allocation20 + $0x7], 12288 }
 0xda8   :  { %9093 = vsyncadd [#allocation20 + $0x7], 4294955008  ;;  %2831 = vmatprep.mubr.bf16.mxu0 %v2656_v10  ;;  %2790 = vmatprep.mubr.bf16.mxu1 %v2656_v10  ;;  %v2711_v26 = vld [vmem:[#allocation9 + $0x188] sm:$0xff]  ;;  %v2710_v24 = vld [vmem:[#allocation9 + $0x180] sm:$0xff] }
 0xda9   :  { %v2714_v53 = vld [vmem:[#allocation9 + $0x1a0] sm:$0xff]  ;;  %2758 = vmatprep.subr.bf16.mxu1 %v2711_v26  ;;  %v2713_v16 = vld [vmem:[#allocation9 + $0x198] sm:$0xff]  ;;  %v2736_v23 = vld [vmem:[#allocation9 + $0x250] sm:$0xff] }
 0xdaa   :  { %2759 = vmatpush1.bf16.msra.mxu1 %v2710_v24  ;;  %v2717_v25 = vld [vmem:[#allocation9 + $0x1b8] sm:$0xff]  ;;  %8065 = vmatprep.subr.bf16.mxu0 %v2736_v23  ;;  %v2712_v40 = vld [vmem:[#allocation9 + $0x190] sm:$0xff]  ;;  %v2739_v34 = vld [vmem:[#allocation9 + $0x268] sm:$0xff] }
 0xdab   :  { %2760 = vmatprep.subr.bf16.mxu1 %v2714_v53  ;;  %v2716_v58 = vld [vmem:[#allocation9 + $0x1b0] sm:$0xff]  ;;  %8066 = vmatpush3.bf16.msra.mxu0 %v2712_v40  ;;  %v2715_v14 = vld [vmem:[#allocation9 + $0x1a8] sm:$0xff]  ;;  %v2742_v49 = vld [vmem:[#allocation9 + $0x280] sm:$0xff] }
 0xdac   :  { %v2720_v33 = vld [vmem:[#allocation9 + $0x1d0] sm:$0xff]  ;;  %8067 = vmatprep.subr.bf16.mxu0 %v2739_v34  ;;  %v2719_v29 = vld [vmem:[#allocation9 + $0x1c8] sm:$0xff]  ;;  %v2718_v28 = vld [vmem:[#allocation9 + $0x1c0] sm:$0xff] }
 0xdad   :  { %v2723_v36 = vld [vmem:[#allocation9 + $0x1e8] sm:$0xff]  ;;  %v2745_v5 = vld [vmem:[#allocation9 + $0x298] sm:$0xff]  ;;  %v2722_v37 = vld [vmem:[#allocation9 + $0x1e0] sm:$0xff] }
 0xdae   :  { %2761 = vmatpush1.bf16.msra.mxu1 %v2713_v16  ;;  %v2726_v2 = vld [vmem:[#allocation9 + $0x200] sm:$0xff]  ;;  %v2721_v9 = vld [vmem:[#allocation9 + $0x1d8] sm:$0xff]  ;;  %v2748_v30 = vld [vmem:[#allocation9 + $0x2b0] sm:$0xff] }
 0xdaf   :  { %2762 = vmatprep.subr.bf16.mxu1 %v2717_v25  ;;  %8068 = vmatpush3.bf16.msra.mxu0 %v2715_v14  ;;  %v2725_v55 = vld [vmem:[#allocation9 + $0x1f8] sm:$0xff]  ;;  %v2724_v47 = vld [vmem:[#allocation9 + $0x1f0] sm:$0xff]  ;;  %v2751_v60 = vld [vmem:[#allocation9 + $0x2c8] sm:$0xff] }
 0xdb0   :  { %8069 = vmatprep.subr.bf16.mxu0 %v2742_v49  ;;  %v2729_v13 = vld [vmem:[#allocation9 + $0x218] sm:$0xff]  ;;  %v2728_v61 = vld [vmem:[#allocation9 + $0x210] sm:$0xff]  ;;  %v2727_v54 = vld [vmem:[#allocation9 + $0x208] sm:$0xff] }
 0xdb1   :  { %v2732_v21 = vld [vmem:[#allocation9 + $0x230] sm:$0xff]  ;;  %v2754_v20 = vld [vmem:[#allocation9 + $0x2e0] sm:$0xff]  ;;  %v2731_v12 = vld [vmem:[#allocation9 + $0x228] sm:$0xff] }
 0xdb2   :  { %2763 = vmatpush1.bf16.msra.mxu1 %v2716_v58  ;;  %v2735_v22 = vld [vmem:[#allocation9 + $0x248] sm:$0xff]  ;;  %v2730_v48 = vld [vmem:[#allocation9 + $0x220] sm:$0xff]  ;;  %v2757_v7 = vld [vmem:[#allocation9 + $0x2f8] sm:$0xff] }
 0xdb3   :  { %2764 = vmatprep.subr.bf16.mxu1 %v2720_v33  ;;  %8070 = vmatpush3.bf16.msra.mxu0 %v2718_v28  ;;  %v2734_v10 = vld [vmem:[#allocation9 + $0x240] sm:$0xff]  ;;  %v2733_v18 = vld [vmem:[#allocation9 + $0x238] sm:$0xff]  ;;  %v2687_v26 = vld [vmem:[#allocation9 + $0xd0] sm:$0xff] }
 0xdb4   :  { %8071 = vmatprep.subr.bf16.mxu0 %v2745_v5  ;;  %v2738_v39 = vld [vmem:[#allocation9 + $0x260] sm:$0xff]  ;;  %v2737_v24 = vld [vmem:[#allocation9 + $0x258] sm:$0xff]  ;;  %v2663_v16 = vld [vmem:[#allocation9 + $0x10] sm:$0xff] }
 0xdb5   :  { %v2741_v53 = vld [vmem:[#allocation9 + $0x278] sm:$0xff]  ;;  %v2690_v25 = vld [vmem:[#allocation9 + $0xe8] sm:$0xff]  ;;  %v2740_v23 = vld [vmem:[#allocation9 + $0x270] sm:$0xff] }
 0xdb6   :  { %2765 = vmatpush1.bf16.msra.mxu1 %v2719_v29  ;;  %v2744_v40 = vld [vmem:[#allocation9 + $0x290] sm:$0xff]  ;;  %v2666_v34 = vld [vmem:[#allocation9 + $0x28] sm:$0xff]  ;;  %v2693_v58 = vld [vmem:[#allocation9 + $0x100] sm:$0xff] }
 0xdb7   :  { %2766 = vmatprep.subr.bf16.mxu1 %v2723_v36  ;;  %8072 = vmatpush3.bf16.msra.mxu0 %v2721_v9  ;;  %v2743_v33 = vld [vmem:[#allocation9 + $0x288] sm:$0xff]  ;;  %v2669_v49 = vld [vmem:[#allocation9 + $0x40] sm:$0xff]  ;;  %v2696_v29 = vld [vmem:[#allocation9 + $0x118] sm:$0xff] }
 0xdb8   :  { %8073 = vmatprep.subr.bf16.mxu0 %v2748_v30  ;;  %v2747_v14 = vld [vmem:[#allocation9 + $0x2a8] sm:$0xff]  ;;  %v2746_v36 = vld [vmem:[#allocation9 + $0x2a0] sm:$0xff]  ;;  %v2672_v5 = vld [vmem:[#allocation9 + $0x58] sm:$0xff] }
 0xdb9   :  { %v2750_v28 = vld [vmem:[#allocation9 + $0x2c0] sm:$0xff]  ;;  %v2753_v9 = vld [vmem:[#allocation9 + $0x2d8] sm:$0xff]  ;;  %v2675_v30 = vld [vmem:[#allocation9 + $0x70] sm:$0xff] }
 0xdba   :  { %2767 = vmatpush1.bf16.msra.mxu1 %v2722_v37  ;;  %v2699_v37 = vld [vmem:[#allocation9 + $0x130] sm:$0xff] }
 0xdbb   :  { %2768 = vmatprep.subr.bf16.mxu1 %v2726_v2  ;;  %8074 = vmatpush3.bf16.msra.mxu0 %v2724_v47  ;;  %v2749_v2 = vld [vmem:[#allocation9 + $0x2b8] sm:$0xff]  ;;  %v2756_v47 = vld [vmem:[#allocation9 + $0x2f0] sm:$0xff] }
 0xdbc   :  { %8075 = vmatprep.subr.bf16.mxu0 %v2751_v60  ;;  %v2678_v60 = vld [vmem:[#allocation9 + $0x88] sm:$0xff] }
 0xdbe   :  { %2769 = vmatpush1.bf16.msra.mxu1 %v2725_v55  ;;  %v2702_v55 = vld [vmem:[#allocation9 + $0x148] sm:$0xff] }
 0xdbf   :  { %2770 = vmatprep.subr.bf16.mxu1 %v2729_v13  ;;  %8076 = vmatpush3.bf16.msra.mxu0 %v2727_v54  ;;  %v2752_v13 = vld [vmem:[#allocation9 + $0x2d0] sm:$0xff]  ;;  %v2662_v54 = vld [vmem:[#allocation9 + $0x8] sm:$0xff] }
 0xdc0   :  { %8077 = vmatprep.subr.bf16.mxu0 %v2754_v20  ;;  %v2681_v20 = vld [vmem:[#allocation9 + $0xa0] sm:$0xff] }
 0xdc2   :  { %2771 = vmatpush1.bf16.msra.mxu1 %v2728_v61  ;;  %v2705_v61 = vld [vmem:[#allocation9 + $0x160] sm:$0xff] }
 0xdc3   :  { %2772 = vmatprep.subr.bf16.mxu1 %v2732_v21  ;;  %8078 = vmatpush3.bf16.msra.mxu0 %v2730_v48  ;;  %v2755_v21 = vld [vmem:[#allocation9 + $0x2e8] sm:$0xff]  ;;  %v2665_v48 = vld [vmem:[#allocation9 + $0x20] sm:$0xff] }
 0xdc4   :  { %8079 = vmatprep.subr.bf16.mxu0 %v2757_v7  ;;  %v2684_v7 = vld [vmem:[#allocation9 + $0xb8] sm:$0xff] }
 0xdc6   :  { %2773 = vmatpush1.bf16.msra.mxu1 %v2731_v12  ;;  %v2708_v12 = vld [vmem:[#allocation9 + $0x178] sm:$0xff] }
 0xdc7   :  { %2774 = vmatprep.subr.bf16.mxu1 %v2735_v22  ;;  %8080 = vmatpush3.bf16.msra.mxu0 %v2733_v18  ;;  %v2661_v22 = vld [vmem:[#allocation9] sm:$0xff]  ;;  %v2667_v18 = vld [vmem:[#allocation9 + $0x30] sm:$0xff] }
 0xdc8   :  { %8087 = vmatprep.subr.bf16.mxu0 %v2687_v26  ;;  %v2671_v26 = vld [vmem:[#allocation9 + $0x50] sm:$0xff] }
 0xdca   :  { %2775 = vmatpush1.bf16.msra.mxu1 %v2734_v10  ;;  %2832 = vmatmul.mubr.bf16.vlgmr.msra.gmra.mrb[32].mxu0 %v10188_v38  ;;  %v2664_v10 = vld [vmem:[#allocation9 + $0x18] sm:$0xff] }
 0xdcb   :  { %2776 = vmatprep.subr.bf16.mxu1 %v2738_v39  ;;  %8088 = vmatpush3.bf16.msra.mxu0 %v2663_v16  ;;  %v2668_v39 = vld [vmem:[#allocation9 + $0x38] sm:$0xff]  ;;  %v2677_v16 = vld [vmem:[#allocation9 + $0x80] sm:$0xff] }
 0xdcc   :  { %8089 = vmatprep.subr.bf16.mxu0 %v2690_v25  ;;  %2912 = vmatprep.mubr.bf16.mxu0 %v10186_v62  ;;  %v2680_v25 = vld [vmem:[#allocation9 + $0x98] sm:$0xff] }
 0xdce   :  { %2777 = vmatpush1.bf16.msra.mxu1 %v2737_v24  ;;  %v2670_v24 = vld [vmem:[#allocation9 + $0x48] sm:$0xff] }
 0xdcf   :  { %2778 = vmatprep.subr.bf16.mxu1 %v2741_v53  ;;  %8090 = vmatpush3.bf16.msra.mxu0 %v2666_v34  ;;  %v2674_v53 = vld [vmem:[#allocation9 + $0x68] sm:$0xff] }
 0xdd0   :  { %8091 = vmatprep.subr.bf16.mxu0 %v2693_v58  ;;  %v2682_v34 = vld [vmem:[#allocation9 + $0xa8] sm:$0xff] }
 0xdd1   :  { %v2686_v58 = vld [vmem:[#allocation9 + $0xc8] sm:$0xff] }
 0xdd2   :  { %2779 = vmatpush1.bf16.msra.mxu1 %v2740_v23  ;;  %v2679_v23 = vld [vmem:[#allocation9 + $0x90] sm:$0xff] }
 0xdd3   :  { %2780 = vmatprep.subr.bf16.mxu1 %v2744_v40  ;;  %8092 = vmatpush3.bf16.msra.mxu0 %v2669_v49  ;;  %v2683_v40 = vld [vmem:[#allocation9 + $0xb0] sm:$0xff]  ;;  %v2688_v49 = vld [vmem:[#allocation9 + $0xd8] sm:$0xff] }
 0xdd4   :  { %8093 = vmatprep.subr.bf16.mxu0 %v2696_v29  ;;  %v2692_v29 = vld [vmem:[#allocation9 + $0xf8] sm:$0xff] }
 0xdd6   :  { %2781 = vmatpush1.bf16.msra.mxu1 %v2743_v33  ;;  %v2685_v33 = vld [vmem:[#allocation9 + $0xc0] sm:$0xff] }
 0xdd7   :  { %2782 = vmatprep.subr.bf16.mxu1 %v2747_v14  ;;  %8094 = vmatpush3.bf16.msra.mxu0 %v2672_v5  ;;  %v2689_v14 = vld [vmem:[#allocation9 + $0xe0] sm:$0xff]  ;;  %v2694_v5 = vld [vmem:[#allocation9 + $0x108] sm:$0xff] }
 0xdd8   :  { %8095 = vmatprep.subr.bf16.mxu0 %v2699_v37  ;;  %v2698_v37 = vld [vmem:[#allocation9 + $0x128] sm:$0xff] }
 0xdda   :  { %2783 = vmatpush1.bf16.msra.mxu1 %v2746_v36  ;;  %v2691_v36 = vld [vmem:[#allocation9 + $0xf0] sm:$0xff] }
 0xddb   :  { %2784 = vmatprep.subr.bf16.mxu1 %v2750_v28  ;;  %8096 = vmatpush3.bf16.msra.mxu0 %v2675_v30  ;;  %v2695_v28 = vld [vmem:[#allocation9 + $0x110] sm:$0xff]  ;;  %v2700_v30 = vld [vmem:[#allocation9 + $0x138] sm:$0xff] }
 0xddc   :  { %8097 = vmatprep.subr.bf16.mxu0 %v2702_v55  ;;  %v2704_v55 = vld [vmem:[#allocation9 + $0x158] sm:$0xff] }
 0xdde   :  { %2785 = vmatpush1.bf16.msra.mxu1 %v2749_v2  ;;  %v2697_v2 = vld [vmem:[#allocation9 + $0x120] sm:$0xff] }
 0xddf   :  { %2786 = vmatprep.subr.bf16.mxu1 %v2753_v9  ;;  %8098 = vmatpush3.bf16.msra.mxu0 %v2678_v60  ;;  %v2701_v9 = vld [vmem:[#allocation9 + $0x140] sm:$0xff]  ;;  %v2706_v60 = vld [vmem:[#allocation9 + $0x168] sm:$0xff] }
 0xde0   :  { %8099 = vmatprep.subr.bf16.mxu0 %v2705_v61 }
 0xde2   :  { %2787 = vmatpush1.bf16.msra.mxu1 %v2752_v13  ;;  %v2703_v13 = vld [vmem:[#allocation9 + $0x150] sm:$0xff] }
 0xde3   :  { %2788 = vmatprep.subr.bf16.mxu1 %v2756_v47  ;;  %8100 = vmatpush3.bf16.msra.mxu0 %v2681_v20  ;;  %v2707_v47 = vld [vmem:[#allocation9 + $0x170] sm:$0xff] }
 0xde4   :  { %8101 = vmatprep.subr.bf16.mxu0 %v2708_v12 }
 0xde6   :  { %2789 = vmatpush1.bf16.msra.mxu1 %v2755_v21 }
 0xde7   :  { %2839 = vmatprep.subr.bf16.mxu1 %v2662_v54  ;;  %8102 = vmatpush3.bf16.msra.mxu0 %v2684_v7 }
 0xde9   :  { %2791 = vmatmul.mubr.bf16.vlgmr.msra.gmra.mrb[64].mxu1 %v10188_v38  ;;  %v2673_v38 = vld [vmem:[#allocation9 + $0x60] sm:$0xff] }
 0xdea   :  { %2840 = vmatpush1.bf16.msra.mxu1 %v2661_v22  ;;  %2871 = vmatprep.mubr.bf16.mxu1 %v10186_v62  ;;  %v2676_v62 = vld [vmem:[#allocation9 + $0x78] sm:$0xff] }
 0xdeb   :  { %2841 = vmatprep.subr.bf16.mxu1 %v2665_v48  ;;  %2913 = vmatmul.mubr.bf16.vlgmr.msra.gmra.mrb[36].mxu0 %v10184_v32 }
 0xdee   :  { %2842 = vmatpush1.bf16.msra.mxu1 %v2664_v10 }
 0xdef   :  { %2843 = vmatprep.subr.bf16.mxu1 %v2668_v39 }
 0xdf2   :  { %2844 = vmatpush1.bf16.msra.mxu1 %v2667_v18 }
 0xdf3   :  { %2845 = vmatprep.subr.bf16.mxu1 %v2671_v26 }
 0xdf6   :  { %2846 = vmatpush1.bf16.msra.mxu1 %v2670_v24 }
 0xdf7   :  { %2847 = vmatprep.subr.bf16.mxu1 %v2674_v53 }
 0xdfa   :  { %2848 = vmatpush1.bf16.msra.mxu1 %v2673_v38 }
 0xdfb   :  { %2849 = vmatprep.subr.bf16.mxu1 %v2677_v16 }
 0xdfe   :  { %2850 = vmatpush1.bf16.msra.mxu1 %v2676_v62 }
 0xdff   :  { %2851 = vmatprep.subr.bf16.mxu1 %v2680_v25 }
 0xe02   :  { %2852 = vmatpush1.bf16.msra.mxu1 %v2679_v23 }
 0xe03   :  { %2853 = vmatprep.subr.bf16.mxu1 %v2683_v40 }
 0xe06   :  { %2854 = vmatpush1.bf16.msra.mxu1 %v2682_v34 }
 0xe07   :  { %2855 = vmatprep.subr.bf16.mxu1 %v2686_v58 }
 0xe0a   :  { %2856 = vmatpush1.bf16.msra.mxu1 %v2685_v33 }
 0xe0b   :  { %2857 = vmatprep.subr.bf16.mxu1 %v2689_v14 }
 0xe0e   :  { %2858 = vmatpush1.bf16.msra.mxu1 %v2688_v49 }
 0xe0f   :  { %2859 = vmatprep.subr.bf16.mxu1 %v2692_v29 }
 0xe12   :  { %2860 = vmatpush1.bf16.msra.mxu1 %v2691_v36 }
 0xe13   :  { %2861 = vmatprep.subr.bf16.mxu1 %v2695_v28 }
 0xe16   :  { %2862 = vmatpush1.bf16.msra.mxu1 %v2694_v5 }
 0xe17   :  { %2863 = vmatprep.subr.bf16.mxu1 %v2698_v37 }
 0xe1a   :  { %2864 = vmatpush1.bf16.msra.mxu1 %v2697_v2 }
 0xe1b   :  { %2865 = vmatprep.subr.bf16.mxu1 %v2701_v9 }
 0xe1e   :  { %2866 = vmatpush1.bf16.msra.mxu1 %v2700_v30 }
 0xe1f   :  { %2867 = vmatprep.subr.bf16.mxu1 %v2704_v55 }
 0xe22   :  { %2868 = vmatpush1.bf16.msra.mxu1 %v2703_v13 }
 0xe23   :  { %2869 = vmatprep.subr.bf16.mxu1 %v2707_v47 }
 0xe26   :  { %2870 = vmatpush1.bf16.msra.mxu1 %v2706_v60 }
 0xe29   :  { %2872 = vmatmul.mubr.bf16.vlgmr.msra.gmra.mrb[64].mxu1 %v10184_v32 }
 0xe9d   :  { %v8081_v61 = vpop.f32.mrb[32].mxu0 }
 0xe9e   :  { %v8082_v21 = vpop.f32.mrb[33].mxu0 }
 0xe9f   :  { %v8083_v54 = vadd.f32 %v8082_v21, %v8081_v61  ;;  %v8084_v20 = vpop.f32.mrb[34].mxu0 }
 0xea0   :  { %v8085_v12 = vpop.f32.mrb[35].mxu0 }
 0xebe   :  { %v8103_v22 = vpop.f32.mrb[36].mxu0 }
 0xebf   :  { %v8104_v48 = vpop.f32.mrb[37].mxu0 }
 0xec0   :  { %v8105_v7 = vadd.f32 %v8104_v48, %v8103_v22  ;;  %v8106_v10 = vpop.f32.mrb[38].mxu0 }
 0xec1   :  { %v8107_v39 = vpop.f32.mrb[39].mxu0 }
 0xec2   :  { %v2915_v18 = vadd.f32 %v8105_v7, %v8083_v54 }
 0xefc   :  { %v10196_v26 = vpop.f32.mrb[64].mxu1 }
 0xefd   :  { %v10198_v24 = vpop.f32.mrb[65].mxu1 }
 0xefe   :  { %v2877_v53 = vpop.f32.mrb[66].mxu1 }
 0xeff   :  { %v2878_v38 = vpop.f32.mrb[67].mxu1 }
 0xf00   :  { %9094 = dma.done.wait [#allocation20 + $0x8], 4096 }
 0xf01   :  { %9095 = vsyncadd [#allocation20 + $0x8], 4294963200  ;;  %3044 = vmatprep.subr.bf16.mxu1 %v10128_v0  ;;  %2987 = vmatprep.mubr.bf16.mxu0 %v9177_v45  ;;  %v7908_v32 = vmul.f32 -1.442695, %v2915_v18  ;;  %v2940_v16 = vld [vmem:[#allocation10 + $0x88] sm:$0xff]  ;;  %v2939_v62 = vld [vmem:[#allocation10 + $0x80] sm:$0xff] }
 0xf02   :  { %3045 = vmatpush1.bf16.msra.mxu1 %v10130_v3  ;;  %3076 = vmatprep.mubr.bf16.mxu1 %v9177_v45  ;;  %v2942_v25 = vld [vmem:[#allocation10 + $0x98] sm:$0xff]  ;;  %v2941_v0 = vld [vmem:[#allocation10 + $0x90] sm:$0xff]  ;;  %v2944_v3 = vld [vmem:[#allocation10 + $0xa8] sm:$0xff] }
 0xf03   :  { %3046 = vmatprep.subr.bf16.mxu1 %v10132_v8  ;;  %8946 = vpow2.f32 %v7908_v32  ;;  %2955 = vmatprep.subr.bf16.mxu0 %v2940_v16  ;;  %v2950_v40 = vld [vmem:[#allocation10 + $0xd8] sm:$0xff]  ;;  %v2923_v33 = vld [vmem:[#allocation10 + $0x8] sm:$0xff]  ;;  %v2926_v49 = vld [vmem:[#allocation10 + $0x20] sm:$0xff] }
 0xf04   :  { %2956 = vmatpush1.bf16.msra.mxu0 %v2939_v62  ;;  %v2925_v14 = vld [vmem:[#allocation10 + $0x18] sm:$0xff]  ;;  %v2928_v36 = vld [vmem:[#allocation10 + $0x30] sm:$0xff]  ;;  %v2931_v28 = vld [vmem:[#allocation10 + $0x48] sm:$0xff] }
 0xf05   :  { %2957 = vmatprep.subr.bf16.mxu0 %v2942_v25  ;;  %v2929_v29 = vld [vmem:[#allocation10 + $0x38] sm:$0xff]  ;;  %v2930_v5 = vld [vmem:[#allocation10 + $0x40] sm:$0xff]  ;;  %v2932_v43 = vld [vmem:[#allocation10 + $0x50] sm:$0xff] }
 0xf06   :  { %3047 = vmatpush1.bf16.msra.mxu1 %v10137_v4  ;;  %v2943_v4 = vld [vmem:[#allocation10 + $0xa0] sm:$0xff]  ;;  %v2933_v37 = vld [vmem:[#allocation10 + $0x58] sm:$0xff]  ;;  %v2936_v30 = vld [vmem:[#allocation10 + $0x70] sm:$0xff] }
 0xf07   :  { %3048 = vmatprep.subr.bf16.mxu1 %v10139_v6  ;;  %v2946_v6 = vld [vmem:[#allocation10 + $0xb8] sm:$0xff]  ;;  %v2934_v2 = vld [vmem:[#allocation10 + $0x60] sm:$0xff] }
 0xf08   :  { %2958 = vmatpush1.bf16.msra.mxu0 %v2941_v0  ;;  %v2937_v9 = vld [vmem:[#allocation10 + $0x78] sm:$0xff] }
 0xf09   :  { %2959 = vmatprep.subr.bf16.mxu0 %v2944_v3 }
 0xf0a   :  { %3049 = vmatpush1.bf16.msra.mxu1 %v10143_v11  ;;  %v2945_v11 = vld [vmem:[#allocation10 + $0xb0] sm:$0xff] }
 0xf0b   :  { %3050 = vmatprep.subr.bf16.mxu1 %v10145_v15  ;;  %v2948_v15 = vld [vmem:[#allocation10 + $0xc8] sm:$0xff] }
 0xf0c   :  { %2960 = vmatpush1.bf16.msra.mxu0 %v2943_v4 }
 0xf0d   :  { %v8947_v23 = vpop.eup %8946  ;;  %2961 = vmatprep.subr.bf16.mxu0 %v2946_v6 }
 0xf0e   :  { %3051 = vmatpush1.bf16.msra.mxu1 %v10149_v59  ;;  %v3040_v8 = vadd.f32 1.0, %v8947_v23  ;;  %v2947_v59 = vld [vmem:[#allocation10 + $0xc0] sm:$0xff] }
 0xf0f   :  { %3052 = vmatprep.subr.bf16.mxu1 %v10151_v52  ;;  %v2949_v52 = vld [vmem:[#allocation10 + $0xd0] sm:$0xff] }
 0xf10   :  { %8948 = vrcp.f32 %v3040_v8  ;;  %2962 = vmatpush1.bf16.msra.mxu0 %v2945_v11 }
 0xf11   :  { %2963 = vmatprep.subr.bf16.mxu0 %v2948_v15 }
 0xf12   :  { %3053 = vmatpush1.bf16.msra.mxu1 %v10155_v1  ;;  %v2952_v1 = vld [vmem:[#allocation10 + $0xe8] sm:$0xff] }
 0xf13   :  { %3054 = vmatprep.subr.bf16.mxu1 %v10157_v42  ;;  %v2951_v42 = vld [vmem:[#allocation10 + $0xe0] sm:$0xff] }
 0xf14   :  { %2964 = vmatpush1.bf16.msra.mxu0 %v2947_v59 }
 0xf15   :  { %2965 = vmatprep.subr.bf16.mxu0 %v2950_v40 }
 0xf16   :  { %3055 = vmatpush1.bf16.msra.mxu1 %v10161_v44  ;;  %v2954_v44 = vld [vmem:[#allocation10 + $0xf8] sm:$0xff] }
 0xf17   :  { %3056 = vmatprep.subr.bf16.mxu1 %v10163_v19  ;;  %v2953_v19 = vld [vmem:[#allocation10 + $0xf0] sm:$0xff] }
 0xf18   :  { %2966 = vmatpush1.bf16.msra.mxu0 %v2949_v52 }
 0xf19   :  { %2967 = vmatprep.subr.bf16.mxu0 %v2952_v1 }
 0xf1a   :  { %v8949_v34 = vpop.eup %8948  ;;  %3057 = vmatpush1.bf16.msra.mxu1 %v10167_v56  ;;  %v2922_v56 = vld [vmem:[#allocation10] sm:$0xff] }
 0xf1b   :  { %3058 = vmatprep.subr.bf16.mxu1 %v10169_v31  ;;  %v3043_v58 = vpack.c.bf16 %v8949_v34, %v8949_v34  ;;  %v2924_v31 = vld [vmem:[#allocation10 + $0x10] sm:$0xff] }
 0xf1c   :  { %2968 = vmatpush1.bf16.msra.mxu0 %v2951_v42 }
 0xf1d   :  { %2969 = vmatprep.subr.bf16.mxu0 %v2954_v44 }
 0xf1e   :  { %3059 = vmatpush1.bf16.msra.mxu1 %v10173_v50  ;;  %v2927_v50 = vld [vmem:[#allocation10 + $0x28] sm:$0xff] }
 0xf20   :  { %2970 = vmatpush1.bf16.msra.mxu0 %v2953_v19 }
 0xf21   :  { %3077 = vmatmul.mubr.bf16.vlgmr.msra.gmra.mrb[68].mxu1 %v3043_v58  ;;  %2996 = vmatprep.subr.bf16.mxu0 %v2923_v33 }
 0xf22   :  { %3258 = vmatprep.mubr.bf16.mxu1 %v9177_v45 }
 0xf23   :  { %2988 = vmatmul.mubr.bf16.vlgmr.msra.gmra.mrb[40].mxu0 %v2279_v51  ;;  %v2935_v51 = vld [vmem:[#allocation10 + $0x68] sm:$0xff] }
 0xf24   :  { %2997 = vmatpush1.bf16.msra.mxu0 %v2922_v56  ;;  %3028 = vmatprep.mubr.bf16.mxu0 %v9177_v45 }
 0xf25   :  { %2998 = vmatprep.subr.bf16.mxu0 %v2925_v14 }
 0xf28   :  { %2999 = vmatpush1.bf16.msra.mxu0 %v2924_v31 }
 0xf29   :  { %3000 = vmatprep.subr.bf16.mxu0 %v2927_v50 }
 0xf2c   :  { %3001 = vmatpush1.bf16.msra.mxu0 %v2926_v49 }
 0xf2d   :  { %3002 = vmatprep.subr.bf16.mxu0 %v2929_v29 }
 0xf30   :  { %3003 = vmatpush1.bf16.msra.mxu0 %v2928_v36 }
 0xf31   :  { %3004 = vmatprep.subr.bf16.mxu0 %v2931_v28 }
 0xf34   :  { %3005 = vmatpush1.bf16.msra.mxu0 %v2930_v5 }
 0xf35   :  { %3006 = vmatprep.subr.bf16.mxu0 %v2933_v37 }
 0xf38   :  { %3007 = vmatpush1.bf16.msra.mxu0 %v2932_v43 }
 0xf39   :  { %3008 = vmatprep.subr.bf16.mxu0 %v2935_v51 }
 0xf3c   :  { %3009 = vmatpush1.bf16.msra.mxu0 %v2934_v2 }
 0xf3d   :  { %3010 = vmatprep.subr.bf16.mxu0 %v2937_v9 }
 0xf40   :  { %3011 = vmatpush1.bf16.msra.mxu0 %v2936_v30 }
 0xf43   :  { %3029 = vmatmul.mubr.bf16.vlgmr.msra.gmra.mrb[44].mxu0 %v2238_v35 }
 0xf44   :  { %3129 = vmatprep.mubr.bf16.mxu0 %v9177_v45 }
 0xff4   :  { %v3078_v55 = vpop.f32.mrb[68].mxu1 }
 0xff5   :  { %v3080_v13 = vpop.f32.mrb[69].mxu1  ;;  %v3085_v12 = vmul.f32 %v3078_v55, %v10196_v26 }
 0xff6   :  { %v3082_v47 = vpop.f32.mrb[70].mxu1  ;;  %v2989_v61 = vpop.f32.mrb[40].mxu0  ;;  %v3086_v22 = vmul.f32 %v3080_v13, %v10198_v24 }
 0xff7   :  { %v3083_v60 = vpop.f32.mrb[71].mxu1  ;;  %v2991_v21 = vpop.f32.mrb[41].mxu0 }
 0xff8   :  { %v2993_v54 = vpop.f32.mrb[42].mxu0 }
 0xff9   :  { %v2994_v20 = vpop.f32.mrb[43].mxu0 }
0x1016   :  { %v3030_v48 = vpop.f32.mrb[44].mxu0 }
0x1017   :  { %v3031_v7 = vadd.f32 %v3030_v48, %v2989_v61  ;;  %v3032_v10 = vpop.f32.mrb[45].mxu0 }
0x1018   :  { %v3033_v39 = vadd.f32 %v3032_v10, %v2991_v21  ;;  %v3034_v46 = vpop.f32.mrb[46].mxu0 }
0x1019   :  { %v3087_v35 = vadd.f32 %v3085_v12, %v3031_v7  ;;  %v3035_v18 = vpop.f32.mrb[47].mxu0 }
0x101a   :  { %v3088_v53 = vadd.f32 %v3086_v22, %v3033_v39 }
0x101b   :  { %v3089_v38 = vpack.c.bf16 %v3087_v35, %v3087_v35 }
0x101c   :  { %v3090_v32 = vpack.c.bf16 %v3088_v53, %v3088_v53 }
0x101d   :  { %v3092_v16 = vsel %vm1055_vm0, %v3089_v38, 0 }
0x101e   :  { %7909 = vmatprep.subr.msk.bf16.mxu0 %vm1055_vm0, %v3090_v32  ;;  %7915 = vmatprep.subr.msk.bf16.mxu1 %vm1055_vm0, %v3090_v32 }
0x101f   :  { %3098 = vmatpush1.bf16.msra.mxu0 %v3092_v16  ;;  %3227 = vmatpush1.bf16.msra.mxu1 %v3092_v16 }
0x1020   :  { %7911 = vmatprep.subr.msk.bf16.mxu0 %vm1055_vm0, %v3090_v32 }
0x1022   :  { %7910 = vmatmul.mubr.msk.bf16.vlgmr.msra.gmra.mrb[48].mxu0 %vm1051_vm9, %v9826_v27  ;;  %7916 = vmatmul.mubr.msk.bf16.vlgmr.msra.gmra.mrb[72].mxu1 %vm1051_vm9, %v9945_v57 }
0x1023   :  { %3141 = vmatpush1.bf16.msra.mxu0 %v3092_v16  ;;  %3172 = vmatprep.mubr.bf16.mxu0 %v9177_v45 }
0x1024   :  { %7913 = vmatprep.subr.msk.bf16.mxu0 %vm1055_vm0, %v3090_v32 }
0x102a   :  { %7912 = vmatmul.mubr.msk.bf16.vlgmr.msra.gmra.mrb[52].mxu0 %vm1051_vm9, %v9814_v41 }
0x102b   :  { %3184 = vmatpush1.bf16.msra.mxu0 %v3092_v16  ;;  %3215 = vmatprep.mubr.bf16.mxu0 %v9177_v45 }
0x1032   :  { %7914 = vmatmul.mubr.msk.bf16.vlgmr.msra.gmra.mrb[56].mxu0 %vm1051_vm9, %v9936_v63 }
0x10f5   :  { %v3131_v26 = vpop.f32.mrb[48].mxu0  ;;  %v3260_v24 = vpop.f32.mrb[72].mxu1 }
0x10f6   :  { %v10244_v62 = vpack.c.bf16 %v3131_v26, %v3131_v26  ;;  %v3133_v25 = vpop.f32.mrb[49].mxu0  ;;  %v10246_v0 = vpack.c.bf16 %v3260_v24, %v3260_v24  ;;  %v3262_v3 = vpop.f32.mrb[73].mxu1 }
0x10f7   :  { %v10248_v23 = vpack.c.bf16 %v3133_v25, %v3133_v25  ;;  %v3135_v8 = vpop.f32.mrb[50].mxu0  ;;  %v10250_v4 = vpack.c.bf16 %v3262_v3, %v3262_v3  ;;  %v3264_v6 = vpop.f32.mrb[74].mxu1 }
0x10f8   :  { %v3136_v11 = vpop.f32.mrb[51].mxu0  ;;  %v3265_v15 = vpop.f32.mrb[75].mxu1 }
0x10fd   :  { %v3174_v59 = vpop.f32.mrb[52].mxu0 }
0x10fe   :  { %v10252_v40 = vpack.c.bf16 %v3174_v59, %v3174_v59  ;;  %v3176_v34 = vpop.f32.mrb[53].mxu0 }
0x10ff   :  { %v10254_v52 = vpack.c.bf16 %v3176_v34, %v3176_v34  ;;  %v3178_v1 = vpop.f32.mrb[54].mxu0 }
0x1100   :  { %v3179_v58 = vpop.f32.mrb[55].mxu0 }
0x1105   :  { %v3217_v42 = vpop.f32.mrb[56].mxu0 }
0x1106   :  { %v10256_v44 = vpack.c.bf16 %v3217_v42, %v3217_v42  ;;  %v3219_v19 = vpop.f32.mrb[57].mxu0 }
0x1107   :  { %v10258_v33 = vpack.c.bf16 %v3219_v19, %v3219_v19  ;;  %v3221_v56 = vpop.f32.mrb[58].mxu0 }
0x1108   :  { %v3222_v14 = vpop.f32.mrb[59].mxu0 }
0x1109   :  { %9096 = dma.done.wait [#allocation20 + $0x9], 20480 }
0x110a   :  { %9097 = vsyncadd [#allocation20 + $0x9], 4294946816  ;;  %3465 = vmatprep.mubr.bf16.mxu0 %v10254_v52  ;;  %3506 = vmatprep.mubr.bf16.mxu1 %v10254_v52  ;;  %v3354_v31 = vld [vmem:[#allocation11 + $0x288] sm:$0xff]  ;;  %v3356_v50 = vld [vmem:[#allocation11 + $0x298] sm:$0xff] }
0x110b   :  { %v3353_v49 = vld [vmem:[#allocation11 + $0x280] sm:$0xff]  ;;  %3433 = vmatprep.subr.bf16.mxu0 %v3354_v31  ;;  %3474 = vmatprep.subr.bf16.mxu1 %v3356_v50  ;;  %v3355_v29 = vld [vmem:[#allocation11 + $0x290] sm:$0xff]  ;;  %v3358_v5 = vld [vmem:[#allocation11 + $0x2a8] sm:$0xff] }
0x110c   :  { %v3359_v36 = vld [vmem:[#allocation11 + $0x2b0] sm:$0xff]  ;;  %v3361_v28 = vld [vmem:[#allocation11 + $0x2c0] sm:$0xff]  ;;  %3434 = vmatpush1.bf16.msra.mxu0 %v3353_v49  ;;  %3475 = vmatpush1.bf16.msra.mxu1 %v3355_v29  ;;  %v3360_v37 = vld [vmem:[#allocation11 + $0x2b8] sm:$0xff] }
0x110d   :  { %3435 = vmatprep.subr.bf16.mxu0 %v3359_v36  ;;  %3476 = vmatprep.subr.bf16.mxu1 %v3361_v28  ;;  %v3364_v43 = vld [vmem:[#allocation11 + $0x2d8] sm:$0xff]  ;;  %v3366_v51 = vld [vmem:[#allocation11 + $0x2e8] sm:$0xff]  ;;  %v3363_v2 = vld [vmem:[#allocation11 + $0x2d0] sm:$0xff] }
0x110e   :  { %v3365_v9 = vld [vmem:[#allocation11 + $0x2e0] sm:$0xff]  ;;  %v3371_v55 = vld [vmem:[#allocation11 + $0x310] sm:$0xff]  ;;  %v3368_v13 = vld [vmem:[#allocation11 + $0x2f8] sm:$0xff] }
0x110f   :  { %v3369_v30 = vld [vmem:[#allocation11 + $0x300] sm:$0xff]  ;;  %v3370_v47 = vld [vmem:[#allocation11 + $0x308] sm:$0xff]  ;;  %v3376_v61 = vld [vmem:[#allocation11 + $0x338] sm:$0xff] }
0x1110   :  { %3436 = vmatpush1.bf16.msra.mxu0 %v3358_v5  ;;  %3477 = vmatpush1.bf16.msra.mxu1 %v3360_v37  ;;  %v3374_v60 = vld [vmem:[#allocation11 + $0x328] sm:$0xff]  ;;  %v3373_v21 = vld [vmem:[#allocation11 + $0x320] sm:$0xff]  ;;  %v3375_v54 = vld [vmem:[#allocation11 + $0x330] sm:$0xff] }
0x1111   :  { %3437 = vmatprep.subr.bf16.mxu0 %v3364_v43  ;;  %3478 = vmatprep.subr.bf16.mxu1 %v3366_v51  ;;  %v3379_v20 = vld [vmem:[#allocation11 + $0x350] sm:$0xff]  ;;  %v3381_v12 = vld [vmem:[#allocation11 + $0x360] sm:$0xff]  ;;  %v3378_v22 = vld [vmem:[#allocation11 + $0x348] sm:$0xff] }
0x1112   :  { %v3380_v48 = vld [vmem:[#allocation11 + $0x358] sm:$0xff]  ;;  %v3386_v10 = vld [vmem:[#allocation11 + $0x388] sm:$0xff]  ;;  %v3383_v39 = vld [vmem:[#allocation11 + $0x370] sm:$0xff] }
0x1113   :  { %v3384_v7 = vld [vmem:[#allocation11 + $0x378] sm:$0xff]  ;;  %v3385_v46 = vld [vmem:[#allocation11 + $0x380] sm:$0xff]  ;;  %v3391_v18 = vld [vmem:[#allocation11 + $0x3b0] sm:$0xff] }
0x1114   :  { %3438 = vmatpush1.bf16.msra.mxu0 %v3363_v2  ;;  %3479 = vmatpush1.bf16.msra.mxu1 %v3365_v9  ;;  %v3389_v35 = vld [vmem:[#allocation11 + $0x3a0] sm:$0xff]  ;;  %v3388_v53 = vld [vmem:[#allocation11 + $0x398] sm:$0xff]  ;;  %v3390_v38 = vld [vmem:[#allocation11 + $0x3a8] sm:$0xff] }
0x1115   :  { %3439 = vmatprep.subr.bf16.mxu0 %v3369_v30  ;;  %3480 = vmatprep.subr.bf16.mxu1 %v3371_v55  ;;  %v3394_v32 = vld [vmem:[#allocation11 + $0x3c8] sm:$0xff]  ;;  %v3396_v16 = vld [vmem:[#allocation11 + $0x3d8] sm:$0xff]  ;;  %v3393_v26 = vld [vmem:[#allocation11 + $0x3c0] sm:$0xff] }
0x1116   :  { %v3395_v24 = vld [vmem:[#allocation11 + $0x3d0] sm:$0xff]  ;;  %v3401_v3 = vld [vmem:[#allocation11 + $0x400] sm:$0xff]  ;;  %v3398_v8 = vld [vmem:[#allocation11 + $0x3e8] sm:$0xff] }
0x1117   :  { %v3399_v25 = vld [vmem:[#allocation11 + $0x3f0] sm:$0xff]  ;;  %v3400_v6 = vld [vmem:[#allocation11 + $0x3f8] sm:$0xff]  ;;  %v3406_v15 = vld [vmem:[#allocation11 + $0x428] sm:$0xff] }
0x1118   :  { %3440 = vmatpush1.bf16.msra.mxu0 %v3368_v13  ;;  %3481 = vmatpush1.bf16.msra.mxu1 %v3370_v47  ;;  %v3404_v11 = vld [vmem:[#allocation11 + $0x418] sm:$0xff]  ;;  %v3403_v59 = vld [vmem:[#allocation11 + $0x410] sm:$0xff]  ;;  %v3405_v34 = vld [vmem:[#allocation11 + $0x420] sm:$0xff] }
0x1119   :  { %3441 = vmatprep.subr.bf16.mxu0 %v3374_v60  ;;  %3482 = vmatprep.subr.bf16.mxu1 %v3376_v61  ;;  %v3409_v1 = vld [vmem:[#allocation11 + $0x440] sm:$0xff]  ;;  %v3411_v58 = vld [vmem:[#allocation11 + $0x450] sm:$0xff]  ;;  %v3408_v42 = vld [vmem:[#allocation11 + $0x438] sm:$0xff] }
0x111a   :  { %v3410_v19 = vld [vmem:[#allocation11 + $0x448] sm:$0xff]  ;;  %v3416_v14 = vld [vmem:[#allocation11 + $0x478] sm:$0xff]  ;;  %v3413_v31 = vld [vmem:[#allocation11 + $0x460] sm:$0xff] }
0x111b   :  { %v3414_v56 = vld [vmem:[#allocation11 + $0x468] sm:$0xff]  ;;  %v3415_v50 = vld [vmem:[#allocation11 + $0x470] sm:$0xff]  ;;  %v3421_v29 = vld [vmem:[#allocation11 + $0x4a0] sm:$0xff] }
0x111c   :  { %3442 = vmatpush1.bf16.msra.mxu0 %v3373_v21  ;;  %3483 = vmatpush1.bf16.msra.mxu1 %v3375_v54  ;;  %v3419_v49 = vld [vmem:[#allocation11 + $0x490] sm:$0xff]  ;;  %v3418_v36 = vld [vmem:[#allocation11 + $0x488] sm:$0xff]  ;;  %v3420_v28 = vld [vmem:[#allocation11 + $0x498] sm:$0xff] }
0x111d   :  { %3443 = vmatprep.subr.bf16.mxu0 %v3379_v20  ;;  %3484 = vmatprep.subr.bf16.mxu1 %v3381_v12  ;;  %v3424_v5 = vld [vmem:[#allocation11 + $0x4b8] sm:$0xff]  ;;  %v3426_v37 = vld [vmem:[#allocation11 + $0x4c8] sm:$0xff]  ;;  %v3423_v43 = vld [vmem:[#allocation11 + $0x4b0] sm:$0xff] }
0x111e   :  { %v3425_v51 = vld [vmem:[#allocation11 + $0x4c0] sm:$0xff]  ;;  %v3431_v9 = vld [vmem:[#allocation11 + $0x4f0] sm:$0xff]  ;;  %v3428_v30 = vld [vmem:[#allocation11 + $0x4d8] sm:$0xff] }
0x111f   :  { %v3429_v2 = vld [vmem:[#allocation11 + $0x4e0] sm:$0xff]  ;;  %v3430_v55 = vld [vmem:[#allocation11 + $0x4e8] sm:$0xff]  ;;  %v3275_v47 = vld [vmem:[#allocation11 + $0x18] sm:$0xff] }
0x1120   :  { %3444 = vmatpush1.bf16.msra.mxu0 %v3378_v22  ;;  %3485 = vmatpush1.bf16.msra.mxu1 %v3380_v48  ;;  %v3397_v13 = vld [vmem:[#allocation11 + $0x3e0] sm:$0xff]  ;;  %v3274_v61 = vld [vmem:[#allocation11 + $0x10] sm:$0xff]  ;;  %v3402_v21 = vld [vmem:[#allocation11 + $0x408] sm:$0xff] }
0x1121   :  { %3445 = vmatprep.subr.bf16.mxu0 %v3384_v7  ;;  %3486 = vmatprep.subr.bf16.mxu1 %v3386_v10  ;;  %v3357_v60 = vld [vmem:[#allocation11 + $0x2a0] sm:$0xff]  ;;  %v3362_v20 = vld [vmem:[#allocation11 + $0x2c8] sm:$0xff]  ;;  %v3279_v12 = vld [vmem:[#allocation11 + $0x38] sm:$0xff] }
0x1122   :  { %v3280_v54 = vld [vmem:[#allocation11 + $0x40] sm:$0xff]  ;;  %v3407_v22 = vld [vmem:[#allocation11 + $0x430] sm:$0xff]  ;;  %v3285_v48 = vld [vmem:[#allocation11 + $0x68] sm:$0xff] }
0x1123   :  { %v3367_v7 = vld [vmem:[#allocation11 + $0x2f0] sm:$0xff]  ;;  %v3284_v10 = vld [vmem:[#allocation11 + $0x60] sm:$0xff] }
0x1124   :  { %3446 = vmatpush1.bf16.msra.mxu0 %v3383_v39  ;;  %3487 = vmatpush1.bf16.msra.mxu1 %v3385_v46  ;;  %v3412_v39 = vld [vmem:[#allocation11 + $0x458] sm:$0xff]  ;;  %v3290_v46 = vld [vmem:[#allocation11 + $0x90] sm:$0xff] }
0x1125   :  { %3447 = vmatprep.subr.bf16.mxu0 %v3389_v35  ;;  %3488 = vmatprep.subr.bf16.mxu1 %v3391_v18  ;;  %v3372_v35 = vld [vmem:[#allocation11 + $0x318] sm:$0xff]  ;;  %v3289_v18 = vld [vmem:[#allocation11 + $0x88] sm:$0xff] }
0x1128   :  { %3448 = vmatpush1.bf16.msra.mxu0 %v3388_v53  ;;  %3489 = vmatpush1.bf16.msra.mxu1 %v3390_v38  ;;  %v3417_v53 = vld [vmem:[#allocation11 + $0x480] sm:$0xff]  ;;  %v3295_v38 = vld [vmem:[#allocation11 + $0xb8] sm:$0xff] }
0x1129   :  { %3449 = vmatprep.subr.bf16.mxu0 %v3394_v32  ;;  %3490 = vmatprep.subr.bf16.mxu1 %v3396_v16  ;;  %v3294_v32 = vld [vmem:[#allocation11 + $0xb0] sm:$0xff]  ;;  %v3422_v16 = vld [vmem:[#allocation11 + $0x4a8] sm:$0xff] }
0x112c   :  { %3450 = vmatpush1.bf16.msra.mxu0 %v3393_v26  ;;  %3491 = vmatpush1.bf16.msra.mxu1 %v3395_v24  ;;  %v3300_v26 = vld [vmem:[#allocation11 + $0xe0] sm:$0xff]  ;;  %v3382_v24 = vld [vmem:[#allocation11 + $0x368] sm:$0xff] }
0x112d   :  { %3451 = vmatprep.subr.bf16.mxu0 %v3399_v25  ;;  %3492 = vmatprep.subr.bf16.mxu1 %v3401_v3  ;;  %v3299_v25 = vld [vmem:[#allocation11 + $0xd8] sm:$0xff]  ;;  %v3427_v3 = vld [vmem:[#allocation11 + $0x4d0] sm:$0xff] }
0x1130   :  { %3452 = vmatpush1.bf16.msra.mxu0 %v3398_v8  ;;  %3493 = vmatpush1.bf16.msra.mxu1 %v3400_v6  ;;  %v3305_v8 = vld [vmem:[#allocation11 + $0x108] sm:$0xff]  ;;  %v3387_v6 = vld [vmem:[#allocation11 + $0x390] sm:$0xff] }
0x1131   :  { %3453 = vmatprep.subr.bf16.mxu0 %v3404_v11  ;;  %3494 = vmatprep.subr.bf16.mxu1 %v3406_v15  ;;  %v3304_v11 = vld [vmem:[#allocation11 + $0x100] sm:$0xff]  ;;  %v3432_v15 = vld [vmem:[#allocation11 + $0x4f8] sm:$0xff] }
0x1134   :  { %3454 = vmatpush1.bf16.msra.mxu0 %v3403_v59  ;;  %3495 = vmatpush1.bf16.msra.mxu1 %v3405_v34  ;;  %v3310_v59 = vld [vmem:[#allocation11 + $0x130] sm:$0xff]  ;;  %v3392_v34 = vld [vmem:[#allocation11 + $0x3b8] sm:$0xff] }
0x1135   :  { %3455 = vmatprep.subr.bf16.mxu0 %v3409_v1  ;;  %3496 = vmatprep.subr.bf16.mxu1 %v3411_v58  ;;  %v3309_v1 = vld [vmem:[#allocation11 + $0x128] sm:$0xff] }
0x1136   :  { %v3273_v58 = vld [vmem:[#allocation11 + $0x8] sm:$0xff] }
0x1138   :  { %3456 = vmatpush1.bf16.msra.mxu0 %v3408_v42  ;;  %3497 = vmatpush1.bf16.msra.mxu1 %v3410_v19  ;;  %v3315_v42 = vld [vmem:[#allocation11 + $0x158] sm:$0xff]  ;;  %v3272_v19 = vld [vmem:[#allocation11] sm:$0xff] }
0x1139   :  { %3457 = vmatprep.subr.bf16.mxu0 %v3414_v56  ;;  %3498 = vmatprep.subr.bf16.mxu1 %v3416_v14  ;;  %v3314_v56 = vld [vmem:[#allocation11 + $0x150] sm:$0xff] }
0x113a   :  { %v3278_v14 = vld [vmem:[#allocation11 + $0x30] sm:$0xff] }
0x113c   :  { %3458 = vmatpush1.bf16.msra.mxu0 %v3413_v31  ;;  %3499 = vmatpush1.bf16.msra.mxu1 %v3415_v50  ;;  %v3320_v31 = vld [vmem:[#allocation11 + $0x180] sm:$0xff]  ;;  %v3277_v50 = vld [vmem:[#allocation11 + $0x28] sm:$0xff] }
0x113d   :  { %3459 = vmatprep.subr.bf16.mxu0 %v3419_v49  ;;  %3500 = vmatprep.subr.bf16.mxu1 %v3421_v29  ;;  %v3319_v49 = vld [vmem:[#allocation11 + $0x178] sm:$0xff] }
0x113e   :  { %v3283_v29 = vld [vmem:[#allocation11 + $0x58] sm:$0xff] }
0x1140   :  { %3460 = vmatpush1.bf16.msra.mxu0 %v3418_v36  ;;  %3501 = vmatpush1.bf16.msra.mxu1 %v3420_v28  ;;  %v3325_v36 = vld [vmem:[#allocation11 + $0x1a8] sm:$0xff]  ;;  %v3282_v28 = vld [vmem:[#allocation11 + $0x50] sm:$0xff] }
0x1141   :  { %3461 = vmatprep.subr.bf16.mxu0 %v3424_v5  ;;  %3502 = vmatprep.subr.bf16.mxu1 %v3426_v37  ;;  %v3324_v5 = vld [vmem:[#allocation11 + $0x1a0] sm:$0xff] }
0x1142   :  { %v3288_v37 = vld [vmem:[#allocation11 + $0x80] sm:$0xff] }
0x1144   :  { %3462 = vmatpush1.bf16.msra.mxu0 %v3423_v43  ;;  %3503 = vmatpush1.bf16.msra.mxu1 %v3425_v51  ;;  %v3330_v43 = vld [vmem:[#allocation11 + $0x1d0] sm:$0xff]  ;;  %v3329_v51 = vld [vmem:[#allocation11 + $0x1c8] sm:$0xff] }
0x1145   :  { %3463 = vmatprep.subr.bf16.mxu0 %v3429_v2  ;;  %3504 = vmatprep.subr.bf16.mxu1 %v3431_v9  ;;  %v3293_v2 = vld [vmem:[#allocation11 + $0xa8] sm:$0xff]  ;;  %v3335_v9 = vld [vmem:[#allocation11 + $0x1f8] sm:$0xff] }
0x1148   :  { %3464 = vmatpush1.bf16.msra.mxu0 %v3428_v30  ;;  %3505 = vmatpush1.bf16.msra.mxu1 %v3430_v55  ;;  %v3292_v30 = vld [vmem:[#allocation11 + $0xa0] sm:$0xff]  ;;  %v3334_v55 = vld [vmem:[#allocation11 + $0x1f0] sm:$0xff] }
0x1149   :  { %8109 = vmatprep.subr.bf16.mxu0 %v3397_v13  ;;  %3596 = vmatprep.subr.bf16.mxu1 %v3275_v47  ;;  %v3298_v13 = vld [vmem:[#allocation11 + $0xd0] sm:$0xff]  ;;  %v3340_v47 = vld [vmem:[#allocation11 + $0x220] sm:$0xff] }
0x114b   :  { %3466 = vmatmul.mubr.bf16.vlgmr.msra.gmra.mrb[60].mxu0 %v10252_v40  ;;  %3507 = vmatmul.mubr.bf16.vlgmr.msra.gmra.mrb[76].mxu1 %v10252_v40 }
0x114c   :  { %8110 = vmatpush3.bf16.msra.mxu0 %v3357_v60  ;;  %3597 = vmatpush1.bf16.msra.mxu1 %v3274_v61  ;;  %v3297_v60 = vld [vmem:[#allocation11 + $0xc8] sm:$0xff]  ;;  %v3339_v61 = vld [vmem:[#allocation11 + $0x218] sm:$0xff] }
0x114d   :  { %8111 = vmatprep.subr.bf16.mxu0 %v3402_v21  ;;  %3598 = vmatprep.subr.bf16.mxu1 %v3280_v54  ;;  %v3303_v21 = vld [vmem:[#allocation11 + $0xf8] sm:$0xff]  ;;  %v3345_v54 = vld [vmem:[#allocation11 + $0x248] sm:$0xff] }
0x114e   :  { %3547 = vmatprep.mubr.bf16.mxu0 %v10254_v52  ;;  %3628 = vmatprep.mubr.bf16.mxu1 %v10248_v23  ;;  %v3377_v52 = vld [vmem:[#allocation11 + $0x340] sm:$0xff] }
0x1150   :  { %8112 = vmatpush3.bf16.msra.mxu0 %v3362_v20  ;;  %3599 = vmatpush1.bf16.msra.mxu1 %v3279_v12  ;;  %v3302_v20 = vld [vmem:[#allocation11 + $0xf0] sm:$0xff]  ;;  %v3344_v12 = vld [vmem:[#allocation11 + $0x240] sm:$0xff] }
0x1151   :  { %8113 = vmatprep.subr.bf16.mxu0 %v3407_v22  ;;  %3600 = vmatprep.subr.bf16.mxu1 %v3285_v48  ;;  %v3308_v22 = vld [vmem:[#allocation11 + $0x120] sm:$0xff]  ;;  %v3350_v48 = vld [vmem:[#allocation11 + $0x270] sm:$0xff] }
0x1154   :  { %8114 = vmatpush3.bf16.msra.mxu0 %v3367_v7  ;;  %3601 = vmatpush1.bf16.msra.mxu1 %v3284_v10  ;;  %v3307_v7 = vld [vmem:[#allocation11 + $0x118] sm:$0xff]  ;;  %v3349_v10 = vld [vmem:[#allocation11 + $0x268] sm:$0xff] }
0x1155   :  { %8115 = vmatprep.subr.bf16.mxu0 %v3412_v39  ;;  %3602 = vmatprep.subr.bf16.mxu1 %v3290_v46  ;;  %v3313_v39 = vld [vmem:[#allocation11 + $0x148] sm:$0xff]  ;;  %v3316_v46 = vld [vmem:[#allocation11 + $0x160] sm:$0xff] }
0x1158   :  { %8116 = vmatpush3.bf16.msra.mxu0 %v3372_v35  ;;  %3603 = vmatpush1.bf16.msra.mxu1 %v3289_v18  ;;  %v3312_v35 = vld [vmem:[#allocation11 + $0x140] sm:$0xff] }
0x1159   :  { %8117 = vmatprep.subr.bf16.mxu0 %v3417_v53  ;;  %3604 = vmatprep.subr.bf16.mxu1 %v3295_v38  ;;  %v3276_v18 = vld [vmem:[#allocation11 + $0x20] sm:$0xff]  ;;  %v3318_v53 = vld [vmem:[#allocation11 + $0x170] sm:$0xff]  ;;  %v3321_v38 = vld [vmem:[#allocation11 + $0x188] sm:$0xff] }
0x115c   :  { %8118 = vmatpush3.bf16.msra.mxu0 %v3377_v52  ;;  %3605 = vmatpush1.bf16.msra.mxu1 %v3294_v32  ;;  %v3317_v52 = vld [vmem:[#allocation11 + $0x168] sm:$0xff] }
0x115d   :  { %8119 = vmatprep.subr.bf16.mxu0 %v3422_v16  ;;  %3606 = vmatprep.subr.bf16.mxu1 %v3300_v26  ;;  %v3281_v32 = vld [vmem:[#allocation11 + $0x48] sm:$0xff]  ;;  %v3323_v16 = vld [vmem:[#allocation11 + $0x198] sm:$0xff]  ;;  %v3326_v26 = vld [vmem:[#allocation11 + $0x1b0] sm:$0xff] }
0x1160   :  { %8120 = vmatpush3.bf16.msra.mxu0 %v3382_v24  ;;  %3607 = vmatpush1.bf16.msra.mxu1 %v3299_v25  ;;  %v3322_v24 = vld [vmem:[#allocation11 + $0x190] sm:$0xff] }
0x1161   :  { %8121 = vmatprep.subr.bf16.mxu0 %v3427_v3  ;;  %3608 = vmatprep.subr.bf16.mxu1 %v3305_v8  ;;  %v3286_v25 = vld [vmem:[#allocation11 + $0x70] sm:$0xff]  ;;  %v3328_v3 = vld [vmem:[#allocation11 + $0x1c0] sm:$0xff]  ;;  %v3331_v8 = vld [vmem:[#allocation11 + $0x1d8] sm:$0xff] }
0x1164   :  { %8122 = vmatpush3.bf16.msra.mxu0 %v3387_v6  ;;  %3609 = vmatpush1.bf16.msra.mxu1 %v3304_v11  ;;  %v3327_v6 = vld [vmem:[#allocation11 + $0x1b8] sm:$0xff] }
0x1165   :  { %8123 = vmatprep.subr.bf16.mxu0 %v3432_v15  ;;  %3610 = vmatprep.subr.bf16.mxu1 %v3310_v59  ;;  %v3291_v11 = vld [vmem:[#allocation11 + $0x98] sm:$0xff]  ;;  %v3333_v15 = vld [vmem:[#allocation11 + $0x1e8] sm:$0xff]  ;;  %v3336_v59 = vld [vmem:[#allocation11 + $0x200] sm:$0xff] }
0x1168   :  { %8124 = vmatpush3.bf16.msra.mxu0 %v3392_v34  ;;  %3611 = vmatpush1.bf16.msra.mxu1 %v3309_v1  ;;  %v3296_v34 = vld [vmem:[#allocation11 + $0xc0] sm:$0xff]  ;;  %v3338_v1 = vld [vmem:[#allocation11 + $0x210] sm:$0xff] }
0x1169   :  { %3555 = vmatprep.subr.bf16.mxu0 %v3273_v58  ;;  %3612 = vmatprep.subr.bf16.mxu1 %v3315_v42  ;;  %v3341_v58 = vld [vmem:[#allocation11 + $0x228] sm:$0xff] }
0x116a   :  { %v3337_v42 = vld [vmem:[#allocation11 + $0x208] sm:$0xff] }
0x116b   :  { %3548 = vmatmul.mubr.bf16.vlgmr.msra.gmra.mrb[64].mxu0 %v10252_v40  ;;  %v3287_v40 = vld [vmem:[#allocation11 + $0x78] sm:$0xff] }
0x116c   :  { %3556 = vmatpush1.bf16.msra.mxu0 %v3272_v19  ;;  %3613 = vmatpush1.bf16.msra.mxu1 %v3314_v56  ;;  %v3301_v19 = vld [vmem:[#allocation11 + $0xe8] sm:$0xff]  ;;  %v3343_v56 = vld [vmem:[#allocation11 + $0x238] sm:$0xff] }
0x116d   :  { %3557 = vmatprep.subr.bf16.mxu0 %v3278_v14  ;;  %3614 = vmatprep.subr.bf16.mxu1 %v3320_v31  ;;  %v3346_v14 = vld [vmem:[#allocation11 + $0x250] sm:$0xff] }
0x116e   :  { %3587 = vmatprep.mubr.bf16.mxu0 %v10248_v23  ;;  %v3342_v31 = vld [vmem:[#allocation11 + $0x230] sm:$0xff] }
0x1170   :  { %3558 = vmatpush1.bf16.msra.mxu0 %v3277_v50  ;;  %3615 = vmatpush1.bf16.msra.mxu1 %v3319_v49  ;;  %v3306_v50 = vld [vmem:[#allocation11 + $0x110] sm:$0xff]  ;;  %v3348_v49 = vld [vmem:[#allocation11 + $0x260] sm:$0xff] }
0x1171   :  { %3559 = vmatprep.subr.bf16.mxu0 %v3283_v29  ;;  %3616 = vmatprep.subr.bf16.mxu1 %v3325_v36  ;;  %v3351_v29 = vld [vmem:[#allocation11 + $0x278] sm:$0xff] }
0x1172   :  { %v3347_v36 = vld [vmem:[#allocation11 + $0x258] sm:$0xff] }
0x1174   :  { %3560 = vmatpush1.bf16.msra.mxu0 %v3282_v28  ;;  %3617 = vmatpush1.bf16.msra.mxu1 %v3324_v5  ;;  %v3311_v28 = vld [vmem:[#allocation11 + $0x138] sm:$0xff] }
0x1175   :  { %3561 = vmatprep.subr.bf16.mxu0 %v3288_v37  ;;  %3618 = vmatprep.subr.bf16.mxu1 %v3330_v43 }
0x1178   :  { %3562 = vmatpush1.bf16.msra.mxu0 %v3287_v40  ;;  %3619 = vmatpush1.bf16.msra.mxu1 %v3329_v51 }
0x1179   :  { %3563 = vmatprep.subr.bf16.mxu0 %v3293_v2  ;;  %3620 = vmatprep.subr.bf16.mxu1 %v3335_v9 }
0x117c   :  { %3564 = vmatpush1.bf16.msra.mxu0 %v3292_v30  ;;  %3621 = vmatpush1.bf16.msra.mxu1 %v3334_v55 }
0x117d   :  { %3565 = vmatprep.subr.bf16.mxu0 %v3298_v13  ;;  %3622 = vmatprep.subr.bf16.mxu1 %v3340_v47 }
0x1180   :  { %3566 = vmatpush1.bf16.msra.mxu0 %v3297_v60  ;;  %3623 = vmatpush1.bf16.msra.mxu1 %v3339_v61 }
0x1181   :  { %3567 = vmatprep.subr.bf16.mxu0 %v3303_v21  ;;  %3624 = vmatprep.subr.bf16.mxu1 %v3345_v54 }
0x1184   :  { %3568 = vmatpush1.bf16.msra.mxu0 %v3302_v20  ;;  %3625 = vmatpush1.bf16.msra.mxu1 %v3344_v12 }
0x1185   :  { %3569 = vmatprep.subr.bf16.mxu0 %v3308_v22  ;;  %3626 = vmatprep.subr.bf16.mxu1 %v3350_v48 }
0x1188   :  { %3570 = vmatpush1.bf16.msra.mxu0 %v3307_v7  ;;  %3627 = vmatpush1.bf16.msra.mxu1 %v3349_v10 }
0x1189   :  { %3571 = vmatprep.subr.bf16.mxu0 %v3313_v39  ;;  %8131 = vmatprep.subr.bf16.mxu1 %v3316_v46 }
0x118b   :  { %3629 = vmatmul.mubr.bf16.vlgmr.msra.gmra.mrb[76].mxu1 %v10244_v62 }
0x118c   :  { %3572 = vmatpush1.bf16.msra.mxu0 %v3312_v35  ;;  %8132 = vmatpush3.bf16.msra.mxu1 %v3276_v18 }
0x118d   :  { %3573 = vmatprep.subr.bf16.mxu0 %v3318_v53  ;;  %8133 = vmatprep.subr.bf16.mxu1 %v3321_v38 }
0x118e   :  { %3669 = vmatprep.mubr.bf16.mxu1 %v10248_v23  ;;  %v3332_v23 = vld [vmem:[#allocation11 + $0x1e0] sm:$0xff] }
0x1190   :  { %3574 = vmatpush1.bf16.msra.mxu0 %v3317_v52  ;;  %8134 = vmatpush3.bf16.msra.mxu1 %v3281_v32 }
0x1191   :  { %3575 = vmatprep.subr.bf16.mxu0 %v3323_v16  ;;  %8135 = vmatprep.subr.bf16.mxu1 %v3326_v26 }
0x1194   :  { %3576 = vmatpush1.bf16.msra.mxu0 %v3322_v24  ;;  %8136 = vmatpush3.bf16.msra.mxu1 %v3286_v25 }
0x1195   :  { %3577 = vmatprep.subr.bf16.mxu0 %v3328_v3  ;;  %8137 = vmatprep.subr.bf16.mxu1 %v3331_v8 }
0x1198   :  { %3578 = vmatpush1.bf16.msra.mxu0 %v3327_v6  ;;  %8138 = vmatpush3.bf16.msra.mxu1 %v3291_v11 }
0x1199   :  { %3579 = vmatprep.subr.bf16.mxu0 %v3333_v15  ;;  %8139 = vmatprep.subr.bf16.mxu1 %v3336_v59 }
0x119c   :  { %3580 = vmatpush1.bf16.msra.mxu0 %v3332_v23  ;;  %8140 = vmatpush3.bf16.msra.mxu1 %v3296_v34 }
0x119d   :  { %3581 = vmatprep.subr.bf16.mxu0 %v3338_v1  ;;  %8141 = vmatprep.subr.bf16.mxu1 %v3341_v58 }
0x11a0   :  { %3582 = vmatpush1.bf16.msra.mxu0 %v3337_v42  ;;  %8142 = vmatpush3.bf16.msra.mxu1 %v3301_v19 }
0x11a1   :  { %3583 = vmatprep.subr.bf16.mxu0 %v3343_v56  ;;  %8143 = vmatprep.subr.bf16.mxu1 %v3346_v14 }
0x11a4   :  { %3584 = vmatpush1.bf16.msra.mxu0 %v3342_v31  ;;  %8144 = vmatpush3.bf16.msra.mxu1 %v3306_v50 }
0x11a5   :  { %3585 = vmatprep.subr.bf16.mxu0 %v3348_v49  ;;  %8145 = vmatprep.subr.bf16.mxu1 %v3351_v29 }
0x11a8   :  { %3586 = vmatpush1.bf16.msra.mxu0 %v3347_v36  ;;  %8146 = vmatpush3.bf16.msra.mxu1 %v3311_v28 }
0x11ab   :  { %3588 = vmatmul.mubr.bf16.vlgmr.msra.gmra.mrb[60].mxu0 %v10244_v62  ;;  %3670 = vmatmul.mubr.bf16.vlgmr.msra.gmra.mrb[80].mxu1 %v10244_v62 }
0x123e   :  { %v8125_v5 = vpop.f32.mrb[64].mxu0 }
0x123f   :  { %v8126_v37 = vpop.f32.mrb[65].mxu0 }
0x1240   :  { %v8127_v43 = vadd.f32 %v8126_v37, %v8125_v5  ;;  %v8128_v40 = vpop.f32.mrb[66].mxu0 }
0x1241   :  { %v8129_v51 = vpop.f32.mrb[67].mxu0 }
0x125e   :  { %v10272_v2 = vpop.f32.mrb[76].mxu1 }
0x125f   :  { %v10274_v9 = vpop.f32.mrb[77].mxu1 }
0x1260   :  { %v3634_v30 = vpop.f32.mrb[78].mxu1 }
0x1261   :  { %v3635_v55 = vpop.f32.mrb[79].mxu1 }
0x127e   :  { %v10276_v13 = vpop.f32.mrb[60].mxu0  ;;  %v8147_v47 = vpop.f32.mrb[80].mxu1 }
0x127f   :  { %v10278_v60 = vpop.f32.mrb[61].mxu0  ;;  %v8148_v61 = vpop.f32.mrb[81].mxu1 }
0x1280   :  { %v8149_v21 = vadd.f32 %v8148_v61, %v8147_v47  ;;  %v3593_v54 = vpop.f32.mrb[62].mxu0  ;;  %v8150_v62 = vpop.f32.mrb[82].mxu1 }
0x1281   :  { %v3594_v20 = vpop.f32.mrb[63].mxu0  ;;  %v8151_v12 = vpop.f32.mrb[83].mxu1 }
0x1282   :  { %v3672_v22 = vadd.f32 %v8149_v21, %v8127_v43 }
0x1283   :  { %9098 = dma.done.wait [#allocation20 + $0xa], 4096 }
0x1284   :  { %9099 = vsyncadd [#allocation20 + $0xa], 4294963200  ;;  %3751 = vmatprep.mubr.bf16.mxu0 %v9177_v45  ;;  %3792 = vmatprep.mubr.bf16.mxu1 %v9177_v45  ;;  %v7917_v48 = vmul.f32 -1.442695, %v3672_v22  ;;  %v10282_v7 = vld [vmem:[#allocation12 + $0x8] sm:$0xff]  ;;  %v10284_v10 = vld [vmem:[#allocation12 + $0x18] sm:$0xff] }
0x1285   :  { %v10286_v39 = vld [vmem:[#allocation12] sm:$0xff]  ;;  %3719 = vmatprep.subr.bf16.mxu0 %v10282_v7  ;;  %3760 = vmatprep.subr.bf16.mxu1 %v10284_v10  ;;  %v10290_v46 = vld [vmem:[#allocation12 + $0x10] sm:$0xff]  ;;  %v10292_v35 = vld [vmem:[#allocation12 + $0x28] sm:$0xff] }
0x1286   :  { %8950 = vpow2.f32 %v7917_v48  ;;  %v10294_v18 = vld [vmem:[#allocation12 + $0x38] sm:$0xff]  ;;  %3720 = vmatpush1.bf16.msra.mxu0 %v10286_v39  ;;  %3761 = vmatpush1.bf16.msra.mxu1 %v10290_v46  ;;  %v10300_v53 = vld [vmem:[#allocation12 + $0x20] sm:$0xff]  ;;  %v10302_v38 = vld [vmem:[#allocation12 + $0x30] sm:$0xff] }
0x1287   :  { %3721 = vmatprep.subr.bf16.mxu0 %v10292_v35  ;;  %3762 = vmatprep.subr.bf16.mxu1 %v10294_v18  ;;  %v10304_v52 = vld [vmem:[#allocation12 + $0x48] sm:$0xff]  ;;  %v10306_v32 = vld [vmem:[#allocation12 + $0x58] sm:$0xff]  ;;  %v10312_v16 = vld [vmem:[#allocation12 + $0x40] sm:$0xff] }
0x1288   :  { %v10314_v26 = vld [vmem:[#allocation12 + $0x50] sm:$0xff]  ;;  %v10316_v24 = vld [vmem:[#allocation12 + $0x68] sm:$0xff]  ;;  %v10318_v25 = vld [vmem:[#allocation12 + $0x78] sm:$0xff] }
0x1289   :  { %v10324_v8 = vld [vmem:[#allocation12 + $0x60] sm:$0xff]  ;;  %v10326_v6 = vld [vmem:[#allocation12 + $0x70] sm:$0xff]  ;;  %v10328_v11 = vld [vmem:[#allocation12 + $0x88] sm:$0xff] }
0x128a   :  { %3722 = vmatpush1.bf16.msra.mxu0 %v10300_v53  ;;  %3763 = vmatpush1.bf16.msra.mxu1 %v10302_v38  ;;  %v10330_v15 = vld [vmem:[#allocation12 + $0x98] sm:$0xff]  ;;  %v10336_v23 = vld [vmem:[#allocation12 + $0x80] sm:$0xff]  ;;  %v10338_v34 = vld [vmem:[#allocation12 + $0x90] sm:$0xff] }
0x128b   :  { %3723 = vmatprep.subr.bf16.mxu0 %v10304_v52  ;;  %3764 = vmatprep.subr.bf16.mxu1 %v10306_v32  ;;  %v10340_v1 = vld [vmem:[#allocation12 + $0xa8] sm:$0xff]  ;;  %v10342_v58 = vld [vmem:[#allocation12 + $0xb8] sm:$0xff]  ;;  %v10348_v42 = vld [vmem:[#allocation12 + $0xa0] sm:$0xff] }
0x128c   :  { %v10350_v19 = vld [vmem:[#allocation12 + $0xb0] sm:$0xff]  ;;  %v10352_v56 = vld [vmem:[#allocation12 + $0xc8] sm:$0xff]  ;;  %v10354_v14 = vld [vmem:[#allocation12 + $0xd8] sm:$0xff] }
0x128d   :  { %v10360_v31 = vld [vmem:[#allocation12 + $0xc0] sm:$0xff]  ;;  %v10362_v50 = vld [vmem:[#allocation12 + $0xd0] sm:$0xff]  ;;  %v10364_v49 = vld [vmem:[#allocation12 + $0xe8] sm:$0xff] }
0x128e   :  { %3724 = vmatpush1.bf16.msra.mxu0 %v10312_v16  ;;  %3765 = vmatpush1.bf16.msra.mxu1 %v10314_v26  ;;  %v10366_v29 = vld [vmem:[#allocation12 + $0xf8] sm:$0xff]  ;;  %v10372_v28 = vld [vmem:[#allocation12 + $0xe0] sm:$0xff]  ;;  %v10374_v5 = vld [vmem:[#allocation12 + $0xf0] sm:$0xff] }
0x128f   :  { %3725 = vmatprep.subr.bf16.mxu0 %v10316_v24  ;;  %3766 = vmatprep.subr.bf16.mxu1 %v10318_v25 }
0x1290   :  { %v8951_v3 = vpop.eup %8950 }
0x1291   :  { %v3715_v59 = vadd.f32 1.0, %v8951_v3 }
0x1292   :  { %3726 = vmatpush1.bf16.msra.mxu0 %v10324_v8  ;;  %3767 = vmatpush1.bf16.msra.mxu1 %v10326_v6 }
0x1293   :  { %3727 = vmatprep.subr.bf16.mxu0 %v10328_v11  ;;  %3768 = vmatprep.subr.bf16.mxu1 %v10330_v15  ;;  %8952 = vrcp.f32 %v3715_v59 }
0x1296   :  { %3728 = vmatpush1.bf16.msra.mxu0 %v10336_v23  ;;  %3769 = vmatpush1.bf16.msra.mxu1 %v10338_v34 }
0x1297   :  { %3729 = vmatprep.subr.bf16.mxu0 %v10340_v1  ;;  %3770 = vmatprep.subr.bf16.mxu1 %v10342_v58 }
0x129a   :  { %3730 = vmatpush1.bf16.msra.mxu0 %v10348_v42  ;;  %3771 = vmatpush1.bf16.msra.mxu1 %v10350_v19 }
0x129b   :  { %3731 = vmatprep.subr.bf16.mxu0 %v10352_v56  ;;  %3772 = vmatprep.subr.bf16.mxu1 %v10354_v14 }
0x129d   :  { %v8953_v36 = vpop.eup %8952 }
0x129e   :  { %3732 = vmatpush1.bf16.msra.mxu0 %v10360_v31  ;;  %3773 = vmatpush1.bf16.msra.mxu1 %v10362_v50  ;;  %v3718_v37 = vpack.c.bf16 %v8953_v36, %v8953_v36 }
0x129f   :  { %3733 = vmatprep.subr.bf16.mxu0 %v10364_v49  ;;  %3774 = vmatprep.subr.bf16.mxu1 %v10366_v29 }
0x12a2   :  { %3734 = vmatpush1.bf16.msra.mxu0 %v10372_v28  ;;  %3775 = vmatpush1.bf16.msra.mxu1 %v10374_v5 }
0x12a5   :  { %3752 = vmatmul.mubr.bf16.vlgmr.msra.gmra.mrb[68].mxu0 %v3718_v37  ;;  %3793 = vmatmul.mubr.bf16.vlgmr.msra.gmra.mrb[84].mxu1 %v3718_v37 }
0x12a6   :  { %3853 = vmatprep.mubr.bf16.mxu0 %v9177_v45  ;;  %3894 = vmatprep.mubr.bf16.mxu1 %v9177_v45 }
0x1378   :  { %v3753_v43 = vpop.f32.mrb[68].mxu0  ;;  %v3794_v40 = vpop.f32.mrb[84].mxu1 }
0x1379   :  { %v3801_v51 = vmul.f32 %v3753_v43, %v10276_v13  ;;  %v3803_v30 = vmul.f32 %v3794_v40, %v10272_v2  ;;  %v3755_v55 = vpop.f32.mrb[69].mxu0  ;;  %v3796_v47 = vpop.f32.mrb[85].mxu1 }
0x137a   :  { %v3802_v61 = vmul.f32 %v3755_v55, %v10278_v60  ;;  %v3804_v21 = vmul.f32 %v3796_v47, %v10274_v9  ;;  %v3757_v54 = vpop.f32.mrb[70].mxu0  ;;  %v3798_v62 = vpop.f32.mrb[86].mxu1 }
0x137b   :  { %v3805_v20 = vpack.c.bf16 %v3801_v51, %v3801_v51  ;;  %v3807_v12 = vpack.c.bf16 %v3803_v30, %v3803_v30  ;;  %v3758_v22 = vpop.f32.mrb[71].mxu0  ;;  %v3799_v48 = vpop.f32.mrb[87].mxu1 }
0x137c   :  { %v3806_v3 = vpack.c.bf16 %v3802_v61, %v3802_v61  ;;  %v3808_v59 = vpack.c.bf16 %v3804_v21, %v3804_v21 }
0x137d   :  { %v3810_v36 = vsel %vm1055_vm0, %v3805_v20, 0  ;;  %v3816_v13 = vsel %vm1055_vm0, %v3807_v12, 0 }
0x137e   :  { %7918 = vmatprep.subr.msk.bf16.mxu0 %vm1055_vm0, %v3806_v3  ;;  %7920 = vmatprep.subr.msk.bf16.mxu1 %vm1055_vm0, %v3808_v59 }
0x137f   :  { %3822 = vmatpush1.bf16.msra.mxu0 %v3810_v36  ;;  %3863 = vmatpush1.bf16.msra.mxu1 %v3816_v13 }
0x1380   :  { %7922 = vmatprep.subr.msk.bf16.mxu0 %vm1055_vm0, %v3806_v3  ;;  %7924 = vmatprep.subr.msk.bf16.mxu1 %vm1055_vm0, %v3808_v59 }
0x1382   :  { %7919 = vmatmul.mubr.msk.bf16.vlgmr.msra.gmra.mrb[72].mxu0 %vm1051_vm9, %v9826_v27  ;;  %7921 = vmatmul.mubr.msk.bf16.vlgmr.msra.gmra.mrb[88].mxu1 %vm1051_vm9, %v9826_v27 }
0x1383   :  { %3908 = vmatpush1.bf16.msra.mxu0 %v3810_v36  ;;  %3949 = vmatpush1.bf16.msra.mxu1 %v3816_v13 }
0x1384   :  { %3939 = vmatprep.mubr.bf16.mxu0 %v9177_v45  ;;  %3980 = vmatprep.mubr.bf16.mxu1 %v9177_v45 }
0x138a   :  { %7923 = vmatmul.mubr.msk.bf16.vlgmr.msra.gmra.mrb[76].mxu0 %vm1051_vm9, %v9814_v41  ;;  %7925 = vmatmul.mubr.msk.bf16.vlgmr.msra.gmra.mrb[92].mxu1 %vm1051_vm9, %v9814_v41 }
0x1455   :  { %v3855_v2 = vpop.f32.mrb[72].mxu0  ;;  %v3896_v9 = vpop.f32.mrb[88].mxu1 }
0x1456   :  { %v10400_v60 = vpack.c.bf16 %v3855_v2, %v3855_v2  ;;  %v10402_v37 = vpack.c.bf16 %v3896_v9, %v3896_v9  ;;  %v3857_v43 = vpop.f32.mrb[73].mxu0  ;;  %v3898_v40 = vpop.f32.mrb[89].mxu1 }
0x1457   :  { %v10404_v51 = vpack.c.bf16 %v3857_v43, %v3857_v43  ;;  %v10406_v30 = vpack.c.bf16 %v3898_v40, %v3898_v40  ;;  %v3859_v55 = vpop.f32.mrb[74].mxu0  ;;  %v3900_v47 = vpop.f32.mrb[90].mxu1 }
0x1458   :  { %v3860_v61 = vpop.f32.mrb[75].mxu0  ;;  %v3901_v21 = vpop.f32.mrb[91].mxu1 }
0x145d   :  { %v3941_v54 = vpop.f32.mrb[76].mxu0  ;;  %v3982_v62 = vpop.f32.mrb[92].mxu1 }
0x145e   :  { %v10408_v20 = vpack.c.bf16 %v3941_v54, %v3941_v54  ;;  %v10410_v12 = vpack.c.bf16 %v3982_v62, %v3982_v62  ;;  %v3943_v22 = vpop.f32.mrb[77].mxu0  ;;  %v3984_v48 = vpop.f32.mrb[93].mxu1 }
0x145f   :  { %v10412_v3 = vpack.c.bf16 %v3943_v22, %v3943_v22  ;;  %v10414_v59 = vpack.c.bf16 %v3984_v48, %v3984_v48  ;;  %v3945_v36 = vpop.f32.mrb[78].mxu0  ;;  %v3986_v13 = vpop.f32.mrb[94].mxu1 }
0x1460   :  { %v3946_v2 = vpop.f32.mrb[79].mxu0  ;;  %v3987_v9 = vpop.f32.mrb[95].mxu1 }
0x1461   :  { %9100 = dma.done.wait [#allocation20 + $0xb], 40960 }
0x1462   :  { %9101 = vsyncadd [#allocation20 + $0xb], 4294926336  ;;  %4350 = vmatprep.mubr.bf16.mxu0 %v10412_v3  ;;  %4432 = vmatprep.mubr.bf16.mxu1 %v10412_v3  ;;  %v4159_v43 = vld [vmem:[#allocation13 + $0x508] sm:$0xff]  ;;  %v4161_v40 = vld [vmem:[#allocation13 + $0x518] sm:$0xff] }
0x1463   :  { %v4158_v55 = vld [vmem:[#allocation13 + $0x500] sm:$0xff]  ;;  %4318 = vmatprep.subr.bf16.mxu0 %v4159_v43  ;;  %4400 = vmatprep.subr.bf16.mxu1 %v4161_v40  ;;  %v4160_v47 = vld [vmem:[#allocation13 + $0x510] sm:$0xff]  ;;  %v4163_v54 = vld [vmem:[#allocation13 + $0x528] sm:$0xff] }
0x1464   :  { %v4164_v61 = vld [vmem:[#allocation13 + $0x530] sm:$0xff]  ;;  %v4166_v21 = vld [vmem:[#allocation13 + $0x540] sm:$0xff]  ;;  %4319 = vmatpush1.bf16.msra.mxu0 %v4158_v55  ;;  %4401 = vmatpush1.bf16.msra.mxu1 %v4160_v47  ;;  %v4165_v62 = vld [vmem:[#allocation13 + $0x538] sm:$0xff] }
0x1465   :  { %4320 = vmatprep.subr.bf16.mxu0 %v4164_v61  ;;  %4402 = vmatprep.subr.bf16.mxu1 %v4166_v21  ;;  %v4169_v22 = vld [vmem:[#allocation13 + $0x558] sm:$0xff]  ;;  %v4171_v48 = vld [vmem:[#allocation13 + $0x568] sm:$0xff]  ;;  %v4168_v36 = vld [vmem:[#allocation13 + $0x550] sm:$0xff] }
0x1466   :  { %v4170_v13 = vld [vmem:[#allocation13 + $0x560] sm:$0xff]  ;;  %v4176_v9 = vld [vmem:[#allocation13 + $0x590] sm:$0xff]  ;;  %v4173_v43 = vld [vmem:[#allocation13 + $0x578] sm:$0xff] }
0x1467   :  { %v4174_v2 = vld [vmem:[#allocation13 + $0x580] sm:$0xff]  ;;  %v4175_v40 = vld [vmem:[#allocation13 + $0x588] sm:$0xff]  ;;  %v4181_v47 = vld [vmem:[#allocation13 + $0x5b8] sm:$0xff] }
0x1468   :  { %4321 = vmatpush1.bf16.msra.mxu0 %v4163_v54  ;;  %4403 = vmatpush1.bf16.msra.mxu1 %v4165_v62  ;;  %v4179_v55 = vld [vmem:[#allocation13 + $0x5a8] sm:$0xff]  ;;  %v4178_v61 = vld [vmem:[#allocation13 + $0x5a0] sm:$0xff]  ;;  %v4180_v21 = vld [vmem:[#allocation13 + $0x5b0] sm:$0xff] }
0x1469   :  { %4322 = vmatprep.subr.bf16.mxu0 %v4169_v22  ;;  %4404 = vmatprep.subr.bf16.mxu1 %v4171_v48  ;;  %v4184_v54 = vld [vmem:[#allocation13 + $0x5d0] sm:$0xff]  ;;  %v4186_v62 = vld [vmem:[#allocation13 + $0x5e0] sm:$0xff]  ;;  %v4183_v22 = vld [vmem:[#allocation13 + $0x5c8] sm:$0xff] }
0x146a   :  { %v4185_v48 = vld [vmem:[#allocation13 + $0x5d8] sm:$0xff] }
0x146c   :  { %4323 = vmatpush1.bf16.msra.mxu0 %v4168_v36  ;;  %4405 = vmatpush1.bf16.msra.mxu1 %v4170_v13  ;;  %v4189_v36 = vld [vmem:[#allocation13 + $0x5f8] sm:$0xff]  ;;  %v4191_v13 = vld [vmem:[#allocation13 + $0x608] sm:$0xff] }
0x146d   :  { %4324 = vmatprep.subr.bf16.mxu0 %v4174_v2  ;;  %4406 = vmatprep.subr.bf16.mxu1 %v4176_v9  ;;  %v4188_v2 = vld [vmem:[#allocation13 + $0x5f0] sm:$0xff]  ;;  %v4190_v9 = vld [vmem:[#allocation13 + $0x600] sm:$0xff] }
0x1470   :  { %4325 = vmatpush1.bf16.msra.mxu0 %v4173_v43  ;;  %4407 = vmatpush1.bf16.msra.mxu1 %v4175_v40  ;;  %v4194_v43 = vld [vmem:[#allocation13 + $0x620] sm:$0xff]  ;;  %v4196_v40 = vld [vmem:[#allocation13 + $0x630] sm:$0xff] }
0x1471   :  { %4326 = vmatprep.subr.bf16.mxu0 %v4179_v55  ;;  %4408 = vmatprep.subr.bf16.mxu1 %v4181_v47  ;;  %v4193_v55 = vld [vmem:[#allocation13 + $0x618] sm:$0xff]  ;;  %v4195_v47 = vld [vmem:[#allocation13 + $0x628] sm:$0xff] }
0x1474   :  { %4327 = vmatpush1.bf16.msra.mxu0 %v4178_v61  ;;  %4409 = vmatpush1.bf16.msra.mxu1 %v4180_v21  ;;  %v4199_v61 = vld [vmem:[#allocation13 + $0x648] sm:$0xff]  ;;  %v4201_v21 = vld [vmem:[#allocation13 + $0x658] sm:$0xff] }
0x1475   :  { %4328 = vmatprep.subr.bf16.mxu0 %v4184_v54  ;;  %4410 = vmatprep.subr.bf16.mxu1 %v4186_v62  ;;  %v4198_v54 = vld [vmem:[#allocation13 + $0x640] sm:$0xff]  ;;  %v4200_v62 = vld [vmem:[#allocation13 + $0x650] sm:$0xff] }
0x1478   :  { %4329 = vmatpush1.bf16.msra.mxu0 %v4183_v22  ;;  %4411 = vmatpush1.bf16.msra.mxu1 %v4185_v48  ;;  %v4204_v22 = vld [vmem:[#allocation13 + $0x670] sm:$0xff]  ;;  %v4206_v48 = vld [vmem:[#allocation13 + $0x680] sm:$0xff] }
0x1479   :  { %4330 = vmatprep.subr.bf16.mxu0 %v4189_v36  ;;  %4412 = vmatprep.subr.bf16.mxu1 %v4191_v13  ;;  %v4203_v36 = vld [vmem:[#allocation13 + $0x668] sm:$0xff]  ;;  %v4205_v13 = vld [vmem:[#allocation13 + $0x678] sm:$0xff] }
0x147c   :  { %4331 = vmatpush1.bf16.msra.mxu0 %v4188_v2  ;;  %4413 = vmatpush1.bf16.msra.mxu1 %v4190_v9  ;;  %v4209_v2 = vld [vmem:[#allocation13 + $0x698] sm:$0xff]  ;;  %v4211_v9 = vld [vmem:[#allocation13 + $0x6a8] sm:$0xff] }
0x147d   :  { %4332 = vmatprep.subr.bf16.mxu0 %v4194_v43  ;;  %4414 = vmatprep.subr.bf16.mxu1 %v4196_v40  ;;  %v4208_v43 = vld [vmem:[#allocation13 + $0x690] sm:$0xff]  ;;  %v4210_v40 = vld [vmem:[#allocation13 + $0x6a0] sm:$0xff] }
0x1480   :  { %4333 = vmatpush1.bf16.msra.mxu0 %v4193_v55  ;;  %4415 = vmatpush1.bf16.msra.mxu1 %v4195_v47  ;;  %v4214_v55 = vld [vmem:[#allocation13 + $0x6c0] sm:$0xff]  ;;  %v4216_v47 = vld [vmem:[#allocation13 + $0x6d0] sm:$0xff] }
0x1481   :  { %4334 = vmatprep.subr.bf16.mxu0 %v4199_v61  ;;  %4416 = vmatprep.subr.bf16.mxu1 %v4201_v21  ;;  %v4213_v61 = vld [vmem:[#allocation13 + $0x6b8] sm:$0xff]  ;;  %v4215_v21 = vld [vmem:[#allocation13 + $0x6c8] sm:$0xff] }
0x1484   :  { %4335 = vmatpush1.bf16.msra.mxu0 %v4198_v54  ;;  %4417 = vmatpush1.bf16.msra.mxu1 %v4200_v62  ;;  %v4219_v54 = vld [vmem:[#allocation13 + $0x6e8] sm:$0xff]  ;;  %v4221_v62 = vld [vmem:[#allocation13 + $0x6f8] sm:$0xff] }
0x1485   :  { %4336 = vmatprep.subr.bf16.mxu0 %v4204_v22  ;;  %4418 = vmatprep.subr.bf16.mxu1 %v4206_v48  ;;  %v4218_v22 = vld [vmem:[#allocation13 + $0x6e0] sm:$0xff]  ;;  %v4220_v48 = vld [vmem:[#allocation13 + $0x6f0] sm:$0xff] }
0x1488   :  { %4337 = vmatpush1.bf16.msra.mxu0 %v4203_v36  ;;  %4419 = vmatpush1.bf16.msra.mxu1 %v4205_v13  ;;  %v4224_v36 = vld [vmem:[#allocation13 + $0x710] sm:$0xff]  ;;  %v4226_v13 = vld [vmem:[#allocation13 + $0x720] sm:$0xff] }
0x1489   :  { %4338 = vmatprep.subr.bf16.mxu0 %v4209_v2  ;;  %4420 = vmatprep.subr.bf16.mxu1 %v4211_v9  ;;  %v4223_v2 = vld [vmem:[#allocation13 + $0x708] sm:$0xff]  ;;  %v4225_v9 = vld [vmem:[#allocation13 + $0x718] sm:$0xff] }
0x148c   :  { %4339 = vmatpush1.bf16.msra.mxu0 %v4208_v43  ;;  %4421 = vmatpush1.bf16.msra.mxu1 %v4210_v40  ;;  %v4229_v43 = vld [vmem:[#allocation13 + $0x738] sm:$0xff]  ;;  %v4231_v40 = vld [vmem:[#allocation13 + $0x748] sm:$0xff] }
0x148d   :  { %4340 = vmatprep.subr.bf16.mxu0 %v4214_v55  ;;  %4422 = vmatprep.subr.bf16.mxu1 %v4216_v47  ;;  %v4228_v55 = vld [vmem:[#allocation13 + $0x730] sm:$0xff]  ;;  %v4230_v47 = vld [vmem:[#allocation13 + $0x740] sm:$0xff] }
0x1490   :  { %4341 = vmatpush1.bf16.msra.mxu0 %v4213_v61  ;;  %4423 = vmatpush1.bf16.msra.mxu1 %v4215_v21  ;;  %v4234_v61 = vld [vmem:[#allocation13 + $0x760] sm:$0xff]  ;;  %v4236_v21 = vld [vmem:[#allocation13 + $0x770] sm:$0xff] }
0x1491   :  { %4342 = vmatprep.subr.bf16.mxu0 %v4219_v54  ;;  %4424 = vmatprep.subr.bf16.mxu1 %v4221_v62  ;;  %v4233_v54 = vld [vmem:[#allocation13 + $0x758] sm:$0xff]  ;;  %v4235_v62 = vld [vmem:[#allocation13 + $0x768] sm:$0xff] }
0x1494   :  { %4343 = vmatpush1.bf16.msra.mxu0 %v4218_v22  ;;  %4425 = vmatpush1.bf16.msra.mxu1 %v4220_v48  ;;  %v4239_v22 = vld [vmem:[#allocation13 + $0x788] sm:$0xff]  ;;  %v4241_v48 = vld [vmem:[#allocation13 + $0x798] sm:$0xff] }
0x1495   :  { %4344 = vmatprep.subr.bf16.mxu0 %v4224_v36  ;;  %4426 = vmatprep.subr.bf16.mxu1 %v4226_v13  ;;  %v4238_v36 = vld [vmem:[#allocation13 + $0x780] sm:$0xff]  ;;  %v4240_v13 = vld [vmem:[#allocation13 + $0x790] sm:$0xff] }
0x1498   :  { %4345 = vmatpush1.bf16.msra.mxu0 %v4223_v2  ;;  %4427 = vmatpush1.bf16.msra.mxu1 %v4225_v9  ;;  %v4244_v2 = vld [vmem:[#allocation13 + $0x7b0] sm:$0xff]  ;;  %v4246_v9 = vld [vmem:[#allocation13 + $0x7c0] sm:$0xff] }
0x1499   :  { %4346 = vmatprep.subr.bf16.mxu0 %v4229_v43  ;;  %4428 = vmatprep.subr.bf16.mxu1 %v4231_v40  ;;  %v4243_v43 = vld [vmem:[#allocation13 + $0x7a8] sm:$0xff]  ;;  %v4245_v40 = vld [vmem:[#allocation13 + $0x7b8] sm:$0xff] }
0x149c   :  { %4347 = vmatpush1.bf16.msra.mxu0 %v4228_v55  ;;  %4429 = vmatpush1.bf16.msra.mxu1 %v4230_v47  ;;  %v4249_v55 = vld [vmem:[#allocation13 + $0x7d8] sm:$0xff]  ;;  %v4251_v47 = vld [vmem:[#allocation13 + $0x7e8] sm:$0xff] }
0x149d   :  { %4348 = vmatprep.subr.bf16.mxu0 %v4234_v61  ;;  %4430 = vmatprep.subr.bf16.mxu1 %v4236_v21  ;;  %v4248_v61 = vld [vmem:[#allocation13 + $0x7d0] sm:$0xff]  ;;  %v4250_v21 = vld [vmem:[#allocation13 + $0x7e0] sm:$0xff] }
0x14a0   :  { %4349 = vmatpush1.bf16.msra.mxu0 %v4233_v54  ;;  %4431 = vmatpush1.bf16.msra.mxu1 %v4235_v62  ;;  %v4254_v54 = vld [vmem:[#allocation13 + $0x800] sm:$0xff]  ;;  %v4256_v62 = vld [vmem:[#allocation13 + $0x810] sm:$0xff] }
0x14a1   :  { %4359 = vmatprep.subr.bf16.mxu0 %v4239_v22  ;;  %4441 = vmatprep.subr.bf16.mxu1 %v4241_v48  ;;  %v4253_v22 = vld [vmem:[#allocation13 + $0x7f8] sm:$0xff]  ;;  %v4255_v48 = vld [vmem:[#allocation13 + $0x808] sm:$0xff] }
0x14a3   :  { %4351 = vmatmul.mubr.bf16.vlgmr.msra.gmra.mrb[80].mxu0 %v10408_v20  ;;  %4433 = vmatmul.mubr.bf16.vlgmr.msra.gmra.mrb[96].mxu1 %v10408_v20 }
0x14a4   :  { %4360 = vmatpush1.bf16.msra.mxu0 %v4238_v36  ;;  %4442 = vmatpush1.bf16.msra.mxu1 %v4240_v13  ;;  %v4259_v36 = vld [vmem:[#allocation13 + $0x828] sm:$0xff]  ;;  %v4261_v13 = vld [vmem:[#allocation13 + $0x838] sm:$0xff] }
0x14a5   :  { %4361 = vmatprep.subr.bf16.mxu0 %v4244_v2  ;;  %4443 = vmatprep.subr.bf16.mxu1 %v4246_v9  ;;  %v4258_v2 = vld [vmem:[#allocation13 + $0x820] sm:$0xff]  ;;  %v4260_v9 = vld [vmem:[#allocation13 + $0x830] sm:$0xff] }
0x14a6   :  { %4391 = vmatprep.mubr.bf16.mxu0 %v10414_v59  ;;  %4473 = vmatprep.mubr.bf16.mxu1 %v10414_v59 }
0x14a8   :  { %4362 = vmatpush1.bf16.msra.mxu0 %v4243_v43  ;;  %4444 = vmatpush1.bf16.msra.mxu1 %v4245_v40  ;;  %v4264_v43 = vld [vmem:[#allocation13 + $0x850] sm:$0xff]  ;;  %v4266_v40 = vld [vmem:[#allocation13 + $0x860] sm:$0xff] }
0x14a9   :  { %4363 = vmatprep.subr.bf16.mxu0 %v4249_v55  ;;  %4445 = vmatprep.subr.bf16.mxu1 %v4251_v47  ;;  %v4263_v55 = vld [vmem:[#allocation13 + $0x848] sm:$0xff]  ;;  %v4265_v47 = vld [vmem:[#allocation13 + $0x858] sm:$0xff] }
0x14ac   :  { %4364 = vmatpush1.bf16.msra.mxu0 %v4248_v61  ;;  %4446 = vmatpush1.bf16.msra.mxu1 %v4250_v21  ;;  %v4269_v61 = vld [vmem:[#allocation13 + $0x878] sm:$0xff]  ;;  %v4271_v21 = vld [vmem:[#allocation13 + $0x888] sm:$0xff] }
0x14ad   :  { %4365 = vmatprep.subr.bf16.mxu0 %v4254_v54  ;;  %4447 = vmatprep.subr.bf16.mxu1 %v4256_v62  ;;  %v4268_v54 = vld [vmem:[#allocation13 + $0x870] sm:$0xff]  ;;  %v4270_v62 = vld [vmem:[#allocation13 + $0x880] sm:$0xff] }
0x14b0   :  { %4366 = vmatpush1.bf16.msra.mxu0 %v4253_v22  ;;  %4448 = vmatpush1.bf16.msra.mxu1 %v4255_v48  ;;  %v4274_v22 = vld [vmem:[#allocation13 + $0x8a0] sm:$0xff]  ;;  %v4276_v48 = vld [vmem:[#allocation13 + $0x8b0] sm:$0xff] }
0x14b1   :  { %4367 = vmatprep.subr.bf16.mxu0 %v4259_v36  ;;  %4449 = vmatprep.subr.bf16.mxu1 %v4261_v13  ;;  %v4273_v36 = vld [vmem:[#allocation13 + $0x898] sm:$0xff]  ;;  %v4275_v13 = vld [vmem:[#allocation13 + $0x8a8] sm:$0xff] }
0x14b4   :  { %4368 = vmatpush1.bf16.msra.mxu0 %v4258_v2  ;;  %4450 = vmatpush1.bf16.msra.mxu1 %v4260_v9  ;;  %v4279_v2 = vld [vmem:[#allocation13 + $0x8c8] sm:$0xff]  ;;  %v4281_v9 = vld [vmem:[#allocation13 + $0x8d8] sm:$0xff] }
0x14b5   :  { %4369 = vmatprep.subr.bf16.mxu0 %v4264_v43  ;;  %4451 = vmatprep.subr.bf16.mxu1 %v4266_v40  ;;  %v4278_v43 = vld [vmem:[#allocation13 + $0x8c0] sm:$0xff]  ;;  %v4280_v40 = vld [vmem:[#allocation13 + $0x8d0] sm:$0xff] }
0x14b8   :  { %4370 = vmatpush1.bf16.msra.mxu0 %v4263_v55  ;;  %4452 = vmatpush1.bf16.msra.mxu1 %v4265_v47  ;;  %v4284_v55 = vld [vmem:[#allocation13 + $0x8f0] sm:$0xff]  ;;  %v4286_v47 = vld [vmem:[#allocation13 + $0x900] sm:$0xff] }
0x14b9   :  { %4371 = vmatprep.subr.bf16.mxu0 %v4269_v61  ;;  %4453 = vmatprep.subr.bf16.mxu1 %v4271_v21  ;;  %v4283_v61 = vld [vmem:[#allocation13 + $0x8e8] sm:$0xff]  ;;  %v4285_v21 = vld [vmem:[#allocation13 + $0x8f8] sm:$0xff] }
0x14bc   :  { %4372 = vmatpush1.bf16.msra.mxu0 %v4268_v54  ;;  %4454 = vmatpush1.bf16.msra.mxu1 %v4270_v62  ;;  %v4289_v54 = vld [vmem:[#allocation13 + $0x918] sm:$0xff]  ;;  %v4291_v62 = vld [vmem:[#allocation13 + $0x928] sm:$0xff] }
0x14bd   :  { %4373 = vmatprep.subr.bf16.mxu0 %v4274_v22  ;;  %4455 = vmatprep.subr.bf16.mxu1 %v4276_v48  ;;  %v4288_v22 = vld [vmem:[#allocation13 + $0x910] sm:$0xff]  ;;  %v4290_v48 = vld [vmem:[#allocation13 + $0x920] sm:$0xff] }
0x14c0   :  { %4374 = vmatpush1.bf16.msra.mxu0 %v4273_v36  ;;  %4456 = vmatpush1.bf16.msra.mxu1 %v4275_v13  ;;  %v4294_v36 = vld [vmem:[#allocation13 + $0x940] sm:$0xff]  ;;  %v4296_v13 = vld [vmem:[#allocation13 + $0x950] sm:$0xff] }
0x14c1   :  { %4375 = vmatprep.subr.bf16.mxu0 %v4279_v2  ;;  %4457 = vmatprep.subr.bf16.mxu1 %v4281_v9  ;;  %v4293_v2 = vld [vmem:[#allocation13 + $0x938] sm:$0xff]  ;;  %v4295_v9 = vld [vmem:[#allocation13 + $0x948] sm:$0xff] }
0x14c4   :  { %4376 = vmatpush1.bf16.msra.mxu0 %v4278_v43  ;;  %4458 = vmatpush1.bf16.msra.mxu1 %v4280_v40  ;;  %v4299_v43 = vld [vmem:[#allocation13 + $0x968] sm:$0xff]  ;;  %v4301_v40 = vld [vmem:[#allocation13 + $0x978] sm:$0xff] }
0x14c5   :  { %4377 = vmatprep.subr.bf16.mxu0 %v4284_v55  ;;  %4459 = vmatprep.subr.bf16.mxu1 %v4286_v47  ;;  %v4298_v55 = vld [vmem:[#allocation13 + $0x960] sm:$0xff]  ;;  %v4300_v47 = vld [vmem:[#allocation13 + $0x970] sm:$0xff] }
0x14c8   :  { %4378 = vmatpush1.bf16.msra.mxu0 %v4283_v61  ;;  %4460 = vmatpush1.bf16.msra.mxu1 %v4285_v21  ;;  %v4304_v61 = vld [vmem:[#allocation13 + $0x990] sm:$0xff]  ;;  %v4306_v21 = vld [vmem:[#allocation13 + $0x9a0] sm:$0xff] }
0x14c9   :  { %4379 = vmatprep.subr.bf16.mxu0 %v4289_v54  ;;  %4461 = vmatprep.subr.bf16.mxu1 %v4291_v62  ;;  %v4303_v54 = vld [vmem:[#allocation13 + $0x988] sm:$0xff]  ;;  %v4305_v62 = vld [vmem:[#allocation13 + $0x998] sm:$0xff] }
0x14cc   :  { %4380 = vmatpush1.bf16.msra.mxu0 %v4288_v22  ;;  %4462 = vmatpush1.bf16.msra.mxu1 %v4290_v48  ;;  %v4309_v22 = vld [vmem:[#allocation13 + $0x9b8] sm:$0xff]  ;;  %v4311_v48 = vld [vmem:[#allocation13 + $0x9c8] sm:$0xff] }
0x14cd   :  { %4381 = vmatprep.subr.bf16.mxu0 %v4294_v36  ;;  %4463 = vmatprep.subr.bf16.mxu1 %v4296_v13  ;;  %v4308_v36 = vld [vmem:[#allocation13 + $0x9b0] sm:$0xff]  ;;  %v4310_v13 = vld [vmem:[#allocation13 + $0x9c0] sm:$0xff] }
0x14d0   :  { %4382 = vmatpush1.bf16.msra.mxu0 %v4293_v2  ;;  %4464 = vmatpush1.bf16.msra.mxu1 %v4295_v9  ;;  %v4314_v2 = vld [vmem:[#allocation13 + $0x9e0] sm:$0xff]  ;;  %v4316_v9 = vld [vmem:[#allocation13 + $0x9f0] sm:$0xff] }
0x14d1   :  { %4383 = vmatprep.subr.bf16.mxu0 %v4299_v43  ;;  %4465 = vmatprep.subr.bf16.mxu1 %v4301_v40  ;;  %v4313_v43 = vld [vmem:[#allocation13 + $0x9d8] sm:$0xff]  ;;  %v4315_v40 = vld [vmem:[#allocation13 + $0x9e8] sm:$0xff] }
0x14d4   :  { %4384 = vmatpush1.bf16.msra.mxu0 %v4298_v55  ;;  %4466 = vmatpush1.bf16.msra.mxu1 %v4300_v47  ;;  %v4202_v55 = vld [vmem:[#allocation13 + $0x660] sm:$0xff] }
0x14d5   :  { %4385 = vmatprep.subr.bf16.mxu0 %v4304_v61  ;;  %4467 = vmatprep.subr.bf16.mxu1 %v4306_v21  ;;  %v4282_v47 = vld [vmem:[#allocation13 + $0x8e0] sm:$0xff] }
0x14d6   :  { %v4162_v61 = vld [vmem:[#allocation13 + $0x520] sm:$0xff] }
0x14d7   :  { %v4242_v21 = vld [vmem:[#allocation13 + $0x7a0] sm:$0xff] }
0x14d8   :  { %4386 = vmatpush1.bf16.msra.mxu0 %v4303_v54  ;;  %4468 = vmatpush1.bf16.msra.mxu1 %v4305_v62  ;;  %v4207_v54 = vld [vmem:[#allocation13 + $0x688] sm:$0xff] }
0x14d9   :  { %4387 = vmatprep.subr.bf16.mxu0 %v4309_v22  ;;  %4469 = vmatprep.subr.bf16.mxu1 %v4311_v48  ;;  %v4287_v62 = vld [vmem:[#allocation13 + $0x908] sm:$0xff] }
0x14da   :  { %v4167_v22 = vld [vmem:[#allocation13 + $0x548] sm:$0xff] }
0x14db   :  { %v4247_v48 = vld [vmem:[#allocation13 + $0x7c8] sm:$0xff] }
0x14dc   :  { %4388 = vmatpush1.bf16.msra.mxu0 %v4308_v36  ;;  %4470 = vmatpush1.bf16.msra.mxu1 %v4310_v13  ;;  %v4212_v36 = vld [vmem:[#allocation13 + $0x6b0] sm:$0xff] }
0x14dd   :  { %4389 = vmatprep.subr.bf16.mxu0 %v4314_v2  ;;  %4471 = vmatprep.subr.bf16.mxu1 %v4316_v9  ;;  %v4292_v13 = vld [vmem:[#allocation13 + $0x930] sm:$0xff] }
0x14de   :  { %v4172_v2 = vld [vmem:[#allocation13 + $0x570] sm:$0xff] }
0x14df   :  { %v4252_v9 = vld [vmem:[#allocation13 + $0x7f0] sm:$0xff] }
0x14e0   :  { %4390 = vmatpush1.bf16.msra.mxu0 %v4313_v43  ;;  %4472 = vmatpush1.bf16.msra.mxu1 %v4315_v40  ;;  %v4217_v43 = vld [vmem:[#allocation13 + $0x6d8] sm:$0xff] }
0x14e1   :  { %8153 = vmatprep.subr.bf16.mxu0 %v4202_v55  ;;  %8175 = vmatprep.subr.bf16.mxu1 %v4282_v47  ;;  %v4297_v40 = vld [vmem:[#allocation13 + $0x958] sm:$0xff] }
0x14e2   :  { %v4177_v55 = vld [vmem:[#allocation13 + $0x598] sm:$0xff] }
0x14e3   :  { %4392 = vmatmul.mubr.bf16.vlgmr.msra.gmra.mrb[80].mxu0 %v10410_v12  ;;  %4474 = vmatmul.mubr.bf16.vlgmr.msra.gmra.mrb[96].mxu1 %v10410_v12  ;;  %v4257_v47 = vld [vmem:[#allocation13 + $0x818] sm:$0xff] }
0x14e4   :  { %8154 = vmatpush3.bf16.msra.mxu0 %v4162_v61  ;;  %8176 = vmatpush3.bf16.msra.mxu1 %v4242_v21  ;;  %v4222_v61 = vld [vmem:[#allocation13 + $0x700] sm:$0xff] }
0x14e5   :  { %8155 = vmatprep.subr.bf16.mxu0 %v4207_v54  ;;  %8177 = vmatprep.subr.bf16.mxu1 %v4287_v62  ;;  %v4302_v21 = vld [vmem:[#allocation13 + $0x980] sm:$0xff]  ;;  %v4227_v54 = vld [vmem:[#allocation13 + $0x728] sm:$0xff] }
0x14e6   :  { %4514 = vmatprep.mubr.bf16.mxu0 %v10412_v3  ;;  %4554 = vmatprep.mubr.bf16.mxu1 %v10414_v59  ;;  %v4182_v3 = vld [vmem:[#allocation13 + $0x5c0] sm:$0xff]  ;;  %v4307_v62 = vld [vmem:[#allocation13 + $0x9a8] sm:$0xff] }
0x14e7   :  { %v4262_v59 = vld [vmem:[#allocation13 + $0x840] sm:$0xff] }
0x14e8   :  { %8156 = vmatpush3.bf16.msra.mxu0 %v4167_v22  ;;  %8178 = vmatpush3.bf16.msra.mxu1 %v4247_v48  ;;  %v4187_v22 = vld [vmem:[#allocation13 + $0x5e8] sm:$0xff] }
0x14e9   :  { %8157 = vmatprep.subr.bf16.mxu0 %v4212_v36  ;;  %8179 = vmatprep.subr.bf16.mxu1 %v4292_v13  ;;  %v4267_v48 = vld [vmem:[#allocation13 + $0x868] sm:$0xff]  ;;  %v4232_v36 = vld [vmem:[#allocation13 + $0x750] sm:$0xff] }
0x14ea   :  { %v4312_v13 = vld [vmem:[#allocation13 + $0x9d0] sm:$0xff] }
0x14ec   :  { %8158 = vmatpush3.bf16.msra.mxu0 %v4172_v2  ;;  %8180 = vmatpush3.bf16.msra.mxu1 %v4252_v9  ;;  %v4192_v2 = vld [vmem:[#allocation13 + $0x610] sm:$0xff] }
0x14ed   :  { %8159 = vmatprep.subr.bf16.mxu0 %v4217_v43  ;;  %8181 = vmatprep.subr.bf16.mxu1 %v4297_v40  ;;  %v4272_v9 = vld [vmem:[#allocation13 + $0x890] sm:$0xff]  ;;  %v4237_v43 = vld [vmem:[#allocation13 + $0x778] sm:$0xff] }
0x14ee   :  { %v4317_v40 = vld [vmem:[#allocation13 + $0x9f8] sm:$0xff] }
0x14f0   :  { %8160 = vmatpush3.bf16.msra.mxu0 %v4177_v55  ;;  %8182 = vmatpush3.bf16.msra.mxu1 %v4257_v47  ;;  %v4197_v55 = vld [vmem:[#allocation13 + $0x638] sm:$0xff] }
0x14f1   :  { %8161 = vmatprep.subr.bf16.mxu0 %v4222_v61  ;;  %8183 = vmatprep.subr.bf16.mxu1 %v4302_v21  ;;  %v4277_v47 = vld [vmem:[#allocation13 + $0x8b8] sm:$0xff]  ;;  %v3998_v61 = vld [vmem:[#allocation13 + $0x8] sm:$0xff] }
0x14f2   :  { %v4000_v21 = vld [vmem:[#allocation13 + $0x18] sm:$0xff] }
0x14f4   :  { %8162 = vmatpush3.bf16.msra.mxu0 %v4182_v3  ;;  %8184 = vmatpush3.bf16.msra.mxu1 %v4262_v59  ;;  %v3997_v3 = vld [vmem:[#allocation13] sm:$0xff]  ;;  %v3999_v59 = vld [vmem:[#allocation13 + $0x10] sm:$0xff] }
0x14f5   :  { %8163 = vmatprep.subr.bf16.mxu0 %v4227_v54  ;;  %8185 = vmatprep.subr.bf16.mxu1 %v4307_v62  ;;  %v4003_v54 = vld [vmem:[#allocation13 + $0x30] sm:$0xff]  ;;  %v4005_v62 = vld [vmem:[#allocation13 + $0x40] sm:$0xff] }
0x14f8   :  { %8164 = vmatpush3.bf16.msra.mxu0 %v4187_v22  ;;  %8186 = vmatpush3.bf16.msra.mxu1 %v4267_v48  ;;  %v4002_v22 = vld [vmem:[#allocation13 + $0x28] sm:$0xff]  ;;  %v4004_v48 = vld [vmem:[#allocation13 + $0x38] sm:$0xff] }
0x14f9   :  { %8165 = vmatprep.subr.bf16.mxu0 %v4232_v36  ;;  %8187 = vmatprep.subr.bf16.mxu1 %v4312_v13  ;;  %v4008_v36 = vld [vmem:[#allocation13 + $0x58] sm:$0xff]  ;;  %v4010_v13 = vld [vmem:[#allocation13 + $0x68] sm:$0xff] }
0x14fc   :  { %8166 = vmatpush3.bf16.msra.mxu0 %v4192_v2  ;;  %8188 = vmatpush3.bf16.msra.mxu1 %v4272_v9  ;;  %v4007_v2 = vld [vmem:[#allocation13 + $0x50] sm:$0xff]  ;;  %v4013_v9 = vld [vmem:[#allocation13 + $0x80] sm:$0xff] }
0x14fd   :  { %8167 = vmatprep.subr.bf16.mxu0 %v4237_v43  ;;  %8189 = vmatprep.subr.bf16.mxu1 %v4317_v40  ;;  %v4012_v43 = vld [vmem:[#allocation13 + $0x78] sm:$0xff]  ;;  %v4014_v40 = vld [vmem:[#allocation13 + $0x88] sm:$0xff] }
0x1500   :  { %8168 = vmatpush3.bf16.msra.mxu0 %v4197_v55  ;;  %8190 = vmatpush3.bf16.msra.mxu1 %v4277_v47  ;;  %v4018_v55 = vld [vmem:[#allocation13 + $0xa8] sm:$0xff]  ;;  %v4020_v47 = vld [vmem:[#allocation13 + $0xb8] sm:$0xff] }
0x1501   :  { %4562 = vmatprep.subr.bf16.mxu0 %v3998_v61  ;;  %4644 = vmatprep.subr.bf16.mxu1 %v4000_v21  ;;  %v4017_v61 = vld [vmem:[#allocation13 + $0xa0] sm:$0xff]  ;;  %v4019_v21 = vld [vmem:[#allocation13 + $0xb0] sm:$0xff] }
0x1503   :  { %4515 = vmatmul.mubr.bf16.vlgmr.msra.gmra.mrb[84].mxu0 %v10408_v20  ;;  %4555 = vmatmul.mubr.bf16.vlgmr.msra.gmra.mrb[100].mxu1 %v10410_v12  ;;  %v4009_v20 = vld [vmem:[#allocation13 + $0x60] sm:$0xff]  ;;  %v4015_v12 = vld [vmem:[#allocation13 + $0x90] sm:$0xff] }
0x1504   :  { %4563 = vmatpush1.bf16.msra.mxu0 %v3997_v3  ;;  %4645 = vmatpush1.bf16.msra.mxu1 %v3999_v59  ;;  %v4023_v3 = vld [vmem:[#allocation13 + $0xd0] sm:$0xff]  ;;  %v4025_v59 = vld [vmem:[#allocation13 + $0xe0] sm:$0xff] }
0x1505   :  { %4564 = vmatprep.subr.bf16.mxu0 %v4003_v54  ;;  %4646 = vmatprep.subr.bf16.mxu1 %v4005_v62  ;;  %v4022_v54 = vld [vmem:[#allocation13 + $0xc8] sm:$0xff]  ;;  %v4024_v62 = vld [vmem:[#allocation13 + $0xd8] sm:$0xff] }
0x1506   :  { %4594 = vmatprep.mubr.bf16.mxu0 %v10404_v51  ;;  %4676 = vmatprep.mubr.bf16.mxu1 %v10404_v51 }
0x1508   :  { %4565 = vmatpush1.bf16.msra.mxu0 %v4002_v22  ;;  %4647 = vmatpush1.bf16.msra.mxu1 %v4004_v48  ;;  %v4028_v22 = vld [vmem:[#allocation13 + $0xf8] sm:$0xff]  ;;  %v4030_v48 = vld [vmem:[#allocation13 + $0x108] sm:$0xff] }
0x1509   :  { %4566 = vmatprep.subr.bf16.mxu0 %v4008_v36  ;;  %4648 = vmatprep.subr.bf16.mxu1 %v4010_v13  ;;  %v4027_v36 = vld [vmem:[#allocation13 + $0xf0] sm:$0xff]  ;;  %v4029_v13 = vld [vmem:[#allocation13 + $0x100] sm:$0xff] }
0x150c   :  { %4567 = vmatpush1.bf16.msra.mxu0 %v4007_v2  ;;  %4649 = vmatpush1.bf16.msra.mxu1 %v4009_v20  ;;  %v4033_v2 = vld [vmem:[#allocation13 + $0x120] sm:$0xff]  ;;  %v4035_v20 = vld [vmem:[#allocation13 + $0x130] sm:$0xff] }
0x150d   :  { %4568 = vmatprep.subr.bf16.mxu0 %v4013_v9  ;;  %4650 = vmatprep.subr.bf16.mxu1 %v4015_v12  ;;  %v4032_v9 = vld [vmem:[#allocation13 + $0x118] sm:$0xff]  ;;  %v4034_v12 = vld [vmem:[#allocation13 + $0x128] sm:$0xff] }
0x1510   :  { %4569 = vmatpush1.bf16.msra.mxu0 %v4012_v43  ;;  %4651 = vmatpush1.bf16.msra.mxu1 %v4014_v40  ;;  %v4038_v43 = vld [vmem:[#allocation13 + $0x148] sm:$0xff]  ;;  %v4040_v40 = vld [vmem:[#allocation13 + $0x158] sm:$0xff] }
0x1511   :  { %4570 = vmatprep.subr.bf16.mxu0 %v4018_v55  ;;  %4652 = vmatprep.subr.bf16.mxu1 %v4020_v47  ;;  %v4037_v55 = vld [vmem:[#allocation13 + $0x140] sm:$0xff]  ;;  %v4039_v47 = vld [vmem:[#allocation13 + $0x150] sm:$0xff] }
0x1514   :  { %4571 = vmatpush1.bf16.msra.mxu0 %v4017_v61  ;;  %4653 = vmatpush1.bf16.msra.mxu1 %v4019_v21  ;;  %v4043_v61 = vld [vmem:[#allocation13 + $0x170] sm:$0xff]  ;;  %v4045_v21 = vld [vmem:[#allocation13 + $0x180] sm:$0xff] }
0x1515   :  { %4572 = vmatprep.subr.bf16.mxu0 %v4023_v3  ;;  %4654 = vmatprep.subr.bf16.mxu1 %v4025_v59  ;;  %v4042_v3 = vld [vmem:[#allocation13 + $0x168] sm:$0xff]  ;;  %v4044_v59 = vld [vmem:[#allocation13 + $0x178] sm:$0xff] }
0x1518   :  { %4573 = vmatpush1.bf16.msra.mxu0 %v4022_v54  ;;  %4655 = vmatpush1.bf16.msra.mxu1 %v4024_v62  ;;  %v4048_v54 = vld [vmem:[#allocation13 + $0x198] sm:$0xff]  ;;  %v4050_v62 = vld [vmem:[#allocation13 + $0x1a8] sm:$0xff] }
0x1519   :  { %4574 = vmatprep.subr.bf16.mxu0 %v4028_v22  ;;  %4656 = vmatprep.subr.bf16.mxu1 %v4030_v48  ;;  %v4047_v22 = vld [vmem:[#allocation13 + $0x190] sm:$0xff]  ;;  %v4049_v48 = vld [vmem:[#allocation13 + $0x1a0] sm:$0xff] }
0x151c   :  { %4575 = vmatpush1.bf16.msra.mxu0 %v4027_v36  ;;  %4657 = vmatpush1.bf16.msra.mxu1 %v4029_v13  ;;  %v4053_v36 = vld [vmem:[#allocation13 + $0x1c0] sm:$0xff]  ;;  %v4055_v13 = vld [vmem:[#allocation13 + $0x1d0] sm:$0xff] }
0x151d   :  { %4576 = vmatprep.subr.bf16.mxu0 %v4033_v2  ;;  %4658 = vmatprep.subr.bf16.mxu1 %v4035_v20  ;;  %v4052_v2 = vld [vmem:[#allocation13 + $0x1b8] sm:$0xff]  ;;  %v4054_v20 = vld [vmem:[#allocation13 + $0x1c8] sm:$0xff] }
0x1520   :  { %4577 = vmatpush1.bf16.msra.mxu0 %v4032_v9  ;;  %4659 = vmatpush1.bf16.msra.mxu1 %v4034_v12  ;;  %v4058_v9 = vld [vmem:[#allocation13 + $0x1e8] sm:$0xff]  ;;  %v4060_v12 = vld [vmem:[#allocation13 + $0x1f8] sm:$0xff] }
0x1521   :  { %4578 = vmatprep.subr.bf16.mxu0 %v4038_v43  ;;  %4660 = vmatprep.subr.bf16.mxu1 %v4040_v40  ;;  %v4057_v43 = vld [vmem:[#allocation13 + $0x1e0] sm:$0xff]  ;;  %v4059_v40 = vld [vmem:[#allocation13 + $0x1f0] sm:$0xff] }
0x1524   :  { %4579 = vmatpush1.bf16.msra.mxu0 %v4037_v55  ;;  %4661 = vmatpush1.bf16.msra.mxu1 %v4039_v47  ;;  %v4063_v55 = vld [vmem:[#allocation13 + $0x210] sm:$0xff]  ;;  %v4065_v47 = vld [vmem:[#allocation13 + $0x220] sm:$0xff] }
0x1525   :  { %4580 = vmatprep.subr.bf16.mxu0 %v4043_v61  ;;  %4662 = vmatprep.subr.bf16.mxu1 %v4045_v21  ;;  %v4062_v61 = vld [vmem:[#allocation13 + $0x208] sm:$0xff]  ;;  %v4064_v21 = vld [vmem:[#allocation13 + $0x218] sm:$0xff] }
0x1528   :  { %4581 = vmatpush1.bf16.msra.mxu0 %v4042_v3  ;;  %4663 = vmatpush1.bf16.msra.mxu1 %v4044_v59  ;;  %v4068_v3 = vld [vmem:[#allocation13 + $0x238] sm:$0xff]  ;;  %v4070_v59 = vld [vmem:[#allocation13 + $0x248] sm:$0xff] }
0x1529   :  { %4582 = vmatprep.subr.bf16.mxu0 %v4048_v54  ;;  %4664 = vmatprep.subr.bf16.mxu1 %v4050_v62  ;;  %v4067_v54 = vld [vmem:[#allocation13 + $0x230] sm:$0xff]  ;;  %v4069_v62 = vld [vmem:[#allocation13 + $0x240] sm:$0xff] }
0x152c   :  { %4583 = vmatpush1.bf16.msra.mxu0 %v4047_v22  ;;  %4665 = vmatpush1.bf16.msra.mxu1 %v4049_v48  ;;  %v4073_v22 = vld [vmem:[#allocation13 + $0x260] sm:$0xff]  ;;  %v4075_v48 = vld [vmem:[#allocation13 + $0x270] sm:$0xff] }
0x152d   :  { %4584 = vmatprep.subr.bf16.mxu0 %v4053_v36  ;;  %4666 = vmatprep.subr.bf16.mxu1 %v4055_v13  ;;  %v4072_v36 = vld [vmem:[#allocation13 + $0x258] sm:$0xff]  ;;  %v4074_v13 = vld [vmem:[#allocation13 + $0x268] sm:$0xff] }
0x1530   :  { %4585 = vmatpush1.bf16.msra.mxu0 %v4052_v2  ;;  %4667 = vmatpush1.bf16.msra.mxu1 %v4054_v20  ;;  %v4078_v2 = vld [vmem:[#allocation13 + $0x288] sm:$0xff]  ;;  %v4080_v20 = vld [vmem:[#allocation13 + $0x298] sm:$0xff] }
0x1531   :  { %4586 = vmatprep.subr.bf16.mxu0 %v4058_v9  ;;  %4668 = vmatprep.subr.bf16.mxu1 %v4060_v12  ;;  %v4077_v9 = vld [vmem:[#allocation13 + $0x280] sm:$0xff]  ;;  %v4079_v12 = vld [vmem:[#allocation13 + $0x290] sm:$0xff] }
0x1534   :  { %4587 = vmatpush1.bf16.msra.mxu0 %v4057_v43  ;;  %4669 = vmatpush1.bf16.msra.mxu1 %v4059_v40  ;;  %v4083_v43 = vld [vmem:[#allocation13 + $0x2b0] sm:$0xff]  ;;  %v4085_v40 = vld [vmem:[#allocation13 + $0x2c0] sm:$0xff] }
0x1535   :  { %4588 = vmatprep.subr.bf16.mxu0 %v4063_v55  ;;  %4670 = vmatprep.subr.bf16.mxu1 %v4065_v47  ;;  %v4082_v55 = vld [vmem:[#allocation13 + $0x2a8] sm:$0xff]  ;;  %v4084_v47 = vld [vmem:[#allocation13 + $0x2b8] sm:$0xff] }
0x1538   :  { %4589 = vmatpush1.bf16.msra.mxu0 %v4062_v61  ;;  %4671 = vmatpush1.bf16.msra.mxu1 %v4064_v21  ;;  %v4088_v61 = vld [vmem:[#allocation13 + $0x2d8] sm:$0xff]  ;;  %v4090_v21 = vld [vmem:[#allocation13 + $0x2e8] sm:$0xff] }
0x1539   :  { %4590 = vmatprep.subr.bf16.mxu0 %v4068_v3  ;;  %4672 = vmatprep.subr.bf16.mxu1 %v4070_v59  ;;  %v4087_v3 = vld [vmem:[#allocation13 + $0x2d0] sm:$0xff]  ;;  %v4089_v59 = vld [vmem:[#allocation13 + $0x2e0] sm:$0xff] }
0x153c   :  { %4591 = vmatpush1.bf16.msra.mxu0 %v4067_v54  ;;  %4673 = vmatpush1.bf16.msra.mxu1 %v4069_v62  ;;  %v4093_v54 = vld [vmem:[#allocation13 + $0x300] sm:$0xff]  ;;  %v4095_v62 = vld [vmem:[#allocation13 + $0x310] sm:$0xff] }
0x153d   :  { %4592 = vmatprep.subr.bf16.mxu0 %v4073_v22  ;;  %4674 = vmatprep.subr.bf16.mxu1 %v4075_v48  ;;  %v4092_v22 = vld [vmem:[#allocation13 + $0x2f8] sm:$0xff]  ;;  %v4094_v48 = vld [vmem:[#allocation13 + $0x308] sm:$0xff] }
0x1540   :  { %4593 = vmatpush1.bf16.msra.mxu0 %v4072_v36  ;;  %4675 = vmatpush1.bf16.msra.mxu1 %v4074_v13  ;;  %v4098_v36 = vld [vmem:[#allocation13 + $0x328] sm:$0xff]  ;;  %v4100_v13 = vld [vmem:[#allocation13 + $0x338] sm:$0xff] }
0x1541   :  { %4603 = vmatprep.subr.bf16.mxu0 %v4078_v2  ;;  %4685 = vmatprep.subr.bf16.mxu1 %v4080_v20  ;;  %v4097_v2 = vld [vmem:[#allocation13 + $0x320] sm:$0xff]  ;;  %v4099_v20 = vld [vmem:[#allocation13 + $0x330] sm:$0xff] }
0x1543   :  { %4595 = vmatmul.mubr.bf16.vlgmr.msra.gmra.mrb[80].mxu0 %v10400_v60  ;;  %4677 = vmatmul.mubr.bf16.vlgmr.msra.gmra.mrb[96].mxu1 %v10400_v60 }
0x1544   :  { %4604 = vmatpush1.bf16.msra.mxu0 %v4077_v9  ;;  %4686 = vmatpush1.bf16.msra.mxu1 %v4079_v12  ;;  %v4103_v9 = vld [vmem:[#allocation13 + $0x350] sm:$0xff]  ;;  %v4105_v12 = vld [vmem:[#allocation13 + $0x360] sm:$0xff] }
0x1545   :  { %4605 = vmatprep.subr.bf16.mxu0 %v4083_v43  ;;  %4687 = vmatprep.subr.bf16.mxu1 %v4085_v40  ;;  %v4102_v43 = vld [vmem:[#allocation13 + $0x348] sm:$0xff]  ;;  %v4104_v40 = vld [vmem:[#allocation13 + $0x358] sm:$0xff] }
0x1546   :  { %4635 = vmatprep.mubr.bf16.mxu0 %v10406_v30  ;;  %4717 = vmatprep.mubr.bf16.mxu1 %v10406_v30 }
0x1548   :  { %4606 = vmatpush1.bf16.msra.mxu0 %v4082_v55  ;;  %4688 = vmatpush1.bf16.msra.mxu1 %v4084_v47  ;;  %v4108_v55 = vld [vmem:[#allocation13 + $0x378] sm:$0xff]  ;;  %v4110_v47 = vld [vmem:[#allocation13 + $0x388] sm:$0xff] }
0x1549   :  { %4607 = vmatprep.subr.bf16.mxu0 %v4088_v61  ;;  %4689 = vmatprep.subr.bf16.mxu1 %v4090_v21  ;;  %v4107_v61 = vld [vmem:[#allocation13 + $0x370] sm:$0xff]  ;;  %v4109_v21 = vld [vmem:[#allocation13 + $0x380] sm:$0xff] }
0x154c   :  { %4608 = vmatpush1.bf16.msra.mxu0 %v4087_v3  ;;  %4690 = vmatpush1.bf16.msra.mxu1 %v4089_v59  ;;  %v4113_v3 = vld [vmem:[#allocation13 + $0x3a0] sm:$0xff]  ;;  %v4115_v59 = vld [vmem:[#allocation13 + $0x3b0] sm:$0xff] }
0x154d   :  { %4609 = vmatprep.subr.bf16.mxu0 %v4093_v54  ;;  %4691 = vmatprep.subr.bf16.mxu1 %v4095_v62  ;;  %v4112_v54 = vld [vmem:[#allocation13 + $0x398] sm:$0xff]  ;;  %v4114_v62 = vld [vmem:[#allocation13 + $0x3a8] sm:$0xff] }
0x1550   :  { %4610 = vmatpush1.bf16.msra.mxu0 %v4092_v22  ;;  %4692 = vmatpush1.bf16.msra.mxu1 %v4094_v48  ;;  %v4118_v22 = vld [vmem:[#allocation13 + $0x3c8] sm:$0xff]  ;;  %v4120_v48 = vld [vmem:[#allocation13 + $0x3d8] sm:$0xff] }
0x1551   :  { %4611 = vmatprep.subr.bf16.mxu0 %v4098_v36  ;;  %4693 = vmatprep.subr.bf16.mxu1 %v4100_v13  ;;  %v4117_v36 = vld [vmem:[#allocation13 + $0x3c0] sm:$0xff]  ;;  %v4119_v13 = vld [vmem:[#allocation13 + $0x3d0] sm:$0xff] }
0x1554   :  { %4612 = vmatpush1.bf16.msra.mxu0 %v4097_v2  ;;  %4694 = vmatpush1.bf16.msra.mxu1 %v4099_v20  ;;  %v4123_v2 = vld [vmem:[#allocation13 + $0x3f0] sm:$0xff]  ;;  %v4125_v20 = vld [vmem:[#allocation13 + $0x400] sm:$0xff] }
0x1555   :  { %4613 = vmatprep.subr.bf16.mxu0 %v4103_v9  ;;  %4695 = vmatprep.subr.bf16.mxu1 %v4105_v12  ;;  %v4122_v9 = vld [vmem:[#allocation13 + $0x3e8] sm:$0xff]  ;;  %v4124_v12 = vld [vmem:[#allocation13 + $0x3f8] sm:$0xff] }
0x1558   :  { %4614 = vmatpush1.bf16.msra.mxu0 %v4102_v43  ;;  %4696 = vmatpush1.bf16.msra.mxu1 %v4104_v40  ;;  %v4128_v43 = vld [vmem:[#allocation13 + $0x418] sm:$0xff]  ;;  %v4130_v40 = vld [vmem:[#allocation13 + $0x428] sm:$0xff] }
0x1559   :  { %4615 = vmatprep.subr.bf16.mxu0 %v4108_v55  ;;  %4697 = vmatprep.subr.bf16.mxu1 %v4110_v47  ;;  %v4127_v55 = vld [vmem:[#allocation13 + $0x410] sm:$0xff]  ;;  %v4129_v47 = vld [vmem:[#allocation13 + $0x420] sm:$0xff] }
0x155c   :  { %4616 = vmatpush1.bf16.msra.mxu0 %v4107_v61  ;;  %4698 = vmatpush1.bf16.msra.mxu1 %v4109_v21  ;;  %v4133_v61 = vld [vmem:[#allocation13 + $0x440] sm:$0xff]  ;;  %v4135_v21 = vld [vmem:[#allocation13 + $0x450] sm:$0xff] }
0x155d   :  { %4617 = vmatprep.subr.bf16.mxu0 %v4113_v3  ;;  %4699 = vmatprep.subr.bf16.mxu1 %v4115_v59  ;;  %v4132_v3 = vld [vmem:[#allocation13 + $0x438] sm:$0xff]  ;;  %v4134_v59 = vld [vmem:[#allocation13 + $0x448] sm:$0xff] }
0x1560   :  { %4618 = vmatpush1.bf16.msra.mxu0 %v4112_v54  ;;  %4700 = vmatpush1.bf16.msra.mxu1 %v4114_v62  ;;  %v4138_v54 = vld [vmem:[#allocation13 + $0x468] sm:$0xff]  ;;  %v4140_v62 = vld [vmem:[#allocation13 + $0x478] sm:$0xff] }
0x1561   :  { %4619 = vmatprep.subr.bf16.mxu0 %v4118_v22  ;;  %4701 = vmatprep.subr.bf16.mxu1 %v4120_v48  ;;  %v4137_v22 = vld [vmem:[#allocation13 + $0x460] sm:$0xff]  ;;  %v4139_v48 = vld [vmem:[#allocation13 + $0x470] sm:$0xff] }
0x1564   :  { %4620 = vmatpush1.bf16.msra.mxu0 %v4117_v36  ;;  %4702 = vmatpush1.bf16.msra.mxu1 %v4119_v13  ;;  %v4143_v36 = vld [vmem:[#allocation13 + $0x490] sm:$0xff]  ;;  %v4145_v13 = vld [vmem:[#allocation13 + $0x4a0] sm:$0xff] }
0x1565   :  { %4621 = vmatprep.subr.bf16.mxu0 %v4123_v2  ;;  %4703 = vmatprep.subr.bf16.mxu1 %v4125_v20  ;;  %v4142_v2 = vld [vmem:[#allocation13 + $0x488] sm:$0xff]  ;;  %v4144_v20 = vld [vmem:[#allocation13 + $0x498] sm:$0xff] }
0x1568   :  { %4622 = vmatpush1.bf16.msra.mxu0 %v4122_v9  ;;  %4704 = vmatpush1.bf16.msra.mxu1 %v4124_v12  ;;  %v4148_v9 = vld [vmem:[#allocation13 + $0x4b8] sm:$0xff]  ;;  %v4150_v12 = vld [vmem:[#allocation13 + $0x4c8] sm:$0xff] }
0x1569   :  { %4623 = vmatprep.subr.bf16.mxu0 %v4128_v43  ;;  %4705 = vmatprep.subr.bf16.mxu1 %v4130_v40  ;;  %v4147_v43 = vld [vmem:[#allocation13 + $0x4b0] sm:$0xff]  ;;  %v4149_v40 = vld [vmem:[#allocation13 + $0x4c0] sm:$0xff] }
0x156c   :  { %4624 = vmatpush1.bf16.msra.mxu0 %v4127_v55  ;;  %4706 = vmatpush1.bf16.msra.mxu1 %v4129_v47  ;;  %v4153_v55 = vld [vmem:[#allocation13 + $0x4e0] sm:$0xff]  ;;  %v4155_v47 = vld [vmem:[#allocation13 + $0x4f0] sm:$0xff] }
0x156d   :  { %4625 = vmatprep.subr.bf16.mxu0 %v4133_v61  ;;  %4707 = vmatprep.subr.bf16.mxu1 %v4135_v21  ;;  %v4152_v61 = vld [vmem:[#allocation13 + $0x4d8] sm:$0xff]  ;;  %v4154_v21 = vld [vmem:[#allocation13 + $0x4e8] sm:$0xff] }
0x1570   :  { %4626 = vmatpush1.bf16.msra.mxu0 %v4132_v3  ;;  %4708 = vmatpush1.bf16.msra.mxu1 %v4134_v59  ;;  %v4041_v3 = vld [vmem:[#allocation13 + $0x160] sm:$0xff] }
0x1571   :  { %4627 = vmatprep.subr.bf16.mxu0 %v4138_v54  ;;  %4709 = vmatprep.subr.bf16.mxu1 %v4140_v62  ;;  %v4121_v59 = vld [vmem:[#allocation13 + $0x3e0] sm:$0xff] }
0x1572   :  { %v4001_v54 = vld [vmem:[#allocation13 + $0x20] sm:$0xff] }
0x1573   :  { %v4081_v62 = vld [vmem:[#allocation13 + $0x2a0] sm:$0xff] }
0x1574   :  { %4628 = vmatpush1.bf16.msra.mxu0 %v4137_v22  ;;  %4710 = vmatpush1.bf16.msra.mxu1 %v4139_v48  ;;  %v4046_v22 = vld [vmem:[#allocation13 + $0x188] sm:$0xff] }
0x1575   :  { %4629 = vmatprep.subr.bf16.mxu0 %v4143_v36  ;;  %4711 = vmatprep.subr.bf16.mxu1 %v4145_v13  ;;  %v4126_v48 = vld [vmem:[#allocation13 + $0x408] sm:$0xff] }
0x1576   :  { %v4006_v36 = vld [vmem:[#allocation13 + $0x48] sm:$0xff] }
0x1577   :  { %v4086_v13 = vld [vmem:[#allocation13 + $0x2c8] sm:$0xff] }
0x1578   :  { %4630 = vmatpush1.bf16.msra.mxu0 %v4142_v2  ;;  %4712 = vmatpush1.bf16.msra.mxu1 %v4144_v20  ;;  %v4051_v2 = vld [vmem:[#allocation13 + $0x1b0] sm:$0xff] }
0x1579   :  { %4631 = vmatprep.subr.bf16.mxu0 %v4148_v9  ;;  %4713 = vmatprep.subr.bf16.mxu1 %v4150_v12  ;;  %v4131_v20 = vld [vmem:[#allocation13 + $0x430] sm:$0xff] }
0x157a   :  { %v4011_v9 = vld [vmem:[#allocation13 + $0x70] sm:$0xff] }
0x157b   :  { %v4091_v12 = vld [vmem:[#allocation13 + $0x2f0] sm:$0xff] }
0x157c   :  { %4632 = vmatpush1.bf16.msra.mxu0 %v4147_v43  ;;  %4714 = vmatpush1.bf16.msra.mxu1 %v4149_v40  ;;  %v4056_v43 = vld [vmem:[#allocation13 + $0x1d8] sm:$0xff] }
0x157d   :  { %4633 = vmatprep.subr.bf16.mxu0 %v4153_v55  ;;  %4715 = vmatprep.subr.bf16.mxu1 %v4155_v47  ;;  %v4136_v40 = vld [vmem:[#allocation13 + $0x458] sm:$0xff] }
0x157e   :  { %v4016_v55 = vld [vmem:[#allocation13 + $0x98] sm:$0xff] }
0x157f   :  { %v4096_v47 = vld [vmem:[#allocation13 + $0x318] sm:$0xff] }
0x1580   :  { %4634 = vmatpush1.bf16.msra.mxu0 %v4152_v61  ;;  %4716 = vmatpush1.bf16.msra.mxu1 %v4154_v21  ;;  %v4061_v61 = vld [vmem:[#allocation13 + $0x200] sm:$0xff] }
0x1581   :  { %8197 = vmatprep.subr.bf16.mxu0 %v4041_v3  ;;  %8219 = vmatprep.subr.bf16.mxu1 %v4121_v59  ;;  %v4141_v21 = vld [vmem:[#allocation13 + $0x480] sm:$0xff]  ;;  %v4066_v3 = vld [vmem:[#allocation13 + $0x228] sm:$0xff] }
0x1582   :  { %v4146_v59 = vld [vmem:[#allocation13 + $0x4a8] sm:$0xff] }
0x1583   :  { %4636 = vmatmul.mubr.bf16.vlgmr.msra.gmra.mrb[80].mxu0 %v10402_v37  ;;  %4718 = vmatmul.mubr.bf16.vlgmr.msra.gmra.mrb[96].mxu1 %v10402_v37 }
0x1584   :  { %8198 = vmatpush3.bf16.msra.mxu0 %v4001_v54  ;;  %8220 = vmatpush3.bf16.msra.mxu1 %v4081_v62  ;;  %v4026_v54 = vld [vmem:[#allocation13 + $0xe8] sm:$0xff] }
0x1585   :  { %8199 = vmatprep.subr.bf16.mxu0 %v4046_v22  ;;  %8221 = vmatprep.subr.bf16.mxu1 %v4126_v48  ;;  %v4106_v62 = vld [vmem:[#allocation13 + $0x368] sm:$0xff]  ;;  %v4071_v22 = vld [vmem:[#allocation13 + $0x250] sm:$0xff] }
0x1586   :  { %4758 = vmatprep.mubr.bf16.mxu0 %v10404_v51  ;;  %4798 = vmatprep.mubr.bf16.mxu1 %v10406_v30  ;;  %v4021_v51 = vld [vmem:[#allocation13 + $0xc0] sm:$0xff]  ;;  %v4151_v48 = vld [vmem:[#allocation13 + $0x4d0] sm:$0xff] }
0x1587   :  { %v4101_v30 = vld [vmem:[#allocation13 + $0x340] sm:$0xff] }
0x1588   :  { %8200 = vmatpush3.bf16.msra.mxu0 %v4006_v36  ;;  %8222 = vmatpush3.bf16.msra.mxu1 %v4086_v13  ;;  %v4031_v36 = vld [vmem:[#allocation13 + $0x110] sm:$0xff] }
0x1589   :  { %8201 = vmatprep.subr.bf16.mxu0 %v4051_v2  ;;  %8223 = vmatprep.subr.bf16.mxu1 %v4131_v20  ;;  %v4111_v13 = vld [vmem:[#allocation13 + $0x390] sm:$0xff]  ;;  %v4076_v2 = vld [vmem:[#allocation13 + $0x278] sm:$0xff] }
0x158a   :  { %v4156_v20 = vld [vmem:[#allocation13 + $0x4f8] sm:$0xff] }
0x158c   :  { %8202 = vmatpush3.bf16.msra.mxu0 %v4011_v9  ;;  %8224 = vmatpush3.bf16.msra.mxu1 %v4091_v12  ;;  %v4036_v9 = vld [vmem:[#allocation13 + $0x138] sm:$0xff] }
0x158d   :  { %8203 = vmatprep.subr.bf16.mxu0 %v4056_v43  ;;  %8225 = vmatprep.subr.bf16.mxu1 %v4136_v40  ;;  %v4116_v12 = vld [vmem:[#allocation13 + $0x3b8] sm:$0xff] }
0x1590   :  { %8204 = vmatpush3.bf16.msra.mxu0 %v4016_v55  ;;  %8226 = vmatpush3.bf16.msra.mxu1 %v4096_v47 }
0x1591   :  { %8205 = vmatprep.subr.bf16.mxu0 %v4061_v61  ;;  %8227 = vmatprep.subr.bf16.mxu1 %v4141_v21 }
0x1594   :  { %8206 = vmatpush3.bf16.msra.mxu0 %v4021_v51  ;;  %8228 = vmatpush3.bf16.msra.mxu1 %v4101_v30 }
0x1595   :  { %8207 = vmatprep.subr.bf16.mxu0 %v4066_v3  ;;  %8229 = vmatprep.subr.bf16.mxu1 %v4146_v59 }
0x1598   :  { %8208 = vmatpush3.bf16.msra.mxu0 %v4026_v54  ;;  %8230 = vmatpush3.bf16.msra.mxu1 %v4106_v62 }
0x1599   :  { %8209 = vmatprep.subr.bf16.mxu0 %v4071_v22  ;;  %8231 = vmatprep.subr.bf16.mxu1 %v4151_v48 }
0x159c   :  { %8210 = vmatpush3.bf16.msra.mxu0 %v4031_v36  ;;  %8232 = vmatpush3.bf16.msra.mxu1 %v4111_v13 }
0x159d   :  { %8211 = vmatprep.subr.bf16.mxu0 %v4076_v2  ;;  %8233 = vmatprep.subr.bf16.mxu1 %v4156_v20 }
0x15a0   :  { %8212 = vmatpush3.bf16.msra.mxu0 %v4036_v9  ;;  %8234 = vmatpush3.bf16.msra.mxu1 %v4116_v12 }
0x15a3   :  { %4759 = vmatmul.mubr.bf16.vlgmr.msra.gmra.mrb[88].mxu0 %v10400_v60  ;;  %4799 = vmatmul.mubr.bf16.vlgmr.msra.gmra.mrb[104].mxu1 %v10402_v37 }
0x15d6   :  { %v8169_v43 = vpop.f32.mrb[84].mxu0  ;;  %v8191_v40 = vpop.f32.mrb[100].mxu1 }
0x15d7   :  { %v8170_v55 = vpop.f32.mrb[85].mxu0  ;;  %v8192_v47 = vpop.f32.mrb[101].mxu1 }
0x15d8   :  { %v8171_v61 = vadd.f32 %v8170_v55, %v8169_v43  ;;  %v8193_v21 = vadd.f32 %v8192_v47, %v8191_v40  ;;  %v8172_v51 = vpop.f32.mrb[86].mxu0  ;;  %v8194_v30 = vpop.f32.mrb[102].mxu1 }
0x15d9   :  { %v8173_v3 = vpop.f32.mrb[87].mxu0  ;;  %v8195_v59 = vpop.f32.mrb[103].mxu1 }
0x15da   :  { %v4557_v54 = vadd.f32 %v8193_v21, %v8171_v61 }
0x1656   :  { %v10440_v62 = vpop.f32.mrb[80].mxu0  ;;  %v10442_v22 = vpop.f32.mrb[96].mxu1 }
0x1657   :  { %v10444_v48 = vpop.f32.mrb[81].mxu0  ;;  %v10446_v60 = vpop.f32.mrb[97].mxu1 }
0x1658   :  { %v4641_v37 = vpop.f32.mrb[82].mxu0  ;;  %v4723_v36 = vpop.f32.mrb[98].mxu1 }
0x1659   :  { %v4642_v13 = vpop.f32.mrb[83].mxu0  ;;  %v4724_v2 = vpop.f32.mrb[99].mxu1 }
0x1676   :  { %v8213_v20 = vpop.f32.mrb[88].mxu0  ;;  %v8235_v9 = vpop.f32.mrb[104].mxu1 }
0x1677   :  { %v8214_v12 = vpop.f32.mrb[89].mxu0  ;;  %v8236_v43 = vpop.f32.mrb[105].mxu1 }
0x1678   :  { %v8215_v40 = vadd.f32 %v8214_v12, %v8213_v20  ;;  %v8237_v55 = vadd.f32 %v8236_v43, %v8235_v9  ;;  %v8216_v47 = vpop.f32.mrb[90].mxu0  ;;  %v8238_v61 = vpop.f32.mrb[106].mxu1 }
0x1679   :  { %v8217_v21 = vpop.f32.mrb[91].mxu0  ;;  %v8239_v51 = vpop.f32.mrb[107].mxu1 }
0x167a   :  { %v4761_v30 = vadd.f32 %v8215_v40, %v4557_v54 }
0x167c   :  { %v10448_v3 = vadd.f32 %v8237_v55, %v4761_v30 }
0x167d   :  { %9102 = dma.done.wait [#allocation20 + $0xc], 16384 }
0x167e   :  { %9103 = vsyncadd [#allocation20 + $0xc], 4294950912  ;;  %4970 = vmatprep.mubr.bf16.mxu0 %v10250_v4  ;;  %5011 = vmatprep.mubr.bf16.mxu1 %v10250_v4  ;;  %v4875_v59 = vld [vmem:[#allocation14 + $0x208] sm:$0xff]  ;;  %v4877_v37 = vld [vmem:[#allocation14 + $0x218] sm:$0xff] }
0x167f   :  { %v4874_v36 = vld [vmem:[#allocation14 + $0x200] sm:$0xff]  ;;  %4938 = vmatprep.subr.bf16.mxu0 %v4875_v59  ;;  %4979 = vmatprep.subr.bf16.mxu1 %v4877_v37  ;;  %v4876_v13 = vld [vmem:[#allocation14 + $0x210] sm:$0xff]  ;;  %v4879_v2 = vld [vmem:[#allocation14 + $0x228] sm:$0xff] }
0x1680   :  { %v4881_v20 = vld [vmem:[#allocation14 + $0x238] sm:$0xff]  ;;  %4939 = vmatpush1.bf16.msra.mxu0 %v4874_v36  ;;  %4980 = vmatpush1.bf16.msra.mxu1 %v4876_v13  ;;  %v4878_v54 = vld [vmem:[#allocation14 + $0x220] sm:$0xff]  ;;  %v4880_v9 = vld [vmem:[#allocation14 + $0x230] sm:$0xff] }
0x1681   :  { %4940 = vmatprep.subr.bf16.mxu0 %v4879_v2  ;;  %4981 = vmatprep.subr.bf16.mxu1 %v4881_v20  ;;  %v4883_v12 = vld [vmem:[#allocation14 + $0x248] sm:$0xff]  ;;  %v4885_v43 = vld [vmem:[#allocation14 + $0x258] sm:$0xff]  ;;  %v4882_v4 = vld [vmem:[#allocation14 + $0x240] sm:$0xff] }
0x1682   :  { %v4884_v40 = vld [vmem:[#allocation14 + $0x250] sm:$0xff]  ;;  %v4887_v55 = vld [vmem:[#allocation14 + $0x268] sm:$0xff]  ;;  %v4889_v47 = vld [vmem:[#allocation14 + $0x278] sm:$0xff] }
0x1683   :  { %v4886_v61 = vld [vmem:[#allocation14 + $0x260] sm:$0xff]  ;;  %v4888_v21 = vld [vmem:[#allocation14 + $0x270] sm:$0xff]  ;;  %v4891_v51 = vld [vmem:[#allocation14 + $0x288] sm:$0xff] }
0x1684   :  { %4941 = vmatpush1.bf16.msra.mxu0 %v4878_v54  ;;  %4982 = vmatpush1.bf16.msra.mxu1 %v4880_v9  ;;  %v4893_v30 = vld [vmem:[#allocation14 + $0x298] sm:$0xff]  ;;  %v4890_v59 = vld [vmem:[#allocation14 + $0x280] sm:$0xff]  ;;  %v4892_v37 = vld [vmem:[#allocation14 + $0x290] sm:$0xff] }
0x1685   :  { %4942 = vmatprep.subr.bf16.mxu0 %v4883_v12  ;;  %4983 = vmatprep.subr.bf16.mxu1 %v4885_v43  ;;  %v4895_v36 = vld [vmem:[#allocation14 + $0x2a8] sm:$0xff]  ;;  %v4897_v13 = vld [vmem:[#allocation14 + $0x2b8] sm:$0xff]  ;;  %v4894_v2 = vld [vmem:[#allocation14 + $0x2a0] sm:$0xff] }
0x1686   :  { %v4896_v20 = vld [vmem:[#allocation14 + $0x2b0] sm:$0xff]  ;;  %v4899_v54 = vld [vmem:[#allocation14 + $0x2c8] sm:$0xff]  ;;  %v4901_v9 = vld [vmem:[#allocation14 + $0x2d8] sm:$0xff] }
0x1687   :  { %v4898_v12 = vld [vmem:[#allocation14 + $0x2c0] sm:$0xff]  ;;  %v4900_v43 = vld [vmem:[#allocation14 + $0x2d0] sm:$0xff] }
0x1688   :  { %4943 = vmatpush1.bf16.msra.mxu0 %v4882_v4  ;;  %4984 = vmatpush1.bf16.msra.mxu1 %v4884_v40  ;;  %v4903_v4 = vld [vmem:[#allocation14 + $0x2e8] sm:$0xff]  ;;  %v4905_v40 = vld [vmem:[#allocation14 + $0x2f8] sm:$0xff] }
0x1689   :  { %4944 = vmatprep.subr.bf16.mxu0 %v4887_v55  ;;  %4985 = vmatprep.subr.bf16.mxu1 %v4889_v47  ;;  %v4902_v55 = vld [vmem:[#allocation14 + $0x2e0] sm:$0xff]  ;;  %v4904_v47 = vld [vmem:[#allocation14 + $0x2f0] sm:$0xff] }
0x168c   :  { %4945 = vmatpush1.bf16.msra.mxu0 %v4886_v61  ;;  %4986 = vmatpush1.bf16.msra.mxu1 %v4888_v21  ;;  %v4907_v61 = vld [vmem:[#allocation14 + $0x308] sm:$0xff]  ;;  %v4909_v21 = vld [vmem:[#allocation14 + $0x318] sm:$0xff] }
0x168d   :  { %4946 = vmatprep.subr.bf16.mxu0 %v4891_v51  ;;  %4987 = vmatprep.subr.bf16.mxu1 %v4893_v30  ;;  %v4906_v51 = vld [vmem:[#allocation14 + $0x300] sm:$0xff]  ;;  %v4908_v30 = vld [vmem:[#allocation14 + $0x310] sm:$0xff] }
0x1690   :  { %4947 = vmatpush1.bf16.msra.mxu0 %v4890_v59  ;;  %4988 = vmatpush1.bf16.msra.mxu1 %v4892_v37  ;;  %v4911_v59 = vld [vmem:[#allocation14 + $0x328] sm:$0xff]  ;;  %v4913_v37 = vld [vmem:[#allocation14 + $0x338] sm:$0xff] }
0x1691   :  { %4948 = vmatprep.subr.bf16.mxu0 %v4895_v36  ;;  %4989 = vmatprep.subr.bf16.mxu1 %v4897_v13  ;;  %v4910_v36 = vld [vmem:[#allocation14 + $0x320] sm:$0xff]  ;;  %v4912_v13 = vld [vmem:[#allocation14 + $0x330] sm:$0xff] }
0x1694   :  { %4949 = vmatpush1.bf16.msra.mxu0 %v4894_v2  ;;  %4990 = vmatpush1.bf16.msra.mxu1 %v4896_v20  ;;  %v4915_v2 = vld [vmem:[#allocation14 + $0x348] sm:$0xff]  ;;  %v4917_v20 = vld [vmem:[#allocation14 + $0x358] sm:$0xff] }
0x1695   :  { %4950 = vmatprep.subr.bf16.mxu0 %v4899_v54  ;;  %4991 = vmatprep.subr.bf16.mxu1 %v4901_v9  ;;  %v4914_v54 = vld [vmem:[#allocation14 + $0x340] sm:$0xff]  ;;  %v4916_v9 = vld [vmem:[#allocation14 + $0x350] sm:$0xff] }
0x1698   :  { %4951 = vmatpush1.bf16.msra.mxu0 %v4898_v12  ;;  %4992 = vmatpush1.bf16.msra.mxu1 %v4900_v43  ;;  %v4919_v12 = vld [vmem:[#allocation14 + $0x368] sm:$0xff]  ;;  %v4921_v43 = vld [vmem:[#allocation14 + $0x378] sm:$0xff] }
0x1699   :  { %4952 = vmatprep.subr.bf16.mxu0 %v4903_v4  ;;  %4993 = vmatprep.subr.bf16.mxu1 %v4905_v40  ;;  %v4918_v4 = vld [vmem:[#allocation14 + $0x360] sm:$0xff]  ;;  %v4920_v40 = vld [vmem:[#allocation14 + $0x370] sm:$0xff] }
0x169c   :  { %4953 = vmatpush1.bf16.msra.mxu0 %v4902_v55  ;;  %4994 = vmatpush1.bf16.msra.mxu1 %v4904_v47  ;;  %v4923_v55 = vld [vmem:[#allocation14 + $0x388] sm:$0xff]  ;;  %v4925_v47 = vld [vmem:[#allocation14 + $0x398] sm:$0xff] }
0x169d   :  { %4954 = vmatprep.subr.bf16.mxu0 %v4907_v61  ;;  %4995 = vmatprep.subr.bf16.mxu1 %v4909_v21  ;;  %v4922_v61 = vld [vmem:[#allocation14 + $0x380] sm:$0xff]  ;;  %v4924_v21 = vld [vmem:[#allocation14 + $0x390] sm:$0xff] }
0x16a0   :  { %4955 = vmatpush1.bf16.msra.mxu0 %v4906_v51  ;;  %4996 = vmatpush1.bf16.msra.mxu1 %v4908_v30  ;;  %v4927_v51 = vld [vmem:[#allocation14 + $0x3a8] sm:$0xff]  ;;  %v4929_v30 = vld [vmem:[#allocation14 + $0x3b8] sm:$0xff] }
0x16a1   :  { %4956 = vmatprep.subr.bf16.mxu0 %v4911_v59  ;;  %4997 = vmatprep.subr.bf16.mxu1 %v4913_v37  ;;  %v4926_v59 = vld [vmem:[#allocation14 + $0x3a0] sm:$0xff]  ;;  %v4928_v37 = vld [vmem:[#allocation14 + $0x3b0] sm:$0xff] }
0x16a4   :  { %4957 = vmatpush1.bf16.msra.mxu0 %v4910_v36  ;;  %4998 = vmatpush1.bf16.msra.mxu1 %v4912_v13  ;;  %v4931_v36 = vld [vmem:[#allocation14 + $0x3c8] sm:$0xff]  ;;  %v4933_v13 = vld [vmem:[#allocation14 + $0x3d8] sm:$0xff] }
0x16a5   :  { %4958 = vmatprep.subr.bf16.mxu0 %v4915_v2  ;;  %4999 = vmatprep.subr.bf16.mxu1 %v4917_v20  ;;  %v4930_v2 = vld [vmem:[#allocation14 + $0x3c0] sm:$0xff]  ;;  %v4932_v20 = vld [vmem:[#allocation14 + $0x3d0] sm:$0xff] }
0x16a8   :  { %4959 = vmatpush1.bf16.msra.mxu0 %v4914_v54  ;;  %5000 = vmatpush1.bf16.msra.mxu1 %v4916_v9  ;;  %v4935_v54 = vld [vmem:[#allocation14 + $0x3e8] sm:$0xff]  ;;  %v4937_v9 = vld [vmem:[#allocation14 + $0x3f8] sm:$0xff] }
0x16a9   :  { %4960 = vmatprep.subr.bf16.mxu0 %v4919_v12  ;;  %5001 = vmatprep.subr.bf16.mxu1 %v4921_v43  ;;  %v4934_v12 = vld [vmem:[#allocation14 + $0x3e0] sm:$0xff]  ;;  %v4936_v43 = vld [vmem:[#allocation14 + $0x3f0] sm:$0xff] }
0x16ac   :  { %4961 = vmatpush1.bf16.msra.mxu0 %v4918_v4  ;;  %5002 = vmatpush1.bf16.msra.mxu1 %v4920_v40  ;;  %v4810_v4 = vld [vmem:[#allocation14 + $0x8] sm:$0xff]  ;;  %v4812_v40 = vld [vmem:[#allocation14 + $0x18] sm:$0xff] }
0x16ad   :  { %4962 = vmatprep.subr.bf16.mxu0 %v4923_v55  ;;  %5003 = vmatprep.subr.bf16.mxu1 %v4925_v47  ;;  %v4809_v55 = vld [vmem:[#allocation14] sm:$0xff]  ;;  %v4811_v47 = vld [vmem:[#allocation14 + $0x10] sm:$0xff] }
0x16b0   :  { %4963 = vmatpush1.bf16.msra.mxu0 %v4922_v61  ;;  %5004 = vmatpush1.bf16.msra.mxu1 %v4924_v21  ;;  %v4814_v61 = vld [vmem:[#allocation14 + $0x28] sm:$0xff]  ;;  %v4816_v21 = vld [vmem:[#allocation14 + $0x38] sm:$0xff] }
0x16b1   :  { %4964 = vmatprep.subr.bf16.mxu0 %v4927_v51  ;;  %5005 = vmatprep.subr.bf16.mxu1 %v4929_v30  ;;  %v4813_v51 = vld [vmem:[#allocation14 + $0x20] sm:$0xff]  ;;  %v4815_v30 = vld [vmem:[#allocation14 + $0x30] sm:$0xff] }
0x16b4   :  { %4965 = vmatpush1.bf16.msra.mxu0 %v4926_v59  ;;  %5006 = vmatpush1.bf16.msra.mxu1 %v4928_v37  ;;  %v4818_v59 = vld [vmem:[#allocation14 + $0x48] sm:$0xff]  ;;  %v4820_v37 = vld [vmem:[#allocation14 + $0x58] sm:$0xff] }
0x16b5   :  { %4966 = vmatprep.subr.bf16.mxu0 %v4931_v36  ;;  %5007 = vmatprep.subr.bf16.mxu1 %v4933_v13  ;;  %v4817_v36 = vld [vmem:[#allocation14 + $0x40] sm:$0xff]  ;;  %v4819_v13 = vld [vmem:[#allocation14 + $0x50] sm:$0xff] }
0x16b8   :  { %4967 = vmatpush1.bf16.msra.mxu0 %v4930_v2  ;;  %5008 = vmatpush1.bf16.msra.mxu1 %v4932_v20  ;;  %v4822_v2 = vld [vmem:[#allocation14 + $0x68] sm:$0xff]  ;;  %v4821_v20 = vld [vmem:[#allocation14 + $0x60] sm:$0xff] }
0x16b9   :  { %4968 = vmatprep.subr.bf16.mxu0 %v4935_v54  ;;  %5009 = vmatprep.subr.bf16.mxu1 %v4937_v9  ;;  %v4823_v54 = vld [vmem:[#allocation14 + $0x70] sm:$0xff]  ;;  %v4826_v9 = vld [vmem:[#allocation14 + $0x88] sm:$0xff] }
0x16bc   :  { %4969 = vmatpush1.bf16.msra.mxu0 %v4934_v12  ;;  %5010 = vmatpush1.bf16.msra.mxu1 %v4936_v43  ;;  %v4828_v12 = vld [vmem:[#allocation14 + $0x98] sm:$0xff]  ;;  %v4827_v43 = vld [vmem:[#allocation14 + $0x90] sm:$0xff] }
0x16bd   :  { %5020 = vmatprep.subr.bf16.mxu0 %v4810_v4  ;;  %5061 = vmatprep.subr.bf16.mxu1 %v4812_v40  ;;  %v4830_v4 = vld [vmem:[#allocation14 + $0xa8] sm:$0xff]  ;;  %v4832_v40 = vld [vmem:[#allocation14 + $0xb8] sm:$0xff] }
0x16bf   :  { %4971 = vmatmul.mubr.bf16.vlgmr.msra.gmra.mrb[92].mxu0 %v10246_v0  ;;  %5012 = vmatmul.mubr.bf16.vlgmr.msra.gmra.mrb[108].mxu1 %v10246_v0  ;;  %v4824_v0 = vld [vmem:[#allocation14 + $0x78] sm:$0xff] }
0x16c0   :  { %5021 = vmatpush1.bf16.msra.mxu0 %v4809_v55  ;;  %5062 = vmatpush1.bf16.msra.mxu1 %v4811_v47  ;;  %v4829_v55 = vld [vmem:[#allocation14 + $0xa0] sm:$0xff]  ;;  %v4831_v47 = vld [vmem:[#allocation14 + $0xb0] sm:$0xff] }
0x16c1   :  { %5022 = vmatprep.subr.bf16.mxu0 %v4814_v61  ;;  %5063 = vmatprep.subr.bf16.mxu1 %v4816_v21  ;;  %v4834_v61 = vld [vmem:[#allocation14 + $0xc8] sm:$0xff]  ;;  %v4836_v21 = vld [vmem:[#allocation14 + $0xd8] sm:$0xff] }
0x16c2   :  { %5052 = vmatprep.mubr.bf16.mxu0 %v10258_v33  ;;  %5093 = vmatprep.mubr.bf16.mxu1 %v10258_v33  ;;  %v4825_v33 = vld [vmem:[#allocation14 + $0x80] sm:$0xff] }
0x16c4   :  { %5023 = vmatpush1.bf16.msra.mxu0 %v4813_v51  ;;  %5064 = vmatpush1.bf16.msra.mxu1 %v4815_v30  ;;  %v4833_v51 = vld [vmem:[#allocation14 + $0xc0] sm:$0xff]  ;;  %v4835_v30 = vld [vmem:[#allocation14 + $0xd0] sm:$0xff] }
0x16c5   :  { %5024 = vmatprep.subr.bf16.mxu0 %v4818_v59  ;;  %5065 = vmatprep.subr.bf16.mxu1 %v4820_v37  ;;  %v4838_v59 = vld [vmem:[#allocation14 + $0xe8] sm:$0xff]  ;;  %v4840_v37 = vld [vmem:[#allocation14 + $0xf8] sm:$0xff] }
0x16c8   :  { %5025 = vmatpush1.bf16.msra.mxu0 %v4817_v36  ;;  %5066 = vmatpush1.bf16.msra.mxu1 %v4819_v13  ;;  %v4837_v36 = vld [vmem:[#allocation14 + $0xe0] sm:$0xff]  ;;  %v4839_v13 = vld [vmem:[#allocation14 + $0xf0] sm:$0xff] }
0x16c9   :  { %5026 = vmatprep.subr.bf16.mxu0 %v4822_v2  ;;  %5067 = vmatprep.subr.bf16.mxu1 %v4824_v0  ;;  %v4842_v2 = vld [vmem:[#allocation14 + $0x108] sm:$0xff]  ;;  %v4844_v0 = vld [vmem:[#allocation14 + $0x118] sm:$0xff] }
0x16cc   :  { %5027 = vmatpush1.bf16.msra.mxu0 %v4821_v20  ;;  %5068 = vmatpush1.bf16.msra.mxu1 %v4823_v54  ;;  %v4841_v20 = vld [vmem:[#allocation14 + $0x100] sm:$0xff]  ;;  %v4843_v54 = vld [vmem:[#allocation14 + $0x110] sm:$0xff] }
0x16cd   :  { %5028 = vmatprep.subr.bf16.mxu0 %v4826_v9  ;;  %5069 = vmatprep.subr.bf16.mxu1 %v4828_v12  ;;  %v4846_v9 = vld [vmem:[#allocation14 + $0x128] sm:$0xff]  ;;  %v4848_v12 = vld [vmem:[#allocation14 + $0x138] sm:$0xff] }
0x16d0   :  { %5029 = vmatpush1.bf16.msra.mxu0 %v4825_v33  ;;  %5070 = vmatpush1.bf16.msra.mxu1 %v4827_v43  ;;  %v4845_v33 = vld [vmem:[#allocation14 + $0x120] sm:$0xff]  ;;  %v4847_v43 = vld [vmem:[#allocation14 + $0x130] sm:$0xff] }
0x16d1   :  { %5030 = vmatprep.subr.bf16.mxu0 %v4830_v4  ;;  %5071 = vmatprep.subr.bf16.mxu1 %v4832_v40  ;;  %v4850_v4 = vld [vmem:[#allocation14 + $0x148] sm:$0xff]  ;;  %v4852_v40 = vld [vmem:[#allocation14 + $0x158] sm:$0xff] }
0x16d4   :  { %5031 = vmatpush1.bf16.msra.mxu0 %v4829_v55  ;;  %5072 = vmatpush1.bf16.msra.mxu1 %v4831_v47  ;;  %v4849_v55 = vld [vmem:[#allocation14 + $0x140] sm:$0xff]  ;;  %v4851_v47 = vld [vmem:[#allocation14 + $0x150] sm:$0xff] }
0x16d5   :  { %5032 = vmatprep.subr.bf16.mxu0 %v4834_v61  ;;  %5073 = vmatprep.subr.bf16.mxu1 %v4836_v21  ;;  %v4854_v61 = vld [vmem:[#allocation14 + $0x168] sm:$0xff]  ;;  %v4856_v21 = vld [vmem:[#allocation14 + $0x178] sm:$0xff] }
0x16d8   :  { %5033 = vmatpush1.bf16.msra.mxu0 %v4833_v51  ;;  %5074 = vmatpush1.bf16.msra.mxu1 %v4835_v30  ;;  %v4853_v51 = vld [vmem:[#allocation14 + $0x160] sm:$0xff]  ;;  %v4855_v30 = vld [vmem:[#allocation14 + $0x170] sm:$0xff] }
0x16d9   :  { %5034 = vmatprep.subr.bf16.mxu0 %v4838_v59  ;;  %5075 = vmatprep.subr.bf16.mxu1 %v4840_v37  ;;  %v4858_v59 = vld [vmem:[#allocation14 + $0x188] sm:$0xff]  ;;  %v4860_v37 = vld [vmem:[#allocation14 + $0x198] sm:$0xff] }
0x16dc   :  { %5035 = vmatpush1.bf16.msra.mxu0 %v4837_v36  ;;  %5076 = vmatpush1.bf16.msra.mxu1 %v4839_v13  ;;  %v4857_v36 = vld [vmem:[#allocation14 + $0x180] sm:$0xff]  ;;  %v4859_v13 = vld [vmem:[#allocation14 + $0x190] sm:$0xff] }
0x16dd   :  { %5036 = vmatprep.subr.bf16.mxu0 %v4842_v2  ;;  %5077 = vmatprep.subr.bf16.mxu1 %v4844_v0  ;;  %v4862_v2 = vld [vmem:[#allocation14 + $0x1a8] sm:$0xff]  ;;  %v4864_v0 = vld [vmem:[#allocation14 + $0x1b8] sm:$0xff] }
0x16e0   :  { %5037 = vmatpush1.bf16.msra.mxu0 %v4841_v20  ;;  %5078 = vmatpush1.bf16.msra.mxu1 %v4843_v54  ;;  %v4861_v20 = vld [vmem:[#allocation14 + $0x1a0] sm:$0xff]  ;;  %v4863_v54 = vld [vmem:[#allocation14 + $0x1b0] sm:$0xff] }
0x16e1   :  { %5038 = vmatprep.subr.bf16.mxu0 %v4846_v9  ;;  %5079 = vmatprep.subr.bf16.mxu1 %v4848_v12  ;;  %v4866_v9 = vld [vmem:[#allocation14 + $0x1c8] sm:$0xff]  ;;  %v4868_v12 = vld [vmem:[#allocation14 + $0x1d8] sm:$0xff] }
0x16e4   :  { %5039 = vmatpush1.bf16.msra.mxu0 %v4845_v33  ;;  %5080 = vmatpush1.bf16.msra.mxu1 %v4847_v43  ;;  %v4865_v33 = vld [vmem:[#allocation14 + $0x1c0] sm:$0xff]  ;;  %v4867_v43 = vld [vmem:[#allocation14 + $0x1d0] sm:$0xff] }
0x16e5   :  { %5040 = vmatprep.subr.bf16.mxu0 %v4850_v4  ;;  %5081 = vmatprep.subr.bf16.mxu1 %v4852_v40  ;;  %v4870_v4 = vld [vmem:[#allocation14 + $0x1e8] sm:$0xff]  ;;  %v4872_v40 = vld [vmem:[#allocation14 + $0x1f8] sm:$0xff] }
0x16e8   :  { %5041 = vmatpush1.bf16.msra.mxu0 %v4849_v55  ;;  %5082 = vmatpush1.bf16.msra.mxu1 %v4851_v47  ;;  %v4869_v55 = vld [vmem:[#allocation14 + $0x1e0] sm:$0xff]  ;;  %v4871_v47 = vld [vmem:[#allocation14 + $0x1f0] sm:$0xff] }
0x16e9   :  { %5042 = vmatprep.subr.bf16.mxu0 %v4854_v61  ;;  %5083 = vmatprep.subr.bf16.mxu1 %v4856_v21  ;;  %v7926_v61 = vmul.f32 -1.442695, %v10448_v3 }
0x16eb   :  { %8954 = vpow2.f32 %v7926_v61 }
0x16ec   :  { %5043 = vmatpush1.bf16.msra.mxu0 %v4853_v51  ;;  %5084 = vmatpush1.bf16.msra.mxu1 %v4855_v30 }
0x16ed   :  { %5044 = vmatprep.subr.bf16.mxu0 %v4858_v59  ;;  %5085 = vmatprep.subr.bf16.mxu1 %v4860_v37 }
0x16f0   :  { %5045 = vmatpush1.bf16.msra.mxu0 %v4857_v36  ;;  %5086 = vmatpush1.bf16.msra.mxu1 %v4859_v13 }
0x16f1   :  { %5046 = vmatprep.subr.bf16.mxu0 %v4862_v2  ;;  %5087 = vmatprep.subr.bf16.mxu1 %v4864_v0 }
0x16f4   :  { %5047 = vmatpush1.bf16.msra.mxu0 %v4861_v20  ;;  %5088 = vmatpush1.bf16.msra.mxu1 %v4863_v54 }
0x16f5   :  { %5048 = vmatprep.subr.bf16.mxu0 %v4866_v9  ;;  %5089 = vmatprep.subr.bf16.mxu1 %v4868_v12 }
0x16f8   :  { %5049 = vmatpush1.bf16.msra.mxu0 %v4865_v33  ;;  %5090 = vmatpush1.bf16.msra.mxu1 %v4867_v43 }
0x16f9   :  { %5050 = vmatprep.subr.bf16.mxu0 %v4870_v4  ;;  %5091 = vmatprep.subr.bf16.mxu1 %v4872_v40 }
0x16fc   :  { %5051 = vmatpush1.bf16.msra.mxu0 %v4869_v55  ;;  %5092 = vmatpush1.bf16.msra.mxu1 %v4871_v47 }
0x16fd   :  { %5109 = vmatprep.subr.bf16.mxu0 %v10282_v7  ;;  %5150 = vmatprep.subr.bf16.mxu1 %v10284_v10 }
0x16ff   :  { %5053 = vmatmul.mubr.bf16.vlgmr.msra.gmra.mrb[96].mxu0 %v10256_v44  ;;  %5094 = vmatmul.mubr.bf16.vlgmr.msra.gmra.mrb[112].mxu1 %v10256_v44  ;;  %v8955_v44 = vpop.eup %8954 }
0x1700   :  { %5110 = vmatpush1.bf16.msra.mxu0 %v10286_v39  ;;  %5151 = vmatpush1.bf16.msra.mxu1 %v10290_v46  ;;  %v5105_v7 = vadd.f32 1.0, %v8955_v44 }
0x1701   :  { %5111 = vmatprep.subr.bf16.mxu0 %v10292_v35  ;;  %5152 = vmatprep.subr.bf16.mxu1 %v10294_v18 }
0x1702   :  { %5141 = vmatprep.mubr.bf16.mxu0 %v9177_v45  ;;  %5182 = vmatprep.mubr.bf16.mxu1 %v9177_v45  ;;  %8956 = vrcp.f32 %v5105_v7 }
0x1704   :  { %5112 = vmatpush1.bf16.msra.mxu0 %v10300_v53  ;;  %5153 = vmatpush1.bf16.msra.mxu1 %v10302_v38 }
0x1705   :  { %5113 = vmatprep.subr.bf16.mxu0 %v10304_v52  ;;  %5154 = vmatprep.subr.bf16.mxu1 %v10306_v32 }
0x1708   :  { %5114 = vmatpush1.bf16.msra.mxu0 %v10312_v16  ;;  %5155 = vmatpush1.bf16.msra.mxu1 %v10314_v26 }
0x1709   :  { %5115 = vmatprep.subr.bf16.mxu0 %v10316_v24  ;;  %5156 = vmatprep.subr.bf16.mxu1 %v10318_v25 }
0x170c   :  { %5116 = vmatpush1.bf16.msra.mxu0 %v10324_v8  ;;  %5157 = vmatpush1.bf16.msra.mxu1 %v10326_v6  ;;  %v8957_v10 = vpop.eup %8956 }
0x170d   :  { %5117 = vmatprep.subr.bf16.mxu0 %v10328_v11  ;;  %5158 = vmatprep.subr.bf16.mxu1 %v10330_v15  ;;  %v5108_v39 = vpack.c.bf16 %v8957_v10, %v8957_v10 }
0x1710   :  { %5118 = vmatpush1.bf16.msra.mxu0 %v10336_v23  ;;  %5159 = vmatpush1.bf16.msra.mxu1 %v10338_v34 }
0x1711   :  { %5119 = vmatprep.subr.bf16.mxu0 %v10340_v1  ;;  %5160 = vmatprep.subr.bf16.mxu1 %v10342_v58 }
0x1714   :  { %5120 = vmatpush1.bf16.msra.mxu0 %v10348_v42  ;;  %5161 = vmatpush1.bf16.msra.mxu1 %v10350_v19 }
0x1715   :  { %5121 = vmatprep.subr.bf16.mxu0 %v10352_v56  ;;  %5162 = vmatprep.subr.bf16.mxu1 %v10354_v14 }
0x1718   :  { %5122 = vmatpush1.bf16.msra.mxu0 %v10360_v31  ;;  %5163 = vmatpush1.bf16.msra.mxu1 %v10362_v50 }
0x1719   :  { %5123 = vmatprep.subr.bf16.mxu0 %v10364_v49  ;;  %5164 = vmatprep.subr.bf16.mxu1 %v10366_v29 }
0x171c   :  { %5124 = vmatpush1.bf16.msra.mxu0 %v10372_v28  ;;  %5165 = vmatpush1.bf16.msra.mxu1 %v10374_v5 }
0x171f   :  { %5142 = vmatmul.mubr.bf16.vlgmr.msra.gmra.mrb[100].mxu0 %v5108_v39  ;;  %5183 = vmatmul.mubr.bf16.vlgmr.msra.gmra.mrb[116].mxu1 %v5108_v39 }
0x1720   :  { %5247 = vmatprep.mubr.bf16.mxu0 %v9177_v45  ;;  %5288 = vmatprep.mubr.bf16.mxu1 %v9177_v45 }
0x1792   :  { %v4972_v46 = vpop.f32.mrb[92].mxu0  ;;  %v5013_v35 = vpop.f32.mrb[108].mxu1 }
0x1793   :  { %v4974_v18 = vpop.f32.mrb[93].mxu0  ;;  %v5015_v53 = vpop.f32.mrb[109].mxu1 }
0x1794   :  { %v4976_v38 = vpop.f32.mrb[94].mxu0  ;;  %v5017_v52 = vpop.f32.mrb[110].mxu1 }
0x1795   :  { %v4977_v32 = vpop.f32.mrb[95].mxu0  ;;  %v5018_v16 = vpop.f32.mrb[111].mxu1 }
0x17d2   :  { %v5054_v26 = vpop.f32.mrb[96].mxu0  ;;  %v5095_v24 = vpop.f32.mrb[112].mxu1 }
0x17d3   :  { %v5055_v25 = vadd.f32 %v5054_v26, %v4972_v46  ;;  %v5096_v8 = vadd.f32 %v5095_v24, %v5013_v35  ;;  %v5056_v6 = vpop.f32.mrb[97].mxu0  ;;  %v5097_v11 = vpop.f32.mrb[113].mxu1 }
0x17d4   :  { %v5057_v15 = vadd.f32 %v5056_v6, %v4974_v18  ;;  %v5098_v23 = vadd.f32 %v5097_v11, %v5015_v53  ;;  %v5058_v34 = vpop.f32.mrb[98].mxu0  ;;  %v5099_v1 = vpop.f32.mrb[114].mxu1 }
0x17d5   :  { %v5059_v58 = vpop.f32.mrb[99].mxu0  ;;  %v5100_v42 = vpop.f32.mrb[115].mxu1 }
0x17f2   :  { %v5143_v19 = vpop.f32.mrb[100].mxu0  ;;  %v5184_v56 = vpop.f32.mrb[116].mxu1 }
0x17f3   :  { %v5191_v14 = vmul.f32 %v5143_v19, %v10440_v62  ;;  %v5193_v31 = vmul.f32 %v5184_v56, %v10442_v22  ;;  %v5145_v50 = vpop.f32.mrb[101].mxu0  ;;  %v5186_v49 = vpop.f32.mrb[117].mxu1 }
0x17f4   :  { %v5192_v29 = vmul.f32 %v5145_v50, %v10444_v48  ;;  %v5194_v28 = vmul.f32 %v5186_v49, %v10446_v60  ;;  %v5147_v5 = vpop.f32.mrb[102].mxu0  ;;  %v5188_v3 = vpop.f32.mrb[118].mxu1 }
0x17f5   :  { %v5195_v21 = vadd.f32 %v5191_v14, %v5055_v25  ;;  %v5197_v51 = vadd.f32 %v5193_v31, %v5096_v8  ;;  %v5148_v30 = vpop.f32.mrb[103].mxu0  ;;  %v5189_v59 = vpop.f32.mrb[119].mxu1 }
0x17f6   :  { %v5196_v37 = vadd.f32 %v5192_v29, %v5057_v15  ;;  %v5198_v36 = vadd.f32 %v5194_v28, %v5098_v23 }
0x17f7   :  { %v5199_v13 = vpack.c.bf16 %v5195_v21, %v5195_v21  ;;  %v5201_v2 = vpack.c.bf16 %v5197_v51, %v5197_v51 }
0x17f8   :  { %v5200_v0 = vpack.c.bf16 %v5196_v37, %v5196_v37  ;;  %v5202_v62 = vpack.c.bf16 %v5198_v36, %v5198_v36 }
0x17f9   :  { %v5204_v22 = vsel %vm1055_vm0, %v5199_v13, 0  ;;  %v5210_v20 = vsel %vm1055_vm0, %v5201_v2, 0 }
0x17fa   :  { %7927 = vmatprep.subr.msk.bf16.mxu0 %vm1055_vm0, %v5200_v0  ;;  %7929 = vmatprep.subr.msk.bf16.mxu1 %vm1055_vm0, %v5202_v62 }
0x17fb   :  { %5216 = vmatpush1.bf16.msra.mxu0 %v5204_v22  ;;  %5257 = vmatpush1.bf16.msra.mxu1 %v5210_v20 }
0x17fc   :  { %7931 = vmatprep.subr.msk.bf16.mxu0 %vm1055_vm0, %v5200_v0  ;;  %7933 = vmatprep.subr.msk.bf16.mxu1 %vm1055_vm0, %v5202_v62 }
0x17fe   :  { %7928 = vmatmul.mubr.msk.bf16.vlgmr.msra.gmra.mrb[104].mxu0 %vm1051_vm9, %v9826_v27  ;;  %7930 = vmatmul.mubr.msk.bf16.vlgmr.msra.gmra.mrb[120].mxu1 %vm1051_vm9, %v9826_v27 }
0x17ff   :  { %5302 = vmatpush1.bf16.msra.mxu0 %v5204_v22  ;;  %5343 = vmatpush1.bf16.msra.mxu1 %v5210_v20 }
0x1800   :  { %7935 = vmatprep.subr.msk.bf16.mxu0 %vm1055_vm0, %v5200_v0  ;;  %7937 = vmatprep.subr.msk.bf16.mxu1 %vm1055_vm0, %v5202_v62 }
0x1801   :  { %5333 = vmatprep.mubr.bf16.mxu0 %v9177_v45  ;;  %5374 = vmatprep.mubr.bf16.mxu1 %v9177_v45 }
0x1806   :  { %7932 = vmatmul.mubr.msk.bf16.vlgmr.msra.gmra.mrb[108].mxu0 %vm1051_vm9, %v9814_v41  ;;  %7934 = vmatmul.mubr.msk.bf16.vlgmr.msra.gmra.mrb[124].mxu1 %vm1051_vm9, %v9814_v41 }
0x1807   :  { %5388 = vmatpush1.bf16.msra.mxu0 %v5204_v22  ;;  %5429 = vmatpush1.bf16.msra.mxu1 %v5210_v20 }
0x1808   :  { %7939 = vmatprep.subr.msk.bf16.mxu0 %vm1055_vm0, %v5200_v0  ;;  %7941 = vmatprep.subr.msk.bf16.mxu1 %vm1055_vm0, %v5202_v62 }
0x1809   :  { %5419 = vmatprep.mubr.bf16.mxu0 %v9177_v45  ;;  %5460 = vmatprep.mubr.bf16.mxu1 %v9177_v45 }
0x180e   :  { %7936 = vmatmul.mubr.msk.bf16.vlgmr.msra.gmra.mrb[112].mxu0 %vm1051_vm9, %v9936_v63  ;;  %7938 = vmatmul.mubr.msk.bf16.vlgmr.msra.gmra.mrb[128].mxu1 %vm1051_vm9, %v9936_v63 }
0x180f   :  { %5474 = vmatpush1.bf16.msra.mxu0 %v5204_v22  ;;  %5515 = vmatpush1.bf16.msra.mxu1 %v5210_v20 }
0x1810   :  { %5505 = vmatprep.mubr.bf16.mxu0 %v9177_v45  ;;  %5546 = vmatprep.mubr.bf16.mxu1 %v9177_v45 }
0x1816   :  { %7940 = vmatmul.mubr.msk.bf16.vlgmr.msra.gmra.mrb[116].mxu0 %vm1051_vm9, %v9945_v57  ;;  %7942 = vmatmul.mubr.msk.bf16.vlgmr.msra.gmra.mrb[132].mxu1 %vm1051_vm9, %v9945_v57 }
0x18d1   :  { %v5249_v48 = vpop.f32.mrb[104].mxu0  ;;  %v5290_v60 = vpop.f32.mrb[120].mxu1 }
0x18d2   :  { %v10531_v54 = vpack.c.bf16 %v5249_v48, %v5249_v48  ;;  %v10533_v9 = vpack.c.bf16 %v5290_v60, %v5290_v60  ;;  %v5251_v12 = vpop.f32.mrb[105].mxu0  ;;  %v5292_v63 = vpop.f32.mrb[121].mxu1 }
0x18d3   :  { %v10535_v33 = vpack.c.bf16 %v5251_v12, %v5251_v12  ;;  %v10537_v43 = vpack.c.bf16 %v5292_v63, %v5292_v63  ;;  %v5253_v4 = vpop.f32.mrb[106].mxu0  ;;  %v5294_v40 = vpop.f32.mrb[122].mxu1 }
0x18d4   :  { %v5254_v55 = vpop.f32.mrb[107].mxu0  ;;  %v5295_v47 = vpop.f32.mrb[123].mxu1 }
0x18d9   :  { %v5335_v61 = vpop.f32.mrb[108].mxu0  ;;  %v5376_v44 = vpop.f32.mrb[124].mxu1 }
0x18da   :  { %v10539_v7 = vpack.c.bf16 %v5335_v61, %v5335_v61  ;;  %v10541_v57 = vpack.c.bf16 %v5376_v44, %v5376_v44  ;;  %v5337_v10 = vpop.f32.mrb[109].mxu0  ;;  %v5378_v39 = vpop.f32.mrb[125].mxu1 }
0x18db   :  { %v5384_v46 = vpack.c.bf16 %v5337_v10, %v5337_v10  ;;  %v10543_v35 = vpack.c.bf16 %v5378_v39, %v5378_v39  ;;  %v5339_v18 = vpop.f32.mrb[110].mxu0  ;;  %v5380_v53 = vpop.f32.mrb[126].mxu1 }
0x18dc   :  { %v5340_v38 = vpop.f32.mrb[111].mxu0  ;;  %v5381_v52 = vpop.f32.mrb[127].mxu1 }
0x18e1   :  { %v5421_v32 = vpop.f32.mrb[112].mxu0  ;;  %v5462_v16 = vpop.f32.mrb[128].mxu1 }
0x18e2   :  { %v10545_v26 = vpack.c.bf16 %v5421_v32, %v5421_v32  ;;  %v10547_v24 = vpack.c.bf16 %v5462_v16, %v5462_v16  ;;  %v5423_v25 = vpop.f32.mrb[113].mxu0  ;;  %v5464_v8 = vpop.f32.mrb[129].mxu1 }
0x18e3   :  { %v10549_v6 = vpack.c.bf16 %v5423_v25, %v5423_v25  ;;  %v10551_v11 = vpack.c.bf16 %v5464_v8, %v5464_v8  ;;  %v5425_v15 = vpop.f32.mrb[114].mxu0  ;;  %v5466_v23 = vpop.f32.mrb[130].mxu1 }
0x18e4   :  { %v5426_v34 = vpop.f32.mrb[115].mxu0  ;;  %v5467_v1 = vpop.f32.mrb[131].mxu1 }
0x18e9   :  { %v5507_v58 = vpop.f32.mrb[116].mxu0  ;;  %v5548_v42 = vpop.f32.mrb[132].mxu1 }
0x18ea   :  { %v10553_v19 = vpack.c.bf16 %v5507_v58, %v5507_v58  ;;  %v10555_v56 = vpack.c.bf16 %v5548_v42, %v5548_v42  ;;  %v5509_v14 = vpop.f32.mrb[117].mxu0  ;;  %v5550_v31 = vpop.f32.mrb[133].mxu1 }
0x18eb   :  { %v10557_v50 = vpack.c.bf16 %v5509_v14, %v5509_v14  ;;  %v10559_v49 = vpack.c.bf16 %v5550_v31, %v5550_v31  ;;  %v5511_v29 = vpop.f32.mrb[118].mxu0  ;;  %v5552_v28 = vpop.f32.mrb[134].mxu1 }
0x18ec   :  { %v5512_v5 = vpop.f32.mrb[119].mxu0  ;;  %v5553_v3 = vpop.f32.mrb[135].mxu1 }
0x18ed   :  { %9104 = dma.done.wait [#allocation20 + $0xd], 32768 }
0x18ee   :  { %9105 = vsyncadd [#allocation20 + $0xd], 4294934528  ;;  %5851 = vmatprep.mubr.bf16.mxu0 %v5384_v46  ;;  %5933 = vmatprep.mubr.bf16.mxu1 %v5384_v46  ;;  %v5692_v21 = vld [vmem:[#allocation15 + $0x408] sm:$0xff]  ;;  %v5694_v51 = vld [vmem:[#allocation15 + $0x418] sm:$0xff] }
0x18ef   :  { %v5691_v30 = vld [vmem:[#allocation15 + $0x400] sm:$0xff]  ;;  %5819 = vmatprep.subr.bf16.mxu0 %v5692_v21  ;;  %5901 = vmatprep.subr.bf16.mxu1 %v5694_v51  ;;  %v5693_v59 = vld [vmem:[#allocation15 + $0x410] sm:$0xff]  ;;  %v5696_v37 = vld [vmem:[#allocation15 + $0x428] sm:$0xff] }
0x18f0   :  { %v5698_v36 = vld [vmem:[#allocation15 + $0x438] sm:$0xff]  ;;  %5820 = vmatpush1.bf16.msra.mxu0 %v5691_v30  ;;  %5902 = vmatpush1.bf16.msra.mxu1 %v5693_v59  ;;  %v5695_v13 = vld [vmem:[#allocation15 + $0x420] sm:$0xff]  ;;  %v5697_v2 = vld [vmem:[#allocation15 + $0x430] sm:$0xff] }
0x18f1   :  { %5821 = vmatprep.subr.bf16.mxu0 %v5696_v37  ;;  %5903 = vmatprep.subr.bf16.mxu1 %v5698_v36  ;;  %v5700_v0 = vld [vmem:[#allocation15 + $0x448] sm:$0xff]  ;;  %v5702_v62 = vld [vmem:[#allocation15 + $0x458] sm:$0xff]  ;;  %v5699_v22 = vld [vmem:[#allocation15 + $0x440] sm:$0xff] }
0x18f2   :  { %v5701_v20 = vld [vmem:[#allocation15 + $0x450] sm:$0xff]  ;;  %v5704_v48 = vld [vmem:[#allocation15 + $0x468] sm:$0xff]  ;;  %v5706_v60 = vld [vmem:[#allocation15 + $0x478] sm:$0xff] }
0x18f3   :  { %v5703_v12 = vld [vmem:[#allocation15 + $0x460] sm:$0xff]  ;;  %v5705_v63 = vld [vmem:[#allocation15 + $0x470] sm:$0xff]  ;;  %v5708_v4 = vld [vmem:[#allocation15 + $0x488] sm:$0xff] }
0x18f4   :  { %5822 = vmatpush1.bf16.msra.mxu0 %v5695_v13  ;;  %5904 = vmatpush1.bf16.msra.mxu1 %v5697_v2  ;;  %v5710_v40 = vld [vmem:[#allocation15 + $0x498] sm:$0xff]  ;;  %v5707_v55 = vld [vmem:[#allocation15 + $0x480] sm:$0xff]  ;;  %v5709_v47 = vld [vmem:[#allocation15 + $0x490] sm:$0xff] }
0x18f5   :  { %5823 = vmatprep.subr.bf16.mxu0 %v5700_v0  ;;  %5905 = vmatprep.subr.bf16.mxu1 %v5702_v62  ;;  %v5712_v61 = vld [vmem:[#allocation15 + $0x4a8] sm:$0xff]  ;;  %v5714_v44 = vld [vmem:[#allocation15 + $0x4b8] sm:$0xff]  ;;  %v5711_v10 = vld [vmem:[#allocation15 + $0x4a0] sm:$0xff] }
0x18f6   :  { %v5713_v39 = vld [vmem:[#allocation15 + $0x4b0] sm:$0xff]  ;;  %v5716_v46 = vld [vmem:[#allocation15 + $0x4c8] sm:$0xff]  ;;  %v5718_v18 = vld [vmem:[#allocation15 + $0x4d8] sm:$0xff] }
0x18f7   :  { %v5715_v53 = vld [vmem:[#allocation15 + $0x4c0] sm:$0xff]  ;;  %v5717_v38 = vld [vmem:[#allocation15 + $0x4d0] sm:$0xff]  ;;  %v5720_v52 = vld [vmem:[#allocation15 + $0x4e8] sm:$0xff] }
0x18f8   :  { %5824 = vmatpush1.bf16.msra.mxu0 %v5699_v22  ;;  %5906 = vmatpush1.bf16.msra.mxu1 %v5701_v20  ;;  %v5722_v32 = vld [vmem:[#allocation15 + $0x4f8] sm:$0xff]  ;;  %v5719_v16 = vld [vmem:[#allocation15 + $0x4e0] sm:$0xff]  ;;  %v5721_v25 = vld [vmem:[#allocation15 + $0x4f0] sm:$0xff] }
0x18f9   :  { %5825 = vmatprep.subr.bf16.mxu0 %v5704_v48  ;;  %5907 = vmatprep.subr.bf16.mxu1 %v5706_v60  ;;  %v5724_v8 = vld [vmem:[#allocation15 + $0x508] sm:$0xff]  ;;  %v5726_v15 = vld [vmem:[#allocation15 + $0x518] sm:$0xff]  ;;  %v5723_v23 = vld [vmem:[#allocation15 + $0x500] sm:$0xff] }
0x18fa   :  { %v5725_v34 = vld [vmem:[#allocation15 + $0x510] sm:$0xff]  ;;  %v5728_v1 = vld [vmem:[#allocation15 + $0x528] sm:$0xff]  ;;  %v5730_v58 = vld [vmem:[#allocation15 + $0x538] sm:$0xff] }
0x18fb   :  { %v5727_v42 = vld [vmem:[#allocation15 + $0x520] sm:$0xff]  ;;  %v5729_v14 = vld [vmem:[#allocation15 + $0x530] sm:$0xff]  ;;  %v5732_v31 = vld [vmem:[#allocation15 + $0x548] sm:$0xff] }
0x18fc   :  { %5826 = vmatpush1.bf16.msra.mxu0 %v5703_v12  ;;  %5908 = vmatpush1.bf16.msra.mxu1 %v5705_v63  ;;  %v5734_v29 = vld [vmem:[#allocation15 + $0x558] sm:$0xff]  ;;  %v5731_v28 = vld [vmem:[#allocation15 + $0x540] sm:$0xff]  ;;  %v5733_v5 = vld [vmem:[#allocation15 + $0x550] sm:$0xff] }
0x18fd   :  { %5827 = vmatprep.subr.bf16.mxu0 %v5708_v4  ;;  %5909 = vmatprep.subr.bf16.mxu1 %v5710_v40  ;;  %v5736_v3 = vld [vmem:[#allocation15 + $0x568] sm:$0xff]  ;;  %v5738_v21 = vld [vmem:[#allocation15 + $0x578] sm:$0xff]  ;;  %v5735_v51 = vld [vmem:[#allocation15 + $0x560] sm:$0xff] }
0x18fe   :  { %v5737_v30 = vld [vmem:[#allocation15 + $0x570] sm:$0xff]  ;;  %v5740_v59 = vld [vmem:[#allocation15 + $0x588] sm:$0xff]  ;;  %v5742_v37 = vld [vmem:[#allocation15 + $0x598] sm:$0xff] }
0x18ff   :  { %v5739_v36 = vld [vmem:[#allocation15 + $0x580] sm:$0xff]  ;;  %v5741_v13 = vld [vmem:[#allocation15 + $0x590] sm:$0xff]  ;;  %v5744_v2 = vld [vmem:[#allocation15 + $0x5a8] sm:$0xff] }
0x1900   :  { %5828 = vmatpush1.bf16.msra.mxu0 %v5707_v55  ;;  %5910 = vmatpush1.bf16.msra.mxu1 %v5709_v47  ;;  %v5746_v0 = vld [vmem:[#allocation15 + $0x5b8] sm:$0xff]  ;;  %v5743_v62 = vld [vmem:[#allocation15 + $0x5a0] sm:$0xff]  ;;  %v5745_v22 = vld [vmem:[#allocation15 + $0x5b0] sm:$0xff] }
0x1901   :  { %5829 = vmatprep.subr.bf16.mxu0 %v5712_v61  ;;  %5911 = vmatprep.subr.bf16.mxu1 %v5714_v44  ;;  %v5748_v20 = vld [vmem:[#allocation15 + $0x5c8] sm:$0xff]  ;;  %v5750_v48 = vld [vmem:[#allocation15 + $0x5d8] sm:$0xff]  ;;  %v5747_v60 = vld [vmem:[#allocation15 + $0x5c0] sm:$0xff] }
0x1902   :  { %v5749_v12 = vld [vmem:[#allocation15 + $0x5d0] sm:$0xff]  ;;  %v5752_v63 = vld [vmem:[#allocation15 + $0x5e8] sm:$0xff]  ;;  %v5754_v4 = vld [vmem:[#allocation15 + $0x5f8] sm:$0xff] }
0x1903   :  { %v5751_v40 = vld [vmem:[#allocation15 + $0x5e0] sm:$0xff]  ;;  %v5753_v55 = vld [vmem:[#allocation15 + $0x5f0] sm:$0xff]  ;;  %v5756_v47 = vld [vmem:[#allocation15 + $0x608] sm:$0xff] }
0x1904   :  { %5830 = vmatpush1.bf16.msra.mxu0 %v5711_v10  ;;  %5912 = vmatpush1.bf16.msra.mxu1 %v5713_v39  ;;  %v5758_v61 = vld [vmem:[#allocation15 + $0x618] sm:$0xff]  ;;  %v5755_v44 = vld [vmem:[#allocation15 + $0x600] sm:$0xff]  ;;  %v5757_v10 = vld [vmem:[#allocation15 + $0x610] sm:$0xff] }
0x1905   :  { %5831 = vmatprep.subr.bf16.mxu0 %v5716_v46  ;;  %5913 = vmatprep.subr.bf16.mxu1 %v5718_v18  ;;  %v5760_v39 = vld [vmem:[#allocation15 + $0x628] sm:$0xff]  ;;  %v5762_v46 = vld [vmem:[#allocation15 + $0x638] sm:$0xff]  ;;  %v5759_v18 = vld [vmem:[#allocation15 + $0x620] sm:$0xff] }
0x1908   :  { %5832 = vmatpush1.bf16.msra.mxu0 %v5715_v53  ;;  %5914 = vmatpush1.bf16.msra.mxu1 %v5717_v38  ;;  %v5761_v53 = vld [vmem:[#allocation15 + $0x630] sm:$0xff]  ;;  %v5764_v38 = vld [vmem:[#allocation15 + $0x648] sm:$0xff] }
0x1909   :  { %5833 = vmatprep.subr.bf16.mxu0 %v5720_v52  ;;  %5915 = vmatprep.subr.bf16.mxu1 %v5722_v32  ;;  %v5766_v52 = vld [vmem:[#allocation15 + $0x658] sm:$0xff]  ;;  %v5763_v32 = vld [vmem:[#allocation15 + $0x640] sm:$0xff] }
0x190c   :  { %5834 = vmatpush1.bf16.msra.mxu0 %v5719_v16  ;;  %5916 = vmatpush1.bf16.msra.mxu1 %v5721_v25  ;;  %v5765_v16 = vld [vmem:[#allocation15 + $0x650] sm:$0xff]  ;;  %v5768_v25 = vld [vmem:[#allocation15 + $0x668] sm:$0xff] }
0x190d   :  { %5835 = vmatprep.subr.bf16.mxu0 %v5724_v8  ;;  %5917 = vmatprep.subr.bf16.mxu1 %v5726_v15  ;;  %v5767_v8 = vld [vmem:[#allocation15 + $0x660] sm:$0xff]  ;;  %v5769_v15 = vld [vmem:[#allocation15 + $0x670] sm:$0xff] }
0x1910   :  { %5836 = vmatpush1.bf16.msra.mxu0 %v5723_v23  ;;  %5918 = vmatpush1.bf16.msra.mxu1 %v5725_v34  ;;  %v5772_v23 = vld [vmem:[#allocation15 + $0x688] sm:$0xff]  ;;  %v5774_v34 = vld [vmem:[#allocation15 + $0x698] sm:$0xff] }
0x1911   :  { %5837 = vmatprep.subr.bf16.mxu0 %v5728_v1  ;;  %5919 = vmatprep.subr.bf16.mxu1 %v5730_v58  ;;  %v5773_v1 = vld [vmem:[#allocation15 + $0x690] sm:$0xff]  ;;  %v5776_v58 = vld [vmem:[#allocation15 + $0x6a8] sm:$0xff] }
0x1914   :  { %5838 = vmatpush1.bf16.msra.mxu0 %v5727_v42  ;;  %5920 = vmatpush1.bf16.msra.mxu1 %v5729_v14  ;;  %v5778_v42 = vld [vmem:[#allocation15 + $0x6b8] sm:$0xff]  ;;  %v5775_v14 = vld [vmem:[#allocation15 + $0x6a0] sm:$0xff] }
0x1915   :  { %5839 = vmatprep.subr.bf16.mxu0 %v5732_v31  ;;  %5921 = vmatprep.subr.bf16.mxu1 %v5734_v29  ;;  %v5777_v31 = vld [vmem:[#allocation15 + $0x6b0] sm:$0xff]  ;;  %v5780_v29 = vld [vmem:[#allocation15 + $0x6c8] sm:$0xff] }
0x1918   :  { %5840 = vmatpush1.bf16.msra.mxu0 %v5731_v28  ;;  %5922 = vmatpush1.bf16.msra.mxu1 %v5733_v5  ;;  %v5782_v28 = vld [vmem:[#allocation15 + $0x6d8] sm:$0xff]  ;;  %v5779_v5 = vld [vmem:[#allocation15 + $0x6c0] sm:$0xff] }
0x1919   :  { %5841 = vmatprep.subr.bf16.mxu0 %v5736_v3  ;;  %5923 = vmatprep.subr.bf16.mxu1 %v5738_v21  ;;  %v5781_v3 = vld [vmem:[#allocation15 + $0x6d0] sm:$0xff]  ;;  %v5784_v21 = vld [vmem:[#allocation15 + $0x6e8] sm:$0xff] }
0x191c   :  { %5842 = vmatpush1.bf16.msra.mxu0 %v5735_v51  ;;  %5924 = vmatpush1.bf16.msra.mxu1 %v5737_v30  ;;  %v5786_v51 = vld [vmem:[#allocation15 + $0x6f8] sm:$0xff]  ;;  %v5783_v30 = vld [vmem:[#allocation15 + $0x6e0] sm:$0xff] }
0x191d   :  { %5843 = vmatprep.subr.bf16.mxu0 %v5740_v59  ;;  %5925 = vmatprep.subr.bf16.mxu1 %v5742_v37  ;;  %v5785_v59 = vld [vmem:[#allocation15 + $0x6f0] sm:$0xff]  ;;  %v5788_v37 = vld [vmem:[#allocation15 + $0x708] sm:$0xff] }
0x1920   :  { %5844 = vmatpush1.bf16.msra.mxu0 %v5739_v36  ;;  %5926 = vmatpush1.bf16.msra.mxu1 %v5741_v13  ;;  %v5790_v36 = vld [vmem:[#allocation15 + $0x718] sm:$0xff]  ;;  %v5787_v13 = vld [vmem:[#allocation15 + $0x700] sm:$0xff] }
0x1921   :  { %5845 = vmatprep.subr.bf16.mxu0 %v5744_v2  ;;  %5927 = vmatprep.subr.bf16.mxu1 %v5746_v0  ;;  %v5789_v2 = vld [vmem:[#allocation15 + $0x710] sm:$0xff]  ;;  %v5792_v0 = vld [vmem:[#allocation15 + $0x728] sm:$0xff] }
0x1924   :  { %5846 = vmatpush1.bf16.msra.mxu0 %v5743_v62  ;;  %5928 = vmatpush1.bf16.msra.mxu1 %v5745_v22  ;;  %v5794_v62 = vld [vmem:[#allocation15 + $0x738] sm:$0xff]  ;;  %v5791_v22 = vld [vmem:[#allocation15 + $0x720] sm:$0xff] }
0x1925   :  { %5847 = vmatprep.subr.bf16.mxu0 %v5748_v20  ;;  %5929 = vmatprep.subr.bf16.mxu1 %v5750_v48  ;;  %v5793_v20 = vld [vmem:[#allocation15 + $0x730] sm:$0xff]  ;;  %v5796_v48 = vld [vmem:[#allocation15 + $0x748] sm:$0xff] }
0x1928   :  { %5848 = vmatpush1.bf16.msra.mxu0 %v5747_v60  ;;  %5930 = vmatpush1.bf16.msra.mxu1 %v5749_v12  ;;  %v5798_v60 = vld [vmem:[#allocation15 + $0x758] sm:$0xff]  ;;  %v5795_v12 = vld [vmem:[#allocation15 + $0x740] sm:$0xff] }
0x1929   :  { %5849 = vmatprep.subr.bf16.mxu0 %v5752_v63  ;;  %5931 = vmatprep.subr.bf16.mxu1 %v5754_v4  ;;  %v5797_v63 = vld [vmem:[#allocation15 + $0x750] sm:$0xff]  ;;  %v5800_v4 = vld [vmem:[#allocation15 + $0x768] sm:$0xff] }
0x192c   :  { %5850 = vmatpush1.bf16.msra.mxu0 %v5751_v40  ;;  %5932 = vmatpush1.bf16.msra.mxu1 %v5753_v55  ;;  %v5802_v40 = vld [vmem:[#allocation15 + $0x778] sm:$0xff]  ;;  %v5799_v55 = vld [vmem:[#allocation15 + $0x760] sm:$0xff] }
0x192d   :  { %5860 = vmatprep.subr.bf16.mxu0 %v5756_v47  ;;  %5942 = vmatprep.subr.bf16.mxu1 %v5758_v61  ;;  %v5801_v47 = vld [vmem:[#allocation15 + $0x770] sm:$0xff]  ;;  %v5804_v61 = vld [vmem:[#allocation15 + $0x788] sm:$0xff] }
0x192f   :  { %5852 = vmatmul.mubr.bf16.vlgmr.msra.gmra.mrb[120].mxu0 %v10539_v7  ;;  %5934 = vmatmul.mubr.bf16.vlgmr.msra.gmra.mrb[136].mxu1 %v10539_v7  ;;  %v5770_v7 = vld [vmem:[#allocation15 + $0x678] sm:$0xff] }
0x1930   :  { %5861 = vmatpush1.bf16.msra.mxu0 %v5755_v44  ;;  %5943 = vmatpush1.bf16.msra.mxu1 %v5757_v10  ;;  %v5806_v44 = vld [vmem:[#allocation15 + $0x798] sm:$0xff]  ;;  %v5803_v10 = vld [vmem:[#allocation15 + $0x780] sm:$0xff] }
0x1931   :  { %5862 = vmatprep.subr.bf16.mxu0 %v5760_v39  ;;  %5944 = vmatprep.subr.bf16.mxu1 %v5762_v46  ;;  %v5805_v39 = vld [vmem:[#allocation15 + $0x790] sm:$0xff]  ;;  %v5808_v46 = vld [vmem:[#allocation15 + $0x7a8] sm:$0xff] }
0x1932   :  { %5892 = vmatprep.mubr.bf16.mxu0 %v10543_v35  ;;  %5974 = vmatprep.mubr.bf16.mxu1 %v10543_v35  ;;  %v5771_v35 = vld [vmem:[#allocation15 + $0x680] sm:$0xff] }
0x1934   :  { %5863 = vmatpush1.bf16.msra.mxu0 %v5759_v18  ;;  %5945 = vmatpush1.bf16.msra.mxu1 %v5761_v53  ;;  %v5810_v18 = vld [vmem:[#allocation15 + $0x7b8] sm:$0xff]  ;;  %v5807_v53 = vld [vmem:[#allocation15 + $0x7a0] sm:$0xff] }
0x1935   :  { %5864 = vmatprep.subr.bf16.mxu0 %v5764_v38  ;;  %5946 = vmatprep.subr.bf16.mxu1 %v5766_v52  ;;  %v5809_v38 = vld [vmem:[#allocation15 + $0x7b0] sm:$0xff]  ;;  %v5812_v52 = vld [vmem:[#allocation15 + $0x7c8] sm:$0xff] }
0x1938   :  { %5865 = vmatpush1.bf16.msra.mxu0 %v5763_v32  ;;  %5947 = vmatpush1.bf16.msra.mxu1 %v5765_v16  ;;  %v5814_v32 = vld [vmem:[#allocation15 + $0x7d8] sm:$0xff]  ;;  %v5811_v16 = vld [vmem:[#allocation15 + $0x7c0] sm:$0xff] }
0x1939   :  { %5866 = vmatprep.subr.bf16.mxu0 %v5768_v25  ;;  %5948 = vmatprep.subr.bf16.mxu1 %v5770_v7  ;;  %v5813_v25 = vld [vmem:[#allocation15 + $0x7d0] sm:$0xff]  ;;  %v5816_v7 = vld [vmem:[#allocation15 + $0x7e8] sm:$0xff] }
0x193c   :  { %5867 = vmatpush1.bf16.msra.mxu0 %v5767_v8  ;;  %5949 = vmatpush1.bf16.msra.mxu1 %v5769_v15  ;;  %v5818_v8 = vld [vmem:[#allocation15 + $0x7f8] sm:$0xff]  ;;  %v5815_v15 = vld [vmem:[#allocation15 + $0x7e0] sm:$0xff] }
0x193d   :  { %5868 = vmatprep.subr.bf16.mxu0 %v5772_v23  ;;  %5950 = vmatprep.subr.bf16.mxu1 %v5774_v34  ;;  %v5817_v23 = vld [vmem:[#allocation15 + $0x7f0] sm:$0xff]  ;;  %v5563_v34 = vld [vmem:[#allocation15 + $0x8] sm:$0xff] }
0x1940   :  { %5869 = vmatpush1.bf16.msra.mxu0 %v5771_v35  ;;  %5951 = vmatpush1.bf16.msra.mxu1 %v5773_v1  ;;  %v5565_v35 = vld [vmem:[#allocation15 + $0x18] sm:$0xff]  ;;  %v5562_v1 = vld [vmem:[#allocation15] sm:$0xff] }
0x1941   :  { %5870 = vmatprep.subr.bf16.mxu0 %v5776_v58  ;;  %5952 = vmatprep.subr.bf16.mxu1 %v5778_v42  ;;  %v5564_v58 = vld [vmem:[#allocation15 + $0x10] sm:$0xff]  ;;  %v5567_v42 = vld [vmem:[#allocation15 + $0x28] sm:$0xff] }
0x1944   :  { %5871 = vmatpush1.bf16.msra.mxu0 %v5775_v14  ;;  %5953 = vmatpush1.bf16.msra.mxu1 %v5777_v31  ;;  %v5569_v14 = vld [vmem:[#allocation15 + $0x38] sm:$0xff]  ;;  %v5566_v31 = vld [vmem:[#allocation15 + $0x20] sm:$0xff] }
0x1945   :  { %5872 = vmatprep.subr.bf16.mxu0 %v5780_v29  ;;  %5954 = vmatprep.subr.bf16.mxu1 %v5782_v28  ;;  %v5568_v29 = vld [vmem:[#allocation15 + $0x30] sm:$0xff]  ;;  %v5571_v28 = vld [vmem:[#allocation15 + $0x48] sm:$0xff] }
0x1948   :  { %5873 = vmatpush1.bf16.msra.mxu0 %v5779_v5  ;;  %5955 = vmatpush1.bf16.msra.mxu1 %v5781_v3  ;;  %v5573_v5 = vld [vmem:[#allocation15 + $0x58] sm:$0xff]  ;;  %v5570_v3 = vld [vmem:[#allocation15 + $0x40] sm:$0xff] }
0x1949   :  { %5874 = vmatprep.subr.bf16.mxu0 %v5784_v21  ;;  %5956 = vmatprep.subr.bf16.mxu1 %v5786_v51  ;;  %v5572_v21 = vld [vmem:[#allocation15 + $0x50] sm:$0xff]  ;;  %v5575_v51 = vld [vmem:[#allocation15 + $0x68] sm:$0xff] }
0x194c   :  { %5875 = vmatpush1.bf16.msra.mxu0 %v5783_v30  ;;  %5957 = vmatpush1.bf16.msra.mxu1 %v5785_v59  ;;  %v5574_v30 = vld [vmem:[#allocation15 + $0x60] sm:$0xff]  ;;  %v5576_v59 = vld [vmem:[#allocation15 + $0x70] sm:$0xff] }
0x194d   :  { %5876 = vmatprep.subr.bf16.mxu0 %v5788_v37  ;;  %5958 = vmatprep.subr.bf16.mxu1 %v5790_v36  ;;  %v5579_v37 = vld [vmem:[#allocation15 + $0x88] sm:$0xff]  ;;  %v5581_v36 = vld [vmem:[#allocation15 + $0x98] sm:$0xff] }
0x1950   :  { %5877 = vmatpush1.bf16.msra.mxu0 %v5787_v13  ;;  %5959 = vmatpush1.bf16.msra.mxu1 %v5789_v2  ;;  %v5580_v13 = vld [vmem:[#allocation15 + $0x90] sm:$0xff]  ;;  %v5583_v2 = vld [vmem:[#allocation15 + $0xa8] sm:$0xff] }
0x1951   :  { %5878 = vmatprep.subr.bf16.mxu0 %v5792_v0  ;;  %5960 = vmatprep.subr.bf16.mxu1 %v5794_v62  ;;  %v5585_v0 = vld [vmem:[#allocation15 + $0xb8] sm:$0xff]  ;;  %v5582_v62 = vld [vmem:[#allocation15 + $0xa0] sm:$0xff] }
0x1954   :  { %5879 = vmatpush1.bf16.msra.mxu0 %v5791_v22  ;;  %5961 = vmatpush1.bf16.msra.mxu1 %v5793_v20  ;;  %v5584_v22 = vld [vmem:[#allocation15 + $0xb0] sm:$0xff]  ;;  %v5587_v20 = vld [vmem:[#allocation15 + $0xc8] sm:$0xff] }
0x1955   :  { %5880 = vmatprep.subr.bf16.mxu0 %v5796_v48  ;;  %5962 = vmatprep.subr.bf16.mxu1 %v5798_v60  ;;  %v5589_v48 = vld [vmem:[#allocation15 + $0xd8] sm:$0xff]  ;;  %v5586_v60 = vld [vmem:[#allocation15 + $0xc0] sm:$0xff] }
0x1958   :  { %5881 = vmatpush1.bf16.msra.mxu0 %v5795_v12  ;;  %5963 = vmatpush1.bf16.msra.mxu1 %v5797_v63  ;;  %v5588_v12 = vld [vmem:[#allocation15 + $0xd0] sm:$0xff]  ;;  %v5591_v63 = vld [vmem:[#allocation15 + $0xe8] sm:$0xff] }
0x1959   :  { %5882 = vmatprep.subr.bf16.mxu0 %v5800_v4  ;;  %5964 = vmatprep.subr.bf16.mxu1 %v5802_v40  ;;  %v5593_v4 = vld [vmem:[#allocation15 + $0xf8] sm:$0xff]  ;;  %v5590_v40 = vld [vmem:[#allocation15 + $0xe0] sm:$0xff] }
0x195c   :  { %5883 = vmatpush1.bf16.msra.mxu0 %v5799_v55  ;;  %5965 = vmatpush1.bf16.msra.mxu1 %v5801_v47  ;;  %v5592_v55 = vld [vmem:[#allocation15 + $0xf0] sm:$0xff]  ;;  %v5595_v47 = vld [vmem:[#allocation15 + $0x108] sm:$0xff] }
0x195d   :  { %5884 = vmatprep.subr.bf16.mxu0 %v5804_v61  ;;  %5966 = vmatprep.subr.bf16.mxu1 %v5806_v44  ;;  %v5597_v61 = vld [vmem:[#allocation15 + $0x118] sm:$0xff]  ;;  %v5594_v44 = vld [vmem:[#allocation15 + $0x100] sm:$0xff] }
0x1960   :  { %5885 = vmatpush1.bf16.msra.mxu0 %v5803_v10  ;;  %5967 = vmatpush1.bf16.msra.mxu1 %v5805_v39  ;;  %v5596_v10 = vld [vmem:[#allocation15 + $0x110] sm:$0xff]  ;;  %v5599_v39 = vld [vmem:[#allocation15 + $0x128] sm:$0xff] }
0x1961   :  { %5886 = vmatprep.subr.bf16.mxu0 %v5808_v46  ;;  %5968 = vmatprep.subr.bf16.mxu1 %v5810_v18  ;;  %v5601_v46 = vld [vmem:[#allocation15 + $0x138] sm:$0xff]  ;;  %v5598_v18 = vld [vmem:[#allocation15 + $0x120] sm:$0xff] }
0x1964   :  { %5887 = vmatpush1.bf16.msra.mxu0 %v5807_v53  ;;  %5969 = vmatpush1.bf16.msra.mxu1 %v5809_v38  ;;  %v5600_v53 = vld [vmem:[#allocation15 + $0x130] sm:$0xff]  ;;  %v5603_v38 = vld [vmem:[#allocation15 + $0x148] sm:$0xff] }
0x1965   :  { %5888 = vmatprep.subr.bf16.mxu0 %v5812_v52  ;;  %5970 = vmatprep.subr.bf16.mxu1 %v5814_v32  ;;  %v5605_v52 = vld [vmem:[#allocation15 + $0x158] sm:$0xff]  ;;  %v5602_v32 = vld [vmem:[#allocation15 + $0x140] sm:$0xff] }
0x1968   :  { %5889 = vmatpush1.bf16.msra.mxu0 %v5811_v16  ;;  %5971 = vmatpush1.bf16.msra.mxu1 %v5813_v25  ;;  %v5604_v16 = vld [vmem:[#allocation15 + $0x150] sm:$0xff]  ;;  %v5607_v25 = vld [vmem:[#allocation15 + $0x168] sm:$0xff] }
0x1969   :  { %5890 = vmatprep.subr.bf16.mxu0 %v5816_v7  ;;  %5972 = vmatprep.subr.bf16.mxu1 %v5818_v8  ;;  %v5609_v7 = vld [vmem:[#allocation15 + $0x178] sm:$0xff]  ;;  %v5606_v8 = vld [vmem:[#allocation15 + $0x160] sm:$0xff] }
0x196c   :  { %5891 = vmatpush1.bf16.msra.mxu0 %v5815_v15  ;;  %5973 = vmatpush1.bf16.msra.mxu1 %v5817_v23  ;;  %v5608_v15 = vld [vmem:[#allocation15 + $0x170] sm:$0xff]  ;;  %v5611_v23 = vld [vmem:[#allocation15 + $0x188] sm:$0xff] }
0x196d   :  { %5983 = vmatprep.subr.bf16.mxu0 %v5563_v34  ;;  %6065 = vmatprep.subr.bf16.mxu1 %v5565_v35  ;;  %v5613_v34 = vld [vmem:[#allocation15 + $0x198] sm:$0xff]  ;;  %v5610_v35 = vld [vmem:[#allocation15 + $0x180] sm:$0xff] }
0x196f   :  { %5893 = vmatmul.mubr.bf16.vlgmr.msra.gmra.mrb[120].mxu0 %v10541_v57  ;;  %5975 = vmatmul.mubr.bf16.vlgmr.msra.gmra.mrb[136].mxu1 %v10541_v57  ;;  %v5577_v57 = vld [vmem:[#allocation15 + $0x78] sm:$0xff] }
0x1970   :  { %5984 = vmatpush1.bf16.msra.mxu0 %v5562_v1  ;;  %6066 = vmatpush1.bf16.msra.mxu1 %v5564_v58  ;;  %v5612_v1 = vld [vmem:[#allocation15 + $0x190] sm:$0xff]  ;;  %v5615_v58 = vld [vmem:[#allocation15 + $0x1a8] sm:$0xff] }
0x1971   :  { %5985 = vmatprep.subr.bf16.mxu0 %v5567_v42  ;;  %6067 = vmatprep.subr.bf16.mxu1 %v5569_v14  ;;  %v5617_v42 = vld [vmem:[#allocation15 + $0x1b8] sm:$0xff]  ;;  %v5614_v14 = vld [vmem:[#allocation15 + $0x1a0] sm:$0xff] }
0x1972   :  { %6015 = vmatprep.mubr.bf16.mxu0 %v10535_v33  ;;  %6097 = vmatprep.mubr.bf16.mxu1 %v10535_v33  ;;  %v5578_v33 = vld [vmem:[#allocation15 + $0x80] sm:$0xff] }
0x1974   :  { %5986 = vmatpush1.bf16.msra.mxu0 %v5566_v31  ;;  %6068 = vmatpush1.bf16.msra.mxu1 %v5568_v29  ;;  %v5616_v31 = vld [vmem:[#allocation15 + $0x1b0] sm:$0xff]  ;;  %v5619_v29 = vld [vmem:[#allocation15 + $0x1c8] sm:$0xff] }
0x1975   :  { %5987 = vmatprep.subr.bf16.mxu0 %v5571_v28  ;;  %6069 = vmatprep.subr.bf16.mxu1 %v5573_v5  ;;  %v5621_v28 = vld [vmem:[#allocation15 + $0x1d8] sm:$0xff]  ;;  %v5618_v5 = vld [vmem:[#allocation15 + $0x1c0] sm:$0xff] }
0x1978   :  { %5988 = vmatpush1.bf16.msra.mxu0 %v5570_v3  ;;  %6070 = vmatpush1.bf16.msra.mxu1 %v5572_v21  ;;  %v5620_v3 = vld [vmem:[#allocation15 + $0x1d0] sm:$0xff]  ;;  %v5623_v21 = vld [vmem:[#allocation15 + $0x1e8] sm:$0xff] }
0x1979   :  { %5989 = vmatprep.subr.bf16.mxu0 %v5575_v51  ;;  %6071 = vmatprep.subr.bf16.mxu1 %v5577_v57  ;;  %v5625_v51 = vld [vmem:[#allocation15 + $0x1f8] sm:$0xff]  ;;  %v5622_v57 = vld [vmem:[#allocation15 + $0x1e0] sm:$0xff] }
0x197c   :  { %5990 = vmatpush1.bf16.msra.mxu0 %v5574_v30  ;;  %6072 = vmatpush1.bf16.msra.mxu1 %v5576_v59  ;;  %v5624_v30 = vld [vmem:[#allocation15 + $0x1f0] sm:$0xff]  ;;  %v5627_v59 = vld [vmem:[#allocation15 + $0x208] sm:$0xff] }
0x197d   :  { %5991 = vmatprep.subr.bf16.mxu0 %v5579_v37  ;;  %6073 = vmatprep.subr.bf16.mxu1 %v5581_v36  ;;  %v5629_v37 = vld [vmem:[#allocation15 + $0x218] sm:$0xff]  ;;  %v5626_v36 = vld [vmem:[#allocation15 + $0x200] sm:$0xff] }
0x1980   :  { %5992 = vmatpush1.bf16.msra.mxu0 %v5578_v33  ;;  %6074 = vmatpush1.bf16.msra.mxu1 %v5580_v13  ;;  %v5628_v33 = vld [vmem:[#allocation15 + $0x210] sm:$0xff]  ;;  %v5631_v13 = vld [vmem:[#allocation15 + $0x228] sm:$0xff] }
0x1981   :  { %5993 = vmatprep.subr.bf16.mxu0 %v5583_v2  ;;  %6075 = vmatprep.subr.bf16.mxu1 %v5585_v0  ;;  %v5633_v2 = vld [vmem:[#allocation15 + $0x238] sm:$0xff]  ;;  %v5630_v0 = vld [vmem:[#allocation15 + $0x220] sm:$0xff] }
0x1984   :  { %5994 = vmatpush1.bf16.msra.mxu0 %v5582_v62  ;;  %6076 = vmatpush1.bf16.msra.mxu1 %v5584_v22  ;;  %v5632_v62 = vld [vmem:[#allocation15 + $0x230] sm:$0xff]  ;;  %v5635_v22 = vld [vmem:[#allocation15 + $0x248] sm:$0xff] }
0x1985   :  { %5995 = vmatprep.subr.bf16.mxu0 %v5587_v20  ;;  %6077 = vmatprep.subr.bf16.mxu1 %v5589_v48  ;;  %v5637_v20 = vld [vmem:[#allocation15 + $0x258] sm:$0xff]  ;;  %v5634_v48 = vld [vmem:[#allocation15 + $0x240] sm:$0xff] }
0x1988   :  { %5996 = vmatpush1.bf16.msra.mxu0 %v5586_v60  ;;  %6078 = vmatpush1.bf16.msra.mxu1 %v5588_v12  ;;  %v5636_v60 = vld [vmem:[#allocation15 + $0x250] sm:$0xff]  ;;  %v5639_v12 = vld [vmem:[#allocation15 + $0x268] sm:$0xff] }
0x1989   :  { %5997 = vmatprep.subr.bf16.mxu0 %v5591_v63  ;;  %6079 = vmatprep.subr.bf16.mxu1 %v5593_v4  ;;  %v5638_v63 = vld [vmem:[#allocation15 + $0x260] sm:$0xff]  ;;  %v5640_v4 = vld [vmem:[#allocation15 + $0x270] sm:$0xff] }
0x198c   :  { %5998 = vmatpush1.bf16.msra.mxu0 %v5590_v40  ;;  %6080 = vmatpush1.bf16.msra.mxu1 %v5592_v55  ;;  %v5643_v40 = vld [vmem:[#allocation15 + $0x288] sm:$0xff]  ;;  %v5645_v55 = vld [vmem:[#allocation15 + $0x298] sm:$0xff] }
0x198d   :  { %5999 = vmatprep.subr.bf16.mxu0 %v5595_v47  ;;  %6081 = vmatprep.subr.bf16.mxu1 %v5597_v61  ;;  %v5644_v47 = vld [vmem:[#allocation15 + $0x290] sm:$0xff]  ;;  %v5647_v61 = vld [vmem:[#allocation15 + $0x2a8] sm:$0xff] }
0x1990   :  { %6000 = vmatpush1.bf16.msra.mxu0 %v5594_v44  ;;  %6082 = vmatpush1.bf16.msra.mxu1 %v5596_v10  ;;  %v5649_v44 = vld [vmem:[#allocation15 + $0x2b8] sm:$0xff]  ;;  %v5646_v10 = vld [vmem:[#allocation15 + $0x2a0] sm:$0xff] }
0x1991   :  { %6001 = vmatprep.subr.bf16.mxu0 %v5599_v39  ;;  %6083 = vmatprep.subr.bf16.mxu1 %v5601_v46  ;;  %v5648_v39 = vld [vmem:[#allocation15 + $0x2b0] sm:$0xff]  ;;  %v5651_v46 = vld [vmem:[#allocation15 + $0x2c8] sm:$0xff] }
0x1994   :  { %6002 = vmatpush1.bf16.msra.mxu0 %v5598_v18  ;;  %6084 = vmatpush1.bf16.msra.mxu1 %v5600_v53  ;;  %v5653_v18 = vld [vmem:[#allocation15 + $0x2d8] sm:$0xff]  ;;  %v5650_v53 = vld [vmem:[#allocation15 + $0x2c0] sm:$0xff] }
0x1995   :  { %6003 = vmatprep.subr.bf16.mxu0 %v5603_v38  ;;  %6085 = vmatprep.subr.bf16.mxu1 %v5605_v52  ;;  %v5652_v38 = vld [vmem:[#allocation15 + $0x2d0] sm:$0xff]  ;;  %v5655_v52 = vld [vmem:[#allocation15 + $0x2e8] sm:$0xff] }
0x1998   :  { %6004 = vmatpush1.bf16.msra.mxu0 %v5602_v32  ;;  %6086 = vmatpush1.bf16.msra.mxu1 %v5604_v16  ;;  %v5657_v32 = vld [vmem:[#allocation15 + $0x2f8] sm:$0xff]  ;;  %v5654_v16 = vld [vmem:[#allocation15 + $0x2e0] sm:$0xff] }
0x1999   :  { %6005 = vmatprep.subr.bf16.mxu0 %v5607_v25  ;;  %6087 = vmatprep.subr.bf16.mxu1 %v5609_v7  ;;  %v5656_v25 = vld [vmem:[#allocation15 + $0x2f0] sm:$0xff]  ;;  %v5659_v7 = vld [vmem:[#allocation15 + $0x308] sm:$0xff] }
0x199c   :  { %6006 = vmatpush1.bf16.msra.mxu0 %v5606_v8  ;;  %6088 = vmatpush1.bf16.msra.mxu1 %v5608_v15  ;;  %v5661_v8 = vld [vmem:[#allocation15 + $0x318] sm:$0xff]  ;;  %v5658_v15 = vld [vmem:[#allocation15 + $0x300] sm:$0xff] }
0x199d   :  { %6007 = vmatprep.subr.bf16.mxu0 %v5611_v23  ;;  %6089 = vmatprep.subr.bf16.mxu1 %v5613_v34  ;;  %v5660_v23 = vld [vmem:[#allocation15 + $0x310] sm:$0xff]  ;;  %v5663_v34 = vld [vmem:[#allocation15 + $0x328] sm:$0xff] }
0x19a0   :  { %6008 = vmatpush1.bf16.msra.mxu0 %v5610_v35  ;;  %6090 = vmatpush1.bf16.msra.mxu1 %v5612_v1  ;;  %v5665_v35 = vld [vmem:[#allocation15 + $0x338] sm:$0xff]  ;;  %v5662_v1 = vld [vmem:[#allocation15 + $0x320] sm:$0xff] }
0x19a1   :  { %6009 = vmatprep.subr.bf16.mxu0 %v5615_v58  ;;  %6091 = vmatprep.subr.bf16.mxu1 %v5617_v42  ;;  %v5664_v58 = vld [vmem:[#allocation15 + $0x330] sm:$0xff]  ;;  %v5667_v42 = vld [vmem:[#allocation15 + $0x348] sm:$0xff] }
0x19a4   :  { %6010 = vmatpush1.bf16.msra.mxu0 %v5614_v14  ;;  %6092 = vmatpush1.bf16.msra.mxu1 %v5616_v31  ;;  %v5669_v14 = vld [vmem:[#allocation15 + $0x358] sm:$0xff]  ;;  %v5666_v31 = vld [vmem:[#allocation15 + $0x340] sm:$0xff] }
0x19a5   :  { %6011 = vmatprep.subr.bf16.mxu0 %v5619_v29  ;;  %6093 = vmatprep.subr.bf16.mxu1 %v5621_v28  ;;  %v5668_v29 = vld [vmem:[#allocation15 + $0x350] sm:$0xff]  ;;  %v5671_v28 = vld [vmem:[#allocation15 + $0x368] sm:$0xff] }
0x19a8   :  { %6012 = vmatpush1.bf16.msra.mxu0 %v5618_v5  ;;  %6094 = vmatpush1.bf16.msra.mxu1 %v5620_v3  ;;  %v5673_v5 = vld [vmem:[#allocation15 + $0x378] sm:$0xff]  ;;  %v5670_v3 = vld [vmem:[#allocation15 + $0x360] sm:$0xff] }
0x19a9   :  { %6013 = vmatprep.subr.bf16.mxu0 %v5623_v21  ;;  %6095 = vmatprep.subr.bf16.mxu1 %v5625_v51  ;;  %v5672_v21 = vld [vmem:[#allocation15 + $0x370] sm:$0xff]  ;;  %v5675_v51 = vld [vmem:[#allocation15 + $0x388] sm:$0xff] }
0x19ac   :  { %6014 = vmatpush1.bf16.msra.mxu0 %v5622_v57  ;;  %6096 = vmatpush1.bf16.msra.mxu1 %v5624_v30  ;;  %v5677_v57 = vld [vmem:[#allocation15 + $0x398] sm:$0xff]  ;;  %v5674_v30 = vld [vmem:[#allocation15 + $0x380] sm:$0xff] }
0x19ad   :  { %6024 = vmatprep.subr.bf16.mxu0 %v5627_v59  ;;  %6106 = vmatprep.subr.bf16.mxu1 %v5629_v37  ;;  %v5676_v59 = vld [vmem:[#allocation15 + $0x390] sm:$0xff]  ;;  %v5679_v37 = vld [vmem:[#allocation15 + $0x3a8] sm:$0xff] }
0x19af   :  { %6016 = vmatmul.mubr.bf16.vlgmr.msra.gmra.mrb[120].mxu0 %v10531_v54  ;;  %6098 = vmatmul.mubr.bf16.vlgmr.msra.gmra.mrb[136].mxu1 %v10531_v54  ;;  %v5641_v54 = vld [vmem:[#allocation15 + $0x278] sm:$0xff] }
0x19b0   :  { %6025 = vmatpush1.bf16.msra.mxu0 %v5626_v36  ;;  %6107 = vmatpush1.bf16.msra.mxu1 %v5628_v33  ;;  %v5681_v36 = vld [vmem:[#allocation15 + $0x3b8] sm:$0xff]  ;;  %v5678_v33 = vld [vmem:[#allocation15 + $0x3a0] sm:$0xff] }
0x19b1   :  { %6026 = vmatprep.subr.bf16.mxu0 %v5631_v13  ;;  %6108 = vmatprep.subr.bf16.mxu1 %v5633_v2  ;;  %v5680_v13 = vld [vmem:[#allocation15 + $0x3b0] sm:$0xff]  ;;  %v5683_v2 = vld [vmem:[#allocation15 + $0x3c8] sm:$0xff] }
0x19b2   :  { %6056 = vmatprep.mubr.bf16.mxu0 %v10537_v43  ;;  %6138 = vmatprep.mubr.bf16.mxu1 %v10537_v43  ;;  %v5642_v43 = vld [vmem:[#allocation15 + $0x280] sm:$0xff] }
0x19b4   :  { %6027 = vmatpush1.bf16.msra.mxu0 %v5630_v0  ;;  %6109 = vmatpush1.bf16.msra.mxu1 %v5632_v62  ;;  %v5685_v0 = vld [vmem:[#allocation15 + $0x3d8] sm:$0xff]  ;;  %v5682_v62 = vld [vmem:[#allocation15 + $0x3c0] sm:$0xff] }
0x19b5   :  { %6028 = vmatprep.subr.bf16.mxu0 %v5635_v22  ;;  %6110 = vmatprep.subr.bf16.mxu1 %v5637_v20  ;;  %v5684_v22 = vld [vmem:[#allocation15 + $0x3d0] sm:$0xff]  ;;  %v5687_v20 = vld [vmem:[#allocation15 + $0x3e8] sm:$0xff] }
0x19b8   :  { %6029 = vmatpush1.bf16.msra.mxu0 %v5634_v48  ;;  %6111 = vmatpush1.bf16.msra.mxu1 %v5636_v60  ;;  %v5689_v48 = vld [vmem:[#allocation15 + $0x3f8] sm:$0xff]  ;;  %v5686_v60 = vld [vmem:[#allocation15 + $0x3e0] sm:$0xff] }
0x19b9   :  { %6030 = vmatprep.subr.bf16.mxu0 %v5639_v12  ;;  %6112 = vmatprep.subr.bf16.mxu1 %v5641_v54  ;;  %v5688_v12 = vld [vmem:[#allocation15 + $0x3f0] sm:$0xff] }
0x19bc   :  { %6031 = vmatpush1.bf16.msra.mxu0 %v5638_v63  ;;  %6113 = vmatpush1.bf16.msra.mxu1 %v5640_v4 }
0x19bd   :  { %6032 = vmatprep.subr.bf16.mxu0 %v5643_v40  ;;  %6114 = vmatprep.subr.bf16.mxu1 %v5645_v55 }
0x19c0   :  { %6033 = vmatpush1.bf16.msra.mxu0 %v5642_v43  ;;  %6115 = vmatpush1.bf16.msra.mxu1 %v5644_v47 }
0x19c1   :  { %6034 = vmatprep.subr.bf16.mxu0 %v5647_v61  ;;  %6116 = vmatprep.subr.bf16.mxu1 %v5649_v44 }
0x19c4   :  { %6035 = vmatpush1.bf16.msra.mxu0 %v5646_v10  ;;  %6117 = vmatpush1.bf16.msra.mxu1 %v5648_v39 }
0x19c5   :  { %6036 = vmatprep.subr.bf16.mxu0 %v5651_v46  ;;  %6118 = vmatprep.subr.bf16.mxu1 %v5653_v18 }
0x19c8   :  { %6037 = vmatpush1.bf16.msra.mxu0 %v5650_v53  ;;  %6119 = vmatpush1.bf16.msra.mxu1 %v5652_v38 }
0x19c9   :  { %6038 = vmatprep.subr.bf16.mxu0 %v5655_v52  ;;  %6120 = vmatprep.subr.bf16.mxu1 %v5657_v32 }
0x19cc   :  { %6039 = vmatpush1.bf16.msra.mxu0 %v5654_v16  ;;  %6121 = vmatpush1.bf16.msra.mxu1 %v5656_v25 }
0x19cd   :  { %6040 = vmatprep.subr.bf16.mxu0 %v5659_v7  ;;  %6122 = vmatprep.subr.bf16.mxu1 %v5661_v8 }
0x19d0   :  { %6041 = vmatpush1.bf16.msra.mxu0 %v5658_v15  ;;  %6123 = vmatpush1.bf16.msra.mxu1 %v5660_v23 }
0x19d1   :  { %6042 = vmatprep.subr.bf16.mxu0 %v5663_v34  ;;  %6124 = vmatprep.subr.bf16.mxu1 %v5665_v35 }
0x19d4   :  { %6043 = vmatpush1.bf16.msra.mxu0 %v5662_v1  ;;  %6125 = vmatpush1.bf16.msra.mxu1 %v5664_v58 }
0x19d5   :  { %6044 = vmatprep.subr.bf16.mxu0 %v5667_v42  ;;  %6126 = vmatprep.subr.bf16.mxu1 %v5669_v14 }
0x19d8   :  { %6045 = vmatpush1.bf16.msra.mxu0 %v5666_v31  ;;  %6127 = vmatpush1.bf16.msra.mxu1 %v5668_v29 }
0x19d9   :  { %6046 = vmatprep.subr.bf16.mxu0 %v5671_v28  ;;  %6128 = vmatprep.subr.bf16.mxu1 %v5673_v5 }
0x19dc   :  { %6047 = vmatpush1.bf16.msra.mxu0 %v5670_v3  ;;  %6129 = vmatpush1.bf16.msra.mxu1 %v5672_v21 }
0x19dd   :  { %6048 = vmatprep.subr.bf16.mxu0 %v5675_v51  ;;  %6130 = vmatprep.subr.bf16.mxu1 %v5677_v57 }
0x19e0   :  { %6049 = vmatpush1.bf16.msra.mxu0 %v5674_v30  ;;  %6131 = vmatpush1.bf16.msra.mxu1 %v5676_v59 }
0x19e1   :  { %6050 = vmatprep.subr.bf16.mxu0 %v5679_v37  ;;  %6132 = vmatprep.subr.bf16.mxu1 %v5681_v36 }
0x19e4   :  { %6051 = vmatpush1.bf16.msra.mxu0 %v5678_v33  ;;  %6133 = vmatpush1.bf16.msra.mxu1 %v5680_v13 }
0x19e5   :  { %6052 = vmatprep.subr.bf16.mxu0 %v5683_v2  ;;  %6134 = vmatprep.subr.bf16.mxu1 %v5685_v0 }
0x19e8   :  { %6053 = vmatpush1.bf16.msra.mxu0 %v5682_v62  ;;  %6135 = vmatpush1.bf16.msra.mxu1 %v5684_v22 }
0x19e9   :  { %6054 = vmatprep.subr.bf16.mxu0 %v5687_v20  ;;  %6136 = vmatprep.subr.bf16.mxu1 %v5689_v48 }
0x19ec   :  { %6055 = vmatpush1.bf16.msra.mxu0 %v5686_v60  ;;  %6137 = vmatpush1.bf16.msra.mxu1 %v5688_v12 }
0x19ef   :  { %6057 = vmatmul.mubr.bf16.vlgmr.msra.gmra.mrb[120].mxu0 %v10533_v9  ;;  %6139 = vmatmul.mubr.bf16.vlgmr.msra.gmra.mrb[136].mxu1 %v10533_v9 }
0x1ac2   :  { %v10575_v54 = vpop.f32.mrb[120].mxu0  ;;  %v10577_v63 = vpop.f32.mrb[136].mxu1 }
0x1ac3   :  { %v10579_v4 = vpop.f32.mrb[121].mxu0  ;;  %v6142_v40 = vpop.f32.mrb[137].mxu1 }
0x1ac4   :  { %v6062_v55 = vpop.f32.mrb[122].mxu0  ;;  %v6144_v43 = vpop.f32.mrb[138].mxu1 }
0x1ac5   :  { %v6063_v47 = vpop.f32.mrb[123].mxu0  ;;  %v6145_v61 = vpop.f32.mrb[139].mxu1 }
0x1ac6   :  { %9106 = dma.done.wait [#allocation20 + $0xe], 3072 }
0x1ac7   :  { %9107 = vsyncadd [#allocation20 + $0xe], 4294964224  ;;  %8614 = vmatprep.subr.bf16.mxu1 %v9175_v17  ;;  %8630 = vmatprep.mubr.msk.bf16.mxu1 %vm9176_vm1, %v9175_v17  ;;  %v7943_v9 = vmul.f32 -1.442695, %v6142_v40  ;;  %v10585_v44 = vld [vmem:[#allocation16 + $0x8] sm:$0xff]  ;;  %v10587_v10 = vld [vmem:[#allocation16 + $0x10] sm:$0xff] }
0x1ac8   :  { %6213 = vmatprep.mubr.bf16.mxu0 %v9177_v45  ;;  %v10589_v39 = vld [vmem:[#allocation16] sm:$0xff]  ;;  %6181 = vmatprep.subr.bf16.mxu0 %v10585_v44  ;;  %v10597_v18 = vld [vmem:[#allocation16 + $0x28] sm:$0xff]  ;;  %v10600_v53 = vld [vmem:[#allocation16 + $0x18] sm:$0xff] }
0x1ac9   :  { %8958 = vpow2.f32 %v7943_v9  ;;  %8615 = vmatpush3.bf16.msra.mxu1 %v10587_v10  ;;  %v10593_v46 = vld [vmem:[#allocation16 + $0x20] sm:$0xff]  ;;  %6182 = vmatpush1.bf16.msra.mxu0 %v10589_v39  ;;  %v10602_v38 = vld [vmem:[#allocation16 + $0x38] sm:$0xff]  ;;  %v10610_v32 = vld [vmem:[#allocation16 + $0x30] sm:$0xff] }
0x1aca   :  { %8616 = vmatprep.subr.bf16.mxu1 %v9175_v17  ;;  %6183 = vmatprep.subr.bf16.mxu0 %v10593_v46  ;;  %v10607_v52 = vld [vmem:[#allocation16 + $0x40] sm:$0xff]  ;;  %v10612_v25 = vld [vmem:[#allocation16 + $0x50] sm:$0xff]  ;;  %v10617_v7 = vld [vmem:[#allocation16 + $0x58] sm:$0xff] }
0x1acb   :  { %v10620_v8 = vld [vmem:[#allocation16 + $0x48] sm:$0xff]  ;;  %v10627_v34 = vld [vmem:[#allocation16 + $0x70] sm:$0xff]  ;;  %v10630_v35 = vld [vmem:[#allocation16 + $0x60] sm:$0xff] }
0x1acc   :  { %v10622_v23 = vld [vmem:[#allocation16 + $0x68] sm:$0xff]  ;;  %v10632_v1 = vld [vmem:[#allocation16 + $0x80] sm:$0xff]  ;;  %v10640_v42 = vld [vmem:[#allocation16 + $0x78] sm:$0xff] }
0x1acd   :  { %8617 = vmatpush3.bf16.msra.mxu1 %v10597_v18  ;;  %6184 = vmatpush1.bf16.msra.mxu0 %v10600_v53  ;;  %v10637_v58 = vld [vmem:[#allocation16 + $0x88] sm:$0xff]  ;;  %v10642_v14 = vld [vmem:[#allocation16 + $0x98] sm:$0xff]  ;;  %v10647_v31 = vld [vmem:[#allocation16 + $0xa0] sm:$0xff] }
0x1ace   :  { %8618 = vmatprep.subr.bf16.mxu1 %v9175_v17  ;;  %6185 = vmatprep.subr.bf16.mxu0 %v10602_v38  ;;  %v10650_v29 = vld [vmem:[#allocation16 + $0x90] sm:$0xff]  ;;  %v10657_v3 = vld [vmem:[#allocation16 + $0xb8] sm:$0xff]  ;;  %v10660_v21 = vld [vmem:[#allocation16 + $0xa8] sm:$0xff] }
0x1acf   :  { %v10652_v28 = vld [vmem:[#allocation16 + $0xb0] sm:$0xff] }
0x1ad1   :  { %8619 = vmatpush3.bf16.msra.mxu1 %v10607_v52  ;;  %6186 = vmatpush1.bf16.msra.mxu0 %v10610_v32 }
0x1ad2   :  { %8620 = vmatprep.subr.bf16.mxu1 %v9175_v17  ;;  %6187 = vmatprep.subr.bf16.mxu0 %v10612_v25 }
0x1ad3   :  { %v8959_v16 = vpop.eup %8958 }
0x1ad4   :  { %v6177_v15 = vadd.f32 1.0, %v8959_v16 }
0x1ad5   :  { %8621 = vmatpush3.bf16.msra.mxu1 %v10617_v7  ;;  %6188 = vmatpush1.bf16.msra.mxu0 %v10620_v8 }
0x1ad6   :  { %8622 = vmatprep.subr.bf16.mxu1 %v9175_v17  ;;  %6189 = vmatprep.subr.bf16.mxu0 %v10622_v23  ;;  %8960 = vrcp.f32 %v6177_v15 }
0x1ad9   :  { %8623 = vmatpush3.bf16.msra.mxu1 %v10627_v34  ;;  %6190 = vmatpush1.bf16.msra.mxu0 %v10630_v35 }
0x1ada   :  { %8624 = vmatprep.subr.bf16.mxu1 %v9175_v17  ;;  %6191 = vmatprep.subr.bf16.mxu0 %v10632_v1 }
0x1add   :  { %8625 = vmatpush3.bf16.msra.mxu1 %v10637_v58  ;;  %6192 = vmatpush1.bf16.msra.mxu0 %v10640_v42 }
0x1ade   :  { %8626 = vmatprep.subr.bf16.mxu1 %v9175_v17  ;;  %6193 = vmatprep.subr.bf16.mxu0 %v10642_v14 }
0x1ae0   :  { %v8961_v5 = vpop.eup %8960 }
0x1ae1   :  { %8627 = vmatpush3.bf16.msra.mxu1 %v10647_v31  ;;  %6194 = vmatpush1.bf16.msra.mxu0 %v10650_v29  ;;  %v6180_v51 = vpack.c.bf16 %v8961_v5, %v8961_v5 }
0x1ae2   :  { %8628 = vmatprep.subr.bf16.mxu1 %v9175_v17  ;;  %6195 = vmatprep.subr.bf16.mxu0 %v10652_v28 }
0x1ae5   :  { %8629 = vmatpush3.bf16.msra.mxu1 %v10657_v3  ;;  %6196 = vmatpush1.bf16.msra.mxu0 %v10660_v21 }
0x1ae6   :  { %8634 = vmatprep.subr.bf16.mxu1 %v9175_v17 }
0x1ae8   :  { %8631 = vmatmul.mubr.bf16.vlgmr.msra.gmra.mrb[140].mxu1 %v6180_v51  ;;  %6214 = vmatmul.mubr.bf16.vlgmr.msra.gmra.mrb[124].mxu0 %v6180_v51 }
0x1ae9   :  { %8636 = vmatprep.mubr.msk.bf16.mxu1 %vm9176_vm1, %v9175_v17  ;;  %6309 = vmatprep.mubr.bf16.mxu0 %v9177_v45 }
0x1bbb   :  { %v6256_v57 = vpop.f32.mrb[140].mxu1  ;;  %v6215_v59 = vpop.f32.mrb[124].mxu0 }
0x1bbc   :  { %v6264_v30 = vmul.f32 %v6256_v57, %v10577_v63  ;;  %v8632_v37 = vpop.f32.mrb[141].mxu1  ;;  %v6262_v36 = vmul.f32 %v6215_v59, %v10575_v54  ;;  %v6217_v33 = vpop.f32.mrb[125].mxu0 }
0x1bbd   :  { %v6259_v13 = vpop.f32.mrb[142].mxu1  ;;  %v6263_v0 = vmul.f32 %v6217_v33, %v10579_v4  ;;  %v6219_v62 = vpop.f32.mrb[126].mxu0 }
0x1bbe   :  { %v6267_v2 = vpack.c.bf16 %v6264_v30, %v6264_v30  ;;  %v8633_v22 = vpop.f32.mrb[143].mxu1  ;;  %v6265_v20 = vpack.c.bf16 %v6262_v36, %v6262_v36  ;;  %v6220_v48 = vpop.f32.mrb[127].mxu0 }
0x1bbf   :  { %v6266_v12 = vpack.c.bf16 %v6263_v0, %v6263_v0 }
0x1bc0   :  { %v6275_v60 = vsel %vm1055_vm0, %v6267_v2, 0  ;;  %v6269_v40 = vsel %vm1055_vm0, %v6265_v20, 0 }
0x1bc1   :  { %8635 = vmatpush3.bf16.msra.mxu1 %v6275_v60  ;;  %7944 = vmatprep.subr.msk.bf16.mxu0 %vm1055_vm0, %v6266_v12 }
0x1bc2   :  { %8640 = vmatprep.subr.bf16.mxu1 %v9175_v17  ;;  %6278 = vmatpush1.bf16.msra.mxu0 %v6269_v40 }
0x1bc3   :  { %7947 = vmatprep.subr.msk.bf16.mxu0 %vm1055_vm0, %v6266_v12 }
0x1bc4   :  { %8637 = vmatmul.mubr.msk.bf16.vlgmr.msra.gmra.mrb[144].mxu1 %vm1051_vm9, %v9826_v27 }
0x1bc5   :  { %8641 = vmatpush3.bf16.msra.mxu1 %v6275_v60  ;;  %8642 = vmatprep.mubr.msk.bf16.mxu1 %vm9176_vm1, %v9175_v17 }
0x1bc6   :  { %7945 = vmatmul.mubr.msk.bf16.vlgmr.msra.gmra.mrb[128].mxu0 %vm1051_vm9, %v9826_v27 }
0x1bc7   :  { %6362 = vmatpush1.bf16.msra.mxu0 %v6269_v40  ;;  %6393 = vmatprep.mubr.bf16.mxu0 %v9177_v45 }
0x1bcc   :  { %8643 = vmatmul.mubr.msk.bf16.vlgmr.msra.gmra.mrb[148].mxu1 %vm1051_vm9, %v9814_v41 }
0x1bce   :  { %7948 = vmatmul.mubr.msk.bf16.vlgmr.msra.gmra.mrb[132].mxu0 %vm1051_vm9, %v9814_v41 }
0x1c97   :  { %v6352_v54 = vpop.f32.mrb[144].mxu1 }
0x1c98   :  { %v10687_v63 = vpack.c.bf16 %v6352_v54, %v6352_v54  ;;  %v8638_v4 = vpop.f32.mrb[145].mxu1 }
0x1c99   :  { %v6311_v55 = vpop.f32.mrb[128].mxu0  ;;  %v6355_v43 = vpop.f32.mrb[146].mxu1 }
0x1c9a   :  { %v10689_v47 = vpack.c.bf16 %v6311_v55, %v6311_v55  ;;  %v6313_v61 = vpop.f32.mrb[129].mxu0  ;;  %v8639_v9 = vpop.f32.mrb[147].mxu1 }
0x1c9b   :  { %v10691_v27 = vpack.c.bf16 %v6313_v61, %v6313_v61  ;;  %v6315_v16 = vpop.f32.mrb[130].mxu0 }
0x1c9c   :  { %v6316_v15 = vpop.f32.mrb[131].mxu0 }
0x1c9f   :  { %v6436_v5 = vpop.f32.mrb[148].mxu1 }
0x1ca0   :  { %v10693_v51 = vpack.c.bf16 %v6436_v5, %v6436_v5  ;;  %v8644_v57 = vpop.f32.mrb[149].mxu1 }
0x1ca1   :  { %v6395_v30 = vpop.f32.mrb[132].mxu0  ;;  %v6439_v41 = vpop.f32.mrb[150].mxu1 }
0x1ca2   :  { %v10695_v59 = vpack.c.bf16 %v6395_v30, %v6395_v30  ;;  %v6397_v37 = vpop.f32.mrb[133].mxu0  ;;  %v8645_v36 = vpop.f32.mrb[151].mxu1 }
0x1ca3   :  { %v6443_v33 = vpack.c.bf16 %v6397_v37, %v6397_v37  ;;  %v6399_v13 = vpop.f32.mrb[134].mxu0 }
0x1ca4   :  { %v6400_v2 = vpop.f32.mrb[135].mxu0 }
0x1ca5   :  { %9108 = dma.done.wait [#allocation20 + $0xf], 24576 }
0x1ca6   :  { %9109 = vsyncadd [#allocation20 + $0xf], 4294942720  ;;  %6674 = vmatprep.mubr.bf16.mxu0 %v6443_v33  ;;  %6756 = vmatprep.mubr.bf16.mxu1 %v6443_v33  ;;  %v6547_v0 = vld [vmem:[#allocation17 + $0x308] sm:$0xff]  ;;  %v6549_v62 = vld [vmem:[#allocation17 + $0x318] sm:$0xff] }
0x1ca7   :  { %v6546_v22 = vld [vmem:[#allocation17 + $0x300] sm:$0xff]  ;;  %6642 = vmatprep.subr.bf16.mxu0 %v6547_v0  ;;  %6724 = vmatprep.subr.bf16.mxu1 %v6549_v62  ;;  %v6548_v20 = vld [vmem:[#allocation17 + $0x310] sm:$0xff]  ;;  %v6551_v48 = vld [vmem:[#allocation17 + $0x328] sm:$0xff] }
0x1ca8   :  { %v6553_v60 = vld [vmem:[#allocation17 + $0x338] sm:$0xff]  ;;  %6643 = vmatpush1.bf16.msra.mxu0 %v6546_v22  ;;  %6725 = vmatpush1.bf16.msra.mxu1 %v6548_v20  ;;  %v6550_v12 = vld [vmem:[#allocation17 + $0x320] sm:$0xff]  ;;  %v6552_v40 = vld [vmem:[#allocation17 + $0x330] sm:$0xff] }
0x1ca9   :  { %6644 = vmatprep.subr.bf16.mxu0 %v6551_v48  ;;  %6726 = vmatprep.subr.bf16.mxu1 %v6553_v60  ;;  %v6555_v54 = vld [vmem:[#allocation17 + $0x348] sm:$0xff]  ;;  %v6557_v4 = vld [vmem:[#allocation17 + $0x358] sm:$0xff]  ;;  %v6554_v55 = vld [vmem:[#allocation17 + $0x340] sm:$0xff] }
0x1caa   :  { %v6556_v43 = vld [vmem:[#allocation17 + $0x350] sm:$0xff]  ;;  %v6559_v61 = vld [vmem:[#allocation17 + $0x368] sm:$0xff]  ;;  %v6561_v9 = vld [vmem:[#allocation17 + $0x378] sm:$0xff] }
0x1cab   :  { %v6558_v16 = vld [vmem:[#allocation17 + $0x360] sm:$0xff]  ;;  %v6560_v15 = vld [vmem:[#allocation17 + $0x370] sm:$0xff]  ;;  %v6563_v5 = vld [vmem:[#allocation17 + $0x388] sm:$0xff] }
0x1cac   :  { %6645 = vmatpush1.bf16.msra.mxu0 %v6550_v12  ;;  %6727 = vmatpush1.bf16.msra.mxu1 %v6552_v40  ;;  %v6565_v57 = vld [vmem:[#allocation17 + $0x398] sm:$0xff]  ;;  %v6562_v30 = vld [vmem:[#allocation17 + $0x380] sm:$0xff]  ;;  %v6564_v41 = vld [vmem:[#allocation17 + $0x390] sm:$0xff] }
0x1cad   :  { %6646 = vmatprep.subr.bf16.mxu0 %v6555_v54  ;;  %6728 = vmatprep.subr.bf16.mxu1 %v6557_v4  ;;  %v6567_v37 = vld [vmem:[#allocation17 + $0x3a8] sm:$0xff]  ;;  %v6569_v36 = vld [vmem:[#allocation17 + $0x3b8] sm:$0xff]  ;;  %v6566_v33 = vld [vmem:[#allocation17 + $0x3a0] sm:$0xff] }
0x1cae   :  { %v6568_v13 = vld [vmem:[#allocation17 + $0x3b0] sm:$0xff]  ;;  %v6571_v2 = vld [vmem:[#allocation17 + $0x3c8] sm:$0xff]  ;;  %v6573_v0 = vld [vmem:[#allocation17 + $0x3d8] sm:$0xff] }
0x1caf   :  { %v6570_v62 = vld [vmem:[#allocation17 + $0x3c0] sm:$0xff]  ;;  %v6572_v22 = vld [vmem:[#allocation17 + $0x3d0] sm:$0xff]  ;;  %v6575_v20 = vld [vmem:[#allocation17 + $0x3e8] sm:$0xff] }
0x1cb0   :  { %6647 = vmatpush1.bf16.msra.mxu0 %v6554_v55  ;;  %6729 = vmatpush1.bf16.msra.mxu1 %v6556_v43  ;;  %v6577_v48 = vld [vmem:[#allocation17 + $0x3f8] sm:$0xff]  ;;  %v6574_v60 = vld [vmem:[#allocation17 + $0x3e0] sm:$0xff]  ;;  %v6576_v12 = vld [vmem:[#allocation17 + $0x3f0] sm:$0xff] }
0x1cb1   :  { %6648 = vmatprep.subr.bf16.mxu0 %v6559_v61  ;;  %6730 = vmatprep.subr.bf16.mxu1 %v6561_v9  ;;  %v6579_v40 = vld [vmem:[#allocation17 + $0x408] sm:$0xff]  ;;  %v6581_v54 = vld [vmem:[#allocation17 + $0x418] sm:$0xff]  ;;  %v6578_v4 = vld [vmem:[#allocation17 + $0x400] sm:$0xff] }
0x1cb2   :  { %v6580_v55 = vld [vmem:[#allocation17 + $0x410] sm:$0xff]  ;;  %v6583_v43 = vld [vmem:[#allocation17 + $0x428] sm:$0xff]  ;;  %v6585_v61 = vld [vmem:[#allocation17 + $0x438] sm:$0xff] }
0x1cb3   :  { %v6582_v9 = vld [vmem:[#allocation17 + $0x420] sm:$0xff] }
0x1cb4   :  { %6649 = vmatpush1.bf16.msra.mxu0 %v6558_v16  ;;  %6731 = vmatpush1.bf16.msra.mxu1 %v6560_v15  ;;  %v6584_v16 = vld [vmem:[#allocation17 + $0x430] sm:$0xff]  ;;  %v6587_v15 = vld [vmem:[#allocation17 + $0x448] sm:$0xff] }
0x1cb5   :  { %6650 = vmatprep.subr.bf16.mxu0 %v6563_v5  ;;  %6732 = vmatprep.subr.bf16.mxu1 %v6565_v57  ;;  %v6589_v5 = vld [vmem:[#allocation17 + $0x458] sm:$0xff]  ;;  %v6586_v57 = vld [vmem:[#allocation17 + $0x440] sm:$0xff] }
0x1cb8   :  { %6651 = vmatpush1.bf16.msra.mxu0 %v6562_v30  ;;  %6733 = vmatpush1.bf16.msra.mxu1 %v6564_v41  ;;  %v6588_v30 = vld [vmem:[#allocation17 + $0x450] sm:$0xff]  ;;  %v6591_v41 = vld [vmem:[#allocation17 + $0x468] sm:$0xff] }
0x1cb9   :  { %6652 = vmatprep.subr.bf16.mxu0 %v6567_v37  ;;  %6734 = vmatprep.subr.bf16.mxu1 %v6569_v36  ;;  %v6593_v37 = vld [vmem:[#allocation17 + $0x478] sm:$0xff]  ;;  %v6590_v36 = vld [vmem:[#allocation17 + $0x460] sm:$0xff] }
0x1cbc   :  { %6653 = vmatpush1.bf16.msra.mxu0 %v6566_v33  ;;  %6735 = vmatpush1.bf16.msra.mxu1 %v6568_v13  ;;  %v6592_v33 = vld [vmem:[#allocation17 + $0x470] sm:$0xff]  ;;  %v6595_v13 = vld [vmem:[#allocation17 + $0x488] sm:$0xff] }
0x1cbd   :  { %6654 = vmatprep.subr.bf16.mxu0 %v6571_v2  ;;  %6736 = vmatprep.subr.bf16.mxu1 %v6573_v0  ;;  %v6597_v2 = vld [vmem:[#allocation17 + $0x498] sm:$0xff]  ;;  %v6594_v0 = vld [vmem:[#allocation17 + $0x480] sm:$0xff] }
0x1cc0   :  { %6655 = vmatpush1.bf16.msra.mxu0 %v6570_v62  ;;  %6737 = vmatpush1.bf16.msra.mxu1 %v6572_v22  ;;  %v6596_v62 = vld [vmem:[#allocation17 + $0x490] sm:$0xff]  ;;  %v6599_v22 = vld [vmem:[#allocation17 + $0x4a8] sm:$0xff] }
0x1cc1   :  { %6656 = vmatprep.subr.bf16.mxu0 %v6575_v20  ;;  %6738 = vmatprep.subr.bf16.mxu1 %v6577_v48  ;;  %v6601_v20 = vld [vmem:[#allocation17 + $0x4b8] sm:$0xff]  ;;  %v6598_v48 = vld [vmem:[#allocation17 + $0x4a0] sm:$0xff] }
0x1cc4   :  { %6657 = vmatpush1.bf16.msra.mxu0 %v6574_v60  ;;  %6739 = vmatpush1.bf16.msra.mxu1 %v6576_v12  ;;  %v6600_v60 = vld [vmem:[#allocation17 + $0x4b0] sm:$0xff]  ;;  %v6603_v12 = vld [vmem:[#allocation17 + $0x4c8] sm:$0xff] }
0x1cc5   :  { %6658 = vmatprep.subr.bf16.mxu0 %v6579_v40  ;;  %6740 = vmatprep.subr.bf16.mxu1 %v6581_v54  ;;  %v6605_v40 = vld [vmem:[#allocation17 + $0x4d8] sm:$0xff]  ;;  %v6602_v54 = vld [vmem:[#allocation17 + $0x4c0] sm:$0xff] }
0x1cc8   :  { %6659 = vmatpush1.bf16.msra.mxu0 %v6578_v4  ;;  %6741 = vmatpush1.bf16.msra.mxu1 %v6580_v55  ;;  %v6604_v4 = vld [vmem:[#allocation17 + $0x4d0] sm:$0xff]  ;;  %v6607_v55 = vld [vmem:[#allocation17 + $0x4e8] sm:$0xff] }
0x1cc9   :  { %6660 = vmatprep.subr.bf16.mxu0 %v6583_v43  ;;  %6742 = vmatprep.subr.bf16.mxu1 %v6585_v61  ;;  %v6609_v43 = vld [vmem:[#allocation17 + $0x4f8] sm:$0xff]  ;;  %v6606_v61 = vld [vmem:[#allocation17 + $0x4e0] sm:$0xff] }
0x1ccc   :  { %6661 = vmatpush1.bf16.msra.mxu0 %v6582_v9  ;;  %6743 = vmatpush1.bf16.msra.mxu1 %v6584_v16  ;;  %v6608_v9 = vld [vmem:[#allocation17 + $0x4f0] sm:$0xff]  ;;  %v6611_v16 = vld [vmem:[#allocation17 + $0x508] sm:$0xff] }
0x1ccd   :  { %6662 = vmatprep.subr.bf16.mxu0 %v6587_v15  ;;  %6744 = vmatprep.subr.bf16.mxu1 %v6589_v5  ;;  %v6613_v15 = vld [vmem:[#allocation17 + $0x518] sm:$0xff]  ;;  %v6610_v5 = vld [vmem:[#allocation17 + $0x500] sm:$0xff] }
0x1cd0   :  { %6663 = vmatpush1.bf16.msra.mxu0 %v6586_v57  ;;  %6745 = vmatpush1.bf16.msra.mxu1 %v6588_v30  ;;  %v6612_v57 = vld [vmem:[#allocation17 + $0x510] sm:$0xff]  ;;  %v6615_v30 = vld [vmem:[#allocation17 + $0x528] sm:$0xff] }
0x1cd1   :  { %6664 = vmatprep.subr.bf16.mxu0 %v6591_v41  ;;  %6746 = vmatprep.subr.bf16.mxu1 %v6593_v37  ;;  %v6617_v41 = vld [vmem:[#allocation17 + $0x538] sm:$0xff]  ;;  %v6614_v37 = vld [vmem:[#allocation17 + $0x520] sm:$0xff] }
0x1cd4   :  { %6665 = vmatpush1.bf16.msra.mxu0 %v6590_v36  ;;  %6747 = vmatpush1.bf16.msra.mxu1 %v6592_v33  ;;  %v6616_v36 = vld [vmem:[#allocation17 + $0x530] sm:$0xff]  ;;  %v6619_v33 = vld [vmem:[#allocation17 + $0x548] sm:$0xff] }
0x1cd5   :  { %6666 = vmatprep.subr.bf16.mxu0 %v6595_v13  ;;  %6748 = vmatprep.subr.bf16.mxu1 %v6597_v2  ;;  %v6621_v13 = vld [vmem:[#allocation17 + $0x558] sm:$0xff]  ;;  %v6618_v2 = vld [vmem:[#allocation17 + $0x540] sm:$0xff] }
0x1cd8   :  { %6667 = vmatpush1.bf16.msra.mxu0 %v6594_v0  ;;  %6749 = vmatpush1.bf16.msra.mxu1 %v6596_v62  ;;  %v6620_v0 = vld [vmem:[#allocation17 + $0x550] sm:$0xff]  ;;  %v6623_v62 = vld [vmem:[#allocation17 + $0x568] sm:$0xff] }
0x1cd9   :  { %6668 = vmatprep.subr.bf16.mxu0 %v6599_v22  ;;  %6750 = vmatprep.subr.bf16.mxu1 %v6601_v20  ;;  %v6622_v22 = vld [vmem:[#allocation17 + $0x560] sm:$0xff]  ;;  %v6624_v20 = vld [vmem:[#allocation17 + $0x570] sm:$0xff] }
0x1cdc   :  { %6669 = vmatpush1.bf16.msra.mxu0 %v6598_v48  ;;  %6751 = vmatpush1.bf16.msra.mxu1 %v6600_v60  ;;  %v6627_v48 = vld [vmem:[#allocation17 + $0x588] sm:$0xff]  ;;  %v6629_v60 = vld [vmem:[#allocation17 + $0x598] sm:$0xff] }
0x1cdd   :  { %6670 = vmatprep.subr.bf16.mxu0 %v6603_v12  ;;  %6752 = vmatprep.subr.bf16.mxu1 %v6605_v40  ;;  %v6626_v12 = vld [vmem:[#allocation17 + $0x580] sm:$0xff]  ;;  %v6628_v40 = vld [vmem:[#allocation17 + $0x590] sm:$0xff] }
0x1ce0   :  { %6671 = vmatpush1.bf16.msra.mxu0 %v6602_v54  ;;  %6753 = vmatpush1.bf16.msra.mxu1 %v6604_v4  ;;  %v6631_v54 = vld [vmem:[#allocation17 + $0x5a8] sm:$0xff]  ;;  %v6633_v4 = vld [vmem:[#allocation17 + $0x5b8] sm:$0xff] }
0x1ce1   :  { %6672 = vmatprep.subr.bf16.mxu0 %v6607_v55  ;;  %6754 = vmatprep.subr.bf16.mxu1 %v6609_v43  ;;  %v6630_v55 = vld [vmem:[#allocation17 + $0x5a0] sm:$0xff]  ;;  %v6632_v43 = vld [vmem:[#allocation17 + $0x5b0] sm:$0xff] }
0x1ce4   :  { %6673 = vmatpush1.bf16.msra.mxu0 %v6606_v61  ;;  %6755 = vmatpush1.bf16.msra.mxu1 %v6608_v9  ;;  %v6635_v61 = vld [vmem:[#allocation17 + $0x5c8] sm:$0xff]  ;;  %v6637_v9 = vld [vmem:[#allocation17 + $0x5d8] sm:$0xff] }
0x1ce5   :  { %6683 = vmatprep.subr.bf16.mxu0 %v6611_v16  ;;  %6765 = vmatprep.subr.bf16.mxu1 %v6613_v15  ;;  %v6634_v16 = vld [vmem:[#allocation17 + $0x5c0] sm:$0xff]  ;;  %v6636_v15 = vld [vmem:[#allocation17 + $0x5d0] sm:$0xff] }
0x1ce7   :  { %6675 = vmatmul.mubr.bf16.vlgmr.msra.gmra.mrb[136].mxu0 %v10695_v59  ;;  %6757 = vmatmul.mubr.bf16.vlgmr.msra.gmra.mrb[152].mxu1 %v10695_v59  ;;  %v6625_v59 = vld [vmem:[#allocation17 + $0x578] sm:$0xff] }
0x1ce8   :  { %6684 = vmatpush1.bf16.msra.mxu0 %v6610_v5  ;;  %6766 = vmatpush1.bf16.msra.mxu1 %v6612_v57  ;;  %v6639_v5 = vld [vmem:[#allocation17 + $0x5e8] sm:$0xff]  ;;  %v6641_v57 = vld [vmem:[#allocation17 + $0x5f8] sm:$0xff] }
0x1ce9   :  { %6685 = vmatprep.subr.bf16.mxu0 %v6615_v30  ;;  %6767 = vmatprep.subr.bf16.mxu1 %v6617_v41  ;;  %v6638_v30 = vld [vmem:[#allocation17 + $0x5e0] sm:$0xff]  ;;  %v6640_v41 = vld [vmem:[#allocation17 + $0x5f0] sm:$0xff] }
0x1cea   :  { %6715 = vmatprep.mubr.bf16.mxu0 %v9177_v45  ;;  %6797 = vmatprep.mubr.bf16.mxu1 %v9177_v45 }
0x1cec   :  { %6686 = vmatpush1.bf16.msra.mxu0 %v6614_v37  ;;  %6768 = vmatpush1.bf16.msra.mxu1 %v6616_v36  ;;  %v6450_v37 = vld [vmem:[#allocation17 + $0x8] sm:$0xff]  ;;  %v6452_v36 = vld [vmem:[#allocation17 + $0x18] sm:$0xff] }
0x1ced   :  { %6687 = vmatprep.subr.bf16.mxu0 %v6619_v33  ;;  %6769 = vmatprep.subr.bf16.mxu1 %v6621_v13  ;;  %v6449_v33 = vld [vmem:[#allocation17] sm:$0xff]  ;;  %v6451_v13 = vld [vmem:[#allocation17 + $0x10] sm:$0xff] }
0x1cf0   :  { %6688 = vmatpush1.bf16.msra.mxu0 %v6618_v2  ;;  %6770 = vmatpush1.bf16.msra.mxu1 %v6620_v0  ;;  %v6454_v2 = vld [vmem:[#allocation17 + $0x28] sm:$0xff]  ;;  %v6456_v0 = vld [vmem:[#allocation17 + $0x38] sm:$0xff] }
0x1cf1   :  { %6689 = vmatprep.subr.bf16.mxu0 %v6623_v62  ;;  %6771 = vmatprep.subr.bf16.mxu1 %v6625_v59  ;;  %v6453_v62 = vld [vmem:[#allocation17 + $0x20] sm:$0xff]  ;;  %v6455_v59 = vld [vmem:[#allocation17 + $0x30] sm:$0xff] }
0x1cf4   :  { %6690 = vmatpush1.bf16.msra.mxu0 %v6622_v22  ;;  %6772 = vmatpush1.bf16.msra.mxu1 %v6624_v20  ;;  %v6458_v22 = vld [vmem:[#allocation17 + $0x48] sm:$0xff]  ;;  %v6460_v20 = vld [vmem:[#allocation17 + $0x58] sm:$0xff] }
0x1cf5   :  { %6691 = vmatprep.subr.bf16.mxu0 %v6627_v48  ;;  %6773 = vmatprep.subr.bf16.mxu1 %v6629_v60  ;;  %v6457_v48 = vld [vmem:[#allocation17 + $0x40] sm:$0xff]  ;;  %v6459_v60 = vld [vmem:[#allocation17 + $0x50] sm:$0xff] }
0x1cf8   :  { %6692 = vmatpush1.bf16.msra.mxu0 %v6626_v12  ;;  %6774 = vmatpush1.bf16.msra.mxu1 %v6628_v40  ;;  %v6462_v12 = vld [vmem:[#allocation17 + $0x68] sm:$0xff]  ;;  %v6461_v40 = vld [vmem:[#allocation17 + $0x60] sm:$0xff] }
0x1cf9   :  { %6693 = vmatprep.subr.bf16.mxu0 %v6631_v54  ;;  %6775 = vmatprep.subr.bf16.mxu1 %v6633_v4  ;;  %v6463_v54 = vld [vmem:[#allocation17 + $0x70] sm:$0xff]  ;;  %v6466_v4 = vld [vmem:[#allocation17 + $0x88] sm:$0xff] }
0x1cfc   :  { %6694 = vmatpush1.bf16.msra.mxu0 %v6630_v55  ;;  %6776 = vmatpush1.bf16.msra.mxu1 %v6632_v43  ;;  %v6468_v55 = vld [vmem:[#allocation17 + $0x98] sm:$0xff]  ;;  %v6467_v43 = vld [vmem:[#allocation17 + $0x90] sm:$0xff] }
0x1cfd   :  { %6695 = vmatprep.subr.bf16.mxu0 %v6635_v61  ;;  %6777 = vmatprep.subr.bf16.mxu1 %v6637_v9  ;;  %v6470_v61 = vld [vmem:[#allocation17 + $0xa8] sm:$0xff]  ;;  %v6472_v9 = vld [vmem:[#allocation17 + $0xb8] sm:$0xff] }
0x1d00   :  { %6696 = vmatpush1.bf16.msra.mxu0 %v6634_v16  ;;  %6778 = vmatpush1.bf16.msra.mxu1 %v6636_v15  ;;  %v6469_v16 = vld [vmem:[#allocation17 + $0xa0] sm:$0xff]  ;;  %v6471_v15 = vld [vmem:[#allocation17 + $0xb0] sm:$0xff] }
0x1d01   :  { %6697 = vmatprep.subr.bf16.mxu0 %v6639_v5  ;;  %6779 = vmatprep.subr.bf16.mxu1 %v6641_v57  ;;  %v6474_v5 = vld [vmem:[#allocation17 + $0xc8] sm:$0xff]  ;;  %v6476_v57 = vld [vmem:[#allocation17 + $0xd8] sm:$0xff] }
0x1d04   :  { %6698 = vmatpush1.bf16.msra.mxu0 %v6638_v30  ;;  %6780 = vmatpush1.bf16.msra.mxu1 %v6640_v41  ;;  %v6473_v30 = vld [vmem:[#allocation17 + $0xc0] sm:$0xff]  ;;  %v6475_v41 = vld [vmem:[#allocation17 + $0xd0] sm:$0xff] }
0x1d05   :  { %6806 = vmatprep.subr.bf16.mxu0 %v6450_v37  ;;  %6888 = vmatprep.subr.bf16.mxu1 %v6452_v36  ;;  %v6478_v37 = vld [vmem:[#allocation17 + $0xe8] sm:$0xff]  ;;  %v6480_v36 = vld [vmem:[#allocation17 + $0xf8] sm:$0xff] }
0x1d07   :  { %6716 = vmatmul.mubr.bf16.vlgmr.msra.gmra.mrb[136].mxu0 %v10693_v51  ;;  %6798 = vmatmul.mubr.bf16.vlgmr.msra.gmra.mrb[152].mxu1 %v10693_v51  ;;  %v6464_v51 = vld [vmem:[#allocation17 + $0x78] sm:$0xff] }
0x1d08   :  { %6807 = vmatpush1.bf16.msra.mxu0 %v6449_v33  ;;  %6889 = vmatpush1.bf16.msra.mxu1 %v6451_v13  ;;  %v6477_v33 = vld [vmem:[#allocation17 + $0xe0] sm:$0xff]  ;;  %v6479_v13 = vld [vmem:[#allocation17 + $0xf0] sm:$0xff] }
0x1d09   :  { %6808 = vmatprep.subr.bf16.mxu0 %v6454_v2  ;;  %6890 = vmatprep.subr.bf16.mxu1 %v6456_v0  ;;  %v6482_v2 = vld [vmem:[#allocation17 + $0x108] sm:$0xff]  ;;  %v6484_v0 = vld [vmem:[#allocation17 + $0x118] sm:$0xff] }
0x1d0a   :  { %6838 = vmatprep.mubr.bf16.mxu0 %v10691_v27  ;;  %6920 = vmatprep.mubr.bf16.mxu1 %v10691_v27  ;;  %v6465_v27 = vld [vmem:[#allocation17 + $0x80] sm:$0xff] }
0x1d0c   :  { %6809 = vmatpush1.bf16.msra.mxu0 %v6453_v62  ;;  %6891 = vmatpush1.bf16.msra.mxu1 %v6455_v59  ;;  %v6481_v62 = vld [vmem:[#allocation17 + $0x100] sm:$0xff]  ;;  %v6483_v59 = vld [vmem:[#allocation17 + $0x110] sm:$0xff] }
0x1d0d   :  { %6810 = vmatprep.subr.bf16.mxu0 %v6458_v22  ;;  %6892 = vmatprep.subr.bf16.mxu1 %v6460_v20  ;;  %v6486_v22 = vld [vmem:[#allocation17 + $0x128] sm:$0xff]  ;;  %v6488_v20 = vld [vmem:[#allocation17 + $0x138] sm:$0xff] }
0x1d10   :  { %6811 = vmatpush1.bf16.msra.mxu0 %v6457_v48  ;;  %6893 = vmatpush1.bf16.msra.mxu1 %v6459_v60  ;;  %v6485_v48 = vld [vmem:[#allocation17 + $0x120] sm:$0xff]  ;;  %v6487_v60 = vld [vmem:[#allocation17 + $0x130] sm:$0xff] }
0x1d11   :  { %6812 = vmatprep.subr.bf16.mxu0 %v6462_v12  ;;  %6894 = vmatprep.subr.bf16.mxu1 %v6464_v51  ;;  %v6490_v12 = vld [vmem:[#allocation17 + $0x148] sm:$0xff]  ;;  %v6492_v51 = vld [vmem:[#allocation17 + $0x158] sm:$0xff] }
0x1d14   :  { %6813 = vmatpush1.bf16.msra.mxu0 %v6461_v40  ;;  %6895 = vmatpush1.bf16.msra.mxu1 %v6463_v54  ;;  %v6489_v40 = vld [vmem:[#allocation17 + $0x140] sm:$0xff]  ;;  %v6491_v54 = vld [vmem:[#allocation17 + $0x150] sm:$0xff] }
0x1d15   :  { %6814 = vmatprep.subr.bf16.mxu0 %v6466_v4  ;;  %6896 = vmatprep.subr.bf16.mxu1 %v6468_v55  ;;  %v6494_v4 = vld [vmem:[#allocation17 + $0x168] sm:$0xff]  ;;  %v6496_v55 = vld [vmem:[#allocation17 + $0x178] sm:$0xff] }
0x1d18   :  { %6815 = vmatpush1.bf16.msra.mxu0 %v6465_v27  ;;  %6897 = vmatpush1.bf16.msra.mxu1 %v6467_v43  ;;  %v6493_v27 = vld [vmem:[#allocation17 + $0x160] sm:$0xff]  ;;  %v6495_v43 = vld [vmem:[#allocation17 + $0x170] sm:$0xff] }
0x1d19   :  { %6816 = vmatprep.subr.bf16.mxu0 %v6470_v61  ;;  %6898 = vmatprep.subr.bf16.mxu1 %v6472_v9  ;;  %v6498_v61 = vld [vmem:[#allocation17 + $0x188] sm:$0xff]  ;;  %v6500_v9 = vld [vmem:[#allocation17 + $0x198] sm:$0xff] }
0x1d1c   :  { %6817 = vmatpush1.bf16.msra.mxu0 %v6469_v16  ;;  %6899 = vmatpush1.bf16.msra.mxu1 %v6471_v15  ;;  %v6497_v16 = vld [vmem:[#allocation17 + $0x180] sm:$0xff]  ;;  %v6499_v15 = vld [vmem:[#allocation17 + $0x190] sm:$0xff] }
0x1d1d   :  { %6818 = vmatprep.subr.bf16.mxu0 %v6474_v5  ;;  %6900 = vmatprep.subr.bf16.mxu1 %v6476_v57  ;;  %v6502_v5 = vld [vmem:[#allocation17 + $0x1a8] sm:$0xff]  ;;  %v6504_v57 = vld [vmem:[#allocation17 + $0x1b8] sm:$0xff] }
0x1d20   :  { %6819 = vmatpush1.bf16.msra.mxu0 %v6473_v30  ;;  %6901 = vmatpush1.bf16.msra.mxu1 %v6475_v41  ;;  %v6501_v30 = vld [vmem:[#allocation17 + $0x1a0] sm:$0xff]  ;;  %v6503_v41 = vld [vmem:[#allocation17 + $0x1b0] sm:$0xff] }
0x1d21   :  { %6820 = vmatprep.subr.bf16.mxu0 %v6478_v37  ;;  %6902 = vmatprep.subr.bf16.mxu1 %v6480_v36  ;;  %v6506_v37 = vld [vmem:[#allocation17 + $0x1c8] sm:$0xff]  ;;  %v6508_v36 = vld [vmem:[#allocation17 + $0x1d8] sm:$0xff] }
0x1d24   :  { %6821 = vmatpush1.bf16.msra.mxu0 %v6477_v33  ;;  %6903 = vmatpush1.bf16.msra.mxu1 %v6479_v13  ;;  %v6505_v33 = vld [vmem:[#allocation17 + $0x1c0] sm:$0xff]  ;;  %v6507_v13 = vld [vmem:[#allocation17 + $0x1d0] sm:$0xff] }
0x1d25   :  { %6822 = vmatprep.subr.bf16.mxu0 %v6482_v2  ;;  %6904 = vmatprep.subr.bf16.mxu1 %v6484_v0  ;;  %v6510_v2 = vld [vmem:[#allocation17 + $0x1e8] sm:$0xff]  ;;  %v6512_v0 = vld [vmem:[#allocation17 + $0x1f8] sm:$0xff] }
0x1d28   :  { %6823 = vmatpush1.bf16.msra.mxu0 %v6481_v62  ;;  %6905 = vmatpush1.bf16.msra.mxu1 %v6483_v59  ;;  %v6509_v62 = vld [vmem:[#allocation17 + $0x1e0] sm:$0xff]  ;;  %v6511_v59 = vld [vmem:[#allocation17 + $0x1f0] sm:$0xff] }
0x1d29   :  { %6824 = vmatprep.subr.bf16.mxu0 %v6486_v22  ;;  %6906 = vmatprep.subr.bf16.mxu1 %v6488_v20  ;;  %v6514_v22 = vld [vmem:[#allocation17 + $0x208] sm:$0xff]  ;;  %v6516_v20 = vld [vmem:[#allocation17 + $0x218] sm:$0xff] }
0x1d2c   :  { %6825 = vmatpush1.bf16.msra.mxu0 %v6485_v48  ;;  %6907 = vmatpush1.bf16.msra.mxu1 %v6487_v60  ;;  %v6513_v48 = vld [vmem:[#allocation17 + $0x200] sm:$0xff]  ;;  %v6515_v60 = vld [vmem:[#allocation17 + $0x210] sm:$0xff] }
0x1d2d   :  { %6826 = vmatprep.subr.bf16.mxu0 %v6490_v12  ;;  %6908 = vmatprep.subr.bf16.mxu1 %v6492_v51  ;;  %v6518_v12 = vld [vmem:[#allocation17 + $0x228] sm:$0xff]  ;;  %v6520_v51 = vld [vmem:[#allocation17 + $0x238] sm:$0xff] }
0x1d30   :  { %6827 = vmatpush1.bf16.msra.mxu0 %v6489_v40  ;;  %6909 = vmatpush1.bf16.msra.mxu1 %v6491_v54  ;;  %v6517_v40 = vld [vmem:[#allocation17 + $0x220] sm:$0xff]  ;;  %v6519_v54 = vld [vmem:[#allocation17 + $0x230] sm:$0xff] }
0x1d31   :  { %6828 = vmatprep.subr.bf16.mxu0 %v6494_v4  ;;  %6910 = vmatprep.subr.bf16.mxu1 %v6496_v55  ;;  %v6522_v4 = vld [vmem:[#allocation17 + $0x248] sm:$0xff]  ;;  %v6524_v55 = vld [vmem:[#allocation17 + $0x258] sm:$0xff] }
0x1d34   :  { %6829 = vmatpush1.bf16.msra.mxu0 %v6493_v27  ;;  %6911 = vmatpush1.bf16.msra.mxu1 %v6495_v43  ;;  %v6521_v27 = vld [vmem:[#allocation17 + $0x240] sm:$0xff]  ;;  %v6523_v43 = vld [vmem:[#allocation17 + $0x250] sm:$0xff] }
0x1d35   :  { %6830 = vmatprep.subr.bf16.mxu0 %v6498_v61  ;;  %6912 = vmatprep.subr.bf16.mxu1 %v6500_v9  ;;  %v6526_v61 = vld [vmem:[#allocation17 + $0x268] sm:$0xff]  ;;  %v6525_v9 = vld [vmem:[#allocation17 + $0x260] sm:$0xff] }
0x1d38   :  { %6831 = vmatpush1.bf16.msra.mxu0 %v6497_v16  ;;  %6913 = vmatpush1.bf16.msra.mxu1 %v6499_v15  ;;  %v6527_v16 = vld [vmem:[#allocation17 + $0x270] sm:$0xff]  ;;  %v6530_v15 = vld [vmem:[#allocation17 + $0x288] sm:$0xff] }
0x1d39   :  { %6832 = vmatprep.subr.bf16.mxu0 %v6502_v5  ;;  %6914 = vmatprep.subr.bf16.mxu1 %v6504_v57  ;;  %v6532_v5 = vld [vmem:[#allocation17 + $0x298] sm:$0xff]  ;;  %v6529_v57 = vld [vmem:[#allocation17 + $0x280] sm:$0xff] }
0x1d3c   :  { %6833 = vmatpush1.bf16.msra.mxu0 %v6501_v30  ;;  %6915 = vmatpush1.bf16.msra.mxu1 %v6503_v41  ;;  %v6531_v30 = vld [vmem:[#allocation17 + $0x290] sm:$0xff]  ;;  %v6534_v41 = vld [vmem:[#allocation17 + $0x2a8] sm:$0xff] }
0x1d3d   :  { %6834 = vmatprep.subr.bf16.mxu0 %v6506_v37  ;;  %6916 = vmatprep.subr.bf16.mxu1 %v6508_v36  ;;  %v6536_v37 = vld [vmem:[#allocation17 + $0x2b8] sm:$0xff]  ;;  %v6533_v36 = vld [vmem:[#allocation17 + $0x2a0] sm:$0xff] }
0x1d40   :  { %6835 = vmatpush1.bf16.msra.mxu0 %v6505_v33  ;;  %6917 = vmatpush1.bf16.msra.mxu1 %v6507_v13  ;;  %v6535_v33 = vld [vmem:[#allocation17 + $0x2b0] sm:$0xff]  ;;  %v6538_v13 = vld [vmem:[#allocation17 + $0x2c8] sm:$0xff] }
0x1d41   :  { %6836 = vmatprep.subr.bf16.mxu0 %v6510_v2  ;;  %6918 = vmatprep.subr.bf16.mxu1 %v6512_v0  ;;  %v6540_v2 = vld [vmem:[#allocation17 + $0x2d8] sm:$0xff]  ;;  %v6537_v0 = vld [vmem:[#allocation17 + $0x2c0] sm:$0xff] }
0x1d44   :  { %6837 = vmatpush1.bf16.msra.mxu0 %v6509_v62  ;;  %6919 = vmatpush1.bf16.msra.mxu1 %v6511_v59  ;;  %v6539_v62 = vld [vmem:[#allocation17 + $0x2d0] sm:$0xff]  ;;  %v6542_v59 = vld [vmem:[#allocation17 + $0x2e8] sm:$0xff] }
0x1d45   :  { %6847 = vmatprep.subr.bf16.mxu0 %v6514_v22  ;;  %6929 = vmatprep.subr.bf16.mxu1 %v6516_v20  ;;  %v6544_v22 = vld [vmem:[#allocation17 + $0x2f8] sm:$0xff]  ;;  %v6541_v20 = vld [vmem:[#allocation17 + $0x2e0] sm:$0xff] }
0x1d47   :  { %6839 = vmatmul.mubr.bf16.vlgmr.msra.gmra.mrb[136].mxu0 %v10689_v47  ;;  %6921 = vmatmul.mubr.bf16.vlgmr.msra.gmra.mrb[152].mxu1 %v10689_v47  ;;  %v6528_v47 = vld [vmem:[#allocation17 + $0x278] sm:$0xff] }
0x1d48   :  { %6848 = vmatpush1.bf16.msra.mxu0 %v6513_v48  ;;  %6930 = vmatpush1.bf16.msra.mxu1 %v6515_v60  ;;  %v6543_v48 = vld [vmem:[#allocation17 + $0x2f0] sm:$0xff] }
0x1d49   :  { %6849 = vmatprep.subr.bf16.mxu0 %v6518_v12  ;;  %6931 = vmatprep.subr.bf16.mxu1 %v6520_v51 }
0x1d4a   :  { %6879 = vmatprep.mubr.bf16.mxu0 %v9177_v45  ;;  %6961 = vmatprep.mubr.bf16.mxu1 %v9177_v45 }
0x1d4c   :  { %6850 = vmatpush1.bf16.msra.mxu0 %v6517_v40  ;;  %6932 = vmatpush1.bf16.msra.mxu1 %v6519_v54 }
0x1d4d   :  { %6851 = vmatprep.subr.bf16.mxu0 %v6522_v4  ;;  %6933 = vmatprep.subr.bf16.mxu1 %v6524_v55 }
0x1d50   :  { %6852 = vmatpush1.bf16.msra.mxu0 %v6521_v27  ;;  %6934 = vmatpush1.bf16.msra.mxu1 %v6523_v43 }
0x1d51   :  { %6853 = vmatprep.subr.bf16.mxu0 %v6526_v61  ;;  %6935 = vmatprep.subr.bf16.mxu1 %v6528_v47 }
0x1d54   :  { %6854 = vmatpush1.bf16.msra.mxu0 %v6525_v9  ;;  %6936 = vmatpush1.bf16.msra.mxu1 %v6527_v16 }
0x1d55   :  { %6855 = vmatprep.subr.bf16.mxu0 %v6530_v15  ;;  %6937 = vmatprep.subr.bf16.mxu1 %v6532_v5 }
0x1d58   :  { %6856 = vmatpush1.bf16.msra.mxu0 %v6529_v57  ;;  %6938 = vmatpush1.bf16.msra.mxu1 %v6531_v30 }
0x1d59   :  { %6857 = vmatprep.subr.bf16.mxu0 %v6534_v41  ;;  %6939 = vmatprep.subr.bf16.mxu1 %v6536_v37 }
0x1d5c   :  { %6858 = vmatpush1.bf16.msra.mxu0 %v6533_v36  ;;  %6940 = vmatpush1.bf16.msra.mxu1 %v6535_v33 }
0x1d5d   :  { %6859 = vmatprep.subr.bf16.mxu0 %v6538_v13  ;;  %6941 = vmatprep.subr.bf16.mxu1 %v6540_v2 }
0x1d60   :  { %6860 = vmatpush1.bf16.msra.mxu0 %v6537_v0  ;;  %6942 = vmatpush1.bf16.msra.mxu1 %v6539_v62 }
0x1d61   :  { %6861 = vmatprep.subr.bf16.mxu0 %v6542_v59  ;;  %6943 = vmatprep.subr.bf16.mxu1 %v6544_v22 }
0x1d64   :  { %6862 = vmatpush1.bf16.msra.mxu0 %v6541_v20  ;;  %6944 = vmatpush1.bf16.msra.mxu1 %v6543_v48 }
0x1d67   :  { %6880 = vmatmul.mubr.bf16.vlgmr.msra.gmra.mrb[136].mxu0 %v10687_v63  ;;  %6962 = vmatmul.mubr.bf16.vlgmr.msra.gmra.mrb[152].mxu1 %v10687_v63 }
0x1e3a   :  { %v10711_v60 = vpop.f32.mrb[136].mxu0  ;;  %v10713_v12 = vpop.f32.mrb[152].mxu1 }
0x1e3b   :  { %v10715_v51 = vpop.f32.mrb[137].mxu0  ;;  %v10717_v40 = vpop.f32.mrb[153].mxu1 }
0x1e3c   :  { %v6885_v54 = vpop.f32.mrb[138].mxu0  ;;  %v6967_v4 = vpop.f32.mrb[154].mxu1 }
0x1e3d   :  { %v6886_v55 = vpop.f32.mrb[139].mxu0  ;;  %v6968_v27 = vpop.f32.mrb[155].mxu1 }
0x1e3e   :  { %9110 = dma.done.wait [#allocation20 + $0x10], 24576 }
0x1e3f   :  { %9111 = vsyncadd [#allocation20 + $0x10], 4294942720  ;;  %7198 = vmatprep.mubr.bf16.mxu0 %v10557_v50  ;;  %7239 = vmatprep.mubr.bf16.mxu1 %v10559_v49  ;;  %v7071_v43 = vld [vmem:[#allocation18 + $0x308] sm:$0xff]  ;;  %v7070_v61 = vld [vmem:[#allocation18 + $0x300] sm:$0xff] }
0x1e40   :  { %v7119_v63 = vld [vmem:[#allocation18 + $0x488] sm:$0xff]  ;;  %7166 = vmatprep.subr.bf16.mxu0 %v7071_v43  ;;  %v7118_v47 = vld [vmem:[#allocation18 + $0x480] sm:$0xff]  ;;  %v7073_v15 = vld [vmem:[#allocation18 + $0x318] sm:$0xff] }
0x1e41   :  { %7207 = vmatprep.subr.bf16.mxu1 %v7119_v63  ;;  %v7074_v9 = vld [vmem:[#allocation18 + $0x320] sm:$0xff]  ;;  %7167 = vmatpush1.bf16.msra.mxu0 %v7070_v61  ;;  %v7121_v5 = vld [vmem:[#allocation18 + $0x498] sm:$0xff]  ;;  %v7076_v41 = vld [vmem:[#allocation18 + $0x330] sm:$0xff] }
0x1e42   :  { %v7122_v16 = vld [vmem:[#allocation18 + $0x4a0] sm:$0xff]  ;;  %7208 = vmatpush1.bf16.msra.mxu1 %v7118_v47  ;;  %7168 = vmatprep.subr.bf16.mxu0 %v7074_v9  ;;  %v7077_v57 = vld [vmem:[#allocation18 + $0x338] sm:$0xff]  ;;  %v7124_v37 = vld [vmem:[#allocation18 + $0x4b0] sm:$0xff] }
0x1e43   :  { %7209 = vmatprep.subr.bf16.mxu1 %v7122_v16  ;;  %v7125_v30 = vld [vmem:[#allocation18 + $0x4b8] sm:$0xff]  ;;  %v7080_v36 = vld [vmem:[#allocation18 + $0x350] sm:$0xff]  ;;  %v7079_v13 = vld [vmem:[#allocation18 + $0x348] sm:$0xff] }
0x1e44   :  { %v7128_v33 = vld [vmem:[#allocation18 + $0x4d0] sm:$0xff]  ;;  %v7127_v2 = vld [vmem:[#allocation18 + $0x4c8] sm:$0xff]  ;;  %v7082_v59 = vld [vmem:[#allocation18 + $0x360] sm:$0xff] }
0x1e45   :  { %7169 = vmatpush1.bf16.msra.mxu0 %v7073_v15  ;;  %v7083_v0 = vld [vmem:[#allocation18 + $0x368] sm:$0xff]  ;;  %v7130_v22 = vld [vmem:[#allocation18 + $0x4e0] sm:$0xff]  ;;  %v7085_v54 = vld [vmem:[#allocation18 + $0x378] sm:$0xff] }
0x1e46   :  { %7210 = vmatpush1.bf16.msra.mxu1 %v7121_v5  ;;  %7170 = vmatprep.subr.bf16.mxu0 %v7077_v57  ;;  %v7131_v62 = vld [vmem:[#allocation18 + $0x4e8] sm:$0xff]  ;;  %v7086_v20 = vld [vmem:[#allocation18 + $0x380] sm:$0xff]  ;;  %v7133_v4 = vld [vmem:[#allocation18 + $0x4f8] sm:$0xff] }
0x1e47   :  { %7211 = vmatprep.subr.bf16.mxu1 %v7125_v30  ;;  %v7134_v48 = vld [vmem:[#allocation18 + $0x500] sm:$0xff]  ;;  %v7089_v55 = vld [vmem:[#allocation18 + $0x398] sm:$0xff]  ;;  %v7088_v43 = vld [vmem:[#allocation18 + $0x390] sm:$0xff] }
0x1e48   :  { %v7137_v27 = vld [vmem:[#allocation18 + $0x518] sm:$0xff]  ;;  %v7136_v63 = vld [vmem:[#allocation18 + $0x510] sm:$0xff]  ;;  %v7091_v9 = vld [vmem:[#allocation18 + $0x3a8] sm:$0xff] }
0x1e49   :  { %7171 = vmatpush1.bf16.msra.mxu0 %v7076_v41  ;;  %v7092_v61 = vld [vmem:[#allocation18 + $0x3b0] sm:$0xff]  ;;  %v7139_v16 = vld [vmem:[#allocation18 + $0x528] sm:$0xff]  ;;  %v7094_v57 = vld [vmem:[#allocation18 + $0x3c0] sm:$0xff] }
0x1e4a   :  { %7212 = vmatpush1.bf16.msra.mxu1 %v7124_v37  ;;  %7172 = vmatprep.subr.bf16.mxu0 %v7080_v36  ;;  %v7140_v47 = vld [vmem:[#allocation18 + $0x530] sm:$0xff]  ;;  %v7095_v15 = vld [vmem:[#allocation18 + $0x3c8] sm:$0xff]  ;;  %v7142_v30 = vld [vmem:[#allocation18 + $0x540] sm:$0xff] }
0x1e4b   :  { %7213 = vmatprep.subr.bf16.mxu1 %v7128_v33  ;;  %v7143_v5 = vld [vmem:[#allocation18 + $0x548] sm:$0xff]  ;;  %v7098_v41 = vld [vmem:[#allocation18 + $0x3e0] sm:$0xff]  ;;  %v7097_v36 = vld [vmem:[#allocation18 + $0x3d8] sm:$0xff] }
0x1e4c   :  { %v7146_v37 = vld [vmem:[#allocation18 + $0x560] sm:$0xff]  ;;  %v7145_v33 = vld [vmem:[#allocation18 + $0x558] sm:$0xff] }
0x1e4d   :  { %7173 = vmatpush1.bf16.msra.mxu0 %v7079_v13  ;;  %v7101_v13 = vld [vmem:[#allocation18 + $0x3f8] sm:$0xff] }
0x1e4e   :  { %7214 = vmatpush1.bf16.msra.mxu1 %v7127_v2  ;;  %7174 = vmatprep.subr.bf16.mxu0 %v7083_v0  ;;  %v7149_v2 = vld [vmem:[#allocation18 + $0x578] sm:$0xff]  ;;  %v7100_v0 = vld [vmem:[#allocation18 + $0x3f0] sm:$0xff] }
0x1e4f   :  { %7215 = vmatprep.subr.bf16.mxu1 %v7131_v62  ;;  %v7148_v62 = vld [vmem:[#allocation18 + $0x570] sm:$0xff] }
0x1e51   :  { %7175 = vmatpush1.bf16.msra.mxu0 %v7082_v59  ;;  %v7104_v59 = vld [vmem:[#allocation18 + $0x410] sm:$0xff] }
0x1e52   :  { %7216 = vmatpush1.bf16.msra.mxu1 %v7130_v22  ;;  %7176 = vmatprep.subr.bf16.mxu0 %v7086_v20  ;;  %v7152_v22 = vld [vmem:[#allocation18 + $0x590] sm:$0xff]  ;;  %v7103_v20 = vld [vmem:[#allocation18 + $0x408] sm:$0xff] }
0x1e53   :  { %7217 = vmatprep.subr.bf16.mxu1 %v7134_v48  ;;  %v7151_v48 = vld [vmem:[#allocation18 + $0x588] sm:$0xff] }
0x1e55   :  { %7177 = vmatpush1.bf16.msra.mxu0 %v7085_v54  ;;  %v7107_v54 = vld [vmem:[#allocation18 + $0x428] sm:$0xff] }
0x1e56   :  { %7218 = vmatpush1.bf16.msra.mxu1 %v7133_v4  ;;  %7178 = vmatprep.subr.bf16.mxu0 %v7089_v55  ;;  %v7155_v4 = vld [vmem:[#allocation18 + $0x5a8] sm:$0xff]  ;;  %v7106_v55 = vld [vmem:[#allocation18 + $0x420] sm:$0xff] }
0x1e57   :  { %7219 = vmatprep.subr.bf16.mxu1 %v7137_v27  ;;  %v7154_v27 = vld [vmem:[#allocation18 + $0x5a0] sm:$0xff] }
0x1e59   :  { %7179 = vmatpush1.bf16.msra.mxu0 %v7088_v43  ;;  %v7110_v43 = vld [vmem:[#allocation18 + $0x440] sm:$0xff] }
0x1e5a   :  { %7220 = vmatpush1.bf16.msra.mxu1 %v7136_v63  ;;  %7180 = vmatprep.subr.bf16.mxu0 %v7092_v61  ;;  %v7158_v63 = vld [vmem:[#allocation18 + $0x5c0] sm:$0xff]  ;;  %v7109_v61 = vld [vmem:[#allocation18 + $0x438] sm:$0xff] }
0x1e5b   :  { %7221 = vmatprep.subr.bf16.mxu1 %v7140_v47  ;;  %v7157_v47 = vld [vmem:[#allocation18 + $0x5b8] sm:$0xff] }
0x1e5d   :  { %7181 = vmatpush1.bf16.msra.mxu0 %v7091_v9  ;;  %v7113_v9 = vld [vmem:[#allocation18 + $0x458] sm:$0xff] }
0x1e5e   :  { %7222 = vmatpush1.bf16.msra.mxu1 %v7139_v16  ;;  %7182 = vmatprep.subr.bf16.mxu0 %v7095_v15  ;;  %v7161_v16 = vld [vmem:[#allocation18 + $0x5d8] sm:$0xff]  ;;  %v7112_v15 = vld [vmem:[#allocation18 + $0x450] sm:$0xff] }
0x1e5f   :  { %7223 = vmatprep.subr.bf16.mxu1 %v7143_v5  ;;  %v7160_v5 = vld [vmem:[#allocation18 + $0x5d0] sm:$0xff] }
0x1e61   :  { %7183 = vmatpush1.bf16.msra.mxu0 %v7094_v57  ;;  %v7116_v57 = vld [vmem:[#allocation18 + $0x470] sm:$0xff] }
0x1e62   :  { %7224 = vmatpush1.bf16.msra.mxu1 %v7142_v30  ;;  %7184 = vmatprep.subr.bf16.mxu0 %v7098_v41  ;;  %v7164_v30 = vld [vmem:[#allocation18 + $0x5f0] sm:$0xff]  ;;  %v7115_v41 = vld [vmem:[#allocation18 + $0x468] sm:$0xff] }
0x1e63   :  { %7225 = vmatprep.subr.bf16.mxu1 %v7146_v37  ;;  %v7163_v37 = vld [vmem:[#allocation18 + $0x5e8] sm:$0xff] }
0x1e65   :  { %7185 = vmatpush1.bf16.msra.mxu0 %v7097_v36  ;;  %v7096_v36 = vld [vmem:[#allocation18 + $0x3d0] sm:$0xff] }
0x1e66   :  { %7226 = vmatpush1.bf16.msra.mxu1 %v7145_v33  ;;  %7186 = vmatprep.subr.bf16.mxu0 %v7101_v13  ;;  %v7144_v33 = vld [vmem:[#allocation18 + $0x550] sm:$0xff] }
0x1e67   :  { %7227 = vmatprep.subr.bf16.mxu1 %v7149_v2  ;;  %v7072_v13 = vld [vmem:[#allocation18 + $0x310] sm:$0xff] }
0x1e68   :  { %v7120_v2 = vld [vmem:[#allocation18 + $0x490] sm:$0xff] }
0x1e69   :  { %7187 = vmatpush1.bf16.msra.mxu0 %v7100_v0  ;;  %v7099_v0 = vld [vmem:[#allocation18 + $0x3e8] sm:$0xff] }
0x1e6a   :  { %7228 = vmatpush1.bf16.msra.mxu1 %v7148_v62  ;;  %7188 = vmatprep.subr.bf16.mxu0 %v7104_v59  ;;  %v7147_v62 = vld [vmem:[#allocation18 + $0x568] sm:$0xff] }
0x1e6b   :  { %7229 = vmatprep.subr.bf16.mxu1 %v7152_v22  ;;  %v7075_v59 = vld [vmem:[#allocation18 + $0x328] sm:$0xff] }
0x1e6c   :  { %v7123_v22 = vld [vmem:[#allocation18 + $0x4a8] sm:$0xff] }
0x1e6d   :  { %7189 = vmatpush1.bf16.msra.mxu0 %v7103_v20  ;;  %v7102_v20 = vld [vmem:[#allocation18 + $0x400] sm:$0xff] }
0x1e6e   :  { %7230 = vmatpush1.bf16.msra.mxu1 %v7151_v48  ;;  %7190 = vmatprep.subr.bf16.mxu0 %v7107_v54  ;;  %v7150_v48 = vld [vmem:[#allocation18 + $0x580] sm:$0xff] }
0x1e6f   :  { %7231 = vmatprep.subr.bf16.mxu1 %v7155_v4  ;;  %v7078_v54 = vld [vmem:[#allocation18 + $0x340] sm:$0xff] }
0x1e70   :  { %v7126_v4 = vld [vmem:[#allocation18 + $0x4c0] sm:$0xff] }
0x1e71   :  { %7191 = vmatpush1.bf16.msra.mxu0 %v7106_v55  ;;  %v7105_v55 = vld [vmem:[#allocation18 + $0x418] sm:$0xff] }
0x1e72   :  { %7232 = vmatpush1.bf16.msra.mxu1 %v7154_v27  ;;  %7192 = vmatprep.subr.bf16.mxu0 %v7110_v43  ;;  %v7153_v27 = vld [vmem:[#allocation18 + $0x598] sm:$0xff] }
0x1e73   :  { %7233 = vmatprep.subr.bf16.mxu1 %v7158_v63  ;;  %v7081_v43 = vld [vmem:[#allocation18 + $0x358] sm:$0xff] }
0x1e74   :  { %v7129_v63 = vld [vmem:[#allocation18 + $0x4d8] sm:$0xff] }
0x1e75   :  { %7193 = vmatpush1.bf16.msra.mxu0 %v7109_v61  ;;  %v7108_v61 = vld [vmem:[#allocation18 + $0x430] sm:$0xff] }
0x1e76   :  { %7234 = vmatpush1.bf16.msra.mxu1 %v7157_v47  ;;  %7194 = vmatprep.subr.bf16.mxu0 %v7113_v9  ;;  %v7156_v47 = vld [vmem:[#allocation18 + $0x5b0] sm:$0xff]  ;;  %v7111_v9 = vld [vmem:[#allocation18 + $0x448] sm:$0xff] }
0x1e77   :  { %7235 = vmatprep.subr.bf16.mxu1 %v7161_v16  ;;  %v7159_v16 = vld [vmem:[#allocation18 + $0x5c8] sm:$0xff] }
0x1e79   :  { %7195 = vmatpush1.bf16.msra.mxu0 %v7112_v15  ;;  %v7087_v15 = vld [vmem:[#allocation18 + $0x388] sm:$0xff] }
0x1e7a   :  { %7236 = vmatpush1.bf16.msra.mxu1 %v7160_v5  ;;  %7196 = vmatprep.subr.bf16.mxu0 %v7116_v57  ;;  %v7135_v5 = vld [vmem:[#allocation18 + $0x508] sm:$0xff]  ;;  %v7114_v57 = vld [vmem:[#allocation18 + $0x460] sm:$0xff] }
0x1e7b   :  { %7237 = vmatprep.subr.bf16.mxu1 %v7164_v30  ;;  %v7162_v30 = vld [vmem:[#allocation18 + $0x5e0] sm:$0xff] }
0x1e7d   :  { %7197 = vmatpush1.bf16.msra.mxu0 %v7115_v41  ;;  %v7090_v41 = vld [vmem:[#allocation18 + $0x3a0] sm:$0xff] }
0x1e7e   :  { %7238 = vmatpush1.bf16.msra.mxu1 %v7163_v37  ;;  %8254 = vmatprep.subr.bf16.mxu0 %v7096_v36  ;;  %v7138_v37 = vld [vmem:[#allocation18 + $0x520] sm:$0xff]  ;;  %v7117_v36 = vld [vmem:[#allocation18 + $0x478] sm:$0xff] }
0x1e7f   :  { %8276 = vmatprep.subr.bf16.mxu1 %v7144_v33  ;;  %v7165_v33 = vld [vmem:[#allocation18 + $0x5f8] sm:$0xff] }
0x1e80   :  { %7199 = vmatmul.mubr.bf16.vlgmr.msra.gmra.mrb[140].mxu0 %v10553_v19 }
0x1e81   :  { %7240 = vmatmul.mubr.bf16.vlgmr.msra.gmra.mrb[156].mxu1 %v10555_v56  ;;  %8255 = vmatpush3.bf16.msra.mxu0 %v7072_v13  ;;  %v7093_v13 = vld [vmem:[#allocation18 + $0x3b8] sm:$0xff] }
0x1e82   :  { %8277 = vmatpush3.bf16.msra.mxu1 %v7120_v2  ;;  %8256 = vmatprep.subr.bf16.mxu0 %v7099_v0  ;;  %v7141_v2 = vld [vmem:[#allocation18 + $0x538] sm:$0xff]  ;;  %v6974_v0 = vld [vmem:[#allocation18 + $0x8] sm:$0xff] }
0x1e83   :  { %8278 = vmatprep.subr.bf16.mxu1 %v7147_v62  ;;  %7280 = vmatprep.mubr.bf16.mxu0 %v10557_v50  ;;  %v7084_v50 = vld [vmem:[#allocation18 + $0x370] sm:$0xff]  ;;  %v7022_v62 = vld [vmem:[#allocation18 + $0x188] sm:$0xff] }
0x1e84   :  { %7320 = vmatprep.mubr.bf16.mxu1 %v10559_v49  ;;  %v7132_v49 = vld [vmem:[#allocation18 + $0x4f0] sm:$0xff] }
0x1e85   :  { %8257 = vmatpush3.bf16.msra.mxu0 %v7075_v59  ;;  %v6973_v59 = vld [vmem:[#allocation18] sm:$0xff] }
0x1e86   :  { %8279 = vmatpush3.bf16.msra.mxu1 %v7123_v22  ;;  %8258 = vmatprep.subr.bf16.mxu0 %v7102_v20  ;;  %v7021_v22 = vld [vmem:[#allocation18 + $0x180] sm:$0xff] }
0x1e87   :  { %8280 = vmatprep.subr.bf16.mxu1 %v7150_v48  ;;  %v6977_v20 = vld [vmem:[#allocation18 + $0x20] sm:$0xff] }
0x1e88   :  { %v7025_v48 = vld [vmem:[#allocation18 + $0x1a0] sm:$0xff] }
0x1e89   :  { %8259 = vmatpush3.bf16.msra.mxu0 %v7078_v54  ;;  %v6976_v54 = vld [vmem:[#allocation18 + $0x18] sm:$0xff] }
0x1e8a   :  { %8281 = vmatpush3.bf16.msra.mxu1 %v7126_v4  ;;  %8260 = vmatprep.subr.bf16.mxu0 %v7105_v55  ;;  %v7024_v4 = vld [vmem:[#allocation18 + $0x198] sm:$0xff] }
0x1e8b   :  { %8282 = vmatprep.subr.bf16.mxu1 %v7153_v27  ;;  %v6980_v55 = vld [vmem:[#allocation18 + $0x38] sm:$0xff] }
0x1e8c   :  { %v7028_v27 = vld [vmem:[#allocation18 + $0x1b8] sm:$0xff] }
0x1e8d   :  { %8261 = vmatpush3.bf16.msra.mxu0 %v7081_v43  ;;  %v6979_v43 = vld [vmem:[#allocation18 + $0x30] sm:$0xff] }
0x1e8e   :  { %8283 = vmatpush3.bf16.msra.mxu1 %v7129_v63  ;;  %8262 = vmatprep.subr.bf16.mxu0 %v7108_v61  ;;  %v6983_v63 = vld [vmem:[#allocation18 + $0x50] sm:$0xff]  ;;  %v6982_v61 = vld [vmem:[#allocation18 + $0x48] sm:$0xff] }
0x1e8f   :  { %8284 = vmatprep.subr.bf16.mxu1 %v7156_v47  ;;  %v7030_v47 = vld [vmem:[#allocation18 + $0x1c8] sm:$0xff] }
0x1e91   :  { %8263 = vmatpush3.bf16.msra.mxu0 %v7084_v50  ;;  %v6986_v50 = vld [vmem:[#allocation18 + $0x68] sm:$0xff] }
0x1e92   :  { %8285 = vmatpush3.bf16.msra.mxu1 %v7132_v49  ;;  %8264 = vmatprep.subr.bf16.mxu0 %v7111_v9  ;;  %v7034_v49 = vld [vmem:[#allocation18 + $0x1e8] sm:$0xff]  ;;  %v6985_v9 = vld [vmem:[#allocation18 + $0x60] sm:$0xff] }
0x1e93   :  { %8286 = vmatprep.subr.bf16.mxu1 %v7159_v16  ;;  %v7033_v16 = vld [vmem:[#allocation18 + $0x1e0] sm:$0xff] }
0x1e95   :  { %8265 = vmatpush3.bf16.msra.mxu0 %v7087_v15  ;;  %v6989_v15 = vld [vmem:[#allocation18 + $0x80] sm:$0xff] }
0x1e96   :  { %8287 = vmatpush3.bf16.msra.mxu1 %v7135_v5  ;;  %8266 = vmatprep.subr.bf16.mxu0 %v7114_v57  ;;  %v7037_v5 = vld [vmem:[#allocation18 + $0x200] sm:$0xff]  ;;  %v6988_v57 = vld [vmem:[#allocation18 + $0x78] sm:$0xff] }
0x1e97   :  { %8288 = vmatprep.subr.bf16.mxu1 %v7162_v30  ;;  %v7036_v30 = vld [vmem:[#allocation18 + $0x1f8] sm:$0xff] }
0x1e99   :  { %8267 = vmatpush3.bf16.msra.mxu0 %v7090_v41  ;;  %v6992_v41 = vld [vmem:[#allocation18 + $0x98] sm:$0xff] }
0x1e9a   :  { %8289 = vmatpush3.bf16.msra.mxu1 %v7138_v37  ;;  %8268 = vmatprep.subr.bf16.mxu0 %v7117_v36  ;;  %v7040_v37 = vld [vmem:[#allocation18 + $0x218] sm:$0xff]  ;;  %v6991_v36 = vld [vmem:[#allocation18 + $0x90] sm:$0xff] }
0x1e9b   :  { %8290 = vmatprep.subr.bf16.mxu1 %v7165_v33  ;;  %v7039_v33 = vld [vmem:[#allocation18 + $0x210] sm:$0xff] }
0x1e9d   :  { %8269 = vmatpush3.bf16.msra.mxu0 %v7093_v13  ;;  %v6995_v13 = vld [vmem:[#allocation18 + $0xb0] sm:$0xff] }
0x1e9e   :  { %8291 = vmatpush3.bf16.msra.mxu1 %v7141_v2  ;;  %7328 = vmatprep.subr.bf16.mxu0 %v6974_v0  ;;  %v7043_v2 = vld [vmem:[#allocation18 + $0x230] sm:$0xff]  ;;  %v6994_v0 = vld [vmem:[#allocation18 + $0xa8] sm:$0xff] }
0x1e9f   :  { %7369 = vmatprep.subr.bf16.mxu1 %v7022_v62  ;;  %v7042_v62 = vld [vmem:[#allocation18 + $0x228] sm:$0xff] }
0x1ea0   :  { %7281 = vmatmul.mubr.bf16.vlgmr.msra.gmra.mrb[144].mxu0 %v10553_v19  ;;  %v7027_v19 = vld [vmem:[#allocation18 + $0x1b0] sm:$0xff] }
0x1ea1   :  { %7321 = vmatmul.mubr.bf16.vlgmr.msra.gmra.mrb[160].mxu1 %v10555_v56  ;;  %7329 = vmatpush1.bf16.msra.mxu0 %v6973_v59  ;;  %v7031_v56 = vld [vmem:[#allocation18 + $0x1d0] sm:$0xff]  ;;  %v6998_v59 = vld [vmem:[#allocation18 + $0xc8] sm:$0xff] }
0x1ea2   :  { %7370 = vmatpush1.bf16.msra.mxu1 %v7021_v22  ;;  %7330 = vmatprep.subr.bf16.mxu0 %v6977_v20  ;;  %v7046_v22 = vld [vmem:[#allocation18 + $0x248] sm:$0xff]  ;;  %v6997_v20 = vld [vmem:[#allocation18 + $0xc0] sm:$0xff] }
0x1ea3   :  { %7371 = vmatprep.subr.bf16.mxu1 %v7025_v48  ;;  %7360 = vmatprep.mubr.bf16.mxu0 %v10549_v6  ;;  %v7045_v48 = vld [vmem:[#allocation18 + $0x240] sm:$0xff] }
0x1ea4   :  { %7401 = vmatprep.mubr.bf16.mxu1 %v10551_v11 }
0x1ea5   :  { %7331 = vmatpush1.bf16.msra.mxu0 %v6976_v54  ;;  %v7001_v54 = vld [vmem:[#allocation18 + $0xe0] sm:$0xff] }
0x1ea6   :  { %7372 = vmatpush1.bf16.msra.mxu1 %v7024_v4  ;;  %7332 = vmatprep.subr.bf16.mxu0 %v6980_v55  ;;  %v7049_v4 = vld [vmem:[#allocation18 + $0x260] sm:$0xff]  ;;  %v7000_v55 = vld [vmem:[#allocation18 + $0xd8] sm:$0xff] }
0x1ea7   :  { %7373 = vmatprep.subr.bf16.mxu1 %v7028_v27  ;;  %v7048_v27 = vld [vmem:[#allocation18 + $0x258] sm:$0xff] }
0x1ea9   :  { %7333 = vmatpush1.bf16.msra.mxu0 %v6979_v43  ;;  %v7004_v43 = vld [vmem:[#allocation18 + $0xf8] sm:$0xff] }
0x1eaa   :  { %7374 = vmatpush1.bf16.msra.mxu1 %v7027_v19  ;;  %7334 = vmatprep.subr.bf16.mxu0 %v6983_v63  ;;  %v7052_v19 = vld [vmem:[#allocation18 + $0x278] sm:$0xff]  ;;  %v7003_v63 = vld [vmem:[#allocation18 + $0xf0] sm:$0xff] }
0x1eab   :  { %7375 = vmatprep.subr.bf16.mxu1 %v7031_v56  ;;  %v7051_v56 = vld [vmem:[#allocation18 + $0x270] sm:$0xff] }
0x1ead   :  { %7335 = vmatpush1.bf16.msra.mxu0 %v6982_v61  ;;  %v7007_v61 = vld [vmem:[#allocation18 + $0x110] sm:$0xff] }
0x1eae   :  { %7376 = vmatpush1.bf16.msra.mxu1 %v7030_v47  ;;  %7336 = vmatprep.subr.bf16.mxu0 %v6986_v50  ;;  %v7055_v47 = vld [vmem:[#allocation18 + $0x290] sm:$0xff]  ;;  %v7006_v50 = vld [vmem:[#allocation18 + $0x108] sm:$0xff] }
0x1eaf   :  { %7377 = vmatprep.subr.bf16.mxu1 %v7034_v49  ;;  %v7054_v49 = vld [vmem:[#allocation18 + $0x288] sm:$0xff] }
0x1eb1   :  { %7337 = vmatpush1.bf16.msra.mxu0 %v6985_v9  ;;  %v7010_v9 = vld [vmem:[#allocation18 + $0x128] sm:$0xff] }
0x1eb2   :  { %7378 = vmatpush1.bf16.msra.mxu1 %v7033_v16  ;;  %7338 = vmatprep.subr.bf16.mxu0 %v6989_v15  ;;  %v7058_v16 = vld [vmem:[#allocation18 + $0x2a8] sm:$0xff]  ;;  %v7009_v15 = vld [vmem:[#allocation18 + $0x120] sm:$0xff] }
0x1eb3   :  { %7379 = vmatprep.subr.bf16.mxu1 %v7037_v5  ;;  %v7057_v5 = vld [vmem:[#allocation18 + $0x2a0] sm:$0xff] }
0x1eb5   :  { %7339 = vmatpush1.bf16.msra.mxu0 %v6988_v57  ;;  %v7013_v57 = vld [vmem:[#allocation18 + $0x140] sm:$0xff] }
0x1eb6   :  { %7380 = vmatpush1.bf16.msra.mxu1 %v7036_v30  ;;  %7340 = vmatprep.subr.bf16.mxu0 %v6992_v41  ;;  %v7061_v30 = vld [vmem:[#allocation18 + $0x2c0] sm:$0xff]  ;;  %v7012_v41 = vld [vmem:[#allocation18 + $0x138] sm:$0xff] }
0x1eb7   :  { %7381 = vmatprep.subr.bf16.mxu1 %v7040_v37  ;;  %v7060_v37 = vld [vmem:[#allocation18 + $0x2b8] sm:$0xff] }
0x1eb9   :  { %7341 = vmatpush1.bf16.msra.mxu0 %v6991_v36  ;;  %v7016_v36 = vld [vmem:[#allocation18 + $0x158] sm:$0xff] }
0x1eba   :  { %7382 = vmatpush1.bf16.msra.mxu1 %v7039_v33  ;;  %7342 = vmatprep.subr.bf16.mxu0 %v6995_v13  ;;  %v7064_v33 = vld [vmem:[#allocation18 + $0x2d8] sm:$0xff]  ;;  %v7015_v13 = vld [vmem:[#allocation18 + $0x150] sm:$0xff] }
0x1ebb   :  { %7383 = vmatprep.subr.bf16.mxu1 %v7043_v2  ;;  %v7063_v2 = vld [vmem:[#allocation18 + $0x2d0] sm:$0xff] }
0x1ebd   :  { %7343 = vmatpush1.bf16.msra.mxu0 %v6994_v0  ;;  %v7019_v0 = vld [vmem:[#allocation18 + $0x170] sm:$0xff] }
0x1ebe   :  { %7384 = vmatpush1.bf16.msra.mxu1 %v7042_v62  ;;  %7344 = vmatprep.subr.bf16.mxu0 %v6998_v59  ;;  %v7067_v62 = vld [vmem:[#allocation18 + $0x2f0] sm:$0xff]  ;;  %v7018_v59 = vld [vmem:[#allocation18 + $0x168] sm:$0xff] }
0x1ebf   :  { %7385 = vmatprep.subr.bf16.mxu1 %v7046_v22  ;;  %v7066_v22 = vld [vmem:[#allocation18 + $0x2e8] sm:$0xff] }
0x1ec1   :  { %7345 = vmatpush1.bf16.msra.mxu0 %v6997_v20  ;;  %v6999_v20 = vld [vmem:[#allocation18 + $0xd0] sm:$0xff] }
0x1ec2   :  { %7386 = vmatpush1.bf16.msra.mxu1 %v7045_v48  ;;  %7346 = vmatprep.subr.bf16.mxu0 %v7001_v54  ;;  %v7047_v48 = vld [vmem:[#allocation18 + $0x250] sm:$0xff] }
0x1ec3   :  { %7387 = vmatprep.subr.bf16.mxu1 %v7049_v4  ;;  %v6975_v54 = vld [vmem:[#allocation18 + $0x10] sm:$0xff] }
0x1ec4   :  { %v7023_v4 = vld [vmem:[#allocation18 + $0x190] sm:$0xff] }
0x1ec5   :  { %7347 = vmatpush1.bf16.msra.mxu0 %v7000_v55  ;;  %v7002_v55 = vld [vmem:[#allocation18 + $0xe8] sm:$0xff] }
0x1ec6   :  { %7388 = vmatpush1.bf16.msra.mxu1 %v7048_v27  ;;  %7348 = vmatprep.subr.bf16.mxu0 %v7004_v43  ;;  %v7050_v27 = vld [vmem:[#allocation18 + $0x268] sm:$0xff] }
0x1ec7   :  { %7389 = vmatprep.subr.bf16.mxu1 %v7052_v19  ;;  %v6978_v43 = vld [vmem:[#allocation18 + $0x28] sm:$0xff] }
0x1ec8   :  { %v7026_v19 = vld [vmem:[#allocation18 + $0x1a8] sm:$0xff] }
0x1ec9   :  { %7349 = vmatpush1.bf16.msra.mxu0 %v7003_v63  ;;  %v7005_v63 = vld [vmem:[#allocation18 + $0x100] sm:$0xff] }
0x1eca   :  { %7390 = vmatpush1.bf16.msra.mxu1 %v7051_v56  ;;  %7350 = vmatprep.subr.bf16.mxu0 %v7007_v61  ;;  %v7053_v56 = vld [vmem:[#allocation18 + $0x280] sm:$0xff] }
0x1ecb   :  { %7391 = vmatprep.subr.bf16.mxu1 %v7055_v47  ;;  %v6981_v61 = vld [vmem:[#allocation18 + $0x40] sm:$0xff] }
0x1ecc   :  { %v7029_v47 = vld [vmem:[#allocation18 + $0x1c0] sm:$0xff] }
0x1ecd   :  { %7351 = vmatpush1.bf16.msra.mxu0 %v7006_v50  ;;  %v7008_v50 = vld [vmem:[#allocation18 + $0x118] sm:$0xff] }
0x1ece   :  { %7392 = vmatpush1.bf16.msra.mxu1 %v7054_v49  ;;  %7352 = vmatprep.subr.bf16.mxu0 %v7010_v9  ;;  %v7056_v49 = vld [vmem:[#allocation18 + $0x298] sm:$0xff] }
0x1ecf   :  { %7393 = vmatprep.subr.bf16.mxu1 %v7058_v16  ;;  %v6984_v9 = vld [vmem:[#allocation18 + $0x58] sm:$0xff] }
0x1ed0   :  { %v7032_v16 = vld [vmem:[#allocation18 + $0x1d8] sm:$0xff] }
0x1ed1   :  { %7353 = vmatpush1.bf16.msra.mxu0 %v7009_v15  ;;  %v7011_v15 = vld [vmem:[#allocation18 + $0x130] sm:$0xff] }
0x1ed2   :  { %7394 = vmatpush1.bf16.msra.mxu1 %v7057_v5  ;;  %7354 = vmatprep.subr.bf16.mxu0 %v7013_v57  ;;  %v7059_v5 = vld [vmem:[#allocation18 + $0x2b0] sm:$0xff]  ;;  %v7014_v57 = vld [vmem:[#allocation18 + $0x148] sm:$0xff] }
0x1ed3   :  { %7395 = vmatprep.subr.bf16.mxu1 %v7061_v30  ;;  %v7062_v30 = vld [vmem:[#allocation18 + $0x2c8] sm:$0xff] }
0x1ed5   :  { %7355 = vmatpush1.bf16.msra.mxu0 %v7012_v41  ;;  %v6990_v41 = vld [vmem:[#allocation18 + $0x88] sm:$0xff] }
0x1ed6   :  { %7396 = vmatpush1.bf16.msra.mxu1 %v7060_v37  ;;  %7356 = vmatprep.subr.bf16.mxu0 %v7016_v36  ;;  %v7038_v37 = vld [vmem:[#allocation18 + $0x208] sm:$0xff]  ;;  %v7017_v36 = vld [vmem:[#allocation18 + $0x160] sm:$0xff] }
0x1ed7   :  { %7397 = vmatprep.subr.bf16.mxu1 %v7064_v33  ;;  %v7065_v33 = vld [vmem:[#allocation18 + $0x2e0] sm:$0xff] }
0x1ed9   :  { %7357 = vmatpush1.bf16.msra.mxu0 %v7015_v13  ;;  %v6993_v13 = vld [vmem:[#allocation18 + $0xa0] sm:$0xff] }
0x1eda   :  { %7398 = vmatpush1.bf16.msra.mxu1 %v7063_v2  ;;  %7358 = vmatprep.subr.bf16.mxu0 %v7019_v0  ;;  %v7041_v2 = vld [vmem:[#allocation18 + $0x220] sm:$0xff]  ;;  %v7020_v0 = vld [vmem:[#allocation18 + $0x178] sm:$0xff] }
0x1edb   :  { %7399 = vmatprep.subr.bf16.mxu1 %v7067_v62  ;;  %v7068_v62 = vld [vmem:[#allocation18 + $0x2f8] sm:$0xff] }
0x1edd   :  { %7359 = vmatpush1.bf16.msra.mxu0 %v7018_v59  ;;  %v6996_v59 = vld [vmem:[#allocation18 + $0xb8] sm:$0xff] }
0x1ede   :  { %7400 = vmatpush1.bf16.msra.mxu1 %v7066_v22  ;;  %8298 = vmatprep.subr.bf16.mxu0 %v6999_v20  ;;  %v7044_v22 = vld [vmem:[#allocation18 + $0x238] sm:$0xff]  ;;  %v7950_v20 = vmul.f32 -1.442695, %v10717_v40 }
0x1edf   :  { %8320 = vmatprep.subr.bf16.mxu1 %v7047_v48 }
0x1ee0   :  { %7361 = vmatmul.mubr.bf16.vlgmr.msra.gmra.mrb[148].mxu0 %v10545_v26  ;;  %8962 = vpow2.f32 %v7950_v20 }
0x1ee1   :  { %7402 = vmatmul.mubr.bf16.vlgmr.msra.gmra.mrb[164].mxu1 %v10547_v24  ;;  %8299 = vmatpush3.bf16.msra.mxu0 %v6975_v54 }
0x1ee2   :  { %8321 = vmatpush3.bf16.msra.mxu1 %v7023_v4  ;;  %8300 = vmatprep.subr.bf16.mxu0 %v7002_v55 }
0x1ee3   :  { %8322 = vmatprep.subr.bf16.mxu1 %v7050_v27  ;;  %7442 = vmatprep.mubr.bf16.mxu0 %v10549_v6  ;;  %v6987_v6 = vld [vmem:[#allocation18 + $0x70] sm:$0xff] }
0x1ee4   :  { %7482 = vmatprep.mubr.bf16.mxu1 %v10551_v11  ;;  %v7035_v11 = vld [vmem:[#allocation18 + $0x1f0] sm:$0xff] }
0x1ee5   :  { %8301 = vmatpush3.bf16.msra.mxu0 %v6978_v43 }
0x1ee6   :  { %8323 = vmatpush3.bf16.msra.mxu1 %v7026_v19  ;;  %8302 = vmatprep.subr.bf16.mxu0 %v7005_v63 }
0x1ee7   :  { %8324 = vmatprep.subr.bf16.mxu1 %v7053_v56 }
0x1ee9   :  { %8303 = vmatpush3.bf16.msra.mxu0 %v6981_v61 }
0x1eea   :  { %8325 = vmatpush3.bf16.msra.mxu1 %v7029_v47  ;;  %8304 = vmatprep.subr.bf16.mxu0 %v7008_v50 }
0x1eeb   :  { %8326 = vmatprep.subr.bf16.mxu1 %v7056_v49 }
0x1eed   :  { %8305 = vmatpush3.bf16.msra.mxu0 %v6984_v9 }
0x1eee   :  { %8327 = vmatpush3.bf16.msra.mxu1 %v7032_v16  ;;  %8306 = vmatprep.subr.bf16.mxu0 %v7011_v15 }
0x1eef   :  { %8328 = vmatprep.subr.bf16.mxu1 %v7059_v5 }
0x1ef1   :  { %8307 = vmatpush3.bf16.msra.mxu0 %v6987_v6 }
0x1ef2   :  { %8329 = vmatpush3.bf16.msra.mxu1 %v7035_v11  ;;  %8308 = vmatprep.subr.bf16.mxu0 %v7014_v57 }
0x1ef3   :  { %8330 = vmatprep.subr.bf16.mxu1 %v7062_v30 }
0x1ef5   :  { %8309 = vmatpush3.bf16.msra.mxu0 %v6990_v41 }
0x1ef6   :  { %8331 = vmatpush3.bf16.msra.mxu1 %v7038_v37  ;;  %8310 = vmatprep.subr.bf16.mxu0 %v7017_v36 }
0x1ef7   :  { %8332 = vmatprep.subr.bf16.mxu1 %v7065_v33 }
0x1ef9   :  { %8311 = vmatpush3.bf16.msra.mxu0 %v6993_v13 }
0x1efa   :  { %8333 = vmatpush3.bf16.msra.mxu1 %v7041_v2  ;;  %8312 = vmatprep.subr.bf16.mxu0 %v7020_v0 }
0x1efb   :  { %8334 = vmatprep.subr.bf16.mxu1 %v7068_v62 }
0x1efd   :  { %8313 = vmatpush3.bf16.msra.mxu0 %v6996_v59 }
0x1efe   :  { %8335 = vmatpush3.bf16.msra.mxu1 %v7044_v22  ;;  %7497 = vmatprep.subr.bf16.mxu0 %v10585_v44 }
0x1eff   :  { %8646 = vmatprep.subr.bf16.mxu1 %v9175_v17 }
0x1f00   :  { %7443 = vmatmul.mubr.bf16.vlgmr.msra.gmra.mrb[152].mxu0 %v10545_v26  ;;  %v8963_v26 = vpop.eup %8962 }
0x1f01   :  { %7483 = vmatmul.mubr.bf16.vlgmr.msra.gmra.mrb[168].mxu1 %v10547_v24  ;;  %7498 = vmatpush1.bf16.msra.mxu0 %v10589_v39 }
0x1f02   :  { %8647 = vmatpush3.bf16.msra.mxu1 %v10587_v10  ;;  %7499 = vmatprep.subr.bf16.mxu0 %v10593_v46 }
0x1f03   :  { %8648 = vmatprep.subr.bf16.mxu1 %v9175_v17  ;;  %7529 = vmatprep.mubr.bf16.mxu0 %v9177_v45  ;;  %v7493_v45 = vadd.f32 1.0, %v8963_v26 }
0x1f04   :  { %8662 = vmatprep.mubr.msk.bf16.mxu1 %vm9176_vm1, %v9175_v17 }
0x1f05   :  { %7500 = vmatpush1.bf16.msra.mxu0 %v10600_v53  ;;  %8964 = vrcp.f32 %v7493_v45 }
0x1f06   :  { %8649 = vmatpush3.bf16.msra.mxu1 %v10597_v18  ;;  %7501 = vmatprep.subr.bf16.mxu0 %v10602_v38 }
0x1f07   :  { %8650 = vmatprep.subr.bf16.mxu1 %v9175_v17 }
0x1f09   :  { %7502 = vmatpush1.bf16.msra.mxu0 %v10610_v32 }
0x1f0a   :  { %8651 = vmatpush3.bf16.msra.mxu1 %v10607_v52  ;;  %7503 = vmatprep.subr.bf16.mxu0 %v10612_v25 }
0x1f0b   :  { %8652 = vmatprep.subr.bf16.mxu1 %v9175_v17 }
0x1f0d   :  { %7504 = vmatpush1.bf16.msra.mxu0 %v10620_v8 }
0x1f0e   :  { %8653 = vmatpush3.bf16.msra.mxu1 %v10617_v7  ;;  %7505 = vmatprep.subr.bf16.mxu0 %v10622_v23 }
0x1f0f   :  { %8654 = vmatprep.subr.bf16.mxu1 %v9175_v17  ;;  %v8965_v24 = vpop.eup %8964 }
0x1f10   :  { %v7496_v44 = vpack.c.bf16 %v8965_v24, %v8965_v24 }
0x1f11   :  { %7506 = vmatpush1.bf16.msra.mxu0 %v10630_v35 }
0x1f12   :  { %8655 = vmatpush3.bf16.msra.mxu1 %v10627_v34  ;;  %7507 = vmatprep.subr.bf16.mxu0 %v10632_v1 }
0x1f13   :  { %8656 = vmatprep.subr.bf16.mxu1 %v9175_v17 }
0x1f15   :  { %7508 = vmatpush1.bf16.msra.mxu0 %v10640_v42 }
0x1f16   :  { %8657 = vmatpush3.bf16.msra.mxu1 %v10637_v58  ;;  %7509 = vmatprep.subr.bf16.mxu0 %v10642_v14 }
0x1f17   :  { %8658 = vmatprep.subr.bf16.mxu1 %v9175_v17 }
0x1f19   :  { %7510 = vmatpush1.bf16.msra.mxu0 %v10650_v29 }
0x1f1a   :  { %8659 = vmatpush3.bf16.msra.mxu1 %v10647_v31  ;;  %7511 = vmatprep.subr.bf16.mxu0 %v10652_v28 }
0x1f1b   :  { %8660 = vmatprep.subr.bf16.mxu1 %v9175_v17 }
0x1f1d   :  { %7512 = vmatpush1.bf16.msra.mxu0 %v10660_v21 }
0x1f1e   :  { %8661 = vmatpush3.bf16.msra.mxu1 %v10657_v3 }
0x1f20   :  { %7530 = vmatmul.mubr.bf16.vlgmr.msra.gmra.mrb[156].mxu0 %v7496_v44 }
0x1f21   :  { %8663 = vmatmul.mubr.bf16.vlgmr.msra.gmra.mrb[172].mxu1 %v7496_v44 }
0x1f53   :  { %v7200_v10 = vpop.f32.mrb[140].mxu0 }
0x1f54   :  { %v7241_v39 = vpop.f32.mrb[156].mxu1  ;;  %v7202_v18 = vpop.f32.mrb[141].mxu0 }
0x1f55   :  { %v7242_v46 = vadd.f32 %v7241_v39, %v7200_v10  ;;  %v7243_v53 = vpop.f32.mrb[157].mxu1  ;;  %v7204_v52 = vpop.f32.mrb[142].mxu0 }
0x1f56   :  { %v7244_v38 = vadd.f32 %v7243_v53, %v7202_v18  ;;  %v7245_v32 = vpop.f32.mrb[158].mxu1  ;;  %v7205_v25 = vpop.f32.mrb[143].mxu0 }
0x1f57   :  { %v7246_v7 = vpop.f32.mrb[159].mxu1 }
0x1f73   :  { %v8270_v8 = vpop.f32.mrb[144].mxu0 }
0x1f74   :  { %v8292_v23 = vpop.f32.mrb[160].mxu1  ;;  %v8271_v34 = vpop.f32.mrb[145].mxu0 }
0x1f75   :  { %v8293_v35 = vpop.f32.mrb[161].mxu1  ;;  %v8272_v1 = vadd.f32 %v8271_v34, %v8270_v8  ;;  %v8273_v42 = vpop.f32.mrb[146].mxu0 }
0x1f76   :  { %v8294_v58 = vadd.f32 %v8293_v35, %v8292_v23  ;;  %v8295_v14 = vpop.f32.mrb[162].mxu1  ;;  %v8274_v31 = vpop.f32.mrb[147].mxu0 }
0x1f77   :  { %v8296_v29 = vpop.f32.mrb[163].mxu1 }
0x1f78   :  { %v7323_v28 = vadd.f32 %v8294_v58, %v8272_v1 }
0x1fb3   :  { %v7362_v3 = vpop.f32.mrb[148].mxu0 }
0x1fb4   :  { %v7403_v21 = vpop.f32.mrb[164].mxu1  ;;  %v7363_v40 = vadd.f32 %v7362_v3, %v7242_v46  ;;  %v7364_v48 = vpop.f32.mrb[149].mxu0 }
0x1fb5   :  { %v7405_v54 = vpop.f32.mrb[165].mxu1  ;;  %v7365_v4 = vadd.f32 %v7364_v48, %v7244_v38  ;;  %v7366_v55 = vpop.f32.mrb[150].mxu0 }
0x1fb6   :  { %v7407_v27 = vpop.f32.mrb[166].mxu1  ;;  %v7404_v43 = vadd.f32 %v7403_v21, %v7363_v40  ;;  %v7367_v19 = vpop.f32.mrb[151].mxu0 }
0x1fb7   :  { %v7408_v63 = vpop.f32.mrb[167].mxu1  ;;  %v7406_v56 = vadd.f32 %v7405_v54, %v7365_v4 }
0x1fd3   :  { %v8314_v61 = vpop.f32.mrb[152].mxu0 }
0x1fd4   :  { %v8336_v47 = vpop.f32.mrb[168].mxu1  ;;  %v8315_v50 = vpop.f32.mrb[153].mxu0 }
0x1fd5   :  { %v8337_v49 = vpop.f32.mrb[169].mxu1  ;;  %v8316_v9 = vadd.f32 %v8315_v50, %v8314_v61  ;;  %v8317_v15 = vpop.f32.mrb[154].mxu0 }
0x1fd6   :  { %v8338_v16 = vadd.f32 %v8337_v49, %v8336_v47  ;;  %v8339_v5 = vpop.f32.mrb[170].mxu1  ;;  %v8318_v6 = vpop.f32.mrb[155].mxu0 }
0x1fd7   :  { %v8340_v11 = vpop.f32.mrb[171].mxu1  ;;  %v7445_v57 = vadd.f32 %v8316_v9, %v7323_v28 }
0x1fd9   :  { %v7485_v30 = vadd.f32 %v8338_v16, %v7445_v57 }
0x1ff3   :  { %v7531_v41 = vpop.f32.mrb[156].mxu0 }
0x1ff4   :  { %v7572_v37 = vpop.f32.mrb[172].mxu1  ;;  %v7578_v36 = vmul.f32 %v7531_v41, %v10711_v60  ;;  %v7533_v13 = vpop.f32.mrb[157].mxu0 }
0x1ff5   :  { %v7580_v33 = vmul.f32 %v7572_v37, %v10713_v12  ;;  %v8664_v2 = vpop.f32.mrb[173].mxu1  ;;  %v7579_v0 = vmul.f32 %v7533_v13, %v10715_v51  ;;  %v7535_v62 = vpop.f32.mrb[158].mxu0 }
0x1ff6   :  { %v7575_v59 = vpop.f32.mrb[174].mxu1  ;;  %v7581_v22 = vadd.f32 %v7578_v36, %v7404_v43  ;;  %v7536_v26 = vpop.f32.mrb[159].mxu0 }
0x1ff7   :  { %v7583_v20 = vadd.f32 %v7580_v33, %v7485_v30  ;;  %v8665_v45 = vpop.f32.mrb[175].mxu1  ;;  %v7582_v24 = vadd.f32 %v7579_v0, %v7406_v56 }
0x1ff8   :  { %9112 = dma.done.wait [#allocation20 + $0x11], 3072 }
0x1ff9   :  { %9113 = vsyncadd [#allocation20 + $0x11], 4294964224  ;;  %8666 = vmatprep.subr.bf16.mxu1 %v9175_v17  ;;  %v7589_v44 = vmul.f32 %v7582_v24, %v7582_v24  ;;  %8682 = vmatprep.mubr.msk.bf16.mxu1 %vm9176_vm1, %v9175_v17  ;;  %v7602_v12 = vld [vmem:[#allocation19 + $0x40] sm:$0xff]  ;;  %v7603_v39 = vld [vmem:[#allocation19 + $0x48] sm:$0xff]  ;;  %v7590_v28 = vmul.f32 %v7583_v20, %v7583_v20  ;;  %v7588_v3 = vmul.f32 %v7581_v22, %v7581_v22  ;;  %s9178_s18 = smov [#allocation21]  }
0x1ffa   :  { %v7594_v10 = vld [vmem:[#allocation19] sm:$0xff]  ;;  %8351 = vmatprep.subr.bf16.mxu0 %v7602_v12  ;;  %v7611_v46 = vld [vmem:[#allocation19 + $0x88] sm:$0xff]  ;;  %v7604_v53 = vld [vmem:[#allocation19 + $0x50] sm:$0xff]  ;;  %s7712_s26 = sshll.u32 %s9178_s18, 4  ;;  %s7713_s26 = int_to_ptr.vmem [resolvable:$true] %s7712_s26 }
0x1ffb   :  { %v7592_v60 = vpack.c.bf16 %v7589_v44, %v7589_v44  ;;  %v7610_v51 = vld [vmem:[#allocation19 + $0x80] sm:$0xff]  ;;  %8352 = vmatpush3.bf16.msra.mxu0 %v7594_v10  ;;  %v7595_v18 = vld [vmem:[#allocation19 + $0x8] sm:$0xff]  ;;  %v7612_v38 = vld [vmem:[#allocation19 + $0x90] sm:$0xff]  ;;  %v7593_v48 = vpack.c.bf16 %v7590_v28, %v7590_v28  ;;  %v7591_v54 = vpack.c.bf16 %v7588_v3, %v7588_v3  ;;  %s9056_s6 = scalar_lea.vmem %s7713_s26, 128  ;;  %p9061_p5 = scmp.lt.s32.totalorder %s7713_s26, %s7713_s26 }
0x1ffc   :  { %8667 = vmatpush3.bf16.msra.mxu1 %v7610_v51  ;;  %8353 = vmatprep.subr.bf16.mxu0 %v7603_v39  ;;  %v7596_v52 = vld [vmem:[#allocation19 + $0x10] sm:$0xff]  ;;  %v7605_v32 = vld [vmem:[#allocation19 + $0x58] sm:$0xff]  ;;  %v7606_v8 = vld [vmem:[#allocation19 + $0x60] sm:$0xff]  ;;  %p9057_p4 = scmp.ne.s32.totalorder %s7713_s26, %s9056_s6  ;;  %p9062_p6 = scmp.lt.s32.totalorder %s9056_s6, %s9056_s6 }
0x1ffd   :  { %7650 = vmatprep.mubr.bf16.mxu0 %v7592_v60  ;;  %8668 = vmatprep.subr.bf16.mxu1 %v9175_v17  ;;  %v7613_v25 = vld [vmem:[#allocation19 + $0x98] sm:$0xff]  ;;  %v7614_v23 = vld [vmem:[#allocation19 + $0xa0] sm:$0xff]  ;;  %v7607_v35 = vld [vmem:[#allocation19 + $0x68] sm:$0xff] }
0x1ffe   :  { %v7597_v7 = vld [vmem:[#allocation19 + $0x18] sm:$0xff]  ;;  %v7598_v34 = vld [vmem:[#allocation19 + $0x20] sm:$0xff]  ;;  %v7615_v1 = vld [vmem:[#allocation19 + $0xa8] sm:$0xff]  ;;  %p9063_p7 = por %p9062_p6, %p9061_p5 }
0x1fff   :  { %8354 = vmatpush3.bf16.msra.mxu0 %v7595_v18  ;;  %v7599_v58 = vld [vmem:[#allocation19 + $0x28] sm:$0xff]  ;;  %v7608_v42 = vld [vmem:[#allocation19 + $0x70] sm:$0xff]  ;;  %v7609_v29 = vld [vmem:[#allocation19 + $0x78] sm:$0xff] }
0x2000   :  { %8669 = vmatpush3.bf16.msra.mxu1 %v7611_v46  ;;  %8355 = vmatprep.subr.bf16.mxu0 %v7604_v53  ;;  %v7616_v14 = vld [vmem:[#allocation19 + $0xb0] sm:$0xff]  ;;  %v7617_v21 = vld [vmem:[#allocation19 + $0xb8] sm:$0xff]  ;;  %p9064_p8 = pnand %p9063_p7, %p9057_p4 }
0x2001   :  { %8670 = vmatprep.subr.bf16.mxu1 %v9175_v17  ;;  %v7600_v31 = vld [vmem:[#allocation19 + $0x30] sm:$0xff]  ;;  %v7601_v40 = vld [vmem:[#allocation19 + $0x38] sm:$0xff] }
0x2003   :  { %8356 = vmatpush3.bf16.msra.mxu0 %v7596_v52 }
0x2004   :  { %8671 = vmatpush3.bf16.msra.mxu1 %v7612_v38  ;;  %8357 = vmatprep.subr.bf16.mxu0 %v7605_v32 }
0x2005   :  { %8672 = vmatprep.subr.bf16.mxu1 %v9175_v17 }
0x2007   :  { %8358 = vmatpush3.bf16.msra.mxu0 %v7597_v7 }
0x2008   :  { %8673 = vmatpush3.bf16.msra.mxu1 %v7613_v25  ;;  %8359 = vmatprep.subr.bf16.mxu0 %v7606_v8 }
0x2009   :  { %8674 = vmatprep.subr.bf16.mxu1 %v9175_v17 }
0x200b   :  { %8360 = vmatpush3.bf16.msra.mxu0 %v7598_v34 }
0x200c   :  { %8675 = vmatpush3.bf16.msra.mxu1 %v7614_v23  ;;  %8361 = vmatprep.subr.bf16.mxu0 %v7607_v35 }
0x200d   :  { %8676 = vmatprep.subr.bf16.mxu1 %v9175_v17 }
0x200f   :  { %8362 = vmatpush3.bf16.msra.mxu0 %v7599_v58 }
0x2010   :  { %8677 = vmatpush3.bf16.msra.mxu1 %v7615_v1  ;;  %8363 = vmatprep.subr.bf16.mxu0 %v7608_v42 }
0x2011   :  { %8678 = vmatprep.subr.bf16.mxu1 %v9175_v17 }
0x2013   :  { %8364 = vmatpush3.bf16.msra.mxu0 %v7600_v31 }
0x2014   :  { %8679 = vmatpush3.bf16.msra.mxu1 %v7616_v14  ;;  %8365 = vmatprep.subr.bf16.mxu0 %v7609_v29 }
0x2015   :  { %8680 = vmatprep.subr.bf16.mxu1 %v9175_v17 }
0x2017   :  { %8366 = vmatpush3.bf16.msra.mxu0 %v7601_v40 }
0x2018   :  { %8681 = vmatpush3.bf16.msra.mxu1 %v7617_v21 }
0x201a   :  { %7651 = vmatmul.mubr.bf16.vlgmr.msra.gmra.mrb[160].mxu0 %v7591_v54 }
0x201b   :  { %8683 = vmatmul.mubr.bf16.vlgmr.msra.gmra.mrb[176].mxu1 %v7593_v48 }
0x20ed   :  { %v8367_v55 = vpop.f32.mrb[160].mxu0 }
0x20ee   :  { %v7692_v4 = vpop.f32.mrb[176].mxu1  ;;  %v8368_v43 = vpop.f32.mrb[161].mxu0 }
0x20ef   :  { %v8684_v27 = vpop.f32.mrb[177].mxu1  ;;  %v8369_v63 = vadd.f32 %v8368_v43, %v8367_v55  ;;  %v8370_v56 = vpop.f32.mrb[162].mxu0 }
0x20f0   :  { %v7695_v19 = vpop.f32.mrb[178].mxu1  ;;  %v8371_v47 = vpop.f32.mrb[163].mxu0 }
0x20f1   :  { %v8685_v61 = vpop.f32.mrb[179].mxu1  ;;  %v7653_v50 = vadd.f32 1e-12, %v8369_v63 }
0x20f3   :  { %v7693_v17 = vadd.f32 %v7692_v4, %v7653_v50 }
0x20f5   :  { %8966 = vrsqrt.f32 %v7693_v17  ;;  %vm7700_vm10 = vcmp.eq.f32.partialorder %v7693_v17, inf  ;;  %v7703_v16 = vand.u32 2147483648, %v7693_v17  ;;  %vm7702_vm11 = vcmp.eq.f32.partialorder %v7693_v17, 0.0 }
0x20ff   :  { %v8967_v49 = vpop.eup %8966 }
0x2100   :  { %v7699_v9 = vmul.f32 %v8967_v49, %v7693_v17 }
0x2102   :  { %v7701_v15 = vsel %vm7700_vm10, %v7693_v17, %v7699_v9 }
0x2103   :  { %v7704_v5 = vsel %vm7702_vm11, %v7703_v16, %v7701_v15 }
0x2104   :  { %7705 = vst [vmem:[#allocation21] sm:$0xff] %v7704_v5 }
0x2105   :  { %9067 = shalt.err (!%p9064_p8)
}
0x2106   :  { %s9068_s27 = scalar_lea.hbm %s10815_s19, 128 }
0x2107   :  { %p9069_p9 = scmp.ne.s32.totalorder %s10815_s19, %s9068_s27  ;;  %p9072_p10 = scmp.lt.u32.totalorder %s9068_s27, %s10815_s19 }
0x2109   :  { %p9074_p11 = pnand %p9072_p10, %p9069_p9 }
0x210b   :  { %9077 = shalt.err (!%p9074_p11)
}
0x210c   :  { %7715 = dma.vmem_to_hbm [thread:$0]  %s7713_s26, 128, %s10815_s19, [#allocation22]  }
0x210d   :  { %9114 = dma.done.wait [#allocation22], 128  }
0x210e   :  { %9115 = vsyncadd [#allocation22], 4294967168 }
0x210f   :  { %7719 = vsyncpa [#allocation22], 1 }
0x2110   :  { %7720 = vsyncmov [#allocation20] }
0x2113   :  { %s7721_s23 = vpop.sfrf %7720 }
0x2114   :  { %p7951_p12 = scmp.ne.s32.totalorder %s7721_s23, 0 }
0x2116   :  { %7725 = shalt.err (%p7951_p12)  }
0x2117   :  { %7727 = vsyncmov [#allocation20 + $0x1] }
0x211a   :  { %s7728_s13 = vpop.sfrf %7727 }
0x211b   :  { %p7952_p13 = scmp.ne.s32.totalorder %s7728_s13, 0 }
0x211d   :  { %7732 = shalt.err (%p7952_p13)  }
0x211e   :  { %7734 = vsyncmov [#allocation20 + $0x2] }
0x2121   :  { %s7735_s30 = vpop.sfrf %7734 }
0x2122   :  { %p7953_p0 = scmp.ne.s32.totalorder %s7735_s30, 0 }
0x2124   :  { %7739 = shalt.err (%p7953_p0)  }
0x2125   :  { %7741 = vsyncmov [#allocation20 + $0x3] }
0x2128   :  { %s7742_s24 = vpop.sfrf %7741 }
0x2129   :  { %p7954_p1 = scmp.ne.s32.totalorder %s7742_s24, 0 }
0x212b   :  { %7746 = shalt.err (%p7954_p1)  }
0x212c   :  { %7748 = vsyncmov [#allocation20 + $0x4] }
0x212f   :  { %s7749_s19 = vpop.sfrf %7748 }
0x2130   :  { %p7955_p2 = scmp.ne.s32.totalorder %s7749_s19, 0 }
0x2132   :  { %7753 = shalt.err (%p7955_p2)  }
0x2133   :  { %7755 = vsyncmov [#allocation20 + $0x5] }
0x2136   :  { %s7756_s25 = vpop.sfrf %7755 }
0x2137   :  { %p7956_p3 = scmp.ne.s32.totalorder %s7756_s25, 0 }
0x2139   :  { %7760 = shalt.err (%p7956_p3)  }
0x213a   :  { %7762 = vsyncmov [#allocation20 + $0x6] }
0x213d   :  { %s7763_s7 = vpop.sfrf %7762 }
0x213e   :  { %p7957_p4 = scmp.ne.s32.totalorder %s7763_s7, 0 }
0x2140   :  { %7767 = shalt.err (%p7957_p4)  }
0x2141   :  { %7769 = vsyncmov [#allocation20 + $0x7] }
0x2144   :  { %s7770_s17 = vpop.sfrf %7769 }
0x2145   :  { %p7958_p5 = scmp.ne.s32.totalorder %s7770_s17, 0 }
0x2147   :  { %7774 = shalt.err (%p7958_p5)  }
0x2148   :  { %7776 = vsyncmov [#allocation20 + $0x8] }
0x214b   :  { %s7777_s21 = vpop.sfrf %7776 }
0x214c   :  { %p7959_p6 = scmp.ne.s32.totalorder %s7777_s21, 0 }
0x214e   :  { %7781 = shalt.err (%p7959_p6)  }
0x214f   :  { %7783 = vsyncmov [#allocation20 + $0x9] }
0x2152   :  { %s7784_s2 = vpop.sfrf %7783 }
0x2153   :  { %p7960_p7 = scmp.ne.s32.totalorder %s7784_s2, 0 }
0x2155   :  { %7788 = shalt.err (%p7960_p7)  }
0x2156   :  { %7790 = vsyncmov [#allocation20 + $0xa] }
0x2159   :  { %s7791_s22 = vpop.sfrf %7790 }
0x215a   :  { %p7961_p8 = scmp.ne.s32.totalorder %s7791_s22, 0 }
0x215c   :  { %7795 = shalt.err (%p7961_p8)  }
0x215d   :  { %7797 = vsyncmov [#allocation20 + $0xb] }
0x2160   :  { %s7798_s1 = vpop.sfrf %7797 }
0x2161   :  { %p7962_p9 = scmp.ne.s32.totalorder %s7798_s1, 0 }
0x2163   :  { %7802 = shalt.err (%p7962_p9)  }
0x2164   :  { %7804 = vsyncmov [#allocation20 + $0xc] }
0x2167   :  { %s7805_s9 = vpop.sfrf %7804 }
0x2168   :  { %p7963_p10 = scmp.ne.s32.totalorder %s7805_s9, 0 }
0x216a   :  { %7809 = shalt.err (%p7963_p10)  }
0x216b   :  { %7811 = vsyncmov [#allocation20 + $0xd] }
0x216e   :  { %s7812_s29 = vpop.sfrf %7811 }
0x216f   :  { %p7964_p11 = scmp.ne.s32.totalorder %s7812_s29, 0 }
0x2171   :  { %7816 = shalt.err (%p7964_p11)  }
0x2172   :  { %7818 = vsyncmov [#allocation20 + $0xe] }
0x2175   :  { %s7819_s11 = vpop.sfrf %7818 }
0x2176   :  { %p7965_p12 = scmp.ne.s32.totalorder %s7819_s11, 0 }
0x2178   :  { %7823 = shalt.err (%p7965_p12)  }
0x2179   :  { %7825 = vsyncmov [#allocation20 + $0xf] }
0x217c   :  { %s7826_s16 = vpop.sfrf %7825 }
0x217d   :  { %p7966_p13 = scmp.ne.s32.totalorder %s7826_s16, 0 }
0x217f   :  { %7830 = shalt.err (%p7966_p13)  }
0x2180   :  { %7832 = vsyncmov [#allocation20 + $0x10] }
0x2183   :  { %s7833_s14 = vpop.sfrf %7832 }
0x2184   :  { %p7967_p0 = scmp.ne.s32.totalorder %s7833_s14, 0 }
0x2186   :  { %7837 = shalt.err (%p7967_p0)  }
0x2187   :  { %7839 = vsyncmov [#allocation20 + $0x11] }
0x218a   :  { %s7840_s4 = vpop.sfrf %7839 }
0x218b   :  { %p7968_p1 = scmp.ne.s32.totalorder %s7840_s4, 0 }
0x218d   :  { %7844 = shalt.err (%p7968_p1)  }

</bundles_post_ra>
